<compile_context>
chip_gen: v6e
topology: v6e:2x2x1
jax: 0.10.0
libtpu: 0.0.40
codegen_flags: <defaults>
</compile_context>

<pallas_src>
import math
import jax
import jax.numpy as jnp
from jax import lax
from jax.experimental import pallas as pl
from jax.experimental.pallas import tpu as pltpu

# ---- static sizes (config) ----
T = 8            # config.max_seqlen (frames)
N = 8            # number of ships / pedestrians
E = 32           # embedding size (emsize)
H = 4 * E        # MLP hidden dim of the transformer block
NOISE_DIM = 16
OBS_LEN = 4      # config.obs_len (unused when iftest=False)
LN_EPS = 1e-5

# ---- packed-parameter layout ----
# wbig (48, 128):
#   rows 0:12  — one bias / LayerNorm vector per row (values in cols 0:len)
#   rows 16:48 — wm1 (E x H) MLP up-projection
_VR = dict(bt=0, bs=1, bf=2, bo=3, ln1g=4, ln1b=5, bk=6, bp=7,
           ln2g=8, ln2b=9, bm1=10, bm2=11)
WBIG_ROWS = 48
WM1_ROW0 = 16
# wmat (320, E): weight matrices stacked at 8-aligned row offsets (E=32 columns;
# wo uses only cols 0:2).
_MR = dict(wt=(0, 2), ws=(8, 10), wk=(16, 48), wp=(48, 80),
           wf=(80, 144), wm2=(144, 272), wo=(272, 320))
WMAT_ROWS = 320

# ---- misc data slab layout (N rows = ships, 128 cols) ----
#   cols 0:T           — presence bit of ship n at frame f (seq_list transposed)
#   row 0, cols 16:32  — the (1, NOISE_DIM) gaussian noise vector
MISC_SEQ0 = 0
MISC_NOISE0 = 16


def _layernorm(x, g, b):
    mu = jnp.mean(x, axis=-1, keepdims=True)
    xc = x - mu
    var = jnp.mean(xc * xc, axis=-1, keepdims=True)
    return xc * lax.rsqrt(var + LN_EPS) * g + b


def star_kernel(nodes_abs_ref, nodes_norm_ref, misc_ref, wbig_ref, wmat_ref,
                out_ref):
    # ------------------------------------------------------------------
    # Unpack parameters once (single invocation; everything is hoisted).
    # ------------------------------------------------------------------
    wbig = wbig_ref[...]          # (48, 128)
    wmat = wmat_ref[...]          # (320, E)
    wm1 = wbig[WM1_ROW0:WM1_ROW0 + E, :]                     # (E, H)

    def vrow(name, width=E):
        r = _VR[name]
        return wbig[r:r + 1, 0:width]

    bt, bs, bf = vrow('bt'), vrow('bs'), vrow('bf')
    bo = vrow('bo', 2)
    ln1g, ln1b = vrow('ln1g'), vrow('ln1b')
    bk, bp = vrow('bk'), vrow('bp')
    ln2g, ln2b = vrow('ln2g'), vrow('ln2b')
    bm1 = vrow('bm1', H)
    bm2 = vrow('bm2')

    def mrows(name):
        a, b_ = _MR[name]
        return wmat[a:b_, :]

    wt, ws = mrows('wt'), mrows('ws')
    wk, wp, wm2 = mrows('wk'), mrows('wp'), mrows('wm2')
    wf_all = mrows('wf')
    wf_t, wf_s = wf_all[0:E, :], wf_all[E:2 * E, :]          # fusion_layer split
    wo_all = mrows('wo')
    wo_t, wo_n = wo_all[0:E, 0:2], wo_all[E:E + NOISE_DIM, 0:2]

    # ------------------------------------------------------------------
    # Loop-invariant precompute.
    # ------------------------------------------------------------------
    nodes_abs = nodes_abs_ref[...]                           # (T, N, 2)
    nodes_norm = nodes_norm_ref[...]                         # (T, N, 2)
    misc = misc_ref[...]                                     # (N, 128)
    present = (misc[:, MISC_SEQ0:MISC_SEQ0 + T] > 0.0).astype(jnp.float32)  # (N, T)
    noise = misc[0:1, MISC_NOISE0:MISC_NOISE0 + NOISE_DIM]   # (1, NOISE_DIM)

    # input_embedding_layer_temporal + ReLU (dropout = identity), all frames.
    temp_emb = jnp.maximum(
        nodes_norm[..., 0:1] * wt[0:1, :]
        + nodes_norm[..., 1:2] * wt[1:2, :] + bt, 0.0)       # (T, N, E)

    # input_embedding_layer_spatial BEFORE mean subtraction, all frames.
    # relu(W(x - m) + b) == relu((W x + b) - W m); the per-frame mean term is a
    # (1, E) correction applied inside the loop.
    spat_raw = (nodes_abs[..., 0:1] * ws[0:1, :]
                + nodes_abs[..., 1:2] * ws[1:2, :] + bs)     # (T, N, E)

    # noise part of output_layer(cat([temporal, noise])) is frame-independent.
    noise_term = jnp.dot(noise, wo_n, preferred_element_type=jnp.float32) + bo   # (1, 2)

    inv_sqrt_e = 1.0 / math.sqrt(E)

    def block_row(x_f, key_prefix):
        """Row-f output of the shared pre-LN causal Block.

        Faithful to Block/CausalSelfAttention: n_head = 1, q = k = v = key(ln1(x)),
        dropouts = identity (eval mode). key_prefix holds key(ln1(GM[t])) for
        earlier frames t < f; rows != f of the block are never used downstream.
        """
        h = _layernorm(x_f, ln1g, ln1b)
        kq = jnp.dot(h, wk, preferred_element_type=jnp.float32) + bk        # (N, E)
        keys = key_prefix + [kq]
        scores = [jnp.sum(kq * k, axis=-1, keepdims=True) * inv_sqrt_e
                  for k in keys]                                            # (N, 1) each
        m = scores[0]
        for s in scores[1:]:
            m = jnp.maximum(m, s)
        exps = [jnp.exp(s - m) for s in scores]
        denom = exps[0]
        for e_ in exps[1:]:
            denom = denom + e_
        inv = pl.reciprocal(denom, approx=True)                             # (N, 1)
        y = exps[0] * keys[0]
        for e_, k in zip(exps[1:], keys[1:]):
            y = y + e_ * k
        y = y * inv                                                         # (N, E)
        y = jnp.dot(y, wp, preferred_element_type=jnp.float32) + bp
        x = x_f + y
        h2 = _layernorm(x, ln2g, ln2b)
        mlp = jnp.maximum(jnp.dot(h2, wm1, preferred_element_type=jnp.float32) + bm1, 0.0)
        mlp = jnp.dot(mlp, wm2, preferred_element_type=jnp.float32) + bm2
        return x + mlp

    # Resident output; frame T-1 is never written by the reference loop.
    out_ref[...] = jnp.zeros((T, N, 2), jnp.float32)

    key_cache = []        # key(ln1(GM[t])) for t < current frame
    node_mask = None      # (N, 1): ships present in every frame 0..f
    abs_cum = None        # running sum over frames of nodes_abs, (N, 2)

    for f in range(T - 1):                                   # frame_id loop (unrolled)
        pres_f = present[:, f:f + 1]                         # (N, 1)
        node_mask = pres_f if f == 0 else node_mask * pres_f
        abs_cum = nodes_abs[f] if f == 0 else abs_cum + nodes_abs[f]

        # ---- mean_normalize_abs over frames<=f of present ships ----
        s_xy = jnp.sum(abs_cum * node_mask, axis=0, keepdims=True)          # (1, 2)
        cnt = (f + 1.0) * jnp.sum(node_mask, keepdims=True)                 # (1, 1)
        mean_xy = s_xy * pl.reciprocal(jnp.maximum(cnt, 1e-6), approx=True)

        # spatial embedding at frame f (spatial_encoder_1/2 == identity, see TODO)
        mean_term = mean_xy[:, 0:1] * ws[0:1, :] + mean_xy[:, 1:2] * ws[1:2, :]  # (1, E)
        spat_last = jnp.maximum(spat_raw[f] - mean_term, 0.0)               # (N, E)

        # temporal_encoder_1 over [GM[0..f-1], temp_emb[f]] -> row f
        temp_last = block_row(temp_emb[f], key_cache)

        # fusion_layer: Linear(64,32) over cat([temporal_last, spatial_last], -1)
        fusion = (jnp.dot(temp_last, wf_t, preferred_element_type=jnp.float32)
                  + jnp.dot(spat_last, wf_s, preferred_element_type=jnp.float32)
                  + bf)                                                     # (N, E)

        # temporal_encoder_2 over [GM[0..f-1], fusion] -> row f
        temp_final = block_row(fusion, key_cache)

        # output_layer: Linear(48,2) over cat([temp_final, noise.repeat(N,1)], -1)
        out_f = jnp.dot(temp_final, wo_t, preferred_element_type=jnp.float32) + noise_term
        out_ref[f:f + 1, :, :] = jnp.where(node_mask > 0.5, out_f, 0.0)[None]   # outputs[f, node_index]

        # GM[f, node_index] = temp_final; only its key(ln1(.)) is ever consumed,
        # so cache that instead of storing GM itself.
        gm_f = jnp.where(node_mask > 0.5, temp_final, 0.0)
        gm_key = jnp.dot(_layernorm(gm_f, ln1g, ln1b), wk,
                         preferred_element_type=jnp.float32) + bk
        key_cache.append(gm_key)


# ---------------------------------------------------------------------------
# parameter init (deterministic, synthetic — shapes from STAR.__init__)
# ---------------------------------------------------------------------------
def init_params(key):
    ks = jax.random.split(key, 8)
    s = 0.1
    p = {
        'wt': jax.random.normal(ks[0], (2, E)) * s,          # input_embedding_layer_temporal
        'bt': jnp.zeros((1, E)),
        'ws': jax.random.normal(ks[1], (2, E)) * s,          # input_embedding_layer_spatial
        'bs': jnp.zeros((1, E)),
        'wf': jax.random.normal(ks[2], (2 * E, E)) * s,      # fusion_layer (64 -> 32)
        'bf': jnp.zeros((1, E)),
        'wo': jax.random.normal(ks[3], (E + NOISE_DIM, 2)) * s,  # output_layer (48 -> 2)
        'bo': jnp.zeros((1, 2)),
        # temporal encoder block (temporal_encoder_1 and _2 share the same layer object)
        'ln1g': jnp.ones((1, E)), 'ln1b': jnp.zeros((1, E)),
        'wk': jax.random.normal(ks[4], (E, E)) * s,
        'bk': jnp.zeros((1, E)),
        'wp': jax.random.normal(ks[5], (E, E)) * s,
        'bp': jnp.zeros((1, E)),
        'ln2g': jnp.ones((1, E)), 'ln2b': jnp.zeros((1, E)),
        'wm1': jax.random.normal(ks[6], (E, H)) * s,
        'bm1': jnp.zeros((1, H)),
        'wm2': jax.random.normal(ks[7], (H, E)) * s,
        'bm2': jnp.zeros((1, E)),
    }
    return {k: v.astype(jnp.float32) for k, v in p.items()}


def pack_params(params):
    """Pack the ~20 tiny parameter tensors into 2 slabs (2 kernel args)."""
    wbig = jnp.zeros((WBIG_ROWS, 128), jnp.float32)
    for name, row in _VR.items():
        v = params[name].reshape(-1).astype(jnp.float32)
        wbig = wbig.at[row, :v.shape[0]].set(v)
    wbig = wbig.at[WM1_ROW0:WM1_ROW0 + E, :].set(params['wm1'].astype(jnp.float32))
    wmat = jnp.zeros((WMAT_ROWS, E), jnp.float32)
    for name, (a, _b) in _MR.items():
        w = params[name].astype(jnp.float32)
        wmat = wmat.at[a:a + w.shape[0], :w.shape[1]].set(w)
    return wbig, wmat


def star_forward(params, inputs, noise):
    nodes_abs, nodes_norm, shift_value, seq_list, nei_lists, nei_num, batch_pednum = inputs
    na = nodes_abs.astype(jnp.float32)                       # (T, N, 2) frames-first
    nn_ = nodes_norm.astype(jnp.float32)                     # (T, N, 2)

    # misc slab: presence bits (ship index on sublanes) + noise vector.
    misc = jnp.zeros((N, 128), jnp.float32)
    misc = misc.at[:, MISC_SEQ0:MISC_SEQ0 + T].set(
        jnp.transpose(seq_list, (1, 0)).astype(jnp.float32))
    misc = misc.at[0, MISC_NOISE0:MISC_NOISE0 + NOISE_DIM].set(
        noise.reshape(-1).astype(jnp.float32))

    wbig, wmat = pack_params(params)

    in_specs = [
        pl.BlockSpec((T, N, 2), lambda i: (0, 0, 0)),        # nodes_abs
        pl.BlockSpec((T, N, 2), lambda i: (0, 0, 0)),        # nodes_norm
        pl.BlockSpec((N, 128), lambda i: (0, 0)),            # misc (presence + noise)
        pl.BlockSpec((WBIG_ROWS, 128), lambda i: (0, 0)),    # vectors + wm1
        pl.BlockSpec((WMAT_ROWS, E), lambda i: (0, 0)),      # stacked matrices
    ]

    out = pl.pallas_call(
        star_kernel,
        out_shape=jax.ShapeDtypeStruct((T, N, 2), jnp.float32),
        grid_spec=pltpu.PrefetchScalarGridSpec(
            num_scalar_prefetch=0,
            grid=(1,),                                       # single invocation
            in_specs=in_specs,
            out_specs=pl.BlockSpec((T, N, 2), lambda i: (0, 0, 0))),
        compiler_params=pltpu.CompilerParams(
            dimension_semantics=("arbitrary",)),
    )(na, nn_, misc, wbig, wmat)
    return out   # (T, N, 2), frames-first like the reference (frame T-1 stays zero)


if __name__ == "__main__":
    key = jax.random.PRNGKey(0)
    kp, k1, k2, kn = jax.random.split(key, 4)
    params = init_params(kp)

    nodes_abs = jax.random.normal(k1, (T, N, 2), jnp.float32) * 5.0
    nodes_norm = jax.random.normal(k2, (T, N, 2), jnp.float32)
    shift_value = jnp.zeros((T, N, 2), jnp.float32)
    seq_list = jnp.ones((T, N), jnp.float32)                 # all ships present
    nei_lists = jnp.ones((T, N, N), jnp.float32)
    nei_num = jnp.full((T, N), float(N - 1), jnp.float32)
    batch_pednum = jnp.array([N], jnp.int32)
    noise = jax.random.normal(kn, (1, NOISE_DIM), jnp.float32)   # get_noise((1,16),'gaussian')

    inputs = (nodes_abs, nodes_norm, shift_value, seq_list, nei_lists, nei_num, batch_pednum)
    out = star_forward(params, inputs, noise)
    jax.block_until_ready(out)
    print("KERNEL_OK")
</pallas_src>

<mosaic_0001>
module attributes {stable_mosaic.version = 11 : i64} {
  func.func @star_kernel(%arg0: i32, %arg1: memref<8x8x2xf32, #tpu.memory_space<vmem>>, %arg2: memref<8x8x2xf32, #tpu.memory_space<vmem>>, %arg3: memref<8x128xf32, #tpu.memory_space<vmem>>, %arg4: memref<48x128xf32, #tpu.memory_space<vmem>>, %arg5: memref<320x32xf32, #tpu.memory_space<vmem>>, %arg6: memref<8x8x2xf32, #tpu.memory_space<vmem>>) attributes {dimension_semantics = [#tpu.dimension_semantics<arbitrary>], iteration_bounds = array<i64: 1>, scalar_prefetch = 0 : i64, scratch_operands = 0 : i64, tpu.core_type = #tpu.core_type<tc>, window_params = [{pipeline_mode = #tpu.pipeline_mode<synchronous>, transform_indices = @transform_0, window_bounds = array<i64: 8, 8, 2>}, {pipeline_mode = #tpu.pipeline_mode<synchronous>, transform_indices = @transform_1, window_bounds = array<i64: 8, 8, 2>}, {pipeline_mode = #tpu.pipeline_mode<synchronous>, transform_indices = @transform_2, window_bounds = array<i64: 8, 128>}, {pipeline_mode = #tpu.pipeline_mode<synchronous>, transform_indices = @transform_3, window_bounds = array<i64: 48, 128>}, {pipeline_mode = #tpu.pipeline_mode<synchronous>, transform_indices = @transform_4, window_bounds = array<i64: 320, 32>}, {pipeline_mode = #tpu.pipeline_mode<synchronous>, transform_indices = @transform_5, window_bounds = array<i64: 8, 8, 2>}]} {
    %c0 = arith.constant 0 : index
    %c0_0 = arith.constant 0 : index
    %0 = vector.load %arg4[%c0, %c0_0] : memref<48x128xf32, #tpu.memory_space<vmem>>, vector<48x128xf32>
    %c0_1 = arith.constant 0 : index
    %c0_2 = arith.constant 0 : index
    %1 = vector.load %arg5[%c0_1, %c0_2] : memref<320x32xf32, #tpu.memory_space<vmem>>, vector<320x32xf32>
    %2 = vector.extract_strided_slice %0 {offsets = [16, 0], sizes = [32, 128], strides = [1, 1]} : vector<48x128xf32> to vector<32x128xf32>
    %3 = vector.extract_strided_slice %0 {offsets = [0, 0], sizes = [1, 32], strides = [1, 1]} : vector<48x128xf32> to vector<1x32xf32>
    %4 = vector.extract_strided_slice %0 {offsets = [1, 0], sizes = [1, 32], strides = [1, 1]} : vector<48x128xf32> to vector<1x32xf32>
    %5 = vector.extract_strided_slice %0 {offsets = [2, 0], sizes = [1, 32], strides = [1, 1]} : vector<48x128xf32> to vector<1x32xf32>
    %6 = vector.extract_strided_slice %0 {offsets = [3, 0], sizes = [1, 2], strides = [1, 1]} : vector<48x128xf32> to vector<1x2xf32>
    %7 = vector.extract_strided_slice %0 {offsets = [4, 0], sizes = [1, 32], strides = [1, 1]} : vector<48x128xf32> to vector<1x32xf32>
    %8 = vector.extract_strided_slice %0 {offsets = [5, 0], sizes = [1, 32], strides = [1, 1]} : vector<48x128xf32> to vector<1x32xf32>
    %9 = vector.extract_strided_slice %0 {offsets = [6, 0], sizes = [1, 32], strides = [1, 1]} : vector<48x128xf32> to vector<1x32xf32>
    %10 = vector.extract_strided_slice %0 {offsets = [7, 0], sizes = [1, 32], strides = [1, 1]} : vector<48x128xf32> to vector<1x32xf32>
    %11 = vector.extract_strided_slice %0 {offsets = [8, 0], sizes = [1, 32], strides = [1, 1]} : vector<48x128xf32> to vector<1x32xf32>
    %12 = vector.extract_strided_slice %0 {offsets = [9, 0], sizes = [1, 32], strides = [1, 1]} : vector<48x128xf32> to vector<1x32xf32>
    %13 = vector.extract_strided_slice %0 {offsets = [10, 0], sizes = [1, 128], strides = [1, 1]} : vector<48x128xf32> to vector<1x128xf32>
    %14 = vector.extract_strided_slice %0 {offsets = [11, 0], sizes = [1, 32], strides = [1, 1]} : vector<48x128xf32> to vector<1x32xf32>
    %15 = vector.extract_strided_slice %1 {offsets = [0, 0], sizes = [2, 32], strides = [1, 1]} : vector<320x32xf32> to vector<2x32xf32>
    %16 = vector.extract_strided_slice %1 {offsets = [8, 0], sizes = [2, 32], strides = [1, 1]} : vector<320x32xf32> to vector<2x32xf32>
    %17 = vector.extract_strided_slice %1 {offsets = [16, 0], sizes = [32, 32], strides = [1, 1]} : vector<320x32xf32> to vector<32x32xf32>
    %18 = vector.extract_strided_slice %1 {offsets = [48, 0], sizes = [32, 32], strides = [1, 1]} : vector<320x32xf32> to vector<32x32xf32>
    %19 = vector.extract_strided_slice %1 {offsets = [144, 0], sizes = [128, 32], strides = [1, 1]} : vector<320x32xf32> to vector<128x32xf32>
    %20 = vector.extract_strided_slice %1 {offsets = [80, 0], sizes = [64, 32], strides = [1, 1]} : vector<320x32xf32> to vector<64x32xf32>
    %21 = vector.extract_strided_slice %20 {offsets = [0, 0], sizes = [32, 32], strides = [1, 1]} : vector<64x32xf32> to vector<32x32xf32>
    %22 = vector.extract_strided_slice %20 {offsets = [32, 0], sizes = [32, 32], strides = [1, 1]} : vector<64x32xf32> to vector<32x32xf32>
    %23 = vector.extract_strided_slice %1 {offsets = [272, 0], sizes = [48, 32], strides = [1, 1]} : vector<320x32xf32> to vector<48x32xf32>
    %24 = vector.extract_strided_slice %23 {offsets = [0, 0], sizes = [32, 2], strides = [1, 1]} : vector<48x32xf32> to vector<32x2xf32>
    %25 = vector.extract_strided_slice %23 {offsets = [32, 0], sizes = [16, 2], strides = [1, 1]} : vector<48x32xf32> to vector<16x2xf32>
    %c0_3 = arith.constant 0 : index
    %c0_4 = arith.constant 0 : index
    %c0_5 = arith.constant 0 : index
    %26 = vector.load %arg1[%c0_3, %c0_4, %c0_5] : memref<8x8x2xf32, #tpu.memory_space<vmem>>, vector<8x8x2xf32>
    %c0_6 = arith.constant 0 : index
    %c0_7 = arith.constant 0 : index
    %c0_8 = arith.constant 0 : index
    %27 = vector.load %arg2[%c0_6, %c0_7, %c0_8] : memref<8x8x2xf32, #tpu.memory_space<vmem>>, vector<8x8x2xf32>
    %c0_9 = arith.constant 0 : index
    %c0_10 = arith.constant 0 : index
    %28 = vector.load %arg3[%c0_9, %c0_10] : memref<8x128xf32, #tpu.memory_space<vmem>>, vector<8x128xf32>
    %29 = vector.extract_strided_slice %28 {offsets = [0, 0], sizes = [8, 8], strides = [1, 1]} : vector<8x128xf32> to vector<8x8xf32>
    %cst = arith.constant 0.000000e+00 : f32
    %30 = vector.broadcast %cst : f32 to vector<8x8xf32>
    %31 = arith.cmpf ogt, %29, %30 : vector<8x8xf32>
    %32 = arith.extui %31 : vector<8x8xi1> to vector<8x8xi32>
    %33 = arith.sitofp %32 : vector<8x8xi32> to vector<8x8xf32>
    %34 = vector.extract_strided_slice %28 {offsets = [0, 16], sizes = [1, 16], strides = [1, 1]} : vector<8x128xf32> to vector<1x16xf32>
    %35 = vector.extract_strided_slice %27 {offsets = [0, 0, 0], sizes = [8, 8, 1], strides = [1, 1, 1]} : vector<8x8x2xf32> to vector<8x8x1xf32>
    %36 = vector.extract_strided_slice %15 {offsets = [0, 0], sizes = [1, 32], strides = [1, 1]} : vector<2x32xf32> to vector<1x32xf32>
    %37 = vector.shape_cast %36 : vector<1x32xf32> to vector<1x1x32xf32>
    %38 = vector.broadcast %35 : vector<8x8x1xf32> to vector<8x8x32xf32>
    %39 = vector.broadcast %37 : vector<1x1x32xf32> to vector<8x8x32xf32>
    %40 = arith.mulf %38, %39 : vector<8x8x32xf32>
    %41 = vector.extract_strided_slice %27 {offsets = [0, 0, 1], sizes = [8, 8, 1], strides = [1, 1, 1]} : vector<8x8x2xf32> to vector<8x8x1xf32>
    %42 = vector.extract_strided_slice %15 {offsets = [1, 0], sizes = [1, 32], strides = [1, 1]} : vector<2x32xf32> to vector<1x32xf32>
    %43 = vector.shape_cast %42 : vector<1x32xf32> to vector<1x1x32xf32>
    %44 = vector.broadcast %41 : vector<8x8x1xf32> to vector<8x8x32xf32>
    %45 = vector.broadcast %43 : vector<1x1x32xf32> to vector<8x8x32xf32>
    %46 = arith.mulf %44, %45 : vector<8x8x32xf32>
    %47 = arith.addf %40, %46 : vector<8x8x32xf32>
    %48 = vector.shape_cast %3 : vector<1x32xf32> to vector<1x1x32xf32>
    %49 = vector.broadcast %48 : vector<1x1x32xf32> to vector<8x8x32xf32>
    %50 = arith.addf %47, %49 : vector<8x8x32xf32>
    %cst_11 = arith.constant 0.000000e+00 : f32
    %51 = vector.broadcast %cst_11 : f32 to vector<8x8x32xf32>
    %52 = arith.maximumf %50, %51 : vector<8x8x32xf32>
    %53 = vector.extract_strided_slice %26 {offsets = [0, 0, 0], sizes = [8, 8, 1], strides = [1, 1, 1]} : vector<8x8x2xf32> to vector<8x8x1xf32>
    %54 = vector.extract_strided_slice %16 {offsets = [0, 0], sizes = [1, 32], strides = [1, 1]} : vector<2x32xf32> to vector<1x32xf32>
    %55 = vector.shape_cast %54 : vector<1x32xf32> to vector<1x1x32xf32>
    %56 = vector.broadcast %53 : vector<8x8x1xf32> to vector<8x8x32xf32>
    %57 = vector.broadcast %55 : vector<1x1x32xf32> to vector<8x8x32xf32>
    %58 = arith.mulf %56, %57 : vector<8x8x32xf32>
    %59 = vector.extract_strided_slice %26 {offsets = [0, 0, 1], sizes = [8, 8, 1], strides = [1, 1, 1]} : vector<8x8x2xf32> to vector<8x8x1xf32>
    %60 = vector.extract_strided_slice %16 {offsets = [1, 0], sizes = [1, 32], strides = [1, 1]} : vector<2x32xf32> to vector<1x32xf32>
    %61 = vector.shape_cast %60 : vector<1x32xf32> to vector<1x1x32xf32>
    %62 = vector.broadcast %59 : vector<8x8x1xf32> to vector<8x8x32xf32>
    %63 = vector.broadcast %61 : vector<1x1x32xf32> to vector<8x8x32xf32>
    %64 = arith.mulf %62, %63 : vector<8x8x32xf32>
    %65 = arith.addf %58, %64 : vector<8x8x32xf32>
    %66 = vector.shape_cast %4 : vector<1x32xf32> to vector<1x1x32xf32>
    %67 = vector.broadcast %66 : vector<1x1x32xf32> to vector<8x8x32xf32>
    %68 = arith.addf %65, %67 : vector<8x8x32xf32>
    %cst_12 = arith.constant dense<0.000000e+00> : vector<1x2xf32>
    %69 = tpu.matmul %34, %25, %cst_12 {dimension_numbers = #tpu.dot_dimension_numbers<[1], [0], [0], [1], [0, 0, 1, 1], [], []>} : vector<1x16xf32>, vector<16x2xf32>, vector<1x2xf32> -> vector<1x2xf32>
    %70 = arith.addf %69, %6 : vector<1x2xf32>
    %cst_13 = arith.constant 0.000000e+00 : f32
    %71 = vector.broadcast %cst_13 : f32 to vector<8x8x2xf32>
    %c0_14 = arith.constant 0 : index
    %c0_15 = arith.constant 0 : index
    %c0_16 = arith.constant 0 : index
    %72 = vector.load %arg6[%c0_14, %c0_15, %c0_16] : memref<8x8x2xf32, #tpu.memory_space<vmem>>, vector<8x8x2xf32>
    tpu.vector_store %arg6[%c0_14, %c0_15, %c0_16], %71 {strides = array<i32>} : memref<8x8x2xf32, #tpu.memory_space<vmem>>, vector<8x8x2xf32>,
    %73 = vector.extract_strided_slice %33 {offsets = [0, 0], sizes = [8, 1], strides = [1, 1]} : vector<8x8xf32> to vector<8x1xf32>
    %74 = vector.extract_strided_slice %26 {offsets = [0, 0, 0], sizes = [1, 8, 2], strides = [1, 1, 1]} : vector<8x8x2xf32> to vector<1x8x2xf32>
    %75 = vector.shape_cast %74 : vector<1x8x2xf32> to vector<8x2xf32>
    %76 = vector.broadcast %73 : vector<8x1xf32> to vector<8x2xf32>
    %77 = arith.mulf %75, %76 : vector<8x2xf32>
    %cst_17 = arith.constant dense<0.000000e+00> : vector<2xf32>
    %78 = vector.multi_reduction <add>, %77, %cst_17 [0] : vector<8x2xf32> to vector<2xf32>
    %79 = vector.shape_cast %78 : vector<2xf32> to vector<1x2xf32>
    %80 = vector.shape_cast %73 : vector<8x1xf32> to vector<1x8x1xf32>
    %cst_18 = arith.constant dense<0.000000e+00> : vector<1xf32>
    %81 = vector.multi_reduction <add>, %80, %cst_18 [1, 2] : vector<1x8x1xf32> to vector<1xf32>
    %82 = vector.shape_cast %81 : vector<1xf32> to vector<1x1x1xf32>
    %83 = vector.extract %82[0, 0, 0] : f32 from vector<1x1x1xf32>
    %84 = vector.broadcast %83 : f32 to vector<1x1xf32>
    %cst_19 = arith.constant 1.000000e+00 : f32
    %85 = vector.broadcast %cst_19 : f32 to vector<1x1xf32>
    %86 = arith.mulf %85, %84 : vector<1x1xf32>
    %cst_20 = arith.constant 9.99999997E-7 : f32
    %87 = vector.broadcast %cst_20 : f32 to vector<1x1xf32>
    %88 = arith.maximumf %86, %87 : vector<1x1xf32>
    %89 = tpu.reciprocal %88 {approx = true} : vector<1x1xf32> -> vector<1x1xf32>
    %90 = vector.broadcast %89 : vector<1x1xf32> to vector<1x2xf32>
    %91 = arith.mulf %79, %90 : vector<1x2xf32>
    %92 = vector.extract_strided_slice %91 {offsets = [0, 0], sizes = [1, 1], strides = [1, 1]} : vector<1x2xf32> to vector<1x1xf32>
    %93 = vector.extract_strided_slice %16 {offsets = [0, 0], sizes = [1, 32], strides = [1, 1]} : vector<2x32xf32> to vector<1x32xf32>
    %94 = vector.broadcast %92 : vector<1x1xf32> to vector<1x32xf32>
    %95 = arith.mulf %94, %93 : vector<1x32xf32>
    %96 = vector.extract_strided_slice %91 {offsets = [0, 1], sizes = [1, 1], strides = [1, 1]} : vector<1x2xf32> to vector<1x1xf32>
    %97 = vector.extract_strided_slice %16 {offsets = [1, 0], sizes = [1, 32], strides = [1, 1]} : vector<2x32xf32> to vector<1x32xf32>
    %98 = vector.broadcast %96 : vector<1x1xf32> to vector<1x32xf32>
    %99 = arith.mulf %98, %97 : vector<1x32xf32>
    %100 = arith.addf %95, %99 : vector<1x32xf32>
    %101 = vector.extract_strided_slice %68 {offsets = [0, 0, 0], sizes = [1, 8, 32], strides = [1, 1, 1]} : vector<8x8x32xf32> to vector<1x8x32xf32>
    %102 = vector.shape_cast %101 : vector<1x8x32xf32> to vector<8x32xf32>
    %103 = vector.broadcast %100 : vector<1x32xf32> to vector<8x32xf32>
    %104 = arith.subf %102, %103 : vector<8x32xf32>
    %cst_21 = arith.constant 0.000000e+00 : f32
    %105 = vector.broadcast %cst_21 : f32 to vector<8x32xf32>
    %106 = arith.maximumf %104, %105 : vector<8x32xf32>
    %107 = vector.extract_strided_slice %52 {offsets = [0, 0, 0], sizes = [1, 8, 32], strides = [1, 1, 1]} : vector<8x8x32xf32> to vector<1x8x32xf32>
    %108 = vector.shape_cast %107 : vector<1x8x32xf32> to vector<8x32xf32>
    %cst_22 = arith.constant dense<0.000000e+00> : vector<8xf32>
    %109 = vector.multi_reduction <add>, %108, %cst_22 [1] : vector<8x32xf32> to vector<8xf32>
    %110 = vector.shape_cast %109 : vector<8xf32> to vector<8x1xf32>
    %cst_23 = arith.constant 3.200000e+01 : f32
    %111 = vector.broadcast %cst_23 : f32 to vector<8x1xf32>
    %112 = arith.divf %110, %111 : vector<8x1xf32>
    %113 = vector.broadcast %112 : vector<8x1xf32> to vector<8x32xf32>
    %114 = arith.subf %108, %113 : vector<8x32xf32>
    %115 = arith.mulf %114, %114 : vector<8x32xf32>
    %cst_24 = arith.constant dense<0.000000e+00> : vector<8xf32>
    %116 = vector.multi_reduction <add>, %115, %cst_24 [1] : vector<8x32xf32> to vector<8xf32>
    %117 = vector.shape_cast %116 : vector<8xf32> to vector<8x1xf32>
    %cst_25 = arith.constant 3.200000e+01 : f32
    %118 = vector.broadcast %cst_25 : f32 to vector<8x1xf32>
    %119 = arith.divf %117, %118 : vector<8x1xf32>
    %cst_26 = arith.constant 9.99999974E-6 : f32
    %120 = vector.broadcast %cst_26 : f32 to vector<8x1xf32>
    %121 = arith.addf %119, %120 : vector<8x1xf32>
    %122 = math.rsqrt %121 : vector<8x1xf32>
    %123 = vector.broadcast %122 : vector<8x1xf32> to vector<8x32xf32>
    %124 = arith.mulf %114, %123 : vector<8x32xf32>
    %125 = vector.broadcast %7 : vector<1x32xf32> to vector<8x32xf32>
    %126 = arith.mulf %124, %125 : vector<8x32xf32>
    %127 = vector.broadcast %8 : vector<1x32xf32> to vector<8x32xf32>
    %128 = arith.addf %126, %127 : vector<8x32xf32>
    %cst_27 = arith.constant dense<0.000000e+00> : vector<8x32xf32>
    %129 = tpu.matmul %128, %17, %cst_27 {dimension_numbers = #tpu.dot_dimension_numbers<[1], [0], [0], [1], [0, 0, 1, 1], [], []>} : vector<8x32xf32>, vector<32x32xf32>, vector<8x32xf32> -> vector<8x32xf32>
    %130 = vector.broadcast %9 : vector<1x32xf32> to vector<8x32xf32>
    %131 = arith.addf %129, %130 : vector<8x32xf32>
    %132 = arith.mulf %131, %131 : vector<8x32xf32>
    %cst_28 = arith.constant dense<0.000000e+00> : vector<8xf32>
    %133 = vector.multi_reduction <add>, %132, %cst_28 [1] : vector<8x32xf32> to vector<8xf32>
    %134 = vector.shape_cast %133 : vector<8xf32> to vector<8x1xf32>
    %cst_29 = arith.constant 0.176776692 : f32
    %135 = vector.broadcast %cst_29 : f32 to vector<8x1xf32>
    %136 = arith.mulf %134, %135 : vector<8x1xf32>
    %137 = arith.subf %136, %136 : vector<8x1xf32>
    %138 = math.exp %137 : vector<8x1xf32>
    %139 = tpu.reciprocal %138 {approx = true} : vector<8x1xf32> -> vector<8x1xf32>
    %140 = vector.broadcast %138 : vector<8x1xf32> to vector<8x32xf32>
    %141 = arith.mulf %140, %131 : vector<8x32xf32>
    %142 = vector.broadcast %139 : vector<8x1xf32> to vector<8x32xf32>
    %143 = arith.mulf %141, %142 : vector<8x32xf32>
    %cst_30 = arith.constant dense<0.000000e+00> : vector<8x32xf32>
    %144 = tpu.matmul %143, %18, %cst_30 {dimension_numbers = #tpu.dot_dimension_numbers<[1], [0], [0], [1], [0, 0, 1, 1], [], []>} : vector<8x32xf32>, vector<32x32xf32>, vector<8x32xf32> -> vector<8x32xf32>
    %145 = vector.broadcast %10 : vector<1x32xf32> to vector<8x32xf32>
    %146 = arith.addf %144, %145 : vector<8x32xf32>
    %147 = arith.addf %108, %146 : vector<8x32xf32>
    %cst_31 = arith.constant dense<0.000000e+00> : vector<8xf32>
    %148 = vector.multi_reduction <add>, %147, %cst_31 [1] : vector<8x32xf32> to vector<8xf32>
    %149 = vector.shape_cast %148 : vector<8xf32> to vector<8x1xf32>
    %cst_32 = arith.constant 3.200000e+01 : f32
    %150 = vector.broadcast %cst_32 : f32 to vector<8x1xf32>
    %151 = arith.divf %149, %150 : vector<8x1xf32>
    %152 = vector.broadcast %151 : vector<8x1xf32> to vector<8x32xf32>
    %153 = arith.subf %147, %152 : vector<8x32xf32>
    %154 = arith.mulf %153, %153 : vector<8x32xf32>
    %cst_33 = arith.constant dense<0.000000e+00> : vector<8xf32>
    %155 = vector.multi_reduction <add>, %154, %cst_33 [1] : vector<8x32xf32> to vector<8xf32>
    %156 = vector.shape_cast %155 : vector<8xf32> to vector<8x1xf32>
    %cst_34 = arith.constant 3.200000e+01 : f32
    %157 = vector.broadcast %cst_34 : f32 to vector<8x1xf32>
    %158 = arith.divf %156, %157 : vector<8x1xf32>
    %cst_35 = arith.constant 9.99999974E-6 : f32
    %159 = vector.broadcast %cst_35 : f32 to vector<8x1xf32>
    %160 = arith.addf %158, %159 : vector<8x1xf32>
    %161 = math.rsqrt %160 : vector<8x1xf32>
    %162 = vector.broadcast %161 : vector<8x1xf32> to vector<8x32xf32>
    %163 = arith.mulf %153, %162 : vector<8x32xf32>
    %164 = vector.broadcast %11 : vector<1x32xf32> to vector<8x32xf32>
    %165 = arith.mulf %163, %164 : vector<8x32xf32>
    %166 = vector.broadcast %12 : vector<1x32xf32> to vector<8x32xf32>
    %167 = arith.addf %165, %166 : vector<8x32xf32>
    %cst_36 = arith.constant dense<0.000000e+00> : vector<8x128xf32>
    %168 = tpu.matmul %167, %2, %cst_36 {dimension_numbers = #tpu.dot_dimension_numbers<[1], [0], [0], [1], [0, 0, 1, 1], [], []>} : vector<8x32xf32>, vector<32x128xf32>, vector<8x128xf32> -> vector<8x128xf32>
    %169 = vector.broadcast %13 : vector<1x128xf32> to vector<8x128xf32>
    %170 = arith.addf %168, %169 : vector<8x128xf32>
    %cst_37 = arith.constant 0.000000e+00 : f32
    %171 = vector.broadcast %cst_37 : f32 to vector<8x128xf32>
    %172 = arith.maximumf %170, %171 : vector<8x128xf32>
    %cst_38 = arith.constant dense<0.000000e+00> : vector<8x32xf32>
    %173 = tpu.matmul %172, %19, %cst_38 {dimension_numbers = #tpu.dot_dimension_numbers<[1], [0], [0], [1], [0, 0, 1, 1], [], []>} : vector<8x128xf32>, vector<128x32xf32>, vector<8x32xf32> -> vector<8x32xf32>
    %174 = vector.broadcast %14 : vector<1x32xf32> to vector<8x32xf32>
    %175 = arith.addf %173, %174 : vector<8x32xf32>
    %176 = arith.addf %147, %175 : vector<8x32xf32>
    %cst_39 = arith.constant dense<0.000000e+00> : vector<8x32xf32>
    %177 = tpu.matmul %176, %21, %cst_39 {dimension_numbers = #tpu.dot_dimension_numbers<[1], [0], [0], [1], [0, 0, 1, 1], [], []>} : vector<8x32xf32>, vector<32x32xf32>, vector<8x32xf32> -> vector<8x32xf32>
    %cst_40 = arith.constant dense<0.000000e+00> : vector<8x32xf32>
    %178 = tpu.matmul %106, %22, %cst_40 {dimension_numbers = #tpu.dot_dimension_numbers<[1], [0], [0], [1], [0, 0, 1, 1], [], []>} : vector<8x32xf32>, vector<32x32xf32>, vector<8x32xf32> -> vector<8x32xf32>
    %179 = arith.addf %177, %178 : vector<8x32xf32>
    %180 = vector.broadcast %5 : vector<1x32xf32> to vector<8x32xf32>
    %181 = arith.addf %179, %180 : vector<8x32xf32>
    %cst_41 = arith.constant dense<0.000000e+00> : vector<8xf32>
    %182 = vector.multi_reduction <add>, %181, %cst_41 [1] : vector<8x32xf32> to vector<8xf32>
    %183 = vector.shape_cast %182 : vector<8xf32> to vector<8x1xf32>
    %cst_42 = arith.constant 3.200000e+01 : f32
    %184 = vector.broadcast %cst_42 : f32 to vector<8x1xf32>
    %185 = arith.divf %183, %184 : vector<8x1xf32>
    %186 = vector.broadcast %185 : vector<8x1xf32> to vector<8x32xf32>
    %187 = arith.subf %181, %186 : vector<8x32xf32>
    %188 = arith.mulf %187, %187 : vector<8x32xf32>
    %cst_43 = arith.constant dense<0.000000e+00> : vector<8xf32>
    %189 = vector.multi_reduction <add>, %188, %cst_43 [1] : vector<8x32xf32> to vector<8xf32>
    %190 = vector.shape_cast %189 : vector<8xf32> to vector<8x1xf32>
    %cst_44 = arith.constant 3.200000e+01 : f32
    %191 = vector.broadcast %cst_44 : f32 to vector<8x1xf32>
    %192 = arith.divf %190, %191 : vector<8x1xf32>
    %cst_45 = arith.constant 9.99999974E-6 : f32
    %193 = vector.broadcast %cst_45 : f32 to vector<8x1xf32>
    %194 = arith.addf %192, %193 : vector<8x1xf32>
    %195 = math.rsqrt %194 : vector<8x1xf32>
    %196 = vector.broadcast %195 : vector<8x1xf32> to vector<8x32xf32>
    %197 = arith.mulf %187, %196 : vector<8x32xf32>
    %198 = vector.broadcast %7 : vector<1x32xf32> to vector<8x32xf32>
    %199 = arith.mulf %197, %198 : vector<8x32xf32>
    %200 = vector.broadcast %8 : vector<1x32xf32> to vector<8x32xf32>
    %201 = arith.addf %199, %200 : vector<8x32xf32>
    %cst_46 = arith.constant dense<0.000000e+00> : vector<8x32xf32>
    %202 = tpu.matmul %201, %17, %cst_46 {dimension_numbers = #tpu.dot_dimension_numbers<[1], [0], [0], [1], [0, 0, 1, 1], [], []>} : vector<8x32xf32>, vector<32x32xf32>, vector<8x32xf32> -> vector<8x32xf32>
    %203 = vector.broadcast %9 : vector<1x32xf32> to vector<8x32xf32>
    %204 = arith.addf %202, %203 : vector<8x32xf32>
    %205 = arith.mulf %204, %204 : vector<8x32xf32>
    %cst_47 = arith.constant dense<0.000000e+00> : vector<8xf32>
    %206 = vector.multi_reduction <add>, %205, %cst_47 [1] : vector<8x32xf32> to vector<8xf32>
    %207 = vector.shape_cast %206 : vector<8xf32> to vector<8x1xf32>
    %cst_48 = arith.constant 0.176776692 : f32
    %208 = vector.broadcast %cst_48 : f32 to vector<8x1xf32>
    %209 = arith.mulf %207, %208 : vector<8x1xf32>
    %210 = arith.subf %209, %209 : vector<8x1xf32>
    %211 = math.exp %210 : vector<8x1xf32>
    %212 = tpu.reciprocal %211 {approx = true} : vector<8x1xf32> -> vector<8x1xf32>
    %213 = vector.broadcast %211 : vector<8x1xf32> to vector<8x32xf32>
    %214 = arith.mulf %213, %204 : vector<8x32xf32>
    %215 = vector.broadcast %212 : vector<8x1xf32> to vector<8x32xf32>
    %216 = arith.mulf %214, %215 : vector<8x32xf32>
    %cst_49 = arith.constant dense<0.000000e+00> : vector<8x32xf32>
    %217 = tpu.matmul %216, %18, %cst_49 {dimension_numbers = #tpu.dot_dimension_numbers<[1], [0], [0], [1], [0, 0, 1, 1], [], []>} : vector<8x32xf32>, vector<32x32xf32>, vector<8x32xf32> -> vector<8x32xf32>
    %218 = vector.broadcast %10 : vector<1x32xf32> to vector<8x32xf32>
    %219 = arith.addf %217, %218 : vector<8x32xf32>
    %220 = arith.addf %181, %219 : vector<8x32xf32>
    %cst_50 = arith.constant dense<0.000000e+00> : vector<8xf32>
    %221 = vector.multi_reduction <add>, %220, %cst_50 [1] : vector<8x32xf32> to vector<8xf32>
    %222 = vector.shape_cast %221 : vector<8xf32> to vector<8x1xf32>
    %cst_51 = arith.constant 3.200000e+01 : f32
    %223 = vector.broadcast %cst_51 : f32 to vector<8x1xf32>
    %224 = arith.divf %222, %223 : vector<8x1xf32>
    %225 = vector.broadcast %224 : vector<8x1xf32> to vector<8x32xf32>
    %226 = arith.subf %220, %225 : vector<8x32xf32>
    %227 = arith.mulf %226, %226 : vector<8x32xf32>
    %cst_52 = arith.constant dense<0.000000e+00> : vector<8xf32>
    %228 = vector.multi_reduction <add>, %227, %cst_52 [1] : vector<8x32xf32> to vector<8xf32>
    %229 = vector.shape_cast %228 : vector<8xf32> to vector<8x1xf32>
    %cst_53 = arith.constant 3.200000e+01 : f32
    %230 = vector.broadcast %cst_53 : f32 to vector<8x1xf32>
    %231 = arith.divf %229, %230 : vector<8x1xf32>
    %cst_54 = arith.constant 9.99999974E-6 : f32
    %232 = vector.broadcast %cst_54 : f32 to vector<8x1xf32>
    %233 = arith.addf %231, %232 : vector<8x1xf32>
    %234 = math.rsqrt %233 : vector<8x1xf32>
    %235 = vector.broadcast %234 : vector<8x1xf32> to vector<8x32xf32>
    %236 = arith.mulf %226, %235 : vector<8x32xf32>
    %237 = vector.broadcast %11 : vector<1x32xf32> to vector<8x32xf32>
    %238 = arith.mulf %236, %237 : vector<8x32xf32>
    %239 = vector.broadcast %12 : vector<1x32xf32> to vector<8x32xf32>
    %240 = arith.addf %238, %239 : vector<8x32xf32>
    %cst_55 = arith.constant dense<0.000000e+00> : vector<8x128xf32>
    %241 = tpu.matmul %240, %2, %cst_55 {dimension_numbers = #tpu.dot_dimension_numbers<[1], [0], [0], [1], [0, 0, 1, 1], [], []>} : vector<8x32xf32>, vector<32x128xf32>, vector<8x128xf32> -> vector<8x128xf32>
    %242 = vector.broadcast %13 : vector<1x128xf32> to vector<8x128xf32>
    %243 = arith.addf %241, %242 : vector<8x128xf32>
    %cst_56 = arith.constant 0.000000e+00 : f32
    %244 = vector.broadcast %cst_56 : f32 to vector<8x128xf32>
    %245 = arith.maximumf %243, %244 : vector<8x128xf32>
    %cst_57 = arith.constant dense<0.000000e+00> : vector<8x32xf32>
    %246 = tpu.matmul %245, %19, %cst_57 {dimension_numbers = #tpu.dot_dimension_numbers<[1], [0], [0], [1], [0, 0, 1, 1], [], []>} : vector<8x128xf32>, vector<128x32xf32>, vector<8x32xf32> -> vector<8x32xf32>
    %247 = vector.broadcast %14 : vector<1x32xf32> to vector<8x32xf32>
    %248 = arith.addf %246, %247 : vector<8x32xf32>
    %249 = arith.addf %220, %248 : vector<8x32xf32>
    %cst_58 = arith.constant dense<0.000000e+00> : vector<8x2xf32>
    %250 = tpu.matmul %249, %24, %cst_58 {dimension_numbers = #tpu.dot_dimension_numbers<[1], [0], [0], [1], [0, 0, 1, 1], [], []>} : vector<8x32xf32>, vector<32x2xf32>, vector<8x2xf32> -> vector<8x2xf32>
    %251 = vector.broadcast %70 : vector<1x2xf32> to vector<8x2xf32>
    %252 = arith.addf %250, %251 : vector<8x2xf32>
    %cst_59 = arith.constant 5.000000e-01 : f32
    %253 = vector.broadcast %cst_59 : f32 to vector<8x1xf32>
    %254 = arith.cmpf ogt, %73, %253 : vector<8x1xf32>
    %cst_60 = arith.constant 0.000000e+00 : f32
    %255 = vector.shape_cast %254 : vector<8x1xi1> to vector<8x1xi1>
    %256 = vector.broadcast %255 : vector<8x1xi1> to vector<8x2xi1>
    %257 = vector.broadcast %cst_60 : f32 to vector<8x2xf32>
    %258 = arith.select %256, %252, %257 : vector<8x2xi1>, vector<8x2xf32>
    %259 = vector.shape_cast %258 : vector<8x2xf32> to vector<1x8x2xf32>
    %c0_61 = arith.constant 0 : index
    %c0_62 = arith.constant 0 : index
    %c0_63 = arith.constant 0 : index
    %260 = vector.load %arg6[%c0_61, %c0_62, %c0_63] : memref<8x8x2xf32, #tpu.memory_space<vmem>>, vector<1x8x2xf32>
    tpu.vector_store %arg6[%c0_61, %c0_62, %c0_63], %259 {strides = array<i32>} : memref<8x8x2xf32, #tpu.memory_space<vmem>>, vector<1x8x2xf32>,
    %cst_64 = arith.constant 5.000000e-01 : f32
    %261 = vector.broadcast %cst_64 : f32 to vector<8x1xf32>
    %262 = arith.cmpf ogt, %73, %261 : vector<8x1xf32>
    %cst_65 = arith.constant 0.000000e+00 : f32
    %263 = vector.shape_cast %262 : vector<8x1xi1> to vector<8x1xi1>
    %264 = vector.broadcast %263 : vector<8x1xi1> to vector<8x32xi1>
    %265 = vector.broadcast %cst_65 : f32 to vector<8x32xf32>
    %266 = arith.select %264, %249, %265 : vector<8x32xi1>, vector<8x32xf32>
    %cst_66 = arith.constant dense<0.000000e+00> : vector<8xf32>
    %267 = vector.multi_reduction <add>, %266, %cst_66 [1] : vector<8x32xf32> to vector<8xf32>
    %268 = vector.shape_cast %267 : vector<8xf32> to vector<8x1xf32>
    %cst_67 = arith.constant 3.200000e+01 : f32
    %269 = vector.broadcast %cst_67 : f32 to vector<8x1xf32>
    %270 = arith.divf %268, %269 : vector<8x1xf32>
    %271 = vector.broadcast %270 : vector<8x1xf32> to vector<8x32xf32>
    %272 = arith.subf %266, %271 : vector<8x32xf32>
    %273 = arith.mulf %272, %272 : vector<8x32xf32>
    %cst_68 = arith.constant dense<0.000000e+00> : vector<8xf32>
    %274 = vector.multi_reduction <add>, %273, %cst_68 [1] : vector<8x32xf32> to vector<8xf32>
    %275 = vector.shape_cast %274 : vector<8xf32> to vector<8x1xf32>
    %cst_69 = arith.constant 3.200000e+01 : f32
    %276 = vector.broadcast %cst_69 : f32 to vector<8x1xf32>
    %277 = arith.divf %275, %276 : vector<8x1xf32>
    %cst_70 = arith.constant 9.99999974E-6 : f32
    %278 = vector.broadcast %cst_70 : f32 to vector<8x1xf32>
    %279 = arith.addf %277, %278 : vector<8x1xf32>
    %280 = math.rsqrt %279 : vector<8x1xf32>
    %281 = vector.broadcast %280 : vector<8x1xf32> to vector<8x32xf32>
    %282 = arith.mulf %272, %281 : vector<8x32xf32>
    %283 = vector.broadcast %7 : vector<1x32xf32> to vector<8x32xf32>
    %284 = arith.mulf %282, %283 : vector<8x32xf32>
    %285 = vector.broadcast %8 : vector<1x32xf32> to vector<8x32xf32>
    %286 = arith.addf %284, %285 : vector<8x32xf32>
    %cst_71 = arith.constant dense<0.000000e+00> : vector<8x32xf32>
    %287 = tpu.matmul %286, %17, %cst_71 {dimension_numbers = #tpu.dot_dimension_numbers<[1], [0], [0], [1], [0, 0, 1, 1], [], []>} : vector<8x32xf32>, vector<32x32xf32>, vector<8x32xf32> -> vector<8x32xf32>
    %288 = vector.broadcast %9 : vector<1x32xf32> to vector<8x32xf32>
    %289 = arith.addf %287, %288 : vector<8x32xf32>
    %290 = vector.extract_strided_slice %33 {offsets = [0, 1], sizes = [8, 1], strides = [1, 1]} : vector<8x8xf32> to vector<8x1xf32>
    %291 = arith.mulf %73, %290 : vector<8x1xf32>
    %292 = vector.extract_strided_slice %26 {offsets = [1, 0, 0], sizes = [1, 8, 2], strides = [1, 1, 1]} : vector<8x8x2xf32> to vector<1x8x2xf32>
    %293 = vector.shape_cast %292 : vector<1x8x2xf32> to vector<8x2xf32>
    %294 = arith.addf %75, %293 : vector<8x2xf32>
    %295 = vector.broadcast %291 : vector<8x1xf32> to vector<8x2xf32>
    %296 = arith.mulf %294, %295 : vector<8x2xf32>
    %cst_72 = arith.constant dense<0.000000e+00> : vector<2xf32>
    %297 = vector.multi_reduction <add>, %296, %cst_72 [0] : vector<8x2xf32> to vector<2xf32>
    %298 = vector.shape_cast %297 : vector<2xf32> to vector<1x2xf32>
    %299 = vector.shape_cast %291 : vector<8x1xf32> to vector<1x8x1xf32>
    %cst_73 = arith.constant dense<0.000000e+00> : vector<1xf32>
    %300 = vector.multi_reduction <add>, %299, %cst_73 [1, 2] : vector<1x8x1xf32> to vector<1xf32>
    %301 = vector.shape_cast %300 : vector<1xf32> to vector<1x1x1xf32>
    %302 = vector.extract %301[0, 0, 0] : f32 from vector<1x1x1xf32>
    %303 = vector.broadcast %302 : f32 to vector<1x1xf32>
    %cst_74 = arith.constant 2.000000e+00 : f32
    %304 = vector.broadcast %cst_74 : f32 to vector<1x1xf32>
    %305 = arith.mulf %304, %303 : vector<1x1xf32>
    %cst_75 = arith.constant 9.99999997E-7 : f32
    %306 = vector.broadcast %cst_75 : f32 to vector<1x1xf32>
    %307 = arith.maximumf %305, %306 : vector<1x1xf32>
    %308 = tpu.reciprocal %307 {approx = true} : vector<1x1xf32> -> vector<1x1xf32>
    %309 = vector.broadcast %308 : vector<1x1xf32> to vector<1x2xf32>
    %310 = arith.mulf %298, %309 : vector<1x2xf32>
    %311 = vector.extract_strided_slice %310 {offsets = [0, 0], sizes = [1, 1], strides = [1, 1]} : vector<1x2xf32> to vector<1x1xf32>
    %312 = vector.extract_strided_slice %16 {offsets = [0, 0], sizes = [1, 32], strides = [1, 1]} : vector<2x32xf32> to vector<1x32xf32>
    %313 = vector.broadcast %311 : vector<1x1xf32> to vector<1x32xf32>
    %314 = arith.mulf %313, %312 : vector<1x32xf32>
    %315 = vector.extract_strided_slice %310 {offsets = [0, 1], sizes = [1, 1], strides = [1, 1]} : vector<1x2xf32> to vector<1x1xf32>
    %316 = vector.extract_strided_slice %16 {offsets = [1, 0], sizes = [1, 32], strides = [1, 1]} : vector<2x32xf32> to vector<1x32xf32>
    %317 = vector.broadcast %315 : vector<1x1xf32> to vector<1x32xf32>
    %318 = arith.mulf %317, %316 : vector<1x32xf32>
    %319 = arith.addf %314, %318 : vector<1x32xf32>
    %320 = vector.extract_strided_slice %68 {offsets = [1, 0, 0], sizes = [1, 8, 32], strides = [1, 1, 1]} : vector<8x8x32xf32> to vector<1x8x32xf32>
    %321 = vector.shape_cast %320 : vector<1x8x32xf32> to vector<8x32xf32>
    %322 = vector.broadcast %319 : vector<1x32xf32> to vector<8x32xf32>
    %323 = arith.subf %321, %322 : vector<8x32xf32>
    %cst_76 = arith.constant 0.000000e+00 : f32
    %324 = vector.broadcast %cst_76 : f32 to vector<8x32xf32>
    %325 = arith.maximumf %323, %324 : vector<8x32xf32>
    %326 = vector.extract_strided_slice %52 {offsets = [1, 0, 0], sizes = [1, 8, 32], strides = [1, 1, 1]} : vector<8x8x32xf32> to vector<1x8x32xf32>
    %327 = vector.shape_cast %326 : vector<1x8x32xf32> to vector<8x32xf32>
    %cst_77 = arith.constant dense<0.000000e+00> : vector<8xf32>
    %328 = vector.multi_reduction <add>, %327, %cst_77 [1] : vector<8x32xf32> to vector<8xf32>
    %329 = vector.shape_cast %328 : vector<8xf32> to vector<8x1xf32>
    %cst_78 = arith.constant 3.200000e+01 : f32
    %330 = vector.broadcast %cst_78 : f32 to vector<8x1xf32>
    %331 = arith.divf %329, %330 : vector<8x1xf32>
    %332 = vector.broadcast %331 : vector<8x1xf32> to vector<8x32xf32>
    %333 = arith.subf %327, %332 : vector<8x32xf32>
    %334 = arith.mulf %333, %333 : vector<8x32xf32>
    %cst_79 = arith.constant dense<0.000000e+00> : vector<8xf32>
    %335 = vector.multi_reduction <add>, %334, %cst_79 [1] : vector<8x32xf32> to vector<8xf32>
    %336 = vector.shape_cast %335 : vector<8xf32> to vector<8x1xf32>
    %cst_80 = arith.constant 3.200000e+01 : f32
    %337 = vector.broadcast %cst_80 : f32 to vector<8x1xf32>
    %338 = arith.divf %336, %337 : vector<8x1xf32>
    %cst_81 = arith.constant 9.99999974E-6 : f32
    %339 = vector.broadcast %cst_81 : f32 to vector<8x1xf32>
    %340 = arith.addf %338, %339 : vector<8x1xf32>
    %341 = math.rsqrt %340 : vector<8x1xf32>
    %342 = vector.broadcast %341 : vector<8x1xf32> to vector<8x32xf32>
    %343 = arith.mulf %333, %342 : vector<8x32xf32>
    %344 = vector.broadcast %7 : vector<1x32xf32> to vector<8x32xf32>
    %345 = arith.mulf %343, %344 : vector<8x32xf32>
    %346 = vector.broadcast %8 : vector<1x32xf32> to vector<8x32xf32>
    %347 = arith.addf %345, %346 : vector<8x32xf32>
    %cst_82 = arith.constant dense<0.000000e+00> : vector<8x32xf32>
    %348 = tpu.matmul %347, %17, %cst_82 {dimension_numbers = #tpu.dot_dimension_numbers<[1], [0], [0], [1], [0, 0, 1, 1], [], []>} : vector<8x32xf32>, vector<32x32xf32>, vector<8x32xf32> -> vector<8x32xf32>
    %349 = vector.broadcast %9 : vector<1x32xf32> to vector<8x32xf32>
    %350 = arith.addf %348, %349 : vector<8x32xf32>
    %351 = arith.mulf %350, %289 : vector<8x32xf32>
    %cst_83 = arith.constant dense<0.000000e+00> : vector<8xf32>
    %352 = vector.multi_reduction <add>, %351, %cst_83 [1] : vector<8x32xf32> to vector<8xf32>
    %353 = vector.shape_cast %352 : vector<8xf32> to vector<8x1xf32>
    %cst_84 = arith.constant 0.176776692 : f32
    %354 = vector.broadcast %cst_84 : f32 to vector<8x1xf32>
    %355 = arith.mulf %353, %354 : vector<8x1xf32>
    %356 = arith.mulf %350, %350 : vector<8x32xf32>
    %cst_85 = arith.constant dense<0.000000e+00> : vector<8xf32>
    %357 = vector.multi_reduction <add>, %356, %cst_85 [1] : vector<8x32xf32> to vector<8xf32>
    %358 = vector.shape_cast %357 : vector<8xf32> to vector<8x1xf32>
    %cst_86 = arith.constant 0.176776692 : f32
    %359 = vector.broadcast %cst_86 : f32 to vector<8x1xf32>
    %360 = arith.mulf %358, %359 : vector<8x1xf32>
    %361 = arith.maximumf %355, %360 : vector<8x1xf32>
    %362 = arith.subf %355, %361 : vector<8x1xf32>
    %363 = math.exp %362 : vector<8x1xf32>
    %364 = arith.subf %360, %361 : vector<8x1xf32>
    %365 = math.exp %364 : vector<8x1xf32>
    %366 = arith.addf %363, %365 : vector<8x1xf32>
    %367 = tpu.reciprocal %366 {approx = true} : vector<8x1xf32> -> vector<8x1xf32>
    %368 = vector.broadcast %363 : vector<8x1xf32> to vector<8x32xf32>
    %369 = arith.mulf %368, %289 : vector<8x32xf32>
    %370 = vector.broadcast %365 : vector<8x1xf32> to vector<8x32xf32>
    %371 = arith.mulf %370, %350 : vector<8x32xf32>
    %372 = arith.addf %369, %371 : vector<8x32xf32>
    %373 = vector.broadcast %367 : vector<8x1xf32> to vector<8x32xf32>
    %374 = arith.mulf %372, %373 : vector<8x32xf32>
    %cst_87 = arith.constant dense<0.000000e+00> : vector<8x32xf32>
    %375 = tpu.matmul %374, %18, %cst_87 {dimension_numbers = #tpu.dot_dimension_numbers<[1], [0], [0], [1], [0, 0, 1, 1], [], []>} : vector<8x32xf32>, vector<32x32xf32>, vector<8x32xf32> -> vector<8x32xf32>
    %376 = vector.broadcast %10 : vector<1x32xf32> to vector<8x32xf32>
    %377 = arith.addf %375, %376 : vector<8x32xf32>
    %378 = arith.addf %327, %377 : vector<8x32xf32>
    %cst_88 = arith.constant dense<0.000000e+00> : vector<8xf32>
    %379 = vector.multi_reduction <add>, %378, %cst_88 [1] : vector<8x32xf32> to vector<8xf32>
    %380 = vector.shape_cast %379 : vector<8xf32> to vector<8x1xf32>
    %cst_89 = arith.constant 3.200000e+01 : f32
    %381 = vector.broadcast %cst_89 : f32 to vector<8x1xf32>
    %382 = arith.divf %380, %381 : vector<8x1xf32>
    %383 = vector.broadcast %382 : vector<8x1xf32> to vector<8x32xf32>
    %384 = arith.subf %378, %383 : vector<8x32xf32>
    %385 = arith.mulf %384, %384 : vector<8x32xf32>
    %cst_90 = arith.constant dense<0.000000e+00> : vector<8xf32>
    %386 = vector.multi_reduction <add>, %385, %cst_90 [1] : vector<8x32xf32> to vector<8xf32>
    %387 = vector.shape_cast %386 : vector<8xf32> to vector<8x1xf32>
    %cst_91 = arith.constant 3.200000e+01 : f32
    %388 = vector.broadcast %cst_91 : f32 to vector<8x1xf32>
    %389 = arith.divf %387, %388 : vector<8x1xf32>
    %cst_92 = arith.constant 9.99999974E-6 : f32
    %390 = vector.broadcast %cst_92 : f32 to vector<8x1xf32>
    %391 = arith.addf %389, %390 : vector<8x1xf32>
    %392 = math.rsqrt %391 : vector<8x1xf32>
    %393 = vector.broadcast %392 : vector<8x1xf32> to vector<8x32xf32>
    %394 = arith.mulf %384, %393 : vector<8x32xf32>
    %395 = vector.broadcast %11 : vector<1x32xf32> to vector<8x32xf32>
    %396 = arith.mulf %394, %395 : vector<8x32xf32>
    %397 = vector.broadcast %12 : vector<1x32xf32> to vector<8x32xf32>
    %398 = arith.addf %396, %397 : vector<8x32xf32>
    %cst_93 = arith.constant dense<0.000000e+00> : vector<8x128xf32>
    %399 = tpu.matmul %398, %2, %cst_93 {dimension_numbers = #tpu.dot_dimension_numbers<[1], [0], [0], [1], [0, 0, 1, 1], [], []>} : vector<8x32xf32>, vector<32x128xf32>, vector<8x128xf32> -> vector<8x128xf32>
    %400 = vector.broadcast %13 : vector<1x128xf32> to vector<8x128xf32>
    %401 = arith.addf %399, %400 : vector<8x128xf32>
    %cst_94 = arith.constant 0.000000e+00 : f32
    %402 = vector.broadcast %cst_94 : f32 to vector<8x128xf32>
    %403 = arith.maximumf %401, %402 : vector<8x128xf32>
    %cst_95 = arith.constant dense<0.000000e+00> : vector<8x32xf32>
    %404 = tpu.matmul %403, %19, %cst_95 {dimension_numbers = #tpu.dot_dimension_numbers<[1], [0], [0], [1], [0, 0, 1, 1], [], []>} : vector<8x128xf32>, vector<128x32xf32>, vector<8x32xf32> -> vector<8x32xf32>
    %405 = vector.broadcast %14 : vector<1x32xf32> to vector<8x32xf32>
    %406 = arith.addf %404, %405 : vector<8x32xf32>
    %407 = arith.addf %378, %406 : vector<8x32xf32>
    %cst_96 = arith.constant dense<0.000000e+00> : vector<8x32xf32>
    %408 = tpu.matmul %407, %21, %cst_96 {dimension_numbers = #tpu.dot_dimension_numbers<[1], [0], [0], [1], [0, 0, 1, 1], [], []>} : vector<8x32xf32>, vector<32x32xf32>, vector<8x32xf32> -> vector<8x32xf32>
    %cst_97 = arith.constant dense<0.000000e+00> : vector<8x32xf32>
    %409 = tpu.matmul %325, %22, %cst_97 {dimension_numbers = #tpu.dot_dimension_numbers<[1], [0], [0], [1], [0, 0, 1, 1], [], []>} : vector<8x32xf32>, vector<32x32xf32>, vector<8x32xf32> -> vector<8x32xf32>
    %410 = arith.addf %408, %409 : vector<8x32xf32>
    %411 = vector.broadcast %5 : vector<1x32xf32> to vector<8x32xf32>
    %412 = arith.addf %410, %411 : vector<8x32xf32>
    %cst_98 = arith.constant dense<0.000000e+00> : vector<8xf32>
    %413 = vector.multi_reduction <add>, %412, %cst_98 [1] : vector<8x32xf32> to vector<8xf32>
    %414 = vector.shape_cast %413 : vector<8xf32> to vector<8x1xf32>
    %cst_99 = arith.constant 3.200000e+01 : f32
    %415 = vector.broadcast %cst_99 : f32 to vector<8x1xf32>
    %416 = arith.divf %414, %415 : vector<8x1xf32>
    %417 = vector.broadcast %416 : vector<8x1xf32> to vector<8x32xf32>
    %418 = arith.subf %412, %417 : vector<8x32xf32>
    %419 = arith.mulf %418, %418 : vector<8x32xf32>
    %cst_100 = arith.constant dense<0.000000e+00> : vector<8xf32>
    %420 = vector.multi_reduction <add>, %419, %cst_100 [1] : vector<8x32xf32> to vector<8xf32>
    %421 = vector.shape_cast %420 : vector<8xf32> to vector<8x1xf32>
    %cst_101 = arith.constant 3.200000e+01 : f32
    %422 = vector.broadcast %cst_101 : f32 to vector<8x1xf32>
    %423 = arith.divf %421, %422 : vector<8x1xf32>
    %cst_102 = arith.constant 9.99999974E-6 : f32
    %424 = vector.broadcast %cst_102 : f32 to vector<8x1xf32>
    %425 = arith.addf %423, %424 : vector<8x1xf32>
    %426 = math.rsqrt %425 : vector<8x1xf32>
    %427 = vector.broadcast %426 : vector<8x1xf32> to vector<8x32xf32>
    %428 = arith.mulf %418, %427 : vector<8x32xf32>
    %429 = vector.broadcast %7 : vector<1x32xf32> to vector<8x32xf32>
    %430 = arith.mulf %428, %429 : vector<8x32xf32>
    %431 = vector.broadcast %8 : vector<1x32xf32> to vector<8x32xf32>
    %432 = arith.addf %430, %431 : vector<8x32xf32>
    %cst_103 = arith.constant dense<0.000000e+00> : vector<8x32xf32>
    %433 = tpu.matmul %432, %17, %cst_103 {dimension_numbers = #tpu.dot_dimension_numbers<[1], [0], [0], [1], [0, 0, 1, 1], [], []>} : vector<8x32xf32>, vector<32x32xf32>, vector<8x32xf32> -> vector<8x32xf32>
    %434 = vector.broadcast %9 : vector<1x32xf32> to vector<8x32xf32>
    %435 = arith.addf %433, %434 : vector<8x32xf32>
    %436 = arith.mulf %435, %289 : vector<8x32xf32>
    %cst_104 = arith.constant dense<0.000000e+00> : vector<8xf32>
    %437 = vector.multi_reduction <add>, %436, %cst_104 [1] : vector<8x32xf32> to vector<8xf32>
    %438 = vector.shape_cast %437 : vector<8xf32> to vector<8x1xf32>
    %cst_105 = arith.constant 0.176776692 : f32
    %439 = vector.broadcast %cst_105 : f32 to vector<8x1xf32>
    %440 = arith.mulf %438, %439 : vector<8x1xf32>
    %441 = arith.mulf %435, %435 : vector<8x32xf32>
    %cst_106 = arith.constant dense<0.000000e+00> : vector<8xf32>
    %442 = vector.multi_reduction <add>, %441, %cst_106 [1] : vector<8x32xf32> to vector<8xf32>
    %443 = vector.shape_cast %442 : vector<8xf32> to vector<8x1xf32>
    %cst_107 = arith.constant 0.176776692 : f32
    %444 = vector.broadcast %cst_107 : f32 to vector<8x1xf32>
    %445 = arith.mulf %443, %444 : vector<8x1xf32>
    %446 = arith.maximumf %440, %445 : vector<8x1xf32>
    %447 = arith.subf %440, %446 : vector<8x1xf32>
    %448 = math.exp %447 : vector<8x1xf32>
    %449 = arith.subf %445, %446 : vector<8x1xf32>
    %450 = math.exp %449 : vector<8x1xf32>
    %451 = arith.addf %448, %450 : vector<8x1xf32>
    %452 = tpu.reciprocal %451 {approx = true} : vector<8x1xf32> -> vector<8x1xf32>
    %453 = vector.broadcast %448 : vector<8x1xf32> to vector<8x32xf32>
    %454 = arith.mulf %453, %289 : vector<8x32xf32>
    %455 = vector.broadcast %450 : vector<8x1xf32> to vector<8x32xf32>
    %456 = arith.mulf %455, %435 : vector<8x32xf32>
    %457 = arith.addf %454, %456 : vector<8x32xf32>
    %458 = vector.broadcast %452 : vector<8x1xf32> to vector<8x32xf32>
    %459 = arith.mulf %457, %458 : vector<8x32xf32>
    %cst_108 = arith.constant dense<0.000000e+00> : vector<8x32xf32>
    %460 = tpu.matmul %459, %18, %cst_108 {dimension_numbers = #tpu.dot_dimension_numbers<[1], [0], [0], [1], [0, 0, 1, 1], [], []>} : vector<8x32xf32>, vector<32x32xf32>, vector<8x32xf32> -> vector<8x32xf32>
    %461 = vector.broadcast %10 : vector<1x32xf32> to vector<8x32xf32>
    %462 = arith.addf %460, %461 : vector<8x32xf32>
    %463 = arith.addf %412, %462 : vector<8x32xf32>
    %cst_109 = arith.constant dense<0.000000e+00> : vector<8xf32>
    %464 = vector.multi_reduction <add>, %463, %cst_109 [1] : vector<8x32xf32> to vector<8xf32>
    %465 = vector.shape_cast %464 : vector<8xf32> to vector<8x1xf32>
    %cst_110 = arith.constant 3.200000e+01 : f32
    %466 = vector.broadcast %cst_110 : f32 to vector<8x1xf32>
    %467 = arith.divf %465, %466 : vector<8x1xf32>
    %468 = vector.broadcast %467 : vector<8x1xf32> to vector<8x32xf32>
    %469 = arith.subf %463, %468 : vector<8x32xf32>
    %470 = arith.mulf %469, %469 : vector<8x32xf32>
    %cst_111 = arith.constant dense<0.000000e+00> : vector<8xf32>
    %471 = vector.multi_reduction <add>, %470, %cst_111 [1] : vector<8x32xf32> to vector<8xf32>
    %472 = vector.shape_cast %471 : vector<8xf32> to vector<8x1xf32>
    %cst_112 = arith.constant 3.200000e+01 : f32
    %473 = vector.broadcast %cst_112 : f32 to vector<8x1xf32>
    %474 = arith.divf %472, %473 : vector<8x1xf32>
    %cst_113 = arith.constant 9.99999974E-6 : f32
    %475 = vector.broadcast %cst_113 : f32 to vector<8x1xf32>
    %476 = arith.addf %474, %475 : vector<8x1xf32>
    %477 = math.rsqrt %476 : vector<8x1xf32>
    %478 = vector.broadcast %477 : vector<8x1xf32> to vector<8x32xf32>
    %479 = arith.mulf %469, %478 : vector<8x32xf32>
    %480 = vector.broadcast %11 : vector<1x32xf32> to vector<8x32xf32>
    %481 = arith.mulf %479, %480 : vector<8x32xf32>
    %482 = vector.broadcast %12 : vector<1x32xf32> to vector<8x32xf32>
    %483 = arith.addf %481, %482 : vector<8x32xf32>
    %cst_114 = arith.constant dense<0.000000e+00> : vector<8x128xf32>
    %484 = tpu.matmul %483, %2, %cst_114 {dimension_numbers = #tpu.dot_dimension_numbers<[1], [0], [0], [1], [0, 0, 1, 1], [], []>} : vector<8x32xf32>, vector<32x128xf32>, vector<8x128xf32> -> vector<8x128xf32>
    %485 = vector.broadcast %13 : vector<1x128xf32> to vector<8x128xf32>
    %486 = arith.addf %484, %485 : vector<8x128xf32>
    %cst_115 = arith.constant 0.000000e+00 : f32
    %487 = vector.broadcast %cst_115 : f32 to vector<8x128xf32>
    %488 = arith.maximumf %486, %487 : vector<8x128xf32>
    %cst_116 = arith.constant dense<0.000000e+00> : vector<8x32xf32>
    %489 = tpu.matmul %488, %19, %cst_116 {dimension_numbers = #tpu.dot_dimension_numbers<[1], [0], [0], [1], [0, 0, 1, 1], [], []>} : vector<8x128xf32>, vector<128x32xf32>, vector<8x32xf32> -> vector<8x32xf32>
    %490 = vector.broadcast %14 : vector<1x32xf32> to vector<8x32xf32>
    %491 = arith.addf %489, %490 : vector<8x32xf32>
    %492 = arith.addf %463, %491 : vector<8x32xf32>
    %cst_117 = arith.constant dense<0.000000e+00> : vector<8x2xf32>
    %493 = tpu.matmul %492, %24, %cst_117 {dimension_numbers = #tpu.dot_dimension_numbers<[1], [0], [0], [1], [0, 0, 1, 1], [], []>} : vector<8x32xf32>, vector<32x2xf32>, vector<8x2xf32> -> vector<8x2xf32>
    %494 = vector.broadcast %70 : vector<1x2xf32> to vector<8x2xf32>
    %495 = arith.addf %493, %494 : vector<8x2xf32>
    %cst_118 = arith.constant 5.000000e-01 : f32
    %496 = vector.broadcast %cst_118 : f32 to vector<8x1xf32>
    %497 = arith.cmpf ogt, %291, %496 : vector<8x1xf32>
    %cst_119 = arith.constant 0.000000e+00 : f32
    %498 = vector.shape_cast %497 : vector<8x1xi1> to vector<8x1xi1>
    %499 = vector.broadcast %498 : vector<8x1xi1> to vector<8x2xi1>
    %500 = vector.broadcast %cst_119 : f32 to vector<8x2xf32>
    %501 = arith.select %499, %495, %500 : vector<8x2xi1>, vector<8x2xf32>
    %502 = vector.shape_cast %501 : vector<8x2xf32> to vector<1x8x2xf32>
    %c1 = arith.constant 1 : index
    %c0_120 = arith.constant 0 : index
    %c0_121 = arith.constant 0 : index
    %503 = vector.load %arg6[%c1, %c0_120, %c0_121] : memref<8x8x2xf32, #tpu.memory_space<vmem>>, vector<1x8x2xf32>
    tpu.vector_store %arg6[%c1, %c0_120, %c0_121], %502 {strides = array<i32>} : memref<8x8x2xf32, #tpu.memory_space<vmem>>, vector<1x8x2xf32>,
    %cst_122 = arith.constant 5.000000e-01 : f32
    %504 = vector.broadcast %cst_122 : f32 to vector<8x1xf32>
    %505 = arith.cmpf ogt, %291, %504 : vector<8x1xf32>
    %cst_123 = arith.constant 0.000000e+00 : f32
    %506 = vector.shape_cast %505 : vector<8x1xi1> to vector<8x1xi1>
    %507 = vector.broadcast %506 : vector<8x1xi1> to vector<8x32xi1>
    %508 = vector.broadcast %cst_123 : f32 to vector<8x32xf32>
    %509 = arith.select %507, %492, %508 : vector<8x32xi1>, vector<8x32xf32>
    %cst_124 = arith.constant dense<0.000000e+00> : vector<8xf32>
    %510 = vector.multi_reduction <add>, %509, %cst_124 [1] : vector<8x32xf32> to vector<8xf32>
    %511 = vector.shape_cast %510 : vector<8xf32> to vector<8x1xf32>
    %cst_125 = arith.constant 3.200000e+01 : f32
    %512 = vector.broadcast %cst_125 : f32 to vector<8x1xf32>
    %513 = arith.divf %511, %512 : vector<8x1xf32>
    %514 = vector.broadcast %513 : vector<8x1xf32> to vector<8x32xf32>
    %515 = arith.subf %509, %514 : vector<8x32xf32>
    %516 = arith.mulf %515, %515 : vector<8x32xf32>
    %cst_126 = arith.constant dense<0.000000e+00> : vector<8xf32>
    %517 = vector.multi_reduction <add>, %516, %cst_126 [1] : vector<8x32xf32> to vector<8xf32>
    %518 = vector.shape_cast %517 : vector<8xf32> to vector<8x1xf32>
    %cst_127 = arith.constant 3.200000e+01 : f32
    %519 = vector.broadcast %cst_127 : f32 to vector<8x1xf32>
    %520 = arith.divf %518, %519 : vector<8x1xf32>
    %cst_128 = arith.constant 9.99999974E-6 : f32
    %521 = vector.broadcast %cst_128 : f32 to vector<8x1xf32>
    %522 = arith.addf %520, %521 : vector<8x1xf32>
    %523 = math.rsqrt %522 : vector<8x1xf32>
    %524 = vector.broadcast %523 : vector<8x1xf32> to vector<8x32xf32>
    %525 = arith.mulf %515, %524 : vector<8x32xf32>
    %526 = vector.broadcast %7 : vector<1x32xf32> to vector<8x32xf32>
    %527 = arith.mulf %525, %526 : vector<8x32xf32>
    %528 = vector.broadcast %8 : vector<1x32xf32> to vector<8x32xf32>
    %529 = arith.addf %527, %528 : vector<8x32xf32>
    %cst_129 = arith.constant dense<0.000000e+00> : vector<8x32xf32>
    %530 = tpu.matmul %529, %17, %cst_129 {dimension_numbers = #tpu.dot_dimension_numbers<[1], [0], [0], [1], [0, 0, 1, 1], [], []>} : vector<8x32xf32>, vector<32x32xf32>, vector<8x32xf32> -> vector<8x32xf32>
    %531 = vector.broadcast %9 : vector<1x32xf32> to vector<8x32xf32>
    %532 = arith.addf %530, %531 : vector<8x32xf32>
    %533 = vector.extract_strided_slice %33 {offsets = [0, 2], sizes = [8, 1], strides = [1, 1]} : vector<8x8xf32> to vector<8x1xf32>
    %534 = arith.mulf %291, %533 : vector<8x1xf32>
    %535 = vector.extract_strided_slice %26 {offsets = [2, 0, 0], sizes = [1, 8, 2], strides = [1, 1, 1]} : vector<8x8x2xf32> to vector<1x8x2xf32>
    %536 = vector.shape_cast %535 : vector<1x8x2xf32> to vector<8x2xf32>
    %537 = arith.addf %294, %536 : vector<8x2xf32>
    %538 = vector.broadcast %534 : vector<8x1xf32> to vector<8x2xf32>
    %539 = arith.mulf %537, %538 : vector<8x2xf32>
    %cst_130 = arith.constant dense<0.000000e+00> : vector<2xf32>
    %540 = vector.multi_reduction <add>, %539, %cst_130 [0] : vector<8x2xf32> to vector<2xf32>
    %541 = vector.shape_cast %540 : vector<2xf32> to vector<1x2xf32>
    %542 = vector.shape_cast %534 : vector<8x1xf32> to vector<1x8x1xf32>
    %cst_131 = arith.constant dense<0.000000e+00> : vector<1xf32>
    %543 = vector.multi_reduction <add>, %542, %cst_131 [1, 2] : vector<1x8x1xf32> to vector<1xf32>
    %544 = vector.shape_cast %543 : vector<1xf32> to vector<1x1x1xf32>
    %545 = vector.extract %544[0, 0, 0] : f32 from vector<1x1x1xf32>
    %546 = vector.broadcast %545 : f32 to vector<1x1xf32>
    %cst_132 = arith.constant 3.000000e+00 : f32
    %547 = vector.broadcast %cst_132 : f32 to vector<1x1xf32>
    %548 = arith.mulf %547, %546 : vector<1x1xf32>
    %cst_133 = arith.constant 9.99999997E-7 : f32
    %549 = vector.broadcast %cst_133 : f32 to vector<1x1xf32>
    %550 = arith.maximumf %548, %549 : vector<1x1xf32>
    %551 = tpu.reciprocal %550 {approx = true} : vector<1x1xf32> -> vector<1x1xf32>
    %552 = vector.broadcast %551 : vector<1x1xf32> to vector<1x2xf32>
    %553 = arith.mulf %541, %552 : vector<1x2xf32>
    %554 = vector.extract_strided_slice %553 {offsets = [0, 0], sizes = [1, 1], strides = [1, 1]} : vector<1x2xf32> to vector<1x1xf32>
    %555 = vector.extract_strided_slice %16 {offsets = [0, 0], sizes = [1, 32], strides = [1, 1]} : vector<2x32xf32> to vector<1x32xf32>
    %556 = vector.broadcast %554 : vector<1x1xf32> to vector<1x32xf32>
    %557 = arith.mulf %556, %555 : vector<1x32xf32>
    %558 = vector.extract_strided_slice %553 {offsets = [0, 1], sizes = [1, 1], strides = [1, 1]} : vector<1x2xf32> to vector<1x1xf32>
    %559 = vector.extract_strided_slice %16 {offsets = [1, 0], sizes = [1, 32], strides = [1, 1]} : vector<2x32xf32> to vector<1x32xf32>
    %560 = vector.broadcast %558 : vector<1x1xf32> to vector<1x32xf32>
    %561 = arith.mulf %560, %559 : vector<1x32xf32>
    %562 = arith.addf %557, %561 : vector<1x32xf32>
    %563 = vector.extract_strided_slice %68 {offsets = [2, 0, 0], sizes = [1, 8, 32], strides = [1, 1, 1]} : vector<8x8x32xf32> to vector<1x8x32xf32>
    %564 = vector.shape_cast %563 : vector<1x8x32xf32> to vector<8x32xf32>
    %565 = vector.broadcast %562 : vector<1x32xf32> to vector<8x32xf32>
    %566 = arith.subf %564, %565 : vector<8x32xf32>
    %cst_134 = arith.constant 0.000000e+00 : f32
    %567 = vector.broadcast %cst_134 : f32 to vector<8x32xf32>
    %568 = arith.maximumf %566, %567 : vector<8x32xf32>
    %569 = vector.extract_strided_slice %52 {offsets = [2, 0, 0], sizes = [1, 8, 32], strides = [1, 1, 1]} : vector<8x8x32xf32> to vector<1x8x32xf32>
    %570 = vector.shape_cast %569 : vector<1x8x32xf32> to vector<8x32xf32>
    %cst_135 = arith.constant dense<0.000000e+00> : vector<8xf32>
    %571 = vector.multi_reduction <add>, %570, %cst_135 [1] : vector<8x32xf32> to vector<8xf32>
    %572 = vector.shape_cast %571 : vector<8xf32> to vector<8x1xf32>
    %cst_136 = arith.constant 3.200000e+01 : f32
    %573 = vector.broadcast %cst_136 : f32 to vector<8x1xf32>
    %574 = arith.divf %572, %573 : vector<8x1xf32>
    %575 = vector.broadcast %574 : vector<8x1xf32> to vector<8x32xf32>
    %576 = arith.subf %570, %575 : vector<8x32xf32>
    %577 = arith.mulf %576, %576 : vector<8x32xf32>
    %cst_137 = arith.constant dense<0.000000e+00> : vector<8xf32>
    %578 = vector.multi_reduction <add>, %577, %cst_137 [1] : vector<8x32xf32> to vector<8xf32>
    %579 = vector.shape_cast %578 : vector<8xf32> to vector<8x1xf32>
    %cst_138 = arith.constant 3.200000e+01 : f32
    %580 = vector.broadcast %cst_138 : f32 to vector<8x1xf32>
    %581 = arith.divf %579, %580 : vector<8x1xf32>
    %cst_139 = arith.constant 9.99999974E-6 : f32
    %582 = vector.broadcast %cst_139 : f32 to vector<8x1xf32>
    %583 = arith.addf %581, %582 : vector<8x1xf32>
    %584 = math.rsqrt %583 : vector<8x1xf32>
    %585 = vector.broadcast %584 : vector<8x1xf32> to vector<8x32xf32>
    %586 = arith.mulf %576, %585 : vector<8x32xf32>
    %587 = vector.broadcast %7 : vector<1x32xf32> to vector<8x32xf32>
    %588 = arith.mulf %586, %587 : vector<8x32xf32>
    %589 = vector.broadcast %8 : vector<1x32xf32> to vector<8x32xf32>
    %590 = arith.addf %588, %589 : vector<8x32xf32>
    %cst_140 = arith.constant dense<0.000000e+00> : vector<8x32xf32>
    %591 = tpu.matmul %590, %17, %cst_140 {dimension_numbers = #tpu.dot_dimension_numbers<[1], [0], [0], [1], [0, 0, 1, 1], [], []>} : vector<8x32xf32>, vector<32x32xf32>, vector<8x32xf32> -> vector<8x32xf32>
    %592 = vector.broadcast %9 : vector<1x32xf32> to vector<8x32xf32>
    %593 = arith.addf %591, %592 : vector<8x32xf32>
    %594 = arith.mulf %593, %289 : vector<8x32xf32>
    %cst_141 = arith.constant dense<0.000000e+00> : vector<8xf32>
    %595 = vector.multi_reduction <add>, %594, %cst_141 [1] : vector<8x32xf32> to vector<8xf32>
    %596 = vector.shape_cast %595 : vector<8xf32> to vector<8x1xf32>
    %cst_142 = arith.constant 0.176776692 : f32
    %597 = vector.broadcast %cst_142 : f32 to vector<8x1xf32>
    %598 = arith.mulf %596, %597 : vector<8x1xf32>
    %599 = arith.mulf %593, %532 : vector<8x32xf32>
    %cst_143 = arith.constant dense<0.000000e+00> : vector<8xf32>
    %600 = vector.multi_reduction <add>, %599, %cst_143 [1] : vector<8x32xf32> to vector<8xf32>
    %601 = vector.shape_cast %600 : vector<8xf32> to vector<8x1xf32>
    %cst_144 = arith.constant 0.176776692 : f32
    %602 = vector.broadcast %cst_144 : f32 to vector<8x1xf32>
    %603 = arith.mulf %601, %602 : vector<8x1xf32>
    %604 = arith.mulf %593, %593 : vector<8x32xf32>
    %cst_145 = arith.constant dense<0.000000e+00> : vector<8xf32>
    %605 = vector.multi_reduction <add>, %604, %cst_145 [1] : vector<8x32xf32> to vector<8xf32>
    %606 = vector.shape_cast %605 : vector<8xf32> to vector<8x1xf32>
    %cst_146 = arith.constant 0.176776692 : f32
    %607 = vector.broadcast %cst_146 : f32 to vector<8x1xf32>
    %608 = arith.mulf %606, %607 : vector<8x1xf32>
    %609 = arith.maximumf %598, %603 : vector<8x1xf32>
    %610 = arith.maximumf %609, %608 : vector<8x1xf32>
    %611 = arith.subf %598, %610 : vector<8x1xf32>
    %612 = math.exp %611 : vector<8x1xf32>
    %613 = arith.subf %603, %610 : vector<8x1xf32>
    %614 = math.exp %613 : vector<8x1xf32>
    %615 = arith.subf %608, %610 : vector<8x1xf32>
    %616 = math.exp %615 : vector<8x1xf32>
    %617 = arith.addf %612, %614 : vector<8x1xf32>
    %618 = arith.addf %617, %616 : vector<8x1xf32>
    %619 = tpu.reciprocal %618 {approx = true} : vector<8x1xf32> -> vector<8x1xf32>
    %620 = vector.broadcast %612 : vector<8x1xf32> to vector<8x32xf32>
    %621 = arith.mulf %620, %289 : vector<8x32xf32>
    %622 = vector.broadcast %614 : vector<8x1xf32> to vector<8x32xf32>
    %623 = arith.mulf %622, %532 : vector<8x32xf32>
    %624 = arith.addf %621, %623 : vector<8x32xf32>
    %625 = vector.broadcast %616 : vector<8x1xf32> to vector<8x32xf32>
    %626 = arith.mulf %625, %593 : vector<8x32xf32>
    %627 = arith.addf %624, %626 : vector<8x32xf32>
    %628 = vector.broadcast %619 : vector<8x1xf32> to vector<8x32xf32>
    %629 = arith.mulf %627, %628 : vector<8x32xf32>
    %cst_147 = arith.constant dense<0.000000e+00> : vector<8x32xf32>
    %630 = tpu.matmul %629, %18, %cst_147 {dimension_numbers = #tpu.dot_dimension_numbers<[1], [0], [0], [1], [0, 0, 1, 1], [], []>} : vector<8x32xf32>, vector<32x32xf32>, vector<8x32xf32> -> vector<8x32xf32>
    %631 = vector.broadcast %10 : vector<1x32xf32> to vector<8x32xf32>
    %632 = arith.addf %630, %631 : vector<8x32xf32>
    %633 = arith.addf %570, %632 : vector<8x32xf32>
    %cst_148 = arith.constant dense<0.000000e+00> : vector<8xf32>
    %634 = vector.multi_reduction <add>, %633, %cst_148 [1] : vector<8x32xf32> to vector<8xf32>
    %635 = vector.shape_cast %634 : vector<8xf32> to vector<8x1xf32>
    %cst_149 = arith.constant 3.200000e+01 : f32
    %636 = vector.broadcast %cst_149 : f32 to vector<8x1xf32>
    %637 = arith.divf %635, %636 : vector<8x1xf32>
    %638 = vector.broadcast %637 : vector<8x1xf32> to vector<8x32xf32>
    %639 = arith.subf %633, %638 : vector<8x32xf32>
    %640 = arith.mulf %639, %639 : vector<8x32xf32>
    %cst_150 = arith.constant dense<0.000000e+00> : vector<8xf32>
    %641 = vector.multi_reduction <add>, %640, %cst_150 [1] : vector<8x32xf32> to vector<8xf32>
    %642 = vector.shape_cast %641 : vector<8xf32> to vector<8x1xf32>
    %cst_151 = arith.constant 3.200000e+01 : f32
    %643 = vector.broadcast %cst_151 : f32 to vector<8x1xf32>
    %644 = arith.divf %642, %643 : vector<8x1xf32>
    %cst_152 = arith.constant 9.99999974E-6 : f32
    %645 = vector.broadcast %cst_152 : f32 to vector<8x1xf32>
    %646 = arith.addf %644, %645 : vector<8x1xf32>
    %647 = math.rsqrt %646 : vector<8x1xf32>
    %648 = vector.broadcast %647 : vector<8x1xf32> to vector<8x32xf32>
    %649 = arith.mulf %639, %648 : vector<8x32xf32>
    %650 = vector.broadcast %11 : vector<1x32xf32> to vector<8x32xf32>
    %651 = arith.mulf %649, %650 : vector<8x32xf32>
    %652 = vector.broadcast %12 : vector<1x32xf32> to vector<8x32xf32>
    %653 = arith.addf %651, %652 : vector<8x32xf32>
    %cst_153 = arith.constant dense<0.000000e+00> : vector<8x128xf32>
    %654 = tpu.matmul %653, %2, %cst_153 {dimension_numbers = #tpu.dot_dimension_numbers<[1], [0], [0], [1], [0, 0, 1, 1], [], []>} : vector<8x32xf32>, vector<32x128xf32>, vector<8x128xf32> -> vector<8x128xf32>
    %655 = vector.broadcast %13 : vector<1x128xf32> to vector<8x128xf32>
    %656 = arith.addf %654, %655 : vector<8x128xf32>
    %cst_154 = arith.constant 0.000000e+00 : f32
    %657 = vector.broadcast %cst_154 : f32 to vector<8x128xf32>
    %658 = arith.maximumf %656, %657 : vector<8x128xf32>
    %cst_155 = arith.constant dense<0.000000e+00> : vector<8x32xf32>
    %659 = tpu.matmul %658, %19, %cst_155 {dimension_numbers = #tpu.dot_dimension_numbers<[1], [0], [0], [1], [0, 0, 1, 1], [], []>} : vector<8x128xf32>, vector<128x32xf32>, vector<8x32xf32> -> vector<8x32xf32>
    %660 = vector.broadcast %14 : vector<1x32xf32> to vector<8x32xf32>
    %661 = arith.addf %659, %660 : vector<8x32xf32>
    %662 = arith.addf %633, %661 : vector<8x32xf32>
    %cst_156 = arith.constant dense<0.000000e+00> : vector<8x32xf32>
    %663 = tpu.matmul %662, %21, %cst_156 {dimension_numbers = #tpu.dot_dimension_numbers<[1], [0], [0], [1], [0, 0, 1, 1], [], []>} : vector<8x32xf32>, vector<32x32xf32>, vector<8x32xf32> -> vector<8x32xf32>
    %cst_157 = arith.constant dense<0.000000e+00> : vector<8x32xf32>
    %664 = tpu.matmul %568, %22, %cst_157 {dimension_numbers = #tpu.dot_dimension_numbers<[1], [0], [0], [1], [0, 0, 1, 1], [], []>} : vector<8x32xf32>, vector<32x32xf32>, vector<8x32xf32> -> vector<8x32xf32>
    %665 = arith.addf %663, %664 : vector<8x32xf32>
    %666 = vector.broadcast %5 : vector<1x32xf32> to vector<8x32xf32>
    %667 = arith.addf %665, %666 : vector<8x32xf32>
    %cst_158 = arith.constant dense<0.000000e+00> : vector<8xf32>
    %668 = vector.multi_reduction <add>, %667, %cst_158 [1] : vector<8x32xf32> to vector<8xf32>
    %669 = vector.shape_cast %668 : vector<8xf32> to vector<8x1xf32>
    %cst_159 = arith.constant 3.200000e+01 : f32
    %670 = vector.broadcast %cst_159 : f32 to vector<8x1xf32>
    %671 = arith.divf %669, %670 : vector<8x1xf32>
    %672 = vector.broadcast %671 : vector<8x1xf32> to vector<8x32xf32>
    %673 = arith.subf %667, %672 : vector<8x32xf32>
    %674 = arith.mulf %673, %673 : vector<8x32xf32>
    %cst_160 = arith.constant dense<0.000000e+00> : vector<8xf32>
    %675 = vector.multi_reduction <add>, %674, %cst_160 [1] : vector<8x32xf32> to vector<8xf32>
    %676 = vector.shape_cast %675 : vector<8xf32> to vector<8x1xf32>
    %cst_161 = arith.constant 3.200000e+01 : f32
    %677 = vector.broadcast %cst_161 : f32 to vector<8x1xf32>
    %678 = arith.divf %676, %677 : vector<8x1xf32>
    %cst_162 = arith.constant 9.99999974E-6 : f32
    %679 = vector.broadcast %cst_162 : f32 to vector<8x1xf32>
    %680 = arith.addf %678, %679 : vector<8x1xf32>
    %681 = math.rsqrt %680 : vector<8x1xf32>
    %682 = vector.broadcast %681 : vector<8x1xf32> to vector<8x32xf32>
    %683 = arith.mulf %673, %682 : vector<8x32xf32>
    %684 = vector.broadcast %7 : vector<1x32xf32> to vector<8x32xf32>
    %685 = arith.mulf %683, %684 : vector<8x32xf32>
    %686 = vector.broadcast %8 : vector<1x32xf32> to vector<8x32xf32>
    %687 = arith.addf %685, %686 : vector<8x32xf32>
    %cst_163 = arith.constant dense<0.000000e+00> : vector<8x32xf32>
    %688 = tpu.matmul %687, %17, %cst_163 {dimension_numbers = #tpu.dot_dimension_numbers<[1], [0], [0], [1], [0, 0, 1, 1], [], []>} : vector<8x32xf32>, vector<32x32xf32>, vector<8x32xf32> -> vector<8x32xf32>
    %689 = vector.broadcast %9 : vector<1x32xf32> to vector<8x32xf32>
    %690 = arith.addf %688, %689 : vector<8x32xf32>
    %691 = arith.mulf %690, %289 : vector<8x32xf32>
    %cst_164 = arith.constant dense<0.000000e+00> : vector<8xf32>
    %692 = vector.multi_reduction <add>, %691, %cst_164 [1] : vector<8x32xf32> to vector<8xf32>
    %693 = vector.shape_cast %692 : vector<8xf32> to vector<8x1xf32>
    %cst_165 = arith.constant 0.176776692 : f32
    %694 = vector.broadcast %cst_165 : f32 to vector<8x1xf32>
    %695 = arith.mulf %693, %694 : vector<8x1xf32>
    %696 = arith.mulf %690, %532 : vector<8x32xf32>
    %cst_166 = arith.constant dense<0.000000e+00> : vector<8xf32>
    %697 = vector.multi_reduction <add>, %696, %cst_166 [1] : vector<8x32xf32> to vector<8xf32>
    %698 = vector.shape_cast %697 : vector<8xf32> to vector<8x1xf32>
    %cst_167 = arith.constant 0.176776692 : f32
    %699 = vector.broadcast %cst_167 : f32 to vector<8x1xf32>
    %700 = arith.mulf %698, %699 : vector<8x1xf32>
    %701 = arith.mulf %690, %690 : vector<8x32xf32>
    %cst_168 = arith.constant dense<0.000000e+00> : vector<8xf32>
    %702 = vector.multi_reduction <add>, %701, %cst_168 [1] : vector<8x32xf32> to vector<8xf32>
    %703 = vector.shape_cast %702 : vector<8xf32> to vector<8x1xf32>
    %cst_169 = arith.constant 0.176776692 : f32
    %704 = vector.broadcast %cst_169 : f32 to vector<8x1xf32>
    %705 = arith.mulf %703, %704 : vector<8x1xf32>
    %706 = arith.maximumf %695, %700 : vector<8x1xf32>
    %707 = arith.maximumf %706, %705 : vector<8x1xf32>
    %708 = arith.subf %695, %707 : vector<8x1xf32>
    %709 = math.exp %708 : vector<8x1xf32>
    %710 = arith.subf %700, %707 : vector<8x1xf32>
    %711 = math.exp %710 : vector<8x1xf32>
    %712 = arith.subf %705, %707 : vector<8x1xf32>
    %713 = math.exp %712 : vector<8x1xf32>
    %714 = arith.addf %709, %711 : vector<8x1xf32>
    %715 = arith.addf %714, %713 : vector<8x1xf32>
    %716 = tpu.reciprocal %715 {approx = true} : vector<8x1xf32> -> vector<8x1xf32>
    %717 = vector.broadcast %709 : vector<8x1xf32> to vector<8x32xf32>
    %718 = arith.mulf %717, %289 : vector<8x32xf32>
    %719 = vector.broadcast %711 : vector<8x1xf32> to vector<8x32xf32>
    %720 = arith.mulf %719, %532 : vector<8x32xf32>
    %721 = arith.addf %718, %720 : vector<8x32xf32>
    %722 = vector.broadcast %713 : vector<8x1xf32> to vector<8x32xf32>
    %723 = arith.mulf %722, %690 : vector<8x32xf32>
    %724 = arith.addf %721, %723 : vector<8x32xf32>
    %725 = vector.broadcast %716 : vector<8x1xf32> to vector<8x32xf32>
    %726 = arith.mulf %724, %725 : vector<8x32xf32>
    %cst_170 = arith.constant dense<0.000000e+00> : vector<8x32xf32>
    %727 = tpu.matmul %726, %18, %cst_170 {dimension_numbers = #tpu.dot_dimension_numbers<[1], [0], [0], [1], [0, 0, 1, 1], [], []>} : vector<8x32xf32>, vector<32x32xf32>, vector<8x32xf32> -> vector<8x32xf32>
    %728 = vector.broadcast %10 : vector<1x32xf32> to vector<8x32xf32>
    %729 = arith.addf %727, %728 : vector<8x32xf32>
    %730 = arith.addf %667, %729 : vector<8x32xf32>
    %cst_171 = arith.constant dense<0.000000e+00> : vector<8xf32>
    %731 = vector.multi_reduction <add>, %730, %cst_171 [1] : vector<8x32xf32> to vector<8xf32>
    %732 = vector.shape_cast %731 : vector<8xf32> to vector<8x1xf32>
    %cst_172 = arith.constant 3.200000e+01 : f32
    %733 = vector.broadcast %cst_172 : f32 to vector<8x1xf32>
    %734 = arith.divf %732, %733 : vector<8x1xf32>
    %735 = vector.broadcast %734 : vector<8x1xf32> to vector<8x32xf32>
    %736 = arith.subf %730, %735 : vector<8x32xf32>
    %737 = arith.mulf %736, %736 : vector<8x32xf32>
    %cst_173 = arith.constant dense<0.000000e+00> : vector<8xf32>
    %738 = vector.multi_reduction <add>, %737, %cst_173 [1] : vector<8x32xf32> to vector<8xf32>
    %739 = vector.shape_cast %738 : vector<8xf32> to vector<8x1xf32>
    %cst_174 = arith.constant 3.200000e+01 : f32
    %740 = vector.broadcast %cst_174 : f32 to vector<8x1xf32>
    %741 = arith.divf %739, %740 : vector<8x1xf32>
    %cst_175 = arith.constant 9.99999974E-6 : f32
    %742 = vector.broadcast %cst_175 : f32 to vector<8x1xf32>
    %743 = arith.addf %741, %742 : vector<8x1xf32>
    %744 = math.rsqrt %743 : vector<8x1xf32>
    %745 = vector.broadcast %744 : vector<8x1xf32> to vector<8x32xf32>
    %746 = arith.mulf %736, %745 : vector<8x32xf32>
    %747 = vector.broadcast %11 : vector<1x32xf32> to vector<8x32xf32>
    %748 = arith.mulf %746, %747 : vector<8x32xf32>
    %749 = vector.broadcast %12 : vector<1x32xf32> to vector<8x32xf32>
    %750 = arith.addf %748, %749 : vector<8x32xf32>
    %cst_176 = arith.constant dense<0.000000e+00> : vector<8x128xf32>
    %751 = tpu.matmul %750, %2, %cst_176 {dimension_numbers = #tpu.dot_dimension_numbers<[1], [0], [0], [1], [0, 0, 1, 1], [], []>} : vector<8x32xf32>, vector<32x128xf32>, vector<8x128xf32> -> vector<8x128xf32>
    %752 = vector.broadcast %13 : vector<1x128xf32> to vector<8x128xf32>
    %753 = arith.addf %751, %752 : vector<8x128xf32>
    %cst_177 = arith.constant 0.000000e+00 : f32
    %754 = vector.broadcast %cst_177 : f32 to vector<8x128xf32>
    %755 = arith.maximumf %753, %754 : vector<8x128xf32>
    %cst_178 = arith.constant dense<0.000000e+00> : vector<8x32xf32>
    %756 = tpu.matmul %755, %19, %cst_178 {dimension_numbers = #tpu.dot_dimension_numbers<[1], [0], [0], [1], [0, 0, 1, 1], [], []>} : vector<8x128xf32>, vector<128x32xf32>, vector<8x32xf32> -> vector<8x32xf32>
    %757 = vector.broadcast %14 : vector<1x32xf32> to vector<8x32xf32>
    %758 = arith.addf %756, %757 : vector<8x32xf32>
    %759 = arith.addf %730, %758 : vector<8x32xf32>
    %cst_179 = arith.constant dense<0.000000e+00> : vector<8x2xf32>
    %760 = tpu.matmul %759, %24, %cst_179 {dimension_numbers = #tpu.dot_dimension_numbers<[1], [0], [0], [1], [0, 0, 1, 1], [], []>} : vector<8x32xf32>, vector<32x2xf32>, vector<8x2xf32> -> vector<8x2xf32>
    %761 = vector.broadcast %70 : vector<1x2xf32> to vector<8x2xf32>
    %762 = arith.addf %760, %761 : vector<8x2xf32>
    %cst_180 = arith.constant 5.000000e-01 : f32
    %763 = vector.broadcast %cst_180 : f32 to vector<8x1xf32>
    %764 = arith.cmpf ogt, %534, %763 : vector<8x1xf32>
    %cst_181 = arith.constant 0.000000e+00 : f32
    %765 = vector.shape_cast %764 : vector<8x1xi1> to vector<8x1xi1>
    %766 = vector.broadcast %765 : vector<8x1xi1> to vector<8x2xi1>
    %767 = vector.broadcast %cst_181 : f32 to vector<8x2xf32>
    %768 = arith.select %766, %762, %767 : vector<8x2xi1>, vector<8x2xf32>
    %769 = vector.shape_cast %768 : vector<8x2xf32> to vector<1x8x2xf32>
    %c2 = arith.constant 2 : index
    %c0_182 = arith.constant 0 : index
    %c0_183 = arith.constant 0 : index
    %770 = vector.load %arg6[%c2, %c0_182, %c0_183] : memref<8x8x2xf32, #tpu.memory_space<vmem>>, vector<1x8x2xf32>
    tpu.vector_store %arg6[%c2, %c0_182, %c0_183], %769 {strides = array<i32>} : memref<8x8x2xf32, #tpu.memory_space<vmem>>, vector<1x8x2xf32>,
    %cst_184 = arith.constant 5.000000e-01 : f32
    %771 = vector.broadcast %cst_184 : f32 to vector<8x1xf32>
    %772 = arith.cmpf ogt, %534, %771 : vector<8x1xf32>
    %cst_185 = arith.constant 0.000000e+00 : f32
    %773 = vector.shape_cast %772 : vector<8x1xi1> to vector<8x1xi1>
    %774 = vector.broadcast %773 : vector<8x1xi1> to vector<8x32xi1>
    %775 = vector.broadcast %cst_185 : f32 to vector<8x32xf32>
    %776 = arith.select %774, %759, %775 : vector<8x32xi1>, vector<8x32xf32>
    %cst_186 = arith.constant dense<0.000000e+00> : vector<8xf32>
    %777 = vector.multi_reduction <add>, %776, %cst_186 [1] : vector<8x32xf32> to vector<8xf32>
    %778 = vector.shape_cast %777 : vector<8xf32> to vector<8x1xf32>
    %cst_187 = arith.constant 3.200000e+01 : f32
    %779 = vector.broadcast %cst_187 : f32 to vector<8x1xf32>
    %780 = arith.divf %778, %779 : vector<8x1xf32>
    %781 = vector.broadcast %780 : vector<8x1xf32> to vector<8x32xf32>
    %782 = arith.subf %776, %781 : vector<8x32xf32>
    %783 = arith.mulf %782, %782 : vector<8x32xf32>
    %cst_188 = arith.constant dense<0.000000e+00> : vector<8xf32>
    %784 = vector.multi_reduction <add>, %783, %cst_188 [1] : vector<8x32xf32> to vector<8xf32>
    %785 = vector.shape_cast %784 : vector<8xf32> to vector<8x1xf32>
    %cst_189 = arith.constant 3.200000e+01 : f32
    %786 = vector.broadcast %cst_189 : f32 to vector<8x1xf32>
    %787 = arith.divf %785, %786 : vector<8x1xf32>
    %cst_190 = arith.constant 9.99999974E-6 : f32
    %788 = vector.broadcast %cst_190 : f32 to vector<8x1xf32>
    %789 = arith.addf %787, %788 : vector<8x1xf32>
    %790 = math.rsqrt %789 : vector<8x1xf32>
    %791 = vector.broadcast %790 : vector<8x1xf32> to vector<8x32xf32>
    %792 = arith.mulf %782, %791 : vector<8x32xf32>
    %793 = vector.broadcast %7 : vector<1x32xf32> to vector<8x32xf32>
    %794 = arith.mulf %792, %793 : vector<8x32xf32>
    %795 = vector.broadcast %8 : vector<1x32xf32> to vector<8x32xf32>
    %796 = arith.addf %794, %795 : vector<8x32xf32>
    %cst_191 = arith.constant dense<0.000000e+00> : vector<8x32xf32>
    %797 = tpu.matmul %796, %17, %cst_191 {dimension_numbers = #tpu.dot_dimension_numbers<[1], [0], [0], [1], [0, 0, 1, 1], [], []>} : vector<8x32xf32>, vector<32x32xf32>, vector<8x32xf32> -> vector<8x32xf32>
    %798 = vector.broadcast %9 : vector<1x32xf32> to vector<8x32xf32>
    %799 = arith.addf %797, %798 : vector<8x32xf32>
    %800 = vector.extract_strided_slice %33 {offsets = [0, 3], sizes = [8, 1], strides = [1, 1]} : vector<8x8xf32> to vector<8x1xf32>
    %801 = arith.mulf %534, %800 : vector<8x1xf32>
    %802 = vector.extract_strided_slice %26 {offsets = [3, 0, 0], sizes = [1, 8, 2], strides = [1, 1, 1]} : vector<8x8x2xf32> to vector<1x8x2xf32>
    %803 = vector.shape_cast %802 : vector<1x8x2xf32> to vector<8x2xf32>
    %804 = arith.addf %537, %803 : vector<8x2xf32>
    %805 = vector.broadcast %801 : vector<8x1xf32> to vector<8x2xf32>
    %806 = arith.mulf %804, %805 : vector<8x2xf32>
    %cst_192 = arith.constant dense<0.000000e+00> : vector<2xf32>
    %807 = vector.multi_reduction <add>, %806, %cst_192 [0] : vector<8x2xf32> to vector<2xf32>
    %808 = vector.shape_cast %807 : vector<2xf32> to vector<1x2xf32>
    %809 = vector.shape_cast %801 : vector<8x1xf32> to vector<1x8x1xf32>
    %cst_193 = arith.constant dense<0.000000e+00> : vector<1xf32>
    %810 = vector.multi_reduction <add>, %809, %cst_193 [1, 2] : vector<1x8x1xf32> to vector<1xf32>
    %811 = vector.shape_cast %810 : vector<1xf32> to vector<1x1x1xf32>
    %812 = vector.extract %811[0, 0, 0] : f32 from vector<1x1x1xf32>
    %813 = vector.broadcast %812 : f32 to vector<1x1xf32>
    %cst_194 = arith.constant 4.000000e+00 : f32
    %814 = vector.broadcast %cst_194 : f32 to vector<1x1xf32>
    %815 = arith.mulf %814, %813 : vector<1x1xf32>
    %cst_195 = arith.constant 9.99999997E-7 : f32
    %816 = vector.broadcast %cst_195 : f32 to vector<1x1xf32>
    %817 = arith.maximumf %815, %816 : vector<1x1xf32>
    %818 = tpu.reciprocal %817 {approx = true} : vector<1x1xf32> -> vector<1x1xf32>
    %819 = vector.broadcast %818 : vector<1x1xf32> to vector<1x2xf32>
    %820 = arith.mulf %808, %819 : vector<1x2xf32>
    %821 = vector.extract_strided_slice %820 {offsets = [0, 0], sizes = [1, 1], strides = [1, 1]} : vector<1x2xf32> to vector<1x1xf32>
    %822 = vector.extract_strided_slice %16 {offsets = [0, 0], sizes = [1, 32], strides = [1, 1]} : vector<2x32xf32> to vector<1x32xf32>
    %823 = vector.broadcast %821 : vector<1x1xf32> to vector<1x32xf32>
    %824 = arith.mulf %823, %822 : vector<1x32xf32>
    %825 = vector.extract_strided_slice %820 {offsets = [0, 1], sizes = [1, 1], strides = [1, 1]} : vector<1x2xf32> to vector<1x1xf32>
    %826 = vector.extract_strided_slice %16 {offsets = [1, 0], sizes = [1, 32], strides = [1, 1]} : vector<2x32xf32> to vector<1x32xf32>
    %827 = vector.broadcast %825 : vector<1x1xf32> to vector<1x32xf32>
    %828 = arith.mulf %827, %826 : vector<1x32xf32>
    %829 = arith.addf %824, %828 : vector<1x32xf32>
    %830 = vector.extract_strided_slice %68 {offsets = [3, 0, 0], sizes = [1, 8, 32], strides = [1, 1, 1]} : vector<8x8x32xf32> to vector<1x8x32xf32>
    %831 = vector.shape_cast %830 : vector<1x8x32xf32> to vector<8x32xf32>
    %832 = vector.broadcast %829 : vector<1x32xf32> to vector<8x32xf32>
    %833 = arith.subf %831, %832 : vector<8x32xf32>
    %cst_196 = arith.constant 0.000000e+00 : f32
    %834 = vector.broadcast %cst_196 : f32 to vector<8x32xf32>
    %835 = arith.maximumf %833, %834 : vector<8x32xf32>
    %836 = vector.extract_strided_slice %52 {offsets = [3, 0, 0], sizes = [1, 8, 32], strides = [1, 1, 1]} : vector<8x8x32xf32> to vector<1x8x32xf32>
    %837 = vector.shape_cast %836 : vector<1x8x32xf32> to vector<8x32xf32>
    %cst_197 = arith.constant dense<0.000000e+00> : vector<8xf32>
    %838 = vector.multi_reduction <add>, %837, %cst_197 [1] : vector<8x32xf32> to vector<8xf32>
    %839 = vector.shape_cast %838 : vector<8xf32> to vector<8x1xf32>
    %cst_198 = arith.constant 3.200000e+01 : f32
    %840 = vector.broadcast %cst_198 : f32 to vector<8x1xf32>
    %841 = arith.divf %839, %840 : vector<8x1xf32>
    %842 = vector.broadcast %841 : vector<8x1xf32> to vector<8x32xf32>
    %843 = arith.subf %837, %842 : vector<8x32xf32>
    %844 = arith.mulf %843, %843 : vector<8x32xf32>
    %cst_199 = arith.constant dense<0.000000e+00> : vector<8xf32>
    %845 = vector.multi_reduction <add>, %844, %cst_199 [1] : vector<8x32xf32> to vector<8xf32>
    %846 = vector.shape_cast %845 : vector<8xf32> to vector<8x1xf32>
    %cst_200 = arith.constant 3.200000e+01 : f32
    %847 = vector.broadcast %cst_200 : f32 to vector<8x1xf32>
    %848 = arith.divf %846, %847 : vector<8x1xf32>
    %cst_201 = arith.constant 9.99999974E-6 : f32
    %849 = vector.broadcast %cst_201 : f32 to vector<8x1xf32>
    %850 = arith.addf %848, %849 : vector<8x1xf32>
    %851 = math.rsqrt %850 : vector<8x1xf32>
    %852 = vector.broadcast %851 : vector<8x1xf32> to vector<8x32xf32>
    %853 = arith.mulf %843, %852 : vector<8x32xf32>
    %854 = vector.broadcast %7 : vector<1x32xf32> to vector<8x32xf32>
    %855 = arith.mulf %853, %854 : vector<8x32xf32>
    %856 = vector.broadcast %8 : vector<1x32xf32> to vector<8x32xf32>
    %857 = arith.addf %855, %856 : vector<8x32xf32>
    %cst_202 = arith.constant dense<0.000000e+00> : vector<8x32xf32>
    %858 = tpu.matmul %857, %17, %cst_202 {dimension_numbers = #tpu.dot_dimension_numbers<[1], [0], [0], [1], [0, 0, 1, 1], [], []>} : vector<8x32xf32>, vector<32x32xf32>, vector<8x32xf32> -> vector<8x32xf32>
    %859 = vector.broadcast %9 : vector<1x32xf32> to vector<8x32xf32>
    %860 = arith.addf %858, %859 : vector<8x32xf32>
    %861 = arith.mulf %860, %289 : vector<8x32xf32>
    %cst_203 = arith.constant dense<0.000000e+00> : vector<8xf32>
    %862 = vector.multi_reduction <add>, %861, %cst_203 [1] : vector<8x32xf32> to vector<8xf32>
    %863 = vector.shape_cast %862 : vector<8xf32> to vector<8x1xf32>
    %cst_204 = arith.constant 0.176776692 : f32
    %864 = vector.broadcast %cst_204 : f32 to vector<8x1xf32>
    %865 = arith.mulf %863, %864 : vector<8x1xf32>
    %866 = arith.mulf %860, %532 : vector<8x32xf32>
    %cst_205 = arith.constant dense<0.000000e+00> : vector<8xf32>
    %867 = vector.multi_reduction <add>, %866, %cst_205 [1] : vector<8x32xf32> to vector<8xf32>
    %868 = vector.shape_cast %867 : vector<8xf32> to vector<8x1xf32>
    %cst_206 = arith.constant 0.176776692 : f32
    %869 = vector.broadcast %cst_206 : f32 to vector<8x1xf32>
    %870 = arith.mulf %868, %869 : vector<8x1xf32>
    %871 = arith.mulf %860, %799 : vector<8x32xf32>
    %cst_207 = arith.constant dense<0.000000e+00> : vector<8xf32>
    %872 = vector.multi_reduction <add>, %871, %cst_207 [1] : vector<8x32xf32> to vector<8xf32>
    %873 = vector.shape_cast %872 : vector<8xf32> to vector<8x1xf32>
    %cst_208 = arith.constant 0.176776692 : f32
    %874 = vector.broadcast %cst_208 : f32 to vector<8x1xf32>
    %875 = arith.mulf %873, %874 : vector<8x1xf32>
    %876 = arith.mulf %860, %860 : vector<8x32xf32>
    %cst_209 = arith.constant dense<0.000000e+00> : vector<8xf32>
    %877 = vector.multi_reduction <add>, %876, %cst_209 [1] : vector<8x32xf32> to vector<8xf32>
    %878 = vector.shape_cast %877 : vector<8xf32> to vector<8x1xf32>
    %cst_210 = arith.constant 0.176776692 : f32
    %879 = vector.broadcast %cst_210 : f32 to vector<8x1xf32>
    %880 = arith.mulf %878, %879 : vector<8x1xf32>
    %881 = arith.maximumf %865, %870 : vector<8x1xf32>
    %882 = arith.maximumf %881, %875 : vector<8x1xf32>
    %883 = arith.maximumf %882, %880 : vector<8x1xf32>
    %884 = arith.subf %865, %883 : vector<8x1xf32>
    %885 = math.exp %884 : vector<8x1xf32>
    %886 = arith.subf %870, %883 : vector<8x1xf32>
    %887 = math.exp %886 : vector<8x1xf32>
    %888 = arith.subf %875, %883 : vector<8x1xf32>
    %889 = math.exp %888 : vector<8x1xf32>
    %890 = arith.subf %880, %883 : vector<8x1xf32>
    %891 = math.exp %890 : vector<8x1xf32>
    %892 = arith.addf %885, %887 : vector<8x1xf32>
    %893 = arith.addf %892, %889 : vector<8x1xf32>
    %894 = arith.addf %893, %891 : vector<8x1xf32>
    %895 = tpu.reciprocal %894 {approx = true} : vector<8x1xf32> -> vector<8x1xf32>
    %896 = vector.broadcast %885 : vector<8x1xf32> to vector<8x32xf32>
    %897 = arith.mulf %896, %289 : vector<8x32xf32>
    %898 = vector.broadcast %887 : vector<8x1xf32> to vector<8x32xf32>
    %899 = arith.mulf %898, %532 : vector<8x32xf32>
    %900 = arith.addf %897, %899 : vector<8x32xf32>
    %901 = vector.broadcast %889 : vector<8x1xf32> to vector<8x32xf32>
    %902 = arith.mulf %901, %799 : vector<8x32xf32>
    %903 = arith.addf %900, %902 : vector<8x32xf32>
    %904 = vector.broadcast %891 : vector<8x1xf32> to vector<8x32xf32>
    %905 = arith.mulf %904, %860 : vector<8x32xf32>
    %906 = arith.addf %903, %905 : vector<8x32xf32>
    %907 = vector.broadcast %895 : vector<8x1xf32> to vector<8x32xf32>
    %908 = arith.mulf %906, %907 : vector<8x32xf32>
    %cst_211 = arith.constant dense<0.000000e+00> : vector<8x32xf32>
    %909 = tpu.matmul %908, %18, %cst_211 {dimension_numbers = #tpu.dot_dimension_numbers<[1], [0], [0], [1], [0, 0, 1, 1], [], []>} : vector<8x32xf32>, vector<32x32xf32>, vector<8x32xf32> -> vector<8x32xf32>
    %910 = vector.broadcast %10 : vector<1x32xf32> to vector<8x32xf32>
    %911 = arith.addf %909, %910 : vector<8x32xf32>
    %912 = arith.addf %837, %911 : vector<8x32xf32>
    %cst_212 = arith.constant dense<0.000000e+00> : vector<8xf32>
    %913 = vector.multi_reduction <add>, %912, %cst_212 [1] : vector<8x32xf32> to vector<8xf32>
    %914 = vector.shape_cast %913 : vector<8xf32> to vector<8x1xf32>
    %cst_213 = arith.constant 3.200000e+01 : f32
    %915 = vector.broadcast %cst_213 : f32 to vector<8x1xf32>
    %916 = arith.divf %914, %915 : vector<8x1xf32>
    %917 = vector.broadcast %916 : vector<8x1xf32> to vector<8x32xf32>
    %918 = arith.subf %912, %917 : vector<8x32xf32>
    %919 = arith.mulf %918, %918 : vector<8x32xf32>
    %cst_214 = arith.constant dense<0.000000e+00> : vector<8xf32>
    %920 = vector.multi_reduction <add>, %919, %cst_214 [1] : vector<8x32xf32> to vector<8xf32>
    %921 = vector.shape_cast %920 : vector<8xf32> to vector<8x1xf32>
    %cst_215 = arith.constant 3.200000e+01 : f32
    %922 = vector.broadcast %cst_215 : f32 to vector<8x1xf32>
    %923 = arith.divf %921, %922 : vector<8x1xf32>
    %cst_216 = arith.constant 9.99999974E-6 : f32
    %924 = vector.broadcast %cst_216 : f32 to vector<8x1xf32>
    %925 = arith.addf %923, %924 : vector<8x1xf32>
    %926 = math.rsqrt %925 : vector<8x1xf32>
    %927 = vector.broadcast %926 : vector<8x1xf32> to vector<8x32xf32>
    %928 = arith.mulf %918, %927 : vector<8x32xf32>
    %929 = vector.broadcast %11 : vector<1x32xf32> to vector<8x32xf32>
    %930 = arith.mulf %928, %929 : vector<8x32xf32>
    %931 = vector.broadcast %12 : vector<1x32xf32> to vector<8x32xf32>
    %932 = arith.addf %930, %931 : vector<8x32xf32>
    %cst_217 = arith.constant dense<0.000000e+00> : vector<8x128xf32>
    %933 = tpu.matmul %932, %2, %cst_217 {dimension_numbers = #tpu.dot_dimension_numbers<[1], [0], [0], [1], [0, 0, 1, 1], [], []>} : vector<8x32xf32>, vector<32x128xf32>, vector<8x128xf32> -> vector<8x128xf32>
    %934 = vector.broadcast %13 : vector<1x128xf32> to vector<8x128xf32>
    %935 = arith.addf %933, %934 : vector<8x128xf32>
    %cst_218 = arith.constant 0.000000e+00 : f32
    %936 = vector.broadcast %cst_218 : f32 to vector<8x128xf32>
    %937 = arith.maximumf %935, %936 : vector<8x128xf32>
    %cst_219 = arith.constant dense<0.000000e+00> : vector<8x32xf32>
    %938 = tpu.matmul %937, %19, %cst_219 {dimension_numbers = #tpu.dot_dimension_numbers<[1], [0], [0], [1], [0, 0, 1, 1], [], []>} : vector<8x128xf32>, vector<128x32xf32>, vector<8x32xf32> -> vector<8x32xf32>
    %939 = vector.broadcast %14 : vector<1x32xf32> to vector<8x32xf32>
    %940 = arith.addf %938, %939 : vector<8x32xf32>
    %941 = arith.addf %912, %940 : vector<8x32xf32>
    %cst_220 = arith.constant dense<0.000000e+00> : vector<8x32xf32>
    %942 = tpu.matmul %941, %21, %cst_220 {dimension_numbers = #tpu.dot_dimension_numbers<[1], [0], [0], [1], [0, 0, 1, 1], [], []>} : vector<8x32xf32>, vector<32x32xf32>, vector<8x32xf32> -> vector<8x32xf32>
    %cst_221 = arith.constant dense<0.000000e+00> : vector<8x32xf32>
    %943 = tpu.matmul %835, %22, %cst_221 {dimension_numbers = #tpu.dot_dimension_numbers<[1], [0], [0], [1], [0, 0, 1, 1], [], []>} : vector<8x32xf32>, vector<32x32xf32>, vector<8x32xf32> -> vector<8x32xf32>
    %944 = arith.addf %942, %943 : vector<8x32xf32>
    %945 = vector.broadcast %5 : vector<1x32xf32> to vector<8x32xf32>
    %946 = arith.addf %944, %945 : vector<8x32xf32>
    %cst_222 = arith.constant dense<0.000000e+00> : vector<8xf32>
    %947 = vector.multi_reduction <add>, %946, %cst_222 [1] : vector<8x32xf32> to vector<8xf32>
    %948 = vector.shape_cast %947 : vector<8xf32> to vector<8x1xf32>
    %cst_223 = arith.constant 3.200000e+01 : f32
    %949 = vector.broadcast %cst_223 : f32 to vector<8x1xf32>
    %950 = arith.divf %948, %949 : vector<8x1xf32>
    %951 = vector.broadcast %950 : vector<8x1xf32> to vector<8x32xf32>
    %952 = arith.subf %946, %951 : vector<8x32xf32>
    %953 = arith.mulf %952, %952 : vector<8x32xf32>
    %cst_224 = arith.constant dense<0.000000e+00> : vector<8xf32>
    %954 = vector.multi_reduction <add>, %953, %cst_224 [1] : vector<8x32xf32> to vector<8xf32>
    %955 = vector.shape_cast %954 : vector<8xf32> to vector<8x1xf32>
    %cst_225 = arith.constant 3.200000e+01 : f32
    %956 = vector.broadcast %cst_225 : f32 to vector<8x1xf32>
    %957 = arith.divf %955, %956 : vector<8x1xf32>
    %cst_226 = arith.constant 9.99999974E-6 : f32
    %958 = vector.broadcast %cst_226 : f32 to vector<8x1xf32>
    %959 = arith.addf %957, %958 : vector<8x1xf32>
    %960 = math.rsqrt %959 : vector<8x1xf32>
    %961 = vector.broadcast %960 : vector<8x1xf32> to vector<8x32xf32>
    %962 = arith.mulf %952, %961 : vector<8x32xf32>
    %963 = vector.broadcast %7 : vector<1x32xf32> to vector<8x32xf32>
    %964 = arith.mulf %962, %963 : vector<8x32xf32>
    %965 = vector.broadcast %8 : vector<1x32xf32> to vector<8x32xf32>
    %966 = arith.addf %964, %965 : vector<8x32xf32>
    %cst_227 = arith.constant dense<0.000000e+00> : vector<8x32xf32>
    %967 = tpu.matmul %966, %17, %cst_227 {dimension_numbers = #tpu.dot_dimension_numbers<[1], [0], [0], [1], [0, 0, 1, 1], [], []>} : vector<8x32xf32>, vector<32x32xf32>, vector<8x32xf32> -> vector<8x32xf32>
    %968 = vector.broadcast %9 : vector<1x32xf32> to vector<8x32xf32>
    %969 = arith.addf %967, %968 : vector<8x32xf32>
    %970 = arith.mulf %969, %289 : vector<8x32xf32>
    %cst_228 = arith.constant dense<0.000000e+00> : vector<8xf32>
    %971 = vector.multi_reduction <add>, %970, %cst_228 [1] : vector<8x32xf32> to vector<8xf32>
    %972 = vector.shape_cast %971 : vector<8xf32> to vector<8x1xf32>
    %cst_229 = arith.constant 0.176776692 : f32
    %973 = vector.broadcast %cst_229 : f32 to vector<8x1xf32>
    %974 = arith.mulf %972, %973 : vector<8x1xf32>
    %975 = arith.mulf %969, %532 : vector<8x32xf32>
    %cst_230 = arith.constant dense<0.000000e+00> : vector<8xf32>
    %976 = vector.multi_reduction <add>, %975, %cst_230 [1] : vector<8x32xf32> to vector<8xf32>
    %977 = vector.shape_cast %976 : vector<8xf32> to vector<8x1xf32>
    %cst_231 = arith.constant 0.176776692 : f32
    %978 = vector.broadcast %cst_231 : f32 to vector<8x1xf32>
    %979 = arith.mulf %977, %978 : vector<8x1xf32>
    %980 = arith.mulf %969, %799 : vector<8x32xf32>
    %cst_232 = arith.constant dense<0.000000e+00> : vector<8xf32>
    %981 = vector.multi_reduction <add>, %980, %cst_232 [1] : vector<8x32xf32> to vector<8xf32>
    %982 = vector.shape_cast %981 : vector<8xf32> to vector<8x1xf32>
    %cst_233 = arith.constant 0.176776692 : f32
    %983 = vector.broadcast %cst_233 : f32 to vector<8x1xf32>
    %984 = arith.mulf %982, %983 : vector<8x1xf32>
    %985 = arith.mulf %969, %969 : vector<8x32xf32>
    %cst_234 = arith.constant dense<0.000000e+00> : vector<8xf32>
    %986 = vector.multi_reduction <add>, %985, %cst_234 [1] : vector<8x32xf32> to vector<8xf32>
    %987 = vector.shape_cast %986 : vector<8xf32> to vector<8x1xf32>
    %cst_235 = arith.constant 0.176776692 : f32
    %988 = vector.broadcast %cst_235 : f32 to vector<8x1xf32>
    %989 = arith.mulf %987, %988 : vector<8x1xf32>
    %990 = arith.maximumf %974, %979 : vector<8x1xf32>
    %991 = arith.maximumf %990, %984 : vector<8x1xf32>
    %992 = arith.maximumf %991, %989 : vector<8x1xf32>
    %993 = arith.subf %974, %992 : vector<8x1xf32>
    %994 = math.exp %993 : vector<8x1xf32>
    %995 = arith.subf %979, %992 : vector<8x1xf32>
    %996 = math.exp %995 : vector<8x1xf32>
    %997 = arith.subf %984, %992 : vector<8x1xf32>
    %998 = math.exp %997 : vector<8x1xf32>
    %999 = arith.subf %989, %992 : vector<8x1xf32>
    %1000 = math.exp %999 : vector<8x1xf32>
    %1001 = arith.addf %994, %996 : vector<8x1xf32>
    %1002 = arith.addf %1001, %998 : vector<8x1xf32>
    %1003 = arith.addf %1002, %1000 : vector<8x1xf32>
    %1004 = tpu.reciprocal %1003 {approx = true} : vector<8x1xf32> -> vector<8x1xf32>
    %1005 = vector.broadcast %994 : vector<8x1xf32> to vector<8x32xf32>
    %1006 = arith.mulf %1005, %289 : vector<8x32xf32>
    %1007 = vector.broadcast %996 : vector<8x1xf32> to vector<8x32xf32>
    %1008 = arith.mulf %1007, %532 : vector<8x32xf32>
    %1009 = arith.addf %1006, %1008 : vector<8x32xf32>
    %1010 = vector.broadcast %998 : vector<8x1xf32> to vector<8x32xf32>
    %1011 = arith.mulf %1010, %799 : vector<8x32xf32>
    %1012 = arith.addf %1009, %1011 : vector<8x32xf32>
    %1013 = vector.broadcast %1000 : vector<8x1xf32> to vector<8x32xf32>
    %1014 = arith.mulf %1013, %969 : vector<8x32xf32>
    %1015 = arith.addf %1012, %1014 : vector<8x32xf32>
    %1016 = vector.broadcast %1004 : vector<8x1xf32> to vector<8x32xf32>
    %1017 = arith.mulf %1015, %1016 : vector<8x32xf32>
    %cst_236 = arith.constant dense<0.000000e+00> : vector<8x32xf32>
    %1018 = tpu.matmul %1017, %18, %cst_236 {dimension_numbers = #tpu.dot_dimension_numbers<[1], [0], [0], [1], [0, 0, 1, 1], [], []>} : vector<8x32xf32>, vector<32x32xf32>, vector<8x32xf32> -> vector<8x32xf32>
    %1019 = vector.broadcast %10 : vector<1x32xf32> to vector<8x32xf32>
    %1020 = arith.addf %1018, %1019 : vector<8x32xf32>
    %1021 = arith.addf %946, %1020 : vector<8x32xf32>
    %cst_237 = arith.constant dense<0.000000e+00> : vector<8xf32>
    %1022 = vector.multi_reduction <add>, %1021, %cst_237 [1] : vector<8x32xf32> to vector<8xf32>
    %1023 = vector.shape_cast %1022 : vector<8xf32> to vector<8x1xf32>
    %cst_238 = arith.constant 3.200000e+01 : f32
    %1024 = vector.broadcast %cst_238 : f32 to vector<8x1xf32>
    %1025 = arith.divf %1023, %1024 : vector<8x1xf32>
    %1026 = vector.broadcast %1025 : vector<8x1xf32> to vector<8x32xf32>
    %1027 = arith.subf %1021, %1026 : vector<8x32xf32>
    %1028 = arith.mulf %1027, %1027 : vector<8x32xf32>
    %cst_239 = arith.constant dense<0.000000e+00> : vector<8xf32>
    %1029 = vector.multi_reduction <add>, %1028, %cst_239 [1] : vector<8x32xf32> to vector<8xf32>
    %1030 = vector.shape_cast %1029 : vector<8xf32> to vector<8x1xf32>
    %cst_240 = arith.constant 3.200000e+01 : f32
    %1031 = vector.broadcast %cst_240 : f32 to vector<8x1xf32>
    %1032 = arith.divf %1030, %1031 : vector<8x1xf32>
    %cst_241 = arith.constant 9.99999974E-6 : f32
    %1033 = vector.broadcast %cst_241 : f32 to vector<8x1xf32>
    %1034 = arith.addf %1032, %1033 : vector<8x1xf32>
    %1035 = math.rsqrt %1034 : vector<8x1xf32>
    %1036 = vector.broadcast %1035 : vector<8x1xf32> to vector<8x32xf32>
    %1037 = arith.mulf %1027, %1036 : vector<8x32xf32>
    %1038 = vector.broadcast %11 : vector<1x32xf32> to vector<8x32xf32>
    %1039 = arith.mulf %1037, %1038 : vector<8x32xf32>
    %1040 = vector.broadcast %12 : vector<1x32xf32> to vector<8x32xf32>
    %1041 = arith.addf %1039, %1040 : vector<8x32xf32>
    %cst_242 = arith.constant dense<0.000000e+00> : vector<8x128xf32>
    %1042 = tpu.matmul %1041, %2, %cst_242 {dimension_numbers = #tpu.dot_dimension_numbers<[1], [0], [0], [1], [0, 0, 1, 1], [], []>} : vector<8x32xf32>, vector<32x128xf32>, vector<8x128xf32> -> vector<8x128xf32>
    %1043 = vector.broadcast %13 : vector<1x128xf32> to vector<8x128xf32>
    %1044 = arith.addf %1042, %1043 : vector<8x128xf32>
    %cst_243 = arith.constant 0.000000e+00 : f32
    %1045 = vector.broadcast %cst_243 : f32 to vector<8x128xf32>
    %1046 = arith.maximumf %1044, %1045 : vector<8x128xf32>
    %cst_244 = arith.constant dense<0.000000e+00> : vector<8x32xf32>
    %1047 = tpu.matmul %1046, %19, %cst_244 {dimension_numbers = #tpu.dot_dimension_numbers<[1], [0], [0], [1], [0, 0, 1, 1], [], []>} : vector<8x128xf32>, vector<128x32xf32>, vector<8x32xf32> -> vector<8x32xf32>
    %1048 = vector.broadcast %14 : vector<1x32xf32> to vector<8x32xf32>
    %1049 = arith.addf %1047, %1048 : vector<8x32xf32>
    %1050 = arith.addf %1021, %1049 : vector<8x32xf32>
    %cst_245 = arith.constant dense<0.000000e+00> : vector<8x2xf32>
    %1051 = tpu.matmul %1050, %24, %cst_245 {dimension_numbers = #tpu.dot_dimension_numbers<[1], [0], [0], [1], [0, 0, 1, 1], [], []>} : vector<8x32xf32>, vector<32x2xf32>, vector<8x2xf32> -> vector<8x2xf32>
    %1052 = vector.broadcast %70 : vector<1x2xf32> to vector<8x2xf32>
    %1053 = arith.addf %1051, %1052 : vector<8x2xf32>
    %cst_246 = arith.constant 5.000000e-01 : f32
    %1054 = vector.broadcast %cst_246 : f32 to vector<8x1xf32>
    %1055 = arith.cmpf ogt, %801, %1054 : vector<8x1xf32>
    %cst_247 = arith.constant 0.000000e+00 : f32
    %1056 = vector.shape_cast %1055 : vector<8x1xi1> to vector<8x1xi1>
    %1057 = vector.broadcast %1056 : vector<8x1xi1> to vector<8x2xi1>
    %1058 = vector.broadcast %cst_247 : f32 to vector<8x2xf32>
    %1059 = arith.select %1057, %1053, %1058 : vector<8x2xi1>, vector<8x2xf32>
    %1060 = vector.shape_cast %1059 : vector<8x2xf32> to vector<1x8x2xf32>
    %c3 = arith.constant 3 : index
    %c0_248 = arith.constant 0 : index
    %c0_249 = arith.constant 0 : index
    %1061 = vector.load %arg6[%c3, %c0_248, %c0_249] : memref<8x8x2xf32, #tpu.memory_space<vmem>>, vector<1x8x2xf32>
    tpu.vector_store %arg6[%c3, %c0_248, %c0_249], %1060 {strides = array<i32>} : memref<8x8x2xf32, #tpu.memory_space<vmem>>, vector<1x8x2xf32>,
    %cst_250 = arith.constant 5.000000e-01 : f32
    %1062 = vector.broadcast %cst_250 : f32 to vector<8x1xf32>
    %1063 = arith.cmpf ogt, %801, %1062 : vector<8x1xf32>
    %cst_251 = arith.constant 0.000000e+00 : f32
    %1064 = vector.shape_cast %1063 : vector<8x1xi1> to vector<8x1xi1>
    %1065 = vector.broadcast %1064 : vector<8x1xi1> to vector<8x32xi1>
    %1066 = vector.broadcast %cst_251 : f32 to vector<8x32xf32>
    %1067 = arith.select %1065, %1050, %1066 : vector<8x32xi1>, vector<8x32xf32>
    %cst_252 = arith.constant dense<0.000000e+00> : vector<8xf32>
    %1068 = vector.multi_reduction <add>, %1067, %cst_252 [1] : vector<8x32xf32> to vector<8xf32>
    %1069 = vector.shape_cast %1068 : vector<8xf32> to vector<8x1xf32>
    %cst_253 = arith.constant 3.200000e+01 : f32
    %1070 = vector.broadcast %cst_253 : f32 to vector<8x1xf32>
    %1071 = arith.divf %1069, %1070 : vector<8x1xf32>
    %1072 = vector.broadcast %1071 : vector<8x1xf32> to vector<8x32xf32>
    %1073 = arith.subf %1067, %1072 : vector<8x32xf32>
    %1074 = arith.mulf %1073, %1073 : vector<8x32xf32>
    %cst_254 = arith.constant dense<0.000000e+00> : vector<8xf32>
    %1075 = vector.multi_reduction <add>, %1074, %cst_254 [1] : vector<8x32xf32> to vector<8xf32>
    %1076 = vector.shape_cast %1075 : vector<8xf32> to vector<8x1xf32>
    %cst_255 = arith.constant 3.200000e+01 : f32
    %1077 = vector.broadcast %cst_255 : f32 to vector<8x1xf32>
    %1078 = arith.divf %1076, %1077 : vector<8x1xf32>
    %cst_256 = arith.constant 9.99999974E-6 : f32
    %1079 = vector.broadcast %cst_256 : f32 to vector<8x1xf32>
    %1080 = arith.addf %1078, %1079 : vector<8x1xf32>
    %1081 = math.rsqrt %1080 : vector<8x1xf32>
    %1082 = vector.broadcast %1081 : vector<8x1xf32> to vector<8x32xf32>
    %1083 = arith.mulf %1073, %1082 : vector<8x32xf32>
    %1084 = vector.broadcast %7 : vector<1x32xf32> to vector<8x32xf32>
    %1085 = arith.mulf %1083, %1084 : vector<8x32xf32>
    %1086 = vector.broadcast %8 : vector<1x32xf32> to vector<8x32xf32>
    %1087 = arith.addf %1085, %1086 : vector<8x32xf32>
    %cst_257 = arith.constant dense<0.000000e+00> : vector<8x32xf32>
    %1088 = tpu.matmul %1087, %17, %cst_257 {dimension_numbers = #tpu.dot_dimension_numbers<[1], [0], [0], [1], [0, 0, 1, 1], [], []>} : vector<8x32xf32>, vector<32x32xf32>, vector<8x32xf32> -> vector<8x32xf32>
    %1089 = vector.broadcast %9 : vector<1x32xf32> to vector<8x32xf32>
    %1090 = arith.addf %1088, %1089 : vector<8x32xf32>
    %1091 = vector.extract_strided_slice %33 {offsets = [0, 4], sizes = [8, 1], strides = [1, 1]} : vector<8x8xf32> to vector<8x1xf32>
    %1092 = arith.mulf %801, %1091 : vector<8x1xf32>
    %1093 = vector.extract_strided_slice %26 {offsets = [4, 0, 0], sizes = [1, 8, 2], strides = [1, 1, 1]} : vector<8x8x2xf32> to vector<1x8x2xf32>
    %1094 = vector.shape_cast %1093 : vector<1x8x2xf32> to vector<8x2xf32>
    %1095 = arith.addf %804, %1094 : vector<8x2xf32>
    %1096 = vector.broadcast %1092 : vector<8x1xf32> to vector<8x2xf32>
    %1097 = arith.mulf %1095, %1096 : vector<8x2xf32>
    %cst_258 = arith.constant dense<0.000000e+00> : vector<2xf32>
    %1098 = vector.multi_reduction <add>, %1097, %cst_258 [0] : vector<8x2xf32> to vector<2xf32>
    %1099 = vector.shape_cast %1098 : vector<2xf32> to vector<1x2xf32>
    %1100 = vector.shape_cast %1092 : vector<8x1xf32> to vector<1x8x1xf32>
    %cst_259 = arith.constant dense<0.000000e+00> : vector<1xf32>
    %1101 = vector.multi_reduction <add>, %1100, %cst_259 [1, 2] : vector<1x8x1xf32> to vector<1xf32>
    %1102 = vector.shape_cast %1101 : vector<1xf32> to vector<1x1x1xf32>
    %1103 = vector.extract %1102[0, 0, 0] : f32 from vector<1x1x1xf32>
    %1104 = vector.broadcast %1103 : f32 to vector<1x1xf32>
    %cst_260 = arith.constant 5.000000e+00 : f32
    %1105 = vector.broadcast %cst_260 : f32 to vector<1x1xf32>
    %1106 = arith.mulf %1105, %1104 : vector<1x1xf32>
    %cst_261 = arith.constant 9.99999997E-7 : f32
    %1107 = vector.broadcast %cst_261 : f32 to vector<1x1xf32>
    %1108 = arith.maximumf %1106, %1107 : vector<1x1xf32>
    %1109 = tpu.reciprocal %1108 {approx = true} : vector<1x1xf32> -> vector<1x1xf32>
    %1110 = vector.broadcast %1109 : vector<1x1xf32> to vector<1x2xf32>
    %1111 = arith.mulf %1099, %1110 : vector<1x2xf32>
    %1112 = vector.extract_strided_slice %1111 {offsets = [0, 0], sizes = [1, 1], strides = [1, 1]} : vector<1x2xf32> to vector<1x1xf32>
    %1113 = vector.extract_strided_slice %16 {offsets = [0, 0], sizes = [1, 32], strides = [1, 1]} : vector<2x32xf32> to vector<1x32xf32>
    %1114 = vector.broadcast %1112 : vector<1x1xf32> to vector<1x32xf32>
    %1115 = arith.mulf %1114, %1113 : vector<1x32xf32>
    %1116 = vector.extract_strided_slice %1111 {offsets = [0, 1], sizes = [1, 1], strides = [1, 1]} : vector<1x2xf32> to vector<1x1xf32>
    %1117 = vector.extract_strided_slice %16 {offsets = [1, 0], sizes = [1, 32], strides = [1, 1]} : vector<2x32xf32> to vector<1x32xf32>
    %1118 = vector.broadcast %1116 : vector<1x1xf32> to vector<1x32xf32>
    %1119 = arith.mulf %1118, %1117 : vector<1x32xf32>
    %1120 = arith.addf %1115, %1119 : vector<1x32xf32>
    %1121 = vector.extract_strided_slice %68 {offsets = [4, 0, 0], sizes = [1, 8, 32], strides = [1, 1, 1]} : vector<8x8x32xf32> to vector<1x8x32xf32>
    %1122 = vector.shape_cast %1121 : vector<1x8x32xf32> to vector<8x32xf32>
    %1123 = vector.broadcast %1120 : vector<1x32xf32> to vector<8x32xf32>
    %1124 = arith.subf %1122, %1123 : vector<8x32xf32>
    %cst_262 = arith.constant 0.000000e+00 : f32
    %1125 = vector.broadcast %cst_262 : f32 to vector<8x32xf32>
    %1126 = arith.maximumf %1124, %1125 : vector<8x32xf32>
    %1127 = vector.extract_strided_slice %52 {offsets = [4, 0, 0], sizes = [1, 8, 32], strides = [1, 1, 1]} : vector<8x8x32xf32> to vector<1x8x32xf32>
    %1128 = vector.shape_cast %1127 : vector<1x8x32xf32> to vector<8x32xf32>
    %cst_263 = arith.constant dense<0.000000e+00> : vector<8xf32>
    %1129 = vector.multi_reduction <add>, %1128, %cst_263 [1] : vector<8x32xf32> to vector<8xf32>
    %1130 = vector.shape_cast %1129 : vector<8xf32> to vector<8x1xf32>
    %cst_264 = arith.constant 3.200000e+01 : f32
    %1131 = vector.broadcast %cst_264 : f32 to vector<8x1xf32>
    %1132 = arith.divf %1130, %1131 : vector<8x1xf32>
    %1133 = vector.broadcast %1132 : vector<8x1xf32> to vector<8x32xf32>
    %1134 = arith.subf %1128, %1133 : vector<8x32xf32>
    %1135 = arith.mulf %1134, %1134 : vector<8x32xf32>
    %cst_265 = arith.constant dense<0.000000e+00> : vector<8xf32>
    %1136 = vector.multi_reduction <add>, %1135, %cst_265 [1] : vector<8x32xf32> to vector<8xf32>
    %1137 = vector.shape_cast %1136 : vector<8xf32> to vector<8x1xf32>
    %cst_266 = arith.constant 3.200000e+01 : f32
    %1138 = vector.broadcast %cst_266 : f32 to vector<8x1xf32>
    %1139 = arith.divf %1137, %1138 : vector<8x1xf32>
    %cst_267 = arith.constant 9.99999974E-6 : f32
    %1140 = vector.broadcast %cst_267 : f32 to vector<8x1xf32>
    %1141 = arith.addf %1139, %1140 : vector<8x1xf32>
    %1142 = math.rsqrt %1141 : vector<8x1xf32>
    %1143 = vector.broadcast %1142 : vector<8x1xf32> to vector<8x32xf32>
    %1144 = arith.mulf %1134, %1143 : vector<8x32xf32>
    %1145 = vector.broadcast %7 : vector<1x32xf32> to vector<8x32xf32>
    %1146 = arith.mulf %1144, %1145 : vector<8x32xf32>
    %1147 = vector.broadcast %8 : vector<1x32xf32> to vector<8x32xf32>
    %1148 = arith.addf %1146, %1147 : vector<8x32xf32>
    %cst_268 = arith.constant dense<0.000000e+00> : vector<8x32xf32>
    %1149 = tpu.matmul %1148, %17, %cst_268 {dimension_numbers = #tpu.dot_dimension_numbers<[1], [0], [0], [1], [0, 0, 1, 1], [], []>} : vector<8x32xf32>, vector<32x32xf32>, vector<8x32xf32> -> vector<8x32xf32>
    %1150 = vector.broadcast %9 : vector<1x32xf32> to vector<8x32xf32>
    %1151 = arith.addf %1149, %1150 : vector<8x32xf32>
    %1152 = arith.mulf %1151, %289 : vector<8x32xf32>
    %cst_269 = arith.constant dense<0.000000e+00> : vector<8xf32>
    %1153 = vector.multi_reduction <add>, %1152, %cst_269 [1] : vector<8x32xf32> to vector<8xf32>
    %1154 = vector.shape_cast %1153 : vector<8xf32> to vector<8x1xf32>
    %cst_270 = arith.constant 0.176776692 : f32
    %1155 = vector.broadcast %cst_270 : f32 to vector<8x1xf32>
    %1156 = arith.mulf %1154, %1155 : vector<8x1xf32>
    %1157 = arith.mulf %1151, %532 : vector<8x32xf32>
    %cst_271 = arith.constant dense<0.000000e+00> : vector<8xf32>
    %1158 = vector.multi_reduction <add>, %1157, %cst_271 [1] : vector<8x32xf32> to vector<8xf32>
    %1159 = vector.shape_cast %1158 : vector<8xf32> to vector<8x1xf32>
    %cst_272 = arith.constant 0.176776692 : f32
    %1160 = vector.broadcast %cst_272 : f32 to vector<8x1xf32>
    %1161 = arith.mulf %1159, %1160 : vector<8x1xf32>
    %1162 = arith.mulf %1151, %799 : vector<8x32xf32>
    %cst_273 = arith.constant dense<0.000000e+00> : vector<8xf32>
    %1163 = vector.multi_reduction <add>, %1162, %cst_273 [1] : vector<8x32xf32> to vector<8xf32>
    %1164 = vector.shape_cast %1163 : vector<8xf32> to vector<8x1xf32>
    %cst_274 = arith.constant 0.176776692 : f32
    %1165 = vector.broadcast %cst_274 : f32 to vector<8x1xf32>
    %1166 = arith.mulf %1164, %1165 : vector<8x1xf32>
    %1167 = arith.mulf %1151, %1090 : vector<8x32xf32>
    %cst_275 = arith.constant dense<0.000000e+00> : vector<8xf32>
    %1168 = vector.multi_reduction <add>, %1167, %cst_275 [1] : vector<8x32xf32> to vector<8xf32>
    %1169 = vector.shape_cast %1168 : vector<8xf32> to vector<8x1xf32>
    %cst_276 = arith.constant 0.176776692 : f32
    %1170 = vector.broadcast %cst_276 : f32 to vector<8x1xf32>
    %1171 = arith.mulf %1169, %1170 : vector<8x1xf32>
    %1172 = arith.mulf %1151, %1151 : vector<8x32xf32>
    %cst_277 = arith.constant dense<0.000000e+00> : vector<8xf32>
    %1173 = vector.multi_reduction <add>, %1172, %cst_277 [1] : vector<8x32xf32> to vector<8xf32>
    %1174 = vector.shape_cast %1173 : vector<8xf32> to vector<8x1xf32>
    %cst_278 = arith.constant 0.176776692 : f32
    %1175 = vector.broadcast %cst_278 : f32 to vector<8x1xf32>
    %1176 = arith.mulf %1174, %1175 : vector<8x1xf32>
    %1177 = arith.maximumf %1156, %1161 : vector<8x1xf32>
    %1178 = arith.maximumf %1177, %1166 : vector<8x1xf32>
    %1179 = arith.maximumf %1178, %1171 : vector<8x1xf32>
    %1180 = arith.maximumf %1179, %1176 : vector<8x1xf32>
    %1181 = arith.subf %1156, %1180 : vector<8x1xf32>
    %1182 = math.exp %1181 : vector<8x1xf32>
    %1183 = arith.subf %1161, %1180 : vector<8x1xf32>
    %1184 = math.exp %1183 : vector<8x1xf32>
    %1185 = arith.subf %1166, %1180 : vector<8x1xf32>
    %1186 = math.exp %1185 : vector<8x1xf32>
    %1187 = arith.subf %1171, %1180 : vector<8x1xf32>
    %1188 = math.exp %1187 : vector<8x1xf32>
    %1189 = arith.subf %1176, %1180 : vector<8x1xf32>
    %1190 = math.exp %1189 : vector<8x1xf32>
    %1191 = arith.addf %1182, %1184 : vector<8x1xf32>
    %1192 = arith.addf %1191, %1186 : vector<8x1xf32>
    %1193 = arith.addf %1192, %1188 : vector<8x1xf32>
    %1194 = arith.addf %1193, %1190 : vector<8x1xf32>
    %1195 = tpu.reciprocal %1194 {approx = true} : vector<8x1xf32> -> vector<8x1xf32>
    %1196 = vector.broadcast %1182 : vector<8x1xf32> to vector<8x32xf32>
    %1197 = arith.mulf %1196, %289 : vector<8x32xf32>
    %1198 = vector.broadcast %1184 : vector<8x1xf32> to vector<8x32xf32>
    %1199 = arith.mulf %1198, %532 : vector<8x32xf32>
    %1200 = arith.addf %1197, %1199 : vector<8x32xf32>
    %1201 = vector.broadcast %1186 : vector<8x1xf32> to vector<8x32xf32>
    %1202 = arith.mulf %1201, %799 : vector<8x32xf32>
    %1203 = arith.addf %1200, %1202 : vector<8x32xf32>
    %1204 = vector.broadcast %1188 : vector<8x1xf32> to vector<8x32xf32>
    %1205 = arith.mulf %1204, %1090 : vector<8x32xf32>
    %1206 = arith.addf %1203, %1205 : vector<8x32xf32>
    %1207 = vector.broadcast %1190 : vector<8x1xf32> to vector<8x32xf32>
    %1208 = arith.mulf %1207, %1151 : vector<8x32xf32>
    %1209 = arith.addf %1206, %1208 : vector<8x32xf32>
    %1210 = vector.broadcast %1195 : vector<8x1xf32> to vector<8x32xf32>
    %1211 = arith.mulf %1209, %1210 : vector<8x32xf32>
    %cst_279 = arith.constant dense<0.000000e+00> : vector<8x32xf32>
    %1212 = tpu.matmul %1211, %18, %cst_279 {dimension_numbers = #tpu.dot_dimension_numbers<[1], [0], [0], [1], [0, 0, 1, 1], [], []>} : vector<8x32xf32>, vector<32x32xf32>, vector<8x32xf32> -> vector<8x32xf32>
    %1213 = vector.broadcast %10 : vector<1x32xf32> to vector<8x32xf32>
    %1214 = arith.addf %1212, %1213 : vector<8x32xf32>
    %1215 = arith.addf %1128, %1214 : vector<8x32xf32>
    %cst_280 = arith.constant dense<0.000000e+00> : vector<8xf32>
    %1216 = vector.multi_reduction <add>, %1215, %cst_280 [1] : vector<8x32xf32> to vector<8xf32>
    %1217 = vector.shape_cast %1216 : vector<8xf32> to vector<8x1xf32>
    %cst_281 = arith.constant 3.200000e+01 : f32
    %1218 = vector.broadcast %cst_281 : f32 to vector<8x1xf32>
    %1219 = arith.divf %1217, %1218 : vector<8x1xf32>
    %1220 = vector.broadcast %1219 : vector<8x1xf32> to vector<8x32xf32>
    %1221 = arith.subf %1215, %1220 : vector<8x32xf32>
    %1222 = arith.mulf %1221, %1221 : vector<8x32xf32>
    %cst_282 = arith.constant dense<0.000000e+00> : vector<8xf32>
    %1223 = vector.multi_reduction <add>, %1222, %cst_282 [1] : vector<8x32xf32> to vector<8xf32>
    %1224 = vector.shape_cast %1223 : vector<8xf32> to vector<8x1xf32>
    %cst_283 = arith.constant 3.200000e+01 : f32
    %1225 = vector.broadcast %cst_283 : f32 to vector<8x1xf32>
    %1226 = arith.divf %1224, %1225 : vector<8x1xf32>
    %cst_284 = arith.constant 9.99999974E-6 : f32
    %1227 = vector.broadcast %cst_284 : f32 to vector<8x1xf32>
    %1228 = arith.addf %1226, %1227 : vector<8x1xf32>
    %1229 = math.rsqrt %1228 : vector<8x1xf32>
    %1230 = vector.broadcast %1229 : vector<8x1xf32> to vector<8x32xf32>
    %1231 = arith.mulf %1221, %1230 : vector<8x32xf32>
    %1232 = vector.broadcast %11 : vector<1x32xf32> to vector<8x32xf32>
    %1233 = arith.mulf %1231, %1232 : vector<8x32xf32>
    %1234 = vector.broadcast %12 : vector<1x32xf32> to vector<8x32xf32>
    %1235 = arith.addf %1233, %1234 : vector<8x32xf32>
    %cst_285 = arith.constant dense<0.000000e+00> : vector<8x128xf32>
    %1236 = tpu.matmul %1235, %2, %cst_285 {dimension_numbers = #tpu.dot_dimension_numbers<[1], [0], [0], [1], [0, 0, 1, 1], [], []>} : vector<8x32xf32>, vector<32x128xf32>, vector<8x128xf32> -> vector<8x128xf32>
    %1237 = vector.broadcast %13 : vector<1x128xf32> to vector<8x128xf32>
    %1238 = arith.addf %1236, %1237 : vector<8x128xf32>
    %cst_286 = arith.constant 0.000000e+00 : f32
    %1239 = vector.broadcast %cst_286 : f32 to vector<8x128xf32>
    %1240 = arith.maximumf %1238, %1239 : vector<8x128xf32>
    %cst_287 = arith.constant dense<0.000000e+00> : vector<8x32xf32>
    %1241 = tpu.matmul %1240, %19, %cst_287 {dimension_numbers = #tpu.dot_dimension_numbers<[1], [0], [0], [1], [0, 0, 1, 1], [], []>} : vector<8x128xf32>, vector<128x32xf32>, vector<8x32xf32> -> vector<8x32xf32>
    %1242 = vector.broadcast %14 : vector<1x32xf32> to vector<8x32xf32>
    %1243 = arith.addf %1241, %1242 : vector<8x32xf32>
    %1244 = arith.addf %1215, %1243 : vector<8x32xf32>
    %cst_288 = arith.constant dense<0.000000e+00> : vector<8x32xf32>
    %1245 = tpu.matmul %1244, %21, %cst_288 {dimension_numbers = #tpu.dot_dimension_numbers<[1], [0], [0], [1], [0, 0, 1, 1], [], []>} : vector<8x32xf32>, vector<32x32xf32>, vector<8x32xf32> -> vector<8x32xf32>
    %cst_289 = arith.constant dense<0.000000e+00> : vector<8x32xf32>
    %1246 = tpu.matmul %1126, %22, %cst_289 {dimension_numbers = #tpu.dot_dimension_numbers<[1], [0], [0], [1], [0, 0, 1, 1], [], []>} : vector<8x32xf32>, vector<32x32xf32>, vector<8x32xf32> -> vector<8x32xf32>
    %1247 = arith.addf %1245, %1246 : vector<8x32xf32>
    %1248 = vector.broadcast %5 : vector<1x32xf32> to vector<8x32xf32>
    %1249 = arith.addf %1247, %1248 : vector<8x32xf32>
    %cst_290 = arith.constant dense<0.000000e+00> : vector<8xf32>
    %1250 = vector.multi_reduction <add>, %1249, %cst_290 [1] : vector<8x32xf32> to vector<8xf32>
    %1251 = vector.shape_cast %1250 : vector<8xf32> to vector<8x1xf32>
    %cst_291 = arith.constant 3.200000e+01 : f32
    %1252 = vector.broadcast %cst_291 : f32 to vector<8x1xf32>
    %1253 = arith.divf %1251, %1252 : vector<8x1xf32>
    %1254 = vector.broadcast %1253 : vector<8x1xf32> to vector<8x32xf32>
    %1255 = arith.subf %1249, %1254 : vector<8x32xf32>
    %1256 = arith.mulf %1255, %1255 : vector<8x32xf32>
    %cst_292 = arith.constant dense<0.000000e+00> : vector<8xf32>
    %1257 = vector.multi_reduction <add>, %1256, %cst_292 [1] : vector<8x32xf32> to vector<8xf32>
    %1258 = vector.shape_cast %1257 : vector<8xf32> to vector<8x1xf32>
    %cst_293 = arith.constant 3.200000e+01 : f32
    %1259 = vector.broadcast %cst_293 : f32 to vector<8x1xf32>
    %1260 = arith.divf %1258, %1259 : vector<8x1xf32>
    %cst_294 = arith.constant 9.99999974E-6 : f32
    %1261 = vector.broadcast %cst_294 : f32 to vector<8x1xf32>
    %1262 = arith.addf %1260, %1261 : vector<8x1xf32>
    %1263 = math.rsqrt %1262 : vector<8x1xf32>
    %1264 = vector.broadcast %1263 : vector<8x1xf32> to vector<8x32xf32>
    %1265 = arith.mulf %1255, %1264 : vector<8x32xf32>
    %1266 = vector.broadcast %7 : vector<1x32xf32> to vector<8x32xf32>
    %1267 = arith.mulf %1265, %1266 : vector<8x32xf32>
    %1268 = vector.broadcast %8 : vector<1x32xf32> to vector<8x32xf32>
    %1269 = arith.addf %1267, %1268 : vector<8x32xf32>
    %cst_295 = arith.constant dense<0.000000e+00> : vector<8x32xf32>
    %1270 = tpu.matmul %1269, %17, %cst_295 {dimension_numbers = #tpu.dot_dimension_numbers<[1], [0], [0], [1], [0, 0, 1, 1], [], []>} : vector<8x32xf32>, vector<32x32xf32>, vector<8x32xf32> -> vector<8x32xf32>
    %1271 = vector.broadcast %9 : vector<1x32xf32> to vector<8x32xf32>
    %1272 = arith.addf %1270, %1271 : vector<8x32xf32>
    %1273 = arith.mulf %1272, %289 : vector<8x32xf32>
    %cst_296 = arith.constant dense<0.000000e+00> : vector<8xf32>
    %1274 = vector.multi_reduction <add>, %1273, %cst_296 [1] : vector<8x32xf32> to vector<8xf32>
    %1275 = vector.shape_cast %1274 : vector<8xf32> to vector<8x1xf32>
    %cst_297 = arith.constant 0.176776692 : f32
    %1276 = vector.broadcast %cst_297 : f32 to vector<8x1xf32>
    %1277 = arith.mulf %1275, %1276 : vector<8x1xf32>
    %1278 = arith.mulf %1272, %532 : vector<8x32xf32>
    %cst_298 = arith.constant dense<0.000000e+00> : vector<8xf32>
    %1279 = vector.multi_reduction <add>, %1278, %cst_298 [1] : vector<8x32xf32> to vector<8xf32>
    %1280 = vector.shape_cast %1279 : vector<8xf32> to vector<8x1xf32>
    %cst_299 = arith.constant 0.176776692 : f32
    %1281 = vector.broadcast %cst_299 : f32 to vector<8x1xf32>
    %1282 = arith.mulf %1280, %1281 : vector<8x1xf32>
    %1283 = arith.mulf %1272, %799 : vector<8x32xf32>
    %cst_300 = arith.constant dense<0.000000e+00> : vector<8xf32>
    %1284 = vector.multi_reduction <add>, %1283, %cst_300 [1] : vector<8x32xf32> to vector<8xf32>
    %1285 = vector.shape_cast %1284 : vector<8xf32> to vector<8x1xf32>
    %cst_301 = arith.constant 0.176776692 : f32
    %1286 = vector.broadcast %cst_301 : f32 to vector<8x1xf32>
    %1287 = arith.mulf %1285, %1286 : vector<8x1xf32>
    %1288 = arith.mulf %1272, %1090 : vector<8x32xf32>
    %cst_302 = arith.constant dense<0.000000e+00> : vector<8xf32>
    %1289 = vector.multi_reduction <add>, %1288, %cst_302 [1] : vector<8x32xf32> to vector<8xf32>
    %1290 = vector.shape_cast %1289 : vector<8xf32> to vector<8x1xf32>
    %cst_303 = arith.constant 0.176776692 : f32
    %1291 = vector.broadcast %cst_303 : f32 to vector<8x1xf32>
    %1292 = arith.mulf %1290, %1291 : vector<8x1xf32>
    %1293 = arith.mulf %1272, %1272 : vector<8x32xf32>
    %cst_304 = arith.constant dense<0.000000e+00> : vector<8xf32>
    %1294 = vector.multi_reduction <add>, %1293, %cst_304 [1] : vector<8x32xf32> to vector<8xf32>
    %1295 = vector.shape_cast %1294 : vector<8xf32> to vector<8x1xf32>
    %cst_305 = arith.constant 0.176776692 : f32
    %1296 = vector.broadcast %cst_305 : f32 to vector<8x1xf32>
    %1297 = arith.mulf %1295, %1296 : vector<8x1xf32>
    %1298 = arith.maximumf %1277, %1282 : vector<8x1xf32>
    %1299 = arith.maximumf %1298, %1287 : vector<8x1xf32>
    %1300 = arith.maximumf %1299, %1292 : vector<8x1xf32>
    %1301 = arith.maximumf %1300, %1297 : vector<8x1xf32>
    %1302 = arith.subf %1277, %1301 : vector<8x1xf32>
    %1303 = math.exp %1302 : vector<8x1xf32>
    %1304 = arith.subf %1282, %1301 : vector<8x1xf32>
    %1305 = math.exp %1304 : vector<8x1xf32>
    %1306 = arith.subf %1287, %1301 : vector<8x1xf32>
    %1307 = math.exp %1306 : vector<8x1xf32>
    %1308 = arith.subf %1292, %1301 : vector<8x1xf32>
    %1309 = math.exp %1308 : vector<8x1xf32>
    %1310 = arith.subf %1297, %1301 : vector<8x1xf32>
    %1311 = math.exp %1310 : vector<8x1xf32>
    %1312 = arith.addf %1303, %1305 : vector<8x1xf32>
    %1313 = arith.addf %1312, %1307 : vector<8x1xf32>
    %1314 = arith.addf %1313, %1309 : vector<8x1xf32>
    %1315 = arith.addf %1314, %1311 : vector<8x1xf32>
    %1316 = tpu.reciprocal %1315 {approx = true} : vector<8x1xf32> -> vector<8x1xf32>
    %1317 = vector.broadcast %1303 : vector<8x1xf32> to vector<8x32xf32>
    %1318 = arith.mulf %1317, %289 : vector<8x32xf32>
    %1319 = vector.broadcast %1305 : vector<8x1xf32> to vector<8x32xf32>
    %1320 = arith.mulf %1319, %532 : vector<8x32xf32>
    %1321 = arith.addf %1318, %1320 : vector<8x32xf32>
    %1322 = vector.broadcast %1307 : vector<8x1xf32> to vector<8x32xf32>
    %1323 = arith.mulf %1322, %799 : vector<8x32xf32>
    %1324 = arith.addf %1321, %1323 : vector<8x32xf32>
    %1325 = vector.broadcast %1309 : vector<8x1xf32> to vector<8x32xf32>
    %1326 = arith.mulf %1325, %1090 : vector<8x32xf32>
    %1327 = arith.addf %1324, %1326 : vector<8x32xf32>
    %1328 = vector.broadcast %1311 : vector<8x1xf32> to vector<8x32xf32>
    %1329 = arith.mulf %1328, %1272 : vector<8x32xf32>
    %1330 = arith.addf %1327, %1329 : vector<8x32xf32>
    %1331 = vector.broadcast %1316 : vector<8x1xf32> to vector<8x32xf32>
    %1332 = arith.mulf %1330, %1331 : vector<8x32xf32>
    %cst_306 = arith.constant dense<0.000000e+00> : vector<8x32xf32>
    %1333 = tpu.matmul %1332, %18, %cst_306 {dimension_numbers = #tpu.dot_dimension_numbers<[1], [0], [0], [1], [0, 0, 1, 1], [], []>} : vector<8x32xf32>, vector<32x32xf32>, vector<8x32xf32> -> vector<8x32xf32>
    %1334 = vector.broadcast %10 : vector<1x32xf32> to vector<8x32xf32>
    %1335 = arith.addf %1333, %1334 : vector<8x32xf32>
    %1336 = arith.addf %1249, %1335 : vector<8x32xf32>
    %cst_307 = arith.constant dense<0.000000e+00> : vector<8xf32>
    %1337 = vector.multi_reduction <add>, %1336, %cst_307 [1] : vector<8x32xf32> to vector<8xf32>
    %1338 = vector.shape_cast %1337 : vector<8xf32> to vector<8x1xf32>
    %cst_308 = arith.constant 3.200000e+01 : f32
    %1339 = vector.broadcast %cst_308 : f32 to vector<8x1xf32>
    %1340 = arith.divf %1338, %1339 : vector<8x1xf32>
    %1341 = vector.broadcast %1340 : vector<8x1xf32> to vector<8x32xf32>
    %1342 = arith.subf %1336, %1341 : vector<8x32xf32>
    %1343 = arith.mulf %1342, %1342 : vector<8x32xf32>
    %cst_309 = arith.constant dense<0.000000e+00> : vector<8xf32>
    %1344 = vector.multi_reduction <add>, %1343, %cst_309 [1] : vector<8x32xf32> to vector<8xf32>
    %1345 = vector.shape_cast %1344 : vector<8xf32> to vector<8x1xf32>
    %cst_310 = arith.constant 3.200000e+01 : f32
    %1346 = vector.broadcast %cst_310 : f32 to vector<8x1xf32>
    %1347 = arith.divf %1345, %1346 : vector<8x1xf32>
    %cst_311 = arith.constant 9.99999974E-6 : f32
    %1348 = vector.broadcast %cst_311 : f32 to vector<8x1xf32>
    %1349 = arith.addf %1347, %1348 : vector<8x1xf32>
    %1350 = math.rsqrt %1349 : vector<8x1xf32>
    %1351 = vector.broadcast %1350 : vector<8x1xf32> to vector<8x32xf32>
    %1352 = arith.mulf %1342, %1351 : vector<8x32xf32>
    %1353 = vector.broadcast %11 : vector<1x32xf32> to vector<8x32xf32>
    %1354 = arith.mulf %1352, %1353 : vector<8x32xf32>
    %1355 = vector.broadcast %12 : vector<1x32xf32> to vector<8x32xf32>
    %1356 = arith.addf %1354, %1355 : vector<8x32xf32>
    %cst_312 = arith.constant dense<0.000000e+00> : vector<8x128xf32>
    %1357 = tpu.matmul %1356, %2, %cst_312 {dimension_numbers = #tpu.dot_dimension_numbers<[1], [0], [0], [1], [0, 0, 1, 1], [], []>} : vector<8x32xf32>, vector<32x128xf32>, vector<8x128xf32> -> vector<8x128xf32>
    %1358 = vector.broadcast %13 : vector<1x128xf32> to vector<8x128xf32>
    %1359 = arith.addf %1357, %1358 : vector<8x128xf32>
    %cst_313 = arith.constant 0.000000e+00 : f32
    %1360 = vector.broadcast %cst_313 : f32 to vector<8x128xf32>
    %1361 = arith.maximumf %1359, %1360 : vector<8x128xf32>
    %cst_314 = arith.constant dense<0.000000e+00> : vector<8x32xf32>
    %1362 = tpu.matmul %1361, %19, %cst_314 {dimension_numbers = #tpu.dot_dimension_numbers<[1], [0], [0], [1], [0, 0, 1, 1], [], []>} : vector<8x128xf32>, vector<128x32xf32>, vector<8x32xf32> -> vector<8x32xf32>
    %1363 = vector.broadcast %14 : vector<1x32xf32> to vector<8x32xf32>
    %1364 = arith.addf %1362, %1363 : vector<8x32xf32>
    %1365 = arith.addf %1336, %1364 : vector<8x32xf32>
    %cst_315 = arith.constant dense<0.000000e+00> : vector<8x2xf32>
    %1366 = tpu.matmul %1365, %24, %cst_315 {dimension_numbers = #tpu.dot_dimension_numbers<[1], [0], [0], [1], [0, 0, 1, 1], [], []>} : vector<8x32xf32>, vector<32x2xf32>, vector<8x2xf32> -> vector<8x2xf32>
    %1367 = vector.broadcast %70 : vector<1x2xf32> to vector<8x2xf32>
    %1368 = arith.addf %1366, %1367 : vector<8x2xf32>
    %cst_316 = arith.constant 5.000000e-01 : f32
    %1369 = vector.broadcast %cst_316 : f32 to vector<8x1xf32>
    %1370 = arith.cmpf ogt, %1092, %1369 : vector<8x1xf32>
    %cst_317 = arith.constant 0.000000e+00 : f32
    %1371 = vector.shape_cast %1370 : vector<8x1xi1> to vector<8x1xi1>
    %1372 = vector.broadcast %1371 : vector<8x1xi1> to vector<8x2xi1>
    %1373 = vector.broadcast %cst_317 : f32 to vector<8x2xf32>
    %1374 = arith.select %1372, %1368, %1373 : vector<8x2xi1>, vector<8x2xf32>
    %1375 = vector.shape_cast %1374 : vector<8x2xf32> to vector<1x8x2xf32>
    %c4 = arith.constant 4 : index
    %c0_318 = arith.constant 0 : index
    %c0_319 = arith.constant 0 : index
    %1376 = vector.load %arg6[%c4, %c0_318, %c0_319] : memref<8x8x2xf32, #tpu.memory_space<vmem>>, vector<1x8x2xf32>
    tpu.vector_store %arg6[%c4, %c0_318, %c0_319], %1375 {strides = array<i32>} : memref<8x8x2xf32, #tpu.memory_space<vmem>>, vector<1x8x2xf32>,
    %cst_320 = arith.constant 5.000000e-01 : f32
    %1377 = vector.broadcast %cst_320 : f32 to vector<8x1xf32>
    %1378 = arith.cmpf ogt, %1092, %1377 : vector<8x1xf32>
    %cst_321 = arith.constant 0.000000e+00 : f32
    %1379 = vector.shape_cast %1378 : vector<8x1xi1> to vector<8x1xi1>
    %1380 = vector.broadcast %1379 : vector<8x1xi1> to vector<8x32xi1>
    %1381 = vector.broadcast %cst_321 : f32 to vector<8x32xf32>
    %1382 = arith.select %1380, %1365, %1381 : vector<8x32xi1>, vector<8x32xf32>
    %cst_322 = arith.constant dense<0.000000e+00> : vector<8xf32>
    %1383 = vector.multi_reduction <add>, %1382, %cst_322 [1] : vector<8x32xf32> to vector<8xf32>
    %1384 = vector.shape_cast %1383 : vector<8xf32> to vector<8x1xf32>
    %cst_323 = arith.constant 3.200000e+01 : f32
    %1385 = vector.broadcast %cst_323 : f32 to vector<8x1xf32>
    %1386 = arith.divf %1384, %1385 : vector<8x1xf32>
    %1387 = vector.broadcast %1386 : vector<8x1xf32> to vector<8x32xf32>
    %1388 = arith.subf %1382, %1387 : vector<8x32xf32>
    %1389 = arith.mulf %1388, %1388 : vector<8x32xf32>
    %cst_324 = arith.constant dense<0.000000e+00> : vector<8xf32>
    %1390 = vector.multi_reduction <add>, %1389, %cst_324 [1] : vector<8x32xf32> to vector<8xf32>
    %1391 = vector.shape_cast %1390 : vector<8xf32> to vector<8x1xf32>
    %cst_325 = arith.constant 3.200000e+01 : f32
    %1392 = vector.broadcast %cst_325 : f32 to vector<8x1xf32>
    %1393 = arith.divf %1391, %1392 : vector<8x1xf32>
    %cst_326 = arith.constant 9.99999974E-6 : f32
    %1394 = vector.broadcast %cst_326 : f32 to vector<8x1xf32>
    %1395 = arith.addf %1393, %1394 : vector<8x1xf32>
    %1396 = math.rsqrt %1395 : vector<8x1xf32>
    %1397 = vector.broadcast %1396 : vector<8x1xf32> to vector<8x32xf32>
    %1398 = arith.mulf %1388, %1397 : vector<8x32xf32>
    %1399 = vector.broadcast %7 : vector<1x32xf32> to vector<8x32xf32>
    %1400 = arith.mulf %1398, %1399 : vector<8x32xf32>
    %1401 = vector.broadcast %8 : vector<1x32xf32> to vector<8x32xf32>
    %1402 = arith.addf %1400, %1401 : vector<8x32xf32>
    %cst_327 = arith.constant dense<0.000000e+00> : vector<8x32xf32>
    %1403 = tpu.matmul %1402, %17, %cst_327 {dimension_numbers = #tpu.dot_dimension_numbers<[1], [0], [0], [1], [0, 0, 1, 1], [], []>} : vector<8x32xf32>, vector<32x32xf32>, vector<8x32xf32> -> vector<8x32xf32>
    %1404 = vector.broadcast %9 : vector<1x32xf32> to vector<8x32xf32>
    %1405 = arith.addf %1403, %1404 : vector<8x32xf32>
    %1406 = vector.extract_strided_slice %33 {offsets = [0, 5], sizes = [8, 1], strides = [1, 1]} : vector<8x8xf32> to vector<8x1xf32>
    %1407 = arith.mulf %1092, %1406 : vector<8x1xf32>
    %1408 = vector.extract_strided_slice %26 {offsets = [5, 0, 0], sizes = [1, 8, 2], strides = [1, 1, 1]} : vector<8x8x2xf32> to vector<1x8x2xf32>
    %1409 = vector.shape_cast %1408 : vector<1x8x2xf32> to vector<8x2xf32>
    %1410 = arith.addf %1095, %1409 : vector<8x2xf32>
    %1411 = vector.broadcast %1407 : vector<8x1xf32> to vector<8x2xf32>
    %1412 = arith.mulf %1410, %1411 : vector<8x2xf32>
    %cst_328 = arith.constant dense<0.000000e+00> : vector<2xf32>
    %1413 = vector.multi_reduction <add>, %1412, %cst_328 [0] : vector<8x2xf32> to vector<2xf32>
    %1414 = vector.shape_cast %1413 : vector<2xf32> to vector<1x2xf32>
    %1415 = vector.shape_cast %1407 : vector<8x1xf32> to vector<1x8x1xf32>
    %cst_329 = arith.constant dense<0.000000e+00> : vector<1xf32>
    %1416 = vector.multi_reduction <add>, %1415, %cst_329 [1, 2] : vector<1x8x1xf32> to vector<1xf32>
    %1417 = vector.shape_cast %1416 : vector<1xf32> to vector<1x1x1xf32>
    %1418 = vector.extract %1417[0, 0, 0] : f32 from vector<1x1x1xf32>
    %1419 = vector.broadcast %1418 : f32 to vector<1x1xf32>
    %cst_330 = arith.constant 6.000000e+00 : f32
    %1420 = vector.broadcast %cst_330 : f32 to vector<1x1xf32>
    %1421 = arith.mulf %1420, %1419 : vector<1x1xf32>
    %cst_331 = arith.constant 9.99999997E-7 : f32
    %1422 = vector.broadcast %cst_331 : f32 to vector<1x1xf32>
    %1423 = arith.maximumf %1421, %1422 : vector<1x1xf32>
    %1424 = tpu.reciprocal %1423 {approx = true} : vector<1x1xf32> -> vector<1x1xf32>
    %1425 = vector.broadcast %1424 : vector<1x1xf32> to vector<1x2xf32>
    %1426 = arith.mulf %1414, %1425 : vector<1x2xf32>
    %1427 = vector.extract_strided_slice %1426 {offsets = [0, 0], sizes = [1, 1], strides = [1, 1]} : vector<1x2xf32> to vector<1x1xf32>
    %1428 = vector.extract_strided_slice %16 {offsets = [0, 0], sizes = [1, 32], strides = [1, 1]} : vector<2x32xf32> to vector<1x32xf32>
    %1429 = vector.broadcast %1427 : vector<1x1xf32> to vector<1x32xf32>
    %1430 = arith.mulf %1429, %1428 : vector<1x32xf32>
    %1431 = vector.extract_strided_slice %1426 {offsets = [0, 1], sizes = [1, 1], strides = [1, 1]} : vector<1x2xf32> to vector<1x1xf32>
    %1432 = vector.extract_strided_slice %16 {offsets = [1, 0], sizes = [1, 32], strides = [1, 1]} : vector<2x32xf32> to vector<1x32xf32>
    %1433 = vector.broadcast %1431 : vector<1x1xf32> to vector<1x32xf32>
    %1434 = arith.mulf %1433, %1432 : vector<1x32xf32>
    %1435 = arith.addf %1430, %1434 : vector<1x32xf32>
    %1436 = vector.extract_strided_slice %68 {offsets = [5, 0, 0], sizes = [1, 8, 32], strides = [1, 1, 1]} : vector<8x8x32xf32> to vector<1x8x32xf32>
    %1437 = vector.shape_cast %1436 : vector<1x8x32xf32> to vector<8x32xf32>
    %1438 = vector.broadcast %1435 : vector<1x32xf32> to vector<8x32xf32>
    %1439 = arith.subf %1437, %1438 : vector<8x32xf32>
    %cst_332 = arith.constant 0.000000e+00 : f32
    %1440 = vector.broadcast %cst_332 : f32 to vector<8x32xf32>
    %1441 = arith.maximumf %1439, %1440 : vector<8x32xf32>
    %1442 = vector.extract_strided_slice %52 {offsets = [5, 0, 0], sizes = [1, 8, 32], strides = [1, 1, 1]} : vector<8x8x32xf32> to vector<1x8x32xf32>
    %1443 = vector.shape_cast %1442 : vector<1x8x32xf32> to vector<8x32xf32>
    %cst_333 = arith.constant dense<0.000000e+00> : vector<8xf32>
    %1444 = vector.multi_reduction <add>, %1443, %cst_333 [1] : vector<8x32xf32> to vector<8xf32>
    %1445 = vector.shape_cast %1444 : vector<8xf32> to vector<8x1xf32>
    %cst_334 = arith.constant 3.200000e+01 : f32
    %1446 = vector.broadcast %cst_334 : f32 to vector<8x1xf32>
    %1447 = arith.divf %1445, %1446 : vector<8x1xf32>
    %1448 = vector.broadcast %1447 : vector<8x1xf32> to vector<8x32xf32>
    %1449 = arith.subf %1443, %1448 : vector<8x32xf32>
    %1450 = arith.mulf %1449, %1449 : vector<8x32xf32>
    %cst_335 = arith.constant dense<0.000000e+00> : vector<8xf32>
    %1451 = vector.multi_reduction <add>, %1450, %cst_335 [1] : vector<8x32xf32> to vector<8xf32>
    %1452 = vector.shape_cast %1451 : vector<8xf32> to vector<8x1xf32>
    %cst_336 = arith.constant 3.200000e+01 : f32
    %1453 = vector.broadcast %cst_336 : f32 to vector<8x1xf32>
    %1454 = arith.divf %1452, %1453 : vector<8x1xf32>
    %cst_337 = arith.constant 9.99999974E-6 : f32
    %1455 = vector.broadcast %cst_337 : f32 to vector<8x1xf32>
    %1456 = arith.addf %1454, %1455 : vector<8x1xf32>
    %1457 = math.rsqrt %1456 : vector<8x1xf32>
    %1458 = vector.broadcast %1457 : vector<8x1xf32> to vector<8x32xf32>
    %1459 = arith.mulf %1449, %1458 : vector<8x32xf32>
    %1460 = vector.broadcast %7 : vector<1x32xf32> to vector<8x32xf32>
    %1461 = arith.mulf %1459, %1460 : vector<8x32xf32>
    %1462 = vector.broadcast %8 : vector<1x32xf32> to vector<8x32xf32>
    %1463 = arith.addf %1461, %1462 : vector<8x32xf32>
    %cst_338 = arith.constant dense<0.000000e+00> : vector<8x32xf32>
    %1464 = tpu.matmul %1463, %17, %cst_338 {dimension_numbers = #tpu.dot_dimension_numbers<[1], [0], [0], [1], [0, 0, 1, 1], [], []>} : vector<8x32xf32>, vector<32x32xf32>, vector<8x32xf32> -> vector<8x32xf32>
    %1465 = vector.broadcast %9 : vector<1x32xf32> to vector<8x32xf32>
    %1466 = arith.addf %1464, %1465 : vector<8x32xf32>
    %1467 = arith.mulf %1466, %289 : vector<8x32xf32>
    %cst_339 = arith.constant dense<0.000000e+00> : vector<8xf32>
    %1468 = vector.multi_reduction <add>, %1467, %cst_339 [1] : vector<8x32xf32> to vector<8xf32>
    %1469 = vector.shape_cast %1468 : vector<8xf32> to vector<8x1xf32>
    %cst_340 = arith.constant 0.176776692 : f32
    %1470 = vector.broadcast %cst_340 : f32 to vector<8x1xf32>
    %1471 = arith.mulf %1469, %1470 : vector<8x1xf32>
    %1472 = arith.mulf %1466, %532 : vector<8x32xf32>
    %cst_341 = arith.constant dense<0.000000e+00> : vector<8xf32>
    %1473 = vector.multi_reduction <add>, %1472, %cst_341 [1] : vector<8x32xf32> to vector<8xf32>
    %1474 = vector.shape_cast %1473 : vector<8xf32> to vector<8x1xf32>
    %cst_342 = arith.constant 0.176776692 : f32
    %1475 = vector.broadcast %cst_342 : f32 to vector<8x1xf32>
    %1476 = arith.mulf %1474, %1475 : vector<8x1xf32>
    %1477 = arith.mulf %1466, %799 : vector<8x32xf32>
    %cst_343 = arith.constant dense<0.000000e+00> : vector<8xf32>
    %1478 = vector.multi_reduction <add>, %1477, %cst_343 [1] : vector<8x32xf32> to vector<8xf32>
    %1479 = vector.shape_cast %1478 : vector<8xf32> to vector<8x1xf32>
    %cst_344 = arith.constant 0.176776692 : f32
    %1480 = vector.broadcast %cst_344 : f32 to vector<8x1xf32>
    %1481 = arith.mulf %1479, %1480 : vector<8x1xf32>
    %1482 = arith.mulf %1466, %1090 : vector<8x32xf32>
    %cst_345 = arith.constant dense<0.000000e+00> : vector<8xf32>
    %1483 = vector.multi_reduction <add>, %1482, %cst_345 [1] : vector<8x32xf32> to vector<8xf32>
    %1484 = vector.shape_cast %1483 : vector<8xf32> to vector<8x1xf32>
    %cst_346 = arith.constant 0.176776692 : f32
    %1485 = vector.broadcast %cst_346 : f32 to vector<8x1xf32>
    %1486 = arith.mulf %1484, %1485 : vector<8x1xf32>
    %1487 = arith.mulf %1466, %1405 : vector<8x32xf32>
    %cst_347 = arith.constant dense<0.000000e+00> : vector<8xf32>
    %1488 = vector.multi_reduction <add>, %1487, %cst_347 [1] : vector<8x32xf32> to vector<8xf32>
    %1489 = vector.shape_cast %1488 : vector<8xf32> to vector<8x1xf32>
    %cst_348 = arith.constant 0.176776692 : f32
    %1490 = vector.broadcast %cst_348 : f32 to vector<8x1xf32>
    %1491 = arith.mulf %1489, %1490 : vector<8x1xf32>
    %1492 = arith.mulf %1466, %1466 : vector<8x32xf32>
    %cst_349 = arith.constant dense<0.000000e+00> : vector<8xf32>
    %1493 = vector.multi_reduction <add>, %1492, %cst_349 [1] : vector<8x32xf32> to vector<8xf32>
    %1494 = vector.shape_cast %1493 : vector<8xf32> to vector<8x1xf32>
    %cst_350 = arith.constant 0.176776692 : f32
    %1495 = vector.broadcast %cst_350 : f32 to vector<8x1xf32>
    %1496 = arith.mulf %1494, %1495 : vector<8x1xf32>
    %1497 = arith.maximumf %1471, %1476 : vector<8x1xf32>
    %1498 = arith.maximumf %1497, %1481 : vector<8x1xf32>
    %1499 = arith.maximumf %1498, %1486 : vector<8x1xf32>
    %1500 = arith.maximumf %1499, %1491 : vector<8x1xf32>
    %1501 = arith.maximumf %1500, %1496 : vector<8x1xf32>
    %1502 = arith.subf %1471, %1501 : vector<8x1xf32>
    %1503 = math.exp %1502 : vector<8x1xf32>
    %1504 = arith.subf %1476, %1501 : vector<8x1xf32>
    %1505 = math.exp %1504 : vector<8x1xf32>
    %1506 = arith.subf %1481, %1501 : vector<8x1xf32>
    %1507 = math.exp %1506 : vector<8x1xf32>
    %1508 = arith.subf %1486, %1501 : vector<8x1xf32>
    %1509 = math.exp %1508 : vector<8x1xf32>
    %1510 = arith.subf %1491, %1501 : vector<8x1xf32>
    %1511 = math.exp %1510 : vector<8x1xf32>
    %1512 = arith.subf %1496, %1501 : vector<8x1xf32>
    %1513 = math.exp %1512 : vector<8x1xf32>
    %1514 = arith.addf %1503, %1505 : vector<8x1xf32>
    %1515 = arith.addf %1514, %1507 : vector<8x1xf32>
    %1516 = arith.addf %1515, %1509 : vector<8x1xf32>
    %1517 = arith.addf %1516, %1511 : vector<8x1xf32>
    %1518 = arith.addf %1517, %1513 : vector<8x1xf32>
    %1519 = tpu.reciprocal %1518 {approx = true} : vector<8x1xf32> -> vector<8x1xf32>
    %1520 = vector.broadcast %1503 : vector<8x1xf32> to vector<8x32xf32>
    %1521 = arith.mulf %1520, %289 : vector<8x32xf32>
    %1522 = vector.broadcast %1505 : vector<8x1xf32> to vector<8x32xf32>
    %1523 = arith.mulf %1522, %532 : vector<8x32xf32>
    %1524 = arith.addf %1521, %1523 : vector<8x32xf32>
    %1525 = vector.broadcast %1507 : vector<8x1xf32> to vector<8x32xf32>
    %1526 = arith.mulf %1525, %799 : vector<8x32xf32>
    %1527 = arith.addf %1524, %1526 : vector<8x32xf32>
    %1528 = vector.broadcast %1509 : vector<8x1xf32> to vector<8x32xf32>
    %1529 = arith.mulf %1528, %1090 : vector<8x32xf32>
    %1530 = arith.addf %1527, %1529 : vector<8x32xf32>
    %1531 = vector.broadcast %1511 : vector<8x1xf32> to vector<8x32xf32>
    %1532 = arith.mulf %1531, %1405 : vector<8x32xf32>
    %1533 = arith.addf %1530, %1532 : vector<8x32xf32>
    %1534 = vector.broadcast %1513 : vector<8x1xf32> to vector<8x32xf32>
    %1535 = arith.mulf %1534, %1466 : vector<8x32xf32>
    %1536 = arith.addf %1533, %1535 : vector<8x32xf32>
    %1537 = vector.broadcast %1519 : vector<8x1xf32> to vector<8x32xf32>
    %1538 = arith.mulf %1536, %1537 : vector<8x32xf32>
    %cst_351 = arith.constant dense<0.000000e+00> : vector<8x32xf32>
    %1539 = tpu.matmul %1538, %18, %cst_351 {dimension_numbers = #tpu.dot_dimension_numbers<[1], [0], [0], [1], [0, 0, 1, 1], [], []>} : vector<8x32xf32>, vector<32x32xf32>, vector<8x32xf32> -> vector<8x32xf32>
    %1540 = vector.broadcast %10 : vector<1x32xf32> to vector<8x32xf32>
    %1541 = arith.addf %1539, %1540 : vector<8x32xf32>
    %1542 = arith.addf %1443, %1541 : vector<8x32xf32>
    %cst_352 = arith.constant dense<0.000000e+00> : vector<8xf32>
    %1543 = vector.multi_reduction <add>, %1542, %cst_352 [1] : vector<8x32xf32> to vector<8xf32>
    %1544 = vector.shape_cast %1543 : vector<8xf32> to vector<8x1xf32>
    %cst_353 = arith.constant 3.200000e+01 : f32
    %1545 = vector.broadcast %cst_353 : f32 to vector<8x1xf32>
    %1546 = arith.divf %1544, %1545 : vector<8x1xf32>
    %1547 = vector.broadcast %1546 : vector<8x1xf32> to vector<8x32xf32>
    %1548 = arith.subf %1542, %1547 : vector<8x32xf32>
    %1549 = arith.mulf %1548, %1548 : vector<8x32xf32>
    %cst_354 = arith.constant dense<0.000000e+00> : vector<8xf32>
    %1550 = vector.multi_reduction <add>, %1549, %cst_354 [1] : vector<8x32xf32> to vector<8xf32>
    %1551 = vector.shape_cast %1550 : vector<8xf32> to vector<8x1xf32>
    %cst_355 = arith.constant 3.200000e+01 : f32
    %1552 = vector.broadcast %cst_355 : f32 to vector<8x1xf32>
    %1553 = arith.divf %1551, %1552 : vector<8x1xf32>
    %cst_356 = arith.constant 9.99999974E-6 : f32
    %1554 = vector.broadcast %cst_356 : f32 to vector<8x1xf32>
    %1555 = arith.addf %1553, %1554 : vector<8x1xf32>
    %1556 = math.rsqrt %1555 : vector<8x1xf32>
    %1557 = vector.broadcast %1556 : vector<8x1xf32> to vector<8x32xf32>
    %1558 = arith.mulf %1548, %1557 : vector<8x32xf32>
    %1559 = vector.broadcast %11 : vector<1x32xf32> to vector<8x32xf32>
    %1560 = arith.mulf %1558, %1559 : vector<8x32xf32>
    %1561 = vector.broadcast %12 : vector<1x32xf32> to vector<8x32xf32>
    %1562 = arith.addf %1560, %1561 : vector<8x32xf32>
    %cst_357 = arith.constant dense<0.000000e+00> : vector<8x128xf32>
    %1563 = tpu.matmul %1562, %2, %cst_357 {dimension_numbers = #tpu.dot_dimension_numbers<[1], [0], [0], [1], [0, 0, 1, 1], [], []>} : vector<8x32xf32>, vector<32x128xf32>, vector<8x128xf32> -> vector<8x128xf32>
    %1564 = vector.broadcast %13 : vector<1x128xf32> to vector<8x128xf32>
    %1565 = arith.addf %1563, %1564 : vector<8x128xf32>
    %cst_358 = arith.constant 0.000000e+00 : f32
    %1566 = vector.broadcast %cst_358 : f32 to vector<8x128xf32>
    %1567 = arith.maximumf %1565, %1566 : vector<8x128xf32>
    %cst_359 = arith.constant dense<0.000000e+00> : vector<8x32xf32>
    %1568 = tpu.matmul %1567, %19, %cst_359 {dimension_numbers = #tpu.dot_dimension_numbers<[1], [0], [0], [1], [0, 0, 1, 1], [], []>} : vector<8x128xf32>, vector<128x32xf32>, vector<8x32xf32> -> vector<8x32xf32>
    %1569 = vector.broadcast %14 : vector<1x32xf32> to vector<8x32xf32>
    %1570 = arith.addf %1568, %1569 : vector<8x32xf32>
    %1571 = arith.addf %1542, %1570 : vector<8x32xf32>
    %cst_360 = arith.constant dense<0.000000e+00> : vector<8x32xf32>
    %1572 = tpu.matmul %1571, %21, %cst_360 {dimension_numbers = #tpu.dot_dimension_numbers<[1], [0], [0], [1], [0, 0, 1, 1], [], []>} : vector<8x32xf32>, vector<32x32xf32>, vector<8x32xf32> -> vector<8x32xf32>
    %cst_361 = arith.constant dense<0.000000e+00> : vector<8x32xf32>
    %1573 = tpu.matmul %1441, %22, %cst_361 {dimension_numbers = #tpu.dot_dimension_numbers<[1], [0], [0], [1], [0, 0, 1, 1], [], []>} : vector<8x32xf32>, vector<32x32xf32>, vector<8x32xf32> -> vector<8x32xf32>
    %1574 = arith.addf %1572, %1573 : vector<8x32xf32>
    %1575 = vector.broadcast %5 : vector<1x32xf32> to vector<8x32xf32>
    %1576 = arith.addf %1574, %1575 : vector<8x32xf32>
    %cst_362 = arith.constant dense<0.000000e+00> : vector<8xf32>
    %1577 = vector.multi_reduction <add>, %1576, %cst_362 [1] : vector<8x32xf32> to vector<8xf32>
    %1578 = vector.shape_cast %1577 : vector<8xf32> to vector<8x1xf32>
    %cst_363 = arith.constant 3.200000e+01 : f32
    %1579 = vector.broadcast %cst_363 : f32 to vector<8x1xf32>
    %1580 = arith.divf %1578, %1579 : vector<8x1xf32>
    %1581 = vector.broadcast %1580 : vector<8x1xf32> to vector<8x32xf32>
    %1582 = arith.subf %1576, %1581 : vector<8x32xf32>
    %1583 = arith.mulf %1582, %1582 : vector<8x32xf32>
    %cst_364 = arith.constant dense<0.000000e+00> : vector<8xf32>
    %1584 = vector.multi_reduction <add>, %1583, %cst_364 [1] : vector<8x32xf32> to vector<8xf32>
    %1585 = vector.shape_cast %1584 : vector<8xf32> to vector<8x1xf32>
    %cst_365 = arith.constant 3.200000e+01 : f32
    %1586 = vector.broadcast %cst_365 : f32 to vector<8x1xf32>
    %1587 = arith.divf %1585, %1586 : vector<8x1xf32>
    %cst_366 = arith.constant 9.99999974E-6 : f32
    %1588 = vector.broadcast %cst_366 : f32 to vector<8x1xf32>
    %1589 = arith.addf %1587, %1588 : vector<8x1xf32>
    %1590 = math.rsqrt %1589 : vector<8x1xf32>
    %1591 = vector.broadcast %1590 : vector<8x1xf32> to vector<8x32xf32>
    %1592 = arith.mulf %1582, %1591 : vector<8x32xf32>
    %1593 = vector.broadcast %7 : vector<1x32xf32> to vector<8x32xf32>
    %1594 = arith.mulf %1592, %1593 : vector<8x32xf32>
    %1595 = vector.broadcast %8 : vector<1x32xf32> to vector<8x32xf32>
    %1596 = arith.addf %1594, %1595 : vector<8x32xf32>
    %cst_367 = arith.constant dense<0.000000e+00> : vector<8x32xf32>
    %1597 = tpu.matmul %1596, %17, %cst_367 {dimension_numbers = #tpu.dot_dimension_numbers<[1], [0], [0], [1], [0, 0, 1, 1], [], []>} : vector<8x32xf32>, vector<32x32xf32>, vector<8x32xf32> -> vector<8x32xf32>
    %1598 = vector.broadcast %9 : vector<1x32xf32> to vector<8x32xf32>
    %1599 = arith.addf %1597, %1598 : vector<8x32xf32>
    %1600 = arith.mulf %1599, %289 : vector<8x32xf32>
    %cst_368 = arith.constant dense<0.000000e+00> : vector<8xf32>
    %1601 = vector.multi_reduction <add>, %1600, %cst_368 [1] : vector<8x32xf32> to vector<8xf32>
    %1602 = vector.shape_cast %1601 : vector<8xf32> to vector<8x1xf32>
    %cst_369 = arith.constant 0.176776692 : f32
    %1603 = vector.broadcast %cst_369 : f32 to vector<8x1xf32>
    %1604 = arith.mulf %1602, %1603 : vector<8x1xf32>
    %1605 = arith.mulf %1599, %532 : vector<8x32xf32>
    %cst_370 = arith.constant dense<0.000000e+00> : vector<8xf32>
    %1606 = vector.multi_reduction <add>, %1605, %cst_370 [1] : vector<8x32xf32> to vector<8xf32>
    %1607 = vector.shape_cast %1606 : vector<8xf32> to vector<8x1xf32>
    %cst_371 = arith.constant 0.176776692 : f32
    %1608 = vector.broadcast %cst_371 : f32 to vector<8x1xf32>
    %1609 = arith.mulf %1607, %1608 : vector<8x1xf32>
    %1610 = arith.mulf %1599, %799 : vector<8x32xf32>
    %cst_372 = arith.constant dense<0.000000e+00> : vector<8xf32>
    %1611 = vector.multi_reduction <add>, %1610, %cst_372 [1] : vector<8x32xf32> to vector<8xf32>
    %1612 = vector.shape_cast %1611 : vector<8xf32> to vector<8x1xf32>
    %cst_373 = arith.constant 0.176776692 : f32
    %1613 = vector.broadcast %cst_373 : f32 to vector<8x1xf32>
    %1614 = arith.mulf %1612, %1613 : vector<8x1xf32>
    %1615 = arith.mulf %1599, %1090 : vector<8x32xf32>
    %cst_374 = arith.constant dense<0.000000e+00> : vector<8xf32>
    %1616 = vector.multi_reduction <add>, %1615, %cst_374 [1] : vector<8x32xf32> to vector<8xf32>
    %1617 = vector.shape_cast %1616 : vector<8xf32> to vector<8x1xf32>
    %cst_375 = arith.constant 0.176776692 : f32
    %1618 = vector.broadcast %cst_375 : f32 to vector<8x1xf32>
    %1619 = arith.mulf %1617, %1618 : vector<8x1xf32>
    %1620 = arith.mulf %1599, %1405 : vector<8x32xf32>
    %cst_376 = arith.constant dense<0.000000e+00> : vector<8xf32>
    %1621 = vector.multi_reduction <add>, %1620, %cst_376 [1] : vector<8x32xf32> to vector<8xf32>
    %1622 = vector.shape_cast %1621 : vector<8xf32> to vector<8x1xf32>
    %cst_377 = arith.constant 0.176776692 : f32
    %1623 = vector.broadcast %cst_377 : f32 to vector<8x1xf32>
    %1624 = arith.mulf %1622, %1623 : vector<8x1xf32>
    %1625 = arith.mulf %1599, %1599 : vector<8x32xf32>
    %cst_378 = arith.constant dense<0.000000e+00> : vector<8xf32>
    %1626 = vector.multi_reduction <add>, %1625, %cst_378 [1] : vector<8x32xf32> to vector<8xf32>
    %1627 = vector.shape_cast %1626 : vector<8xf32> to vector<8x1xf32>
    %cst_379 = arith.constant 0.176776692 : f32
    %1628 = vector.broadcast %cst_379 : f32 to vector<8x1xf32>
    %1629 = arith.mulf %1627, %1628 : vector<8x1xf32>
    %1630 = arith.maximumf %1604, %1609 : vector<8x1xf32>
    %1631 = arith.maximumf %1630, %1614 : vector<8x1xf32>
    %1632 = arith.maximumf %1631, %1619 : vector<8x1xf32>
    %1633 = arith.maximumf %1632, %1624 : vector<8x1xf32>
    %1634 = arith.maximumf %1633, %1629 : vector<8x1xf32>
    %1635 = arith.subf %1604, %1634 : vector<8x1xf32>
    %1636 = math.exp %1635 : vector<8x1xf32>
    %1637 = arith.subf %1609, %1634 : vector<8x1xf32>
    %1638 = math.exp %1637 : vector<8x1xf32>
    %1639 = arith.subf %1614, %1634 : vector<8x1xf32>
    %1640 = math.exp %1639 : vector<8x1xf32>
    %1641 = arith.subf %1619, %1634 : vector<8x1xf32>
    %1642 = math.exp %1641 : vector<8x1xf32>
    %1643 = arith.subf %1624, %1634 : vector<8x1xf32>
    %1644 = math.exp %1643 : vector<8x1xf32>
    %1645 = arith.subf %1629, %1634 : vector<8x1xf32>
    %1646 = math.exp %1645 : vector<8x1xf32>
    %1647 = arith.addf %1636, %1638 : vector<8x1xf32>
    %1648 = arith.addf %1647, %1640 : vector<8x1xf32>
    %1649 = arith.addf %1648, %1642 : vector<8x1xf32>
    %1650 = arith.addf %1649, %1644 : vector<8x1xf32>
    %1651 = arith.addf %1650, %1646 : vector<8x1xf32>
    %1652 = tpu.reciprocal %1651 {approx = true} : vector<8x1xf32> -> vector<8x1xf32>
    %1653 = vector.broadcast %1636 : vector<8x1xf32> to vector<8x32xf32>
    %1654 = arith.mulf %1653, %289 : vector<8x32xf32>
    %1655 = vector.broadcast %1638 : vector<8x1xf32> to vector<8x32xf32>
    %1656 = arith.mulf %1655, %532 : vector<8x32xf32>
    %1657 = arith.addf %1654, %1656 : vector<8x32xf32>
    %1658 = vector.broadcast %1640 : vector<8x1xf32> to vector<8x32xf32>
    %1659 = arith.mulf %1658, %799 : vector<8x32xf32>
    %1660 = arith.addf %1657, %1659 : vector<8x32xf32>
    %1661 = vector.broadcast %1642 : vector<8x1xf32> to vector<8x32xf32>
    %1662 = arith.mulf %1661, %1090 : vector<8x32xf32>
    %1663 = arith.addf %1660, %1662 : vector<8x32xf32>
    %1664 = vector.broadcast %1644 : vector<8x1xf32> to vector<8x32xf32>
    %1665 = arith.mulf %1664, %1405 : vector<8x32xf32>
    %1666 = arith.addf %1663, %1665 : vector<8x32xf32>
    %1667 = vector.broadcast %1646 : vector<8x1xf32> to vector<8x32xf32>
    %1668 = arith.mulf %1667, %1599 : vector<8x32xf32>
    %1669 = arith.addf %1666, %1668 : vector<8x32xf32>
    %1670 = vector.broadcast %1652 : vector<8x1xf32> to vector<8x32xf32>
    %1671 = arith.mulf %1669, %1670 : vector<8x32xf32>
    %cst_380 = arith.constant dense<0.000000e+00> : vector<8x32xf32>
    %1672 = tpu.matmul %1671, %18, %cst_380 {dimension_numbers = #tpu.dot_dimension_numbers<[1], [0], [0], [1], [0, 0, 1, 1], [], []>} : vector<8x32xf32>, vector<32x32xf32>, vector<8x32xf32> -> vector<8x32xf32>
    %1673 = vector.broadcast %10 : vector<1x32xf32> to vector<8x32xf32>
    %1674 = arith.addf %1672, %1673 : vector<8x32xf32>
    %1675 = arith.addf %1576, %1674 : vector<8x32xf32>
    %cst_381 = arith.constant dense<0.000000e+00> : vector<8xf32>
    %1676 = vector.multi_reduction <add>, %1675, %cst_381 [1] : vector<8x32xf32> to vector<8xf32>
    %1677 = vector.shape_cast %1676 : vector<8xf32> to vector<8x1xf32>
    %cst_382 = arith.constant 3.200000e+01 : f32
    %1678 = vector.broadcast %cst_382 : f32 to vector<8x1xf32>
    %1679 = arith.divf %1677, %1678 : vector<8x1xf32>
    %1680 = vector.broadcast %1679 : vector<8x1xf32> to vector<8x32xf32>
    %1681 = arith.subf %1675, %1680 : vector<8x32xf32>
    %1682 = arith.mulf %1681, %1681 : vector<8x32xf32>
    %cst_383 = arith.constant dense<0.000000e+00> : vector<8xf32>
    %1683 = vector.multi_reduction <add>, %1682, %cst_383 [1] : vector<8x32xf32> to vector<8xf32>
    %1684 = vector.shape_cast %1683 : vector<8xf32> to vector<8x1xf32>
    %cst_384 = arith.constant 3.200000e+01 : f32
    %1685 = vector.broadcast %cst_384 : f32 to vector<8x1xf32>
    %1686 = arith.divf %1684, %1685 : vector<8x1xf32>
    %cst_385 = arith.constant 9.99999974E-6 : f32
    %1687 = vector.broadcast %cst_385 : f32 to vector<8x1xf32>
    %1688 = arith.addf %1686, %1687 : vector<8x1xf32>
    %1689 = math.rsqrt %1688 : vector<8x1xf32>
    %1690 = vector.broadcast %1689 : vector<8x1xf32> to vector<8x32xf32>
    %1691 = arith.mulf %1681, %1690 : vector<8x32xf32>
    %1692 = vector.broadcast %11 : vector<1x32xf32> to vector<8x32xf32>
    %1693 = arith.mulf %1691, %1692 : vector<8x32xf32>
    %1694 = vector.broadcast %12 : vector<1x32xf32> to vector<8x32xf32>
    %1695 = arith.addf %1693, %1694 : vector<8x32xf32>
    %cst_386 = arith.constant dense<0.000000e+00> : vector<8x128xf32>
    %1696 = tpu.matmul %1695, %2, %cst_386 {dimension_numbers = #tpu.dot_dimension_numbers<[1], [0], [0], [1], [0, 0, 1, 1], [], []>} : vector<8x32xf32>, vector<32x128xf32>, vector<8x128xf32> -> vector<8x128xf32>
    %1697 = vector.broadcast %13 : vector<1x128xf32> to vector<8x128xf32>
    %1698 = arith.addf %1696, %1697 : vector<8x128xf32>
    %cst_387 = arith.constant 0.000000e+00 : f32
    %1699 = vector.broadcast %cst_387 : f32 to vector<8x128xf32>
    %1700 = arith.maximumf %1698, %1699 : vector<8x128xf32>
    %cst_388 = arith.constant dense<0.000000e+00> : vector<8x32xf32>
    %1701 = tpu.matmul %1700, %19, %cst_388 {dimension_numbers = #tpu.dot_dimension_numbers<[1], [0], [0], [1], [0, 0, 1, 1], [], []>} : vector<8x128xf32>, vector<128x32xf32>, vector<8x32xf32> -> vector<8x32xf32>
    %1702 = vector.broadcast %14 : vector<1x32xf32> to vector<8x32xf32>
    %1703 = arith.addf %1701, %1702 : vector<8x32xf32>
    %1704 = arith.addf %1675, %1703 : vector<8x32xf32>
    %cst_389 = arith.constant dense<0.000000e+00> : vector<8x2xf32>
    %1705 = tpu.matmul %1704, %24, %cst_389 {dimension_numbers = #tpu.dot_dimension_numbers<[1], [0], [0], [1], [0, 0, 1, 1], [], []>} : vector<8x32xf32>, vector<32x2xf32>, vector<8x2xf32> -> vector<8x2xf32>
    %1706 = vector.broadcast %70 : vector<1x2xf32> to vector<8x2xf32>
    %1707 = arith.addf %1705, %1706 : vector<8x2xf32>
    %cst_390 = arith.constant 5.000000e-01 : f32
    %1708 = vector.broadcast %cst_390 : f32 to vector<8x1xf32>
    %1709 = arith.cmpf ogt, %1407, %1708 : vector<8x1xf32>
    %cst_391 = arith.constant 0.000000e+00 : f32
    %1710 = vector.shape_cast %1709 : vector<8x1xi1> to vector<8x1xi1>
    %1711 = vector.broadcast %1710 : vector<8x1xi1> to vector<8x2xi1>
    %1712 = vector.broadcast %cst_391 : f32 to vector<8x2xf32>
    %1713 = arith.select %1711, %1707, %1712 : vector<8x2xi1>, vector<8x2xf32>
    %1714 = vector.shape_cast %1713 : vector<8x2xf32> to vector<1x8x2xf32>
    %c5 = arith.constant 5 : index
    %c0_392 = arith.constant 0 : index
    %c0_393 = arith.constant 0 : index
    %1715 = vector.load %arg6[%c5, %c0_392, %c0_393] : memref<8x8x2xf32, #tpu.memory_space<vmem>>, vector<1x8x2xf32>
    tpu.vector_store %arg6[%c5, %c0_392, %c0_393], %1714 {strides = array<i32>} : memref<8x8x2xf32, #tpu.memory_space<vmem>>, vector<1x8x2xf32>,
    %cst_394 = arith.constant 5.000000e-01 : f32
    %1716 = vector.broadcast %cst_394 : f32 to vector<8x1xf32>
    %1717 = arith.cmpf ogt, %1407, %1716 : vector<8x1xf32>
    %cst_395 = arith.constant 0.000000e+00 : f32
    %1718 = vector.shape_cast %1717 : vector<8x1xi1> to vector<8x1xi1>
    %1719 = vector.broadcast %1718 : vector<8x1xi1> to vector<8x32xi1>
    %1720 = vector.broadcast %cst_395 : f32 to vector<8x32xf32>
    %1721 = arith.select %1719, %1704, %1720 : vector<8x32xi1>, vector<8x32xf32>
    %cst_396 = arith.constant dense<0.000000e+00> : vector<8xf32>
    %1722 = vector.multi_reduction <add>, %1721, %cst_396 [1] : vector<8x32xf32> to vector<8xf32>
    %1723 = vector.shape_cast %1722 : vector<8xf32> to vector<8x1xf32>
    %cst_397 = arith.constant 3.200000e+01 : f32
    %1724 = vector.broadcast %cst_397 : f32 to vector<8x1xf32>
    %1725 = arith.divf %1723, %1724 : vector<8x1xf32>
    %1726 = vector.broadcast %1725 : vector<8x1xf32> to vector<8x32xf32>
    %1727 = arith.subf %1721, %1726 : vector<8x32xf32>
    %1728 = arith.mulf %1727, %1727 : vector<8x32xf32>
    %cst_398 = arith.constant dense<0.000000e+00> : vector<8xf32>
    %1729 = vector.multi_reduction <add>, %1728, %cst_398 [1] : vector<8x32xf32> to vector<8xf32>
    %1730 = vector.shape_cast %1729 : vector<8xf32> to vector<8x1xf32>
    %cst_399 = arith.constant 3.200000e+01 : f32
    %1731 = vector.broadcast %cst_399 : f32 to vector<8x1xf32>
    %1732 = arith.divf %1730, %1731 : vector<8x1xf32>
    %cst_400 = arith.constant 9.99999974E-6 : f32
    %1733 = vector.broadcast %cst_400 : f32 to vector<8x1xf32>
    %1734 = arith.addf %1732, %1733 : vector<8x1xf32>
    %1735 = math.rsqrt %1734 : vector<8x1xf32>
    %1736 = vector.broadcast %1735 : vector<8x1xf32> to vector<8x32xf32>
    %1737 = arith.mulf %1727, %1736 : vector<8x32xf32>
    %1738 = vector.broadcast %7 : vector<1x32xf32> to vector<8x32xf32>
    %1739 = arith.mulf %1737, %1738 : vector<8x32xf32>
    %1740 = vector.broadcast %8 : vector<1x32xf32> to vector<8x32xf32>
    %1741 = arith.addf %1739, %1740 : vector<8x32xf32>
    %cst_401 = arith.constant dense<0.000000e+00> : vector<8x32xf32>
    %1742 = tpu.matmul %1741, %17, %cst_401 {dimension_numbers = #tpu.dot_dimension_numbers<[1], [0], [0], [1], [0, 0, 1, 1], [], []>} : vector<8x32xf32>, vector<32x32xf32>, vector<8x32xf32> -> vector<8x32xf32>
    %1743 = vector.broadcast %9 : vector<1x32xf32> to vector<8x32xf32>
    %1744 = arith.addf %1742, %1743 : vector<8x32xf32>
    %1745 = vector.extract_strided_slice %33 {offsets = [0, 6], sizes = [8, 1], strides = [1, 1]} : vector<8x8xf32> to vector<8x1xf32>
    %1746 = arith.mulf %1407, %1745 : vector<8x1xf32>
    %1747 = vector.extract_strided_slice %26 {offsets = [6, 0, 0], sizes = [1, 8, 2], strides = [1, 1, 1]} : vector<8x8x2xf32> to vector<1x8x2xf32>
    %1748 = vector.shape_cast %1747 : vector<1x8x2xf32> to vector<8x2xf32>
    %1749 = arith.addf %1410, %1748 : vector<8x2xf32>
    %1750 = vector.broadcast %1746 : vector<8x1xf32> to vector<8x2xf32>
    %1751 = arith.mulf %1749, %1750 : vector<8x2xf32>
    %cst_402 = arith.constant dense<0.000000e+00> : vector<2xf32>
    %1752 = vector.multi_reduction <add>, %1751, %cst_402 [0] : vector<8x2xf32> to vector<2xf32>
    %1753 = vector.shape_cast %1752 : vector<2xf32> to vector<1x2xf32>
    %1754 = vector.shape_cast %1746 : vector<8x1xf32> to vector<1x8x1xf32>
    %cst_403 = arith.constant dense<0.000000e+00> : vector<1xf32>
    %1755 = vector.multi_reduction <add>, %1754, %cst_403 [1, 2] : vector<1x8x1xf32> to vector<1xf32>
    %1756 = vector.shape_cast %1755 : vector<1xf32> to vector<1x1x1xf32>
    %1757 = vector.extract %1756[0, 0, 0] : f32 from vector<1x1x1xf32>
    %1758 = vector.broadcast %1757 : f32 to vector<1x1xf32>
    %cst_404 = arith.constant 7.000000e+00 : f32
    %1759 = vector.broadcast %cst_404 : f32 to vector<1x1xf32>
    %1760 = arith.mulf %1759, %1758 : vector<1x1xf32>
    %cst_405 = arith.constant 9.99999997E-7 : f32
    %1761 = vector.broadcast %cst_405 : f32 to vector<1x1xf32>
    %1762 = arith.maximumf %1760, %1761 : vector<1x1xf32>
    %1763 = tpu.reciprocal %1762 {approx = true} : vector<1x1xf32> -> vector<1x1xf32>
    %1764 = vector.broadcast %1763 : vector<1x1xf32> to vector<1x2xf32>
    %1765 = arith.mulf %1753, %1764 : vector<1x2xf32>
    %1766 = vector.extract_strided_slice %1765 {offsets = [0, 0], sizes = [1, 1], strides = [1, 1]} : vector<1x2xf32> to vector<1x1xf32>
    %1767 = vector.extract_strided_slice %16 {offsets = [0, 0], sizes = [1, 32], strides = [1, 1]} : vector<2x32xf32> to vector<1x32xf32>
    %1768 = vector.broadcast %1766 : vector<1x1xf32> to vector<1x32xf32>
    %1769 = arith.mulf %1768, %1767 : vector<1x32xf32>
    %1770 = vector.extract_strided_slice %1765 {offsets = [0, 1], sizes = [1, 1], strides = [1, 1]} : vector<1x2xf32> to vector<1x1xf32>
    %1771 = vector.extract_strided_slice %16 {offsets = [1, 0], sizes = [1, 32], strides = [1, 1]} : vector<2x32xf32> to vector<1x32xf32>
    %1772 = vector.broadcast %1770 : vector<1x1xf32> to vector<1x32xf32>
    %1773 = arith.mulf %1772, %1771 : vector<1x32xf32>
    %1774 = arith.addf %1769, %1773 : vector<1x32xf32>
    %1775 = vector.extract_strided_slice %68 {offsets = [6, 0, 0], sizes = [1, 8, 32], strides = [1, 1, 1]} : vector<8x8x32xf32> to vector<1x8x32xf32>
    %1776 = vector.shape_cast %1775 : vector<1x8x32xf32> to vector<8x32xf32>
    %1777 = vector.broadcast %1774 : vector<1x32xf32> to vector<8x32xf32>
    %1778 = arith.subf %1776, %1777 : vector<8x32xf32>
    %cst_406 = arith.constant 0.000000e+00 : f32
    %1779 = vector.broadcast %cst_406 : f32 to vector<8x32xf32>
    %1780 = arith.maximumf %1778, %1779 : vector<8x32xf32>
    %1781 = vector.extract_strided_slice %52 {offsets = [6, 0, 0], sizes = [1, 8, 32], strides = [1, 1, 1]} : vector<8x8x32xf32> to vector<1x8x32xf32>
    %1782 = vector.shape_cast %1781 : vector<1x8x32xf32> to vector<8x32xf32>
    %cst_407 = arith.constant dense<0.000000e+00> : vector<8xf32>
    %1783 = vector.multi_reduction <add>, %1782, %cst_407 [1] : vector<8x32xf32> to vector<8xf32>
    %1784 = vector.shape_cast %1783 : vector<8xf32> to vector<8x1xf32>
    %cst_408 = arith.constant 3.200000e+01 : f32
    %1785 = vector.broadcast %cst_408 : f32 to vector<8x1xf32>
    %1786 = arith.divf %1784, %1785 : vector<8x1xf32>
    %1787 = vector.broadcast %1786 : vector<8x1xf32> to vector<8x32xf32>
    %1788 = arith.subf %1782, %1787 : vector<8x32xf32>
    %1789 = arith.mulf %1788, %1788 : vector<8x32xf32>
    %cst_409 = arith.constant dense<0.000000e+00> : vector<8xf32>
    %1790 = vector.multi_reduction <add>, %1789, %cst_409 [1] : vector<8x32xf32> to vector<8xf32>
    %1791 = vector.shape_cast %1790 : vector<8xf32> to vector<8x1xf32>
    %cst_410 = arith.constant 3.200000e+01 : f32
    %1792 = vector.broadcast %cst_410 : f32 to vector<8x1xf32>
    %1793 = arith.divf %1791, %1792 : vector<8x1xf32>
    %cst_411 = arith.constant 9.99999974E-6 : f32
    %1794 = vector.broadcast %cst_411 : f32 to vector<8x1xf32>
    %1795 = arith.addf %1793, %1794 : vector<8x1xf32>
    %1796 = math.rsqrt %1795 : vector<8x1xf32>
    %1797 = vector.broadcast %1796 : vector<8x1xf32> to vector<8x32xf32>
    %1798 = arith.mulf %1788, %1797 : vector<8x32xf32>
    %1799 = vector.broadcast %7 : vector<1x32xf32> to vector<8x32xf32>
    %1800 = arith.mulf %1798, %1799 : vector<8x32xf32>
    %1801 = vector.broadcast %8 : vector<1x32xf32> to vector<8x32xf32>
    %1802 = arith.addf %1800, %1801 : vector<8x32xf32>
    %cst_412 = arith.constant dense<0.000000e+00> : vector<8x32xf32>
    %1803 = tpu.matmul %1802, %17, %cst_412 {dimension_numbers = #tpu.dot_dimension_numbers<[1], [0], [0], [1], [0, 0, 1, 1], [], []>} : vector<8x32xf32>, vector<32x32xf32>, vector<8x32xf32> -> vector<8x32xf32>
    %1804 = vector.broadcast %9 : vector<1x32xf32> to vector<8x32xf32>
    %1805 = arith.addf %1803, %1804 : vector<8x32xf32>
    %1806 = arith.mulf %1805, %289 : vector<8x32xf32>
    %cst_413 = arith.constant dense<0.000000e+00> : vector<8xf32>
    %1807 = vector.multi_reduction <add>, %1806, %cst_413 [1] : vector<8x32xf32> to vector<8xf32>
    %1808 = vector.shape_cast %1807 : vector<8xf32> to vector<8x1xf32>
    %cst_414 = arith.constant 0.176776692 : f32
    %1809 = vector.broadcast %cst_414 : f32 to vector<8x1xf32>
    %1810 = arith.mulf %1808, %1809 : vector<8x1xf32>
    %1811 = arith.mulf %1805, %532 : vector<8x32xf32>
    %cst_415 = arith.constant dense<0.000000e+00> : vector<8xf32>
    %1812 = vector.multi_reduction <add>, %1811, %cst_415 [1] : vector<8x32xf32> to vector<8xf32>
    %1813 = vector.shape_cast %1812 : vector<8xf32> to vector<8x1xf32>
    %cst_416 = arith.constant 0.176776692 : f32
    %1814 = vector.broadcast %cst_416 : f32 to vector<8x1xf32>
    %1815 = arith.mulf %1813, %1814 : vector<8x1xf32>
    %1816 = arith.mulf %1805, %799 : vector<8x32xf32>
    %cst_417 = arith.constant dense<0.000000e+00> : vector<8xf32>
    %1817 = vector.multi_reduction <add>, %1816, %cst_417 [1] : vector<8x32xf32> to vector<8xf32>
    %1818 = vector.shape_cast %1817 : vector<8xf32> to vector<8x1xf32>
    %cst_418 = arith.constant 0.176776692 : f32
    %1819 = vector.broadcast %cst_418 : f32 to vector<8x1xf32>
    %1820 = arith.mulf %1818, %1819 : vector<8x1xf32>
    %1821 = arith.mulf %1805, %1090 : vector<8x32xf32>
    %cst_419 = arith.constant dense<0.000000e+00> : vector<8xf32>
    %1822 = vector.multi_reduction <add>, %1821, %cst_419 [1] : vector<8x32xf32> to vector<8xf32>
    %1823 = vector.shape_cast %1822 : vector<8xf32> to vector<8x1xf32>
    %cst_420 = arith.constant 0.176776692 : f32
    %1824 = vector.broadcast %cst_420 : f32 to vector<8x1xf32>
    %1825 = arith.mulf %1823, %1824 : vector<8x1xf32>
    %1826 = arith.mulf %1805, %1405 : vector<8x32xf32>
    %cst_421 = arith.constant dense<0.000000e+00> : vector<8xf32>
    %1827 = vector.multi_reduction <add>, %1826, %cst_421 [1] : vector<8x32xf32> to vector<8xf32>
    %1828 = vector.shape_cast %1827 : vector<8xf32> to vector<8x1xf32>
    %cst_422 = arith.constant 0.176776692 : f32
    %1829 = vector.broadcast %cst_422 : f32 to vector<8x1xf32>
    %1830 = arith.mulf %1828, %1829 : vector<8x1xf32>
    %1831 = arith.mulf %1805, %1744 : vector<8x32xf32>
    %cst_423 = arith.constant dense<0.000000e+00> : vector<8xf32>
    %1832 = vector.multi_reduction <add>, %1831, %cst_423 [1] : vector<8x32xf32> to vector<8xf32>
    %1833 = vector.shape_cast %1832 : vector<8xf32> to vector<8x1xf32>
    %cst_424 = arith.constant 0.176776692 : f32
    %1834 = vector.broadcast %cst_424 : f32 to vector<8x1xf32>
    %1835 = arith.mulf %1833, %1834 : vector<8x1xf32>
    %1836 = arith.mulf %1805, %1805 : vector<8x32xf32>
    %cst_425 = arith.constant dense<0.000000e+00> : vector<8xf32>
    %1837 = vector.multi_reduction <add>, %1836, %cst_425 [1] : vector<8x32xf32> to vector<8xf32>
    %1838 = vector.shape_cast %1837 : vector<8xf32> to vector<8x1xf32>
    %cst_426 = arith.constant 0.176776692 : f32
    %1839 = vector.broadcast %cst_426 : f32 to vector<8x1xf32>
    %1840 = arith.mulf %1838, %1839 : vector<8x1xf32>
    %1841 = arith.maximumf %1810, %1815 : vector<8x1xf32>
    %1842 = arith.maximumf %1841, %1820 : vector<8x1xf32>
    %1843 = arith.maximumf %1842, %1825 : vector<8x1xf32>
    %1844 = arith.maximumf %1843, %1830 : vector<8x1xf32>
    %1845 = arith.maximumf %1844, %1835 : vector<8x1xf32>
    %1846 = arith.maximumf %1845, %1840 : vector<8x1xf32>
    %1847 = arith.subf %1810, %1846 : vector<8x1xf32>
    %1848 = math.exp %1847 : vector<8x1xf32>
    %1849 = arith.subf %1815, %1846 : vector<8x1xf32>
    %1850 = math.exp %1849 : vector<8x1xf32>
    %1851 = arith.subf %1820, %1846 : vector<8x1xf32>
    %1852 = math.exp %1851 : vector<8x1xf32>
    %1853 = arith.subf %1825, %1846 : vector<8x1xf32>
    %1854 = math.exp %1853 : vector<8x1xf32>
    %1855 = arith.subf %1830, %1846 : vector<8x1xf32>
    %1856 = math.exp %1855 : vector<8x1xf32>
    %1857 = arith.subf %1835, %1846 : vector<8x1xf32>
    %1858 = math.exp %1857 : vector<8x1xf32>
    %1859 = arith.subf %1840, %1846 : vector<8x1xf32>
    %1860 = math.exp %1859 : vector<8x1xf32>
    %1861 = arith.addf %1848, %1850 : vector<8x1xf32>
    %1862 = arith.addf %1861, %1852 : vector<8x1xf32>
    %1863 = arith.addf %1862, %1854 : vector<8x1xf32>
    %1864 = arith.addf %1863, %1856 : vector<8x1xf32>
    %1865 = arith.addf %1864, %1858 : vector<8x1xf32>
    %1866 = arith.addf %1865, %1860 : vector<8x1xf32>
    %1867 = tpu.reciprocal %1866 {approx = true} : vector<8x1xf32> -> vector<8x1xf32>
    %1868 = vector.broadcast %1848 : vector<8x1xf32> to vector<8x32xf32>
    %1869 = arith.mulf %1868, %289 : vector<8x32xf32>
    %1870 = vector.broadcast %1850 : vector<8x1xf32> to vector<8x32xf32>
    %1871 = arith.mulf %1870, %532 : vector<8x32xf32>
    %1872 = arith.addf %1869, %1871 : vector<8x32xf32>
    %1873 = vector.broadcast %1852 : vector<8x1xf32> to vector<8x32xf32>
    %1874 = arith.mulf %1873, %799 : vector<8x32xf32>
    %1875 = arith.addf %1872, %1874 : vector<8x32xf32>
    %1876 = vector.broadcast %1854 : vector<8x1xf32> to vector<8x32xf32>
    %1877 = arith.mulf %1876, %1090 : vector<8x32xf32>
    %1878 = arith.addf %1875, %1877 : vector<8x32xf32>
    %1879 = vector.broadcast %1856 : vector<8x1xf32> to vector<8x32xf32>
    %1880 = arith.mulf %1879, %1405 : vector<8x32xf32>
    %1881 = arith.addf %1878, %1880 : vector<8x32xf32>
    %1882 = vector.broadcast %1858 : vector<8x1xf32> to vector<8x32xf32>
    %1883 = arith.mulf %1882, %1744 : vector<8x32xf32>
    %1884 = arith.addf %1881, %1883 : vector<8x32xf32>
    %1885 = vector.broadcast %1860 : vector<8x1xf32> to vector<8x32xf32>
    %1886 = arith.mulf %1885, %1805 : vector<8x32xf32>
    %1887 = arith.addf %1884, %1886 : vector<8x32xf32>
    %1888 = vector.broadcast %1867 : vector<8x1xf32> to vector<8x32xf32>
    %1889 = arith.mulf %1887, %1888 : vector<8x32xf32>
    %cst_427 = arith.constant dense<0.000000e+00> : vector<8x32xf32>
    %1890 = tpu.matmul %1889, %18, %cst_427 {dimension_numbers = #tpu.dot_dimension_numbers<[1], [0], [0], [1], [0, 0, 1, 1], [], []>} : vector<8x32xf32>, vector<32x32xf32>, vector<8x32xf32> -> vector<8x32xf32>
    %1891 = vector.broadcast %10 : vector<1x32xf32> to vector<8x32xf32>
    %1892 = arith.addf %1890, %1891 : vector<8x32xf32>
    %1893 = arith.addf %1782, %1892 : vector<8x32xf32>
    %cst_428 = arith.constant dense<0.000000e+00> : vector<8xf32>
    %1894 = vector.multi_reduction <add>, %1893, %cst_428 [1] : vector<8x32xf32> to vector<8xf32>
    %1895 = vector.shape_cast %1894 : vector<8xf32> to vector<8x1xf32>
    %cst_429 = arith.constant 3.200000e+01 : f32
    %1896 = vector.broadcast %cst_429 : f32 to vector<8x1xf32>
    %1897 = arith.divf %1895, %1896 : vector<8x1xf32>
    %1898 = vector.broadcast %1897 : vector<8x1xf32> to vector<8x32xf32>
    %1899 = arith.subf %1893, %1898 : vector<8x32xf32>
    %1900 = arith.mulf %1899, %1899 : vector<8x32xf32>
    %cst_430 = arith.constant dense<0.000000e+00> : vector<8xf32>
    %1901 = vector.multi_reduction <add>, %1900, %cst_430 [1] : vector<8x32xf32> to vector<8xf32>
    %1902 = vector.shape_cast %1901 : vector<8xf32> to vector<8x1xf32>
    %cst_431 = arith.constant 3.200000e+01 : f32
    %1903 = vector.broadcast %cst_431 : f32 to vector<8x1xf32>
    %1904 = arith.divf %1902, %1903 : vector<8x1xf32>
    %cst_432 = arith.constant 9.99999974E-6 : f32
    %1905 = vector.broadcast %cst_432 : f32 to vector<8x1xf32>
    %1906 = arith.addf %1904, %1905 : vector<8x1xf32>
    %1907 = math.rsqrt %1906 : vector<8x1xf32>
    %1908 = vector.broadcast %1907 : vector<8x1xf32> to vector<8x32xf32>
    %1909 = arith.mulf %1899, %1908 : vector<8x32xf32>
    %1910 = vector.broadcast %11 : vector<1x32xf32> to vector<8x32xf32>
    %1911 = arith.mulf %1909, %1910 : vector<8x32xf32>
    %1912 = vector.broadcast %12 : vector<1x32xf32> to vector<8x32xf32>
    %1913 = arith.addf %1911, %1912 : vector<8x32xf32>
    %cst_433 = arith.constant dense<0.000000e+00> : vector<8x128xf32>
    %1914 = tpu.matmul %1913, %2, %cst_433 {dimension_numbers = #tpu.dot_dimension_numbers<[1], [0], [0], [1], [0, 0, 1, 1], [], []>} : vector<8x32xf32>, vector<32x128xf32>, vector<8x128xf32> -> vector<8x128xf32>
    %1915 = vector.broadcast %13 : vector<1x128xf32> to vector<8x128xf32>
    %1916 = arith.addf %1914, %1915 : vector<8x128xf32>
    %cst_434 = arith.constant 0.000000e+00 : f32
    %1917 = vector.broadcast %cst_434 : f32 to vector<8x128xf32>
    %1918 = arith.maximumf %1916, %1917 : vector<8x128xf32>
    %cst_435 = arith.constant dense<0.000000e+00> : vector<8x32xf32>
    %1919 = tpu.matmul %1918, %19, %cst_435 {dimension_numbers = #tpu.dot_dimension_numbers<[1], [0], [0], [1], [0, 0, 1, 1], [], []>} : vector<8x128xf32>, vector<128x32xf32>, vector<8x32xf32> -> vector<8x32xf32>
    %1920 = vector.broadcast %14 : vector<1x32xf32> to vector<8x32xf32>
    %1921 = arith.addf %1919, %1920 : vector<8x32xf32>
    %1922 = arith.addf %1893, %1921 : vector<8x32xf32>
    %cst_436 = arith.constant dense<0.000000e+00> : vector<8x32xf32>
    %1923 = tpu.matmul %1922, %21, %cst_436 {dimension_numbers = #tpu.dot_dimension_numbers<[1], [0], [0], [1], [0, 0, 1, 1], [], []>} : vector<8x32xf32>, vector<32x32xf32>, vector<8x32xf32> -> vector<8x32xf32>
    %cst_437 = arith.constant dense<0.000000e+00> : vector<8x32xf32>
    %1924 = tpu.matmul %1780, %22, %cst_437 {dimension_numbers = #tpu.dot_dimension_numbers<[1], [0], [0], [1], [0, 0, 1, 1], [], []>} : vector<8x32xf32>, vector<32x32xf32>, vector<8x32xf32> -> vector<8x32xf32>
    %1925 = arith.addf %1923, %1924 : vector<8x32xf32>
    %1926 = vector.broadcast %5 : vector<1x32xf32> to vector<8x32xf32>
    %1927 = arith.addf %1925, %1926 : vector<8x32xf32>
    %cst_438 = arith.constant dense<0.000000e+00> : vector<8xf32>
    %1928 = vector.multi_reduction <add>, %1927, %cst_438 [1] : vector<8x32xf32> to vector<8xf32>
    %1929 = vector.shape_cast %1928 : vector<8xf32> to vector<8x1xf32>
    %cst_439 = arith.constant 3.200000e+01 : f32
    %1930 = vector.broadcast %cst_439 : f32 to vector<8x1xf32>
    %1931 = arith.divf %1929, %1930 : vector<8x1xf32>
    %1932 = vector.broadcast %1931 : vector<8x1xf32> to vector<8x32xf32>
    %1933 = arith.subf %1927, %1932 : vector<8x32xf32>
    %1934 = arith.mulf %1933, %1933 : vector<8x32xf32>
    %cst_440 = arith.constant dense<0.000000e+00> : vector<8xf32>
    %1935 = vector.multi_reduction <add>, %1934, %cst_440 [1] : vector<8x32xf32> to vector<8xf32>
    %1936 = vector.shape_cast %1935 : vector<8xf32> to vector<8x1xf32>
    %cst_441 = arith.constant 3.200000e+01 : f32
    %1937 = vector.broadcast %cst_441 : f32 to vector<8x1xf32>
    %1938 = arith.divf %1936, %1937 : vector<8x1xf32>
    %cst_442 = arith.constant 9.99999974E-6 : f32
    %1939 = vector.broadcast %cst_442 : f32 to vector<8x1xf32>
    %1940 = arith.addf %1938, %1939 : vector<8x1xf32>
    %1941 = math.rsqrt %1940 : vector<8x1xf32>
    %1942 = vector.broadcast %1941 : vector<8x1xf32> to vector<8x32xf32>
    %1943 = arith.mulf %1933, %1942 : vector<8x32xf32>
    %1944 = vector.broadcast %7 : vector<1x32xf32> to vector<8x32xf32>
    %1945 = arith.mulf %1943, %1944 : vector<8x32xf32>
    %1946 = vector.broadcast %8 : vector<1x32xf32> to vector<8x32xf32>
    %1947 = arith.addf %1945, %1946 : vector<8x32xf32>
    %cst_443 = arith.constant dense<0.000000e+00> : vector<8x32xf32>
    %1948 = tpu.matmul %1947, %17, %cst_443 {dimension_numbers = #tpu.dot_dimension_numbers<[1], [0], [0], [1], [0, 0, 1, 1], [], []>} : vector<8x32xf32>, vector<32x32xf32>, vector<8x32xf32> -> vector<8x32xf32>
    %1949 = vector.broadcast %9 : vector<1x32xf32> to vector<8x32xf32>
    %1950 = arith.addf %1948, %1949 : vector<8x32xf32>
    %1951 = arith.mulf %1950, %289 : vector<8x32xf32>
    %cst_444 = arith.constant dense<0.000000e+00> : vector<8xf32>
    %1952 = vector.multi_reduction <add>, %1951, %cst_444 [1] : vector<8x32xf32> to vector<8xf32>
    %1953 = vector.shape_cast %1952 : vector<8xf32> to vector<8x1xf32>
    %cst_445 = arith.constant 0.176776692 : f32
    %1954 = vector.broadcast %cst_445 : f32 to vector<8x1xf32>
    %1955 = arith.mulf %1953, %1954 : vector<8x1xf32>
    %1956 = arith.mulf %1950, %532 : vector<8x32xf32>
    %cst_446 = arith.constant dense<0.000000e+00> : vector<8xf32>
    %1957 = vector.multi_reduction <add>, %1956, %cst_446 [1] : vector<8x32xf32> to vector<8xf32>
    %1958 = vector.shape_cast %1957 : vector<8xf32> to vector<8x1xf32>
    %cst_447 = arith.constant 0.176776692 : f32
    %1959 = vector.broadcast %cst_447 : f32 to vector<8x1xf32>
    %1960 = arith.mulf %1958, %1959 : vector<8x1xf32>
    %1961 = arith.mulf %1950, %799 : vector<8x32xf32>
    %cst_448 = arith.constant dense<0.000000e+00> : vector<8xf32>
    %1962 = vector.multi_reduction <add>, %1961, %cst_448 [1] : vector<8x32xf32> to vector<8xf32>
    %1963 = vector.shape_cast %1962 : vector<8xf32> to vector<8x1xf32>
    %cst_449 = arith.constant 0.176776692 : f32
    %1964 = vector.broadcast %cst_449 : f32 to vector<8x1xf32>
    %1965 = arith.mulf %1963, %1964 : vector<8x1xf32>
    %1966 = arith.mulf %1950, %1090 : vector<8x32xf32>
    %cst_450 = arith.constant dense<0.000000e+00> : vector<8xf32>
    %1967 = vector.multi_reduction <add>, %1966, %cst_450 [1] : vector<8x32xf32> to vector<8xf32>
    %1968 = vector.shape_cast %1967 : vector<8xf32> to vector<8x1xf32>
    %cst_451 = arith.constant 0.176776692 : f32
    %1969 = vector.broadcast %cst_451 : f32 to vector<8x1xf32>
    %1970 = arith.mulf %1968, %1969 : vector<8x1xf32>
    %1971 = arith.mulf %1950, %1405 : vector<8x32xf32>
    %cst_452 = arith.constant dense<0.000000e+00> : vector<8xf32>
    %1972 = vector.multi_reduction <add>, %1971, %cst_452 [1] : vector<8x32xf32> to vector<8xf32>
    %1973 = vector.shape_cast %1972 : vector<8xf32> to vector<8x1xf32>
    %cst_453 = arith.constant 0.176776692 : f32
    %1974 = vector.broadcast %cst_453 : f32 to vector<8x1xf32>
    %1975 = arith.mulf %1973, %1974 : vector<8x1xf32>
    %1976 = arith.mulf %1950, %1744 : vector<8x32xf32>
    %cst_454 = arith.constant dense<0.000000e+00> : vector<8xf32>
    %1977 = vector.multi_reduction <add>, %1976, %cst_454 [1] : vector<8x32xf32> to vector<8xf32>
    %1978 = vector.shape_cast %1977 : vector<8xf32> to vector<8x1xf32>
    %cst_455 = arith.constant 0.176776692 : f32
    %1979 = vector.broadcast %cst_455 : f32 to vector<8x1xf32>
    %1980 = arith.mulf %1978, %1979 : vector<8x1xf32>
    %1981 = arith.mulf %1950, %1950 : vector<8x32xf32>
    %cst_456 = arith.constant dense<0.000000e+00> : vector<8xf32>
    %1982 = vector.multi_reduction <add>, %1981, %cst_456 [1] : vector<8x32xf32> to vector<8xf32>
    %1983 = vector.shape_cast %1982 : vector<8xf32> to vector<8x1xf32>
    %cst_457 = arith.constant 0.176776692 : f32
    %1984 = vector.broadcast %cst_457 : f32 to vector<8x1xf32>
    %1985 = arith.mulf %1983, %1984 : vector<8x1xf32>
    %1986 = arith.maximumf %1955, %1960 : vector<8x1xf32>
    %1987 = arith.maximumf %1986, %1965 : vector<8x1xf32>
    %1988 = arith.maximumf %1987, %1970 : vector<8x1xf32>
    %1989 = arith.maximumf %1988, %1975 : vector<8x1xf32>
    %1990 = arith.maximumf %1989, %1980 : vector<8x1xf32>
    %1991 = arith.maximumf %1990, %1985 : vector<8x1xf32>
    %1992 = arith.subf %1955, %1991 : vector<8x1xf32>
    %1993 = math.exp %1992 : vector<8x1xf32>
    %1994 = arith.subf %1960, %1991 : vector<8x1xf32>
    %1995 = math.exp %1994 : vector<8x1xf32>
    %1996 = arith.subf %1965, %1991 : vector<8x1xf32>
    %1997 = math.exp %1996 : vector<8x1xf32>
    %1998 = arith.subf %1970, %1991 : vector<8x1xf32>
    %1999 = math.exp %1998 : vector<8x1xf32>
    %2000 = arith.subf %1975, %1991 : vector<8x1xf32>
    %2001 = math.exp %2000 : vector<8x1xf32>
    %2002 = arith.subf %1980, %1991 : vector<8x1xf32>
    %2003 = math.exp %2002 : vector<8x1xf32>
    %2004 = arith.subf %1985, %1991 : vector<8x1xf32>
    %2005 = math.exp %2004 : vector<8x1xf32>
    %2006 = arith.addf %1993, %1995 : vector<8x1xf32>
    %2007 = arith.addf %2006, %1997 : vector<8x1xf32>
    %2008 = arith.addf %2007, %1999 : vector<8x1xf32>
    %2009 = arith.addf %2008, %2001 : vector<8x1xf32>
    %2010 = arith.addf %2009, %2003 : vector<8x1xf32>
    %2011 = arith.addf %2010, %2005 : vector<8x1xf32>
    %2012 = tpu.reciprocal %2011 {approx = true} : vector<8x1xf32> -> vector<8x1xf32>
    %2013 = vector.broadcast %1993 : vector<8x1xf32> to vector<8x32xf32>
    %2014 = arith.mulf %2013, %289 : vector<8x32xf32>
    %2015 = vector.broadcast %1995 : vector<8x1xf32> to vector<8x32xf32>
    %2016 = arith.mulf %2015, %532 : vector<8x32xf32>
    %2017 = arith.addf %2014, %2016 : vector<8x32xf32>
    %2018 = vector.broadcast %1997 : vector<8x1xf32> to vector<8x32xf32>
    %2019 = arith.mulf %2018, %799 : vector<8x32xf32>
    %2020 = arith.addf %2017, %2019 : vector<8x32xf32>
    %2021 = vector.broadcast %1999 : vector<8x1xf32> to vector<8x32xf32>
    %2022 = arith.mulf %2021, %1090 : vector<8x32xf32>
    %2023 = arith.addf %2020, %2022 : vector<8x32xf32>
    %2024 = vector.broadcast %2001 : vector<8x1xf32> to vector<8x32xf32>
    %2025 = arith.mulf %2024, %1405 : vector<8x32xf32>
    %2026 = arith.addf %2023, %2025 : vector<8x32xf32>
    %2027 = vector.broadcast %2003 : vector<8x1xf32> to vector<8x32xf32>
    %2028 = arith.mulf %2027, %1744 : vector<8x32xf32>
    %2029 = arith.addf %2026, %2028 : vector<8x32xf32>
    %2030 = vector.broadcast %2005 : vector<8x1xf32> to vector<8x32xf32>
    %2031 = arith.mulf %2030, %1950 : vector<8x32xf32>
    %2032 = arith.addf %2029, %2031 : vector<8x32xf32>
    %2033 = vector.broadcast %2012 : vector<8x1xf32> to vector<8x32xf32>
    %2034 = arith.mulf %2032, %2033 : vector<8x32xf32>
    %cst_458 = arith.constant dense<0.000000e+00> : vector<8x32xf32>
    %2035 = tpu.matmul %2034, %18, %cst_458 {dimension_numbers = #tpu.dot_dimension_numbers<[1], [0], [0], [1], [0, 0, 1, 1], [], []>} : vector<8x32xf32>, vector<32x32xf32>, vector<8x32xf32> -> vector<8x32xf32>
    %2036 = vector.broadcast %10 : vector<1x32xf32> to vector<8x32xf32>
    %2037 = arith.addf %2035, %2036 : vector<8x32xf32>
    %2038 = arith.addf %1927, %2037 : vector<8x32xf32>
    %cst_459 = arith.constant dense<0.000000e+00> : vector<8xf32>
    %2039 = vector.multi_reduction <add>, %2038, %cst_459 [1] : vector<8x32xf32> to vector<8xf32>
    %2040 = vector.shape_cast %2039 : vector<8xf32> to vector<8x1xf32>
    %cst_460 = arith.constant 3.200000e+01 : f32
    %2041 = vector.broadcast %cst_460 : f32 to vector<8x1xf32>
    %2042 = arith.divf %2040, %2041 : vector<8x1xf32>
    %2043 = vector.broadcast %2042 : vector<8x1xf32> to vector<8x32xf32>
    %2044 = arith.subf %2038, %2043 : vector<8x32xf32>
    %2045 = arith.mulf %2044, %2044 : vector<8x32xf32>
    %cst_461 = arith.constant dense<0.000000e+00> : vector<8xf32>
    %2046 = vector.multi_reduction <add>, %2045, %cst_461 [1] : vector<8x32xf32> to vector<8xf32>
    %2047 = vector.shape_cast %2046 : vector<8xf32> to vector<8x1xf32>
    %cst_462 = arith.constant 3.200000e+01 : f32
    %2048 = vector.broadcast %cst_462 : f32 to vector<8x1xf32>
    %2049 = arith.divf %2047, %2048 : vector<8x1xf32>
    %cst_463 = arith.constant 9.99999974E-6 : f32
    %2050 = vector.broadcast %cst_463 : f32 to vector<8x1xf32>
    %2051 = arith.addf %2049, %2050 : vector<8x1xf32>
    %2052 = math.rsqrt %2051 : vector<8x1xf32>
    %2053 = vector.broadcast %2052 : vector<8x1xf32> to vector<8x32xf32>
    %2054 = arith.mulf %2044, %2053 : vector<8x32xf32>
    %2055 = vector.broadcast %11 : vector<1x32xf32> to vector<8x32xf32>
    %2056 = arith.mulf %2054, %2055 : vector<8x32xf32>
    %2057 = vector.broadcast %12 : vector<1x32xf32> to vector<8x32xf32>
    %2058 = arith.addf %2056, %2057 : vector<8x32xf32>
    %cst_464 = arith.constant dense<0.000000e+00> : vector<8x128xf32>
    %2059 = tpu.matmul %2058, %2, %cst_464 {dimension_numbers = #tpu.dot_dimension_numbers<[1], [0], [0], [1], [0, 0, 1, 1], [], []>} : vector<8x32xf32>, vector<32x128xf32>, vector<8x128xf32> -> vector<8x128xf32>
    %2060 = vector.broadcast %13 : vector<1x128xf32> to vector<8x128xf32>
    %2061 = arith.addf %2059, %2060 : vector<8x128xf32>
    %cst_465 = arith.constant 0.000000e+00 : f32
    %2062 = vector.broadcast %cst_465 : f32 to vector<8x128xf32>
    %2063 = arith.maximumf %2061, %2062 : vector<8x128xf32>
    %cst_466 = arith.constant dense<0.000000e+00> : vector<8x32xf32>
    %2064 = tpu.matmul %2063, %19, %cst_466 {dimension_numbers = #tpu.dot_dimension_numbers<[1], [0], [0], [1], [0, 0, 1, 1], [], []>} : vector<8x128xf32>, vector<128x32xf32>, vector<8x32xf32> -> vector<8x32xf32>
    %2065 = vector.broadcast %14 : vector<1x32xf32> to vector<8x32xf32>
    %2066 = arith.addf %2064, %2065 : vector<8x32xf32>
    %2067 = arith.addf %2038, %2066 : vector<8x32xf32>
    %cst_467 = arith.constant dense<0.000000e+00> : vector<8x2xf32>
    %2068 = tpu.matmul %2067, %24, %cst_467 {dimension_numbers = #tpu.dot_dimension_numbers<[1], [0], [0], [1], [0, 0, 1, 1], [], []>} : vector<8x32xf32>, vector<32x2xf32>, vector<8x2xf32> -> vector<8x2xf32>
    %2069 = vector.broadcast %70 : vector<1x2xf32> to vector<8x2xf32>
    %2070 = arith.addf %2068, %2069 : vector<8x2xf32>
    %cst_468 = arith.constant 5.000000e-01 : f32
    %2071 = vector.broadcast %cst_468 : f32 to vector<8x1xf32>
    %2072 = arith.cmpf ogt, %1746, %2071 : vector<8x1xf32>
    %cst_469 = arith.constant 0.000000e+00 : f32
    %2073 = vector.shape_cast %2072 : vector<8x1xi1> to vector<8x1xi1>
    %2074 = vector.broadcast %2073 : vector<8x1xi1> to vector<8x2xi1>
    %2075 = vector.broadcast %cst_469 : f32 to vector<8x2xf32>
    %2076 = arith.select %2074, %2070, %2075 : vector<8x2xi1>, vector<8x2xf32>
    %2077 = vector.shape_cast %2076 : vector<8x2xf32> to vector<1x8x2xf32>
    %c6 = arith.constant 6 : index
    %c0_470 = arith.constant 0 : index
    %c0_471 = arith.constant 0 : index
    %2078 = vector.load %arg6[%c6, %c0_470, %c0_471] : memref<8x8x2xf32, #tpu.memory_space<vmem>>, vector<1x8x2xf32>
    tpu.vector_store %arg6[%c6, %c0_470, %c0_471], %2077 {strides = array<i32>} : memref<8x8x2xf32, #tpu.memory_space<vmem>>, vector<1x8x2xf32>,
    return
  }
  func.func @transform_0(%arg0: i32) -> (i32, i32, i32) {
    %c0_i32 = arith.constant 0 : i32
    %c0_i32_0 = arith.constant 0 : i32
    %c0_i32_1 = arith.constant 0 : i32
    %c0_i32_2 = arith.constant 0 : i32
    return %c0_i32, %c0_i32_0, %c0_i32_1 : i32, i32, i32
  }
  func.func @transform_1(%arg0: i32) -> (i32, i32, i32) {
    %c0_i32 = arith.constant 0 : i32
    %c0_i32_0 = arith.constant 0 : i32
    %c0_i32_1 = arith.constant 0 : i32
    %c0_i32_2 = arith.constant 0 : i32
    return %c0_i32, %c0_i32_0, %c0_i32_1 : i32, i32, i32
  }
  func.func @transform_2(%arg0: i32) -> (i32, i32) {
    %c0_i32 = arith.constant 0 : i32
    %c0_i32_0 = arith.constant 0 : i32
    %c0_i32_1 = arith.constant 0 : i32
    return %c0_i32, %c0_i32_0 : i32, i32
  }
  func.func @transform_3(%arg0: i32) -> (i32, i32) {
    %c0_i32 = arith.constant 0 : i32
    %c0_i32_0 = arith.constant 0 : i32
    %c0_i32_1 = arith.constant 0 : i32
    return %c0_i32, %c0_i32_0 : i32, i32
  }
  func.func @transform_4(%arg0: i32) -> (i32, i32) {
    %c0_i32 = arith.constant 0 : i32
    %c0_i32_0 = arith.constant 0 : i32
    %c0_i32_1 = arith.constant 0 : i32
    return %c0_i32, %c0_i32_0 : i32, i32
  }
  func.func @transform_5(%arg0: i32) -> (i32, i32, i32) {
    %c0_i32 = arith.constant 0 : i32
    %c0_i32_0 = arith.constant 0 : i32
    %c0_i32_1 = arith.constant 0 : i32
    %c0_i32_2 = arith.constant 0 : i32
    return %c0_i32, %c0_i32_0, %c0_i32_1 : i32, i32, i32
  }
}

</mosaic_0001>

<bundles_post_ra>
// kernel: tpu_custom_call.1
= control target key start
LH: loop header
LB: loop body
LE: loop exit
PB: predicated region body
PF: predicated region fallthrough
CT: control target
= control target key end

     0   :  { %v119_v0 = vlaneseq  ;;  %v13729_v1 = vmov 0   ;;  %v13727_v3 = vmov 1   ;;  %vm434_vm0 = vcmask 261120   ;;  %s10483_s8 = smov 127   ;;  %s10484_s20 = smov 126   ;;  %s13721_s1 = inlined_call_operand.vmem [shape: f32[8,8,2], index: 1, kind: input, shape index: {}]   ;;  %s13722_s3 = inlined_call_operand.vmem [shape: f32[48,128], index: 3, kind: input, shape index: {}]   ;;  %s13723_s4 = inlined_call_operand.vmem [shape: f32[320,32], index: 4, kind: input, shape index: {}]   ;;  %s13724_s2 = inlined_call_operand.vmem [shape: f32[8,128], index: 2, kind: input, shape index: {}]   ;;  %s13725_s0 = inlined_call_operand.vmem [shape: f32[8,8,2], index: 0, kind: input, shape index: {}]   ;;  %s13726_s5 = inlined_call_operand.vmem [shape: f32[8,8,2], index: 5, kind: output, shape index: {}]  }
   0x1   :  { %10050 = vset.pattern.permute.xlu0 %v13729_v1  ;;  %v73_v2 = vld [vmem:[%s13721_s1] sm:$0xff]  ;;  %10053 = vset.pattern.permute.xlu1 %v13727_v3  ;;  %v10531_v6 = vld [vmem:[%s13722_s3 + $0x8] sm:$0xff]  ;;  %v13732_v23 = vmov 0.0   ;;  %v65_v30 = vld [vmem:[%s13723_s4 + $0x138] sm:$0xff]  ;;  %vm10481_vm1 = vmmov 0   ;;  %vm303_vm2 = vcmask 130048  }
   0x2   :  { %86 = vperm.xlu0 %10050, %v73_v2   ;;  %v10524_v4 = vshrl.u32 %v119_v0, 7  ;;  %v26_v10 = vld [vmem:[%s13723_s4] sm:$0xff]  ;;  %8769 = vmatprep.subr.mxu0 %v13732_v23  ;;  %v64_v31 = vld [vmem:[%s13723_s4 + $0x130] sm:$0xff]  ;;  %v10593_v35 = vld [vmem:[%s13723_s4 + $0x28] sm:$0xff]  ;;  %vm398_vm4 = vcmask 7168   ;;  %vm376_vm5 = vcmask 15360  }
   0x3   :  { %v10555_v14 = vld [vmem:[%s13722_s3] sm:$0xff]  ;;  %8798 = vmatprep.subr.mxu1 %v13732_v23  ;;  %8770 = vmatpush3.msra.mxu0 %v65_v30  ;;  %v10607_v38 = vld [vmem:[%s13723_s4 + $0x18] sm:$0xff]  ;;  %v10614_v39 = vld [vmem:[%s13723_s4 + $0x10] sm:$0xff]  ;;  %s10486_s14 = smov 124   ;;  %s10487_s26 = smov 123  }
   0x4   :  { %v728_v5 = vsub.s32 3, %v10524_v4  ;;  %v10538_v8 = vsub.s32 0, %v10524_v4  ;;  %v10541_v9 = vsub.s32 1, %v10524_v4  ;;  %v10575_v29 = vld [vmem:[%s13724_s2] sm:$0xff]  ;;  %8773 = vmatprep.mubr.msk.f32.mxu0 %vm10481_vm1, %v13732_v23  ;;  %8771 = vmatprep.subr.mxu0 %v13732_v23  ;;  %s10482_s2 = smov 112   ;;  %v451_v40 = vsub.s32 4, %v10524_v4 }
   0x5   :  { %8806 = vmatprep.mubr.msk.f32.mxu1 %vm10481_vm1, %v13732_v23  ;;  %8772 = vmatpush3.msra.mxu0 %v64_v31  ;;  %v10598_v37 = vld [vmem:[%s13723_s4 + $0x20] sm:$0xff]  ;;  %v456_v41 = vsub.s32 5, %v10524_v4  ;;  %v461_v50 = vsub.s32 6, %v10524_v4  ;;  %v10644_v57 = vld [vmem:[%s13723_s4 + $0x48] sm:$0xff]  ;;  %v10656_v59 = vld [vmem:[%s13723_s4 + $0x38] sm:$0xff]  ;;  %vm81_vm3 = vcmp.gt.f32.partialorder %v10575_v29, 0.0 }
   0x6   :  { %10051 = vset.pattern.permute.xlu0 %v13727_v3  ;;  %v10534_v7 = vrot.slane %v10531_v6, %v728_v5  ;;  %13820 = vst [vmem:[#allocation2_spill] sm:$0xff] %v10538_v8  ;;  %v10547_v12 = vrot.slane %v26_v10, %v10538_v8  ;;  %v10550_v13 = vrot.slane %v26_v10, %v10541_v9  ;;  %v10649_v58 = vld [vmem:[%s13723_s4 + $0x40] sm:$0xff]  ;;  %v10663_v60 = vld [vmem:[%s13723_s4 + $0x30] sm:$0xff]  ;;  %v10695_v31 = vld [vmem:[%s13722_s3 + $0x28] sm:$0xff]  ;;  %s10488_s19 = smov 122  }
   0x7   :  { %131 = vperm.xlu0 %10051, %v73_v2   ;;  %v10561_v18 = vrot.slane %v10555_v14, %v10538_v8  ;;  %8776 = vmatprep.subr.mxu0 %v13732_v23  ;;  %v10623_v42 = vrot.slane %v10555_v14, %v451_v40  ;;  %v10626_v44 = vrot.slane %v10555_v14, %v456_v41  ;;  %v10731_v40 = vld [vmem:[%s13723_s4 + $0x100] sm:$0xff]  ;;  %v10738_v41 = vld [vmem:[%s13723_s4 + $0xf8] sm:$0xff] }
   0x8   :  { %13821 = vst [vmem:[#allocation3_spill] sm:$0xff] %v10547_v12  ;;  %13822 = vst [vmem:[#allocation4_spill] sm:$0xff] %v10550_v13  ;;  %v10637_v51 = vrot.slane %v10555_v14, %v461_v50  ;;  %8799 = vmatpush3.msra.mxu1 %v10695_v31  ;;  %v10780_v50 = vld [vmem:[%s13723_s4 + $0xc8] sm:$0xff] }
   0x9   :  { %13823 = vst [vmem:[#allocation5_spill] sm:$0xff] %v10561_v18  ;;  %13824 = vst [vmem:[#allocation6_spill] sm:$0xff] %v10623_v42  ;;  %8800 = vmatprep.subr.mxu1 %v13732_v23 }
   0xa   :  { %13825 = vst [vmem:[#allocation7_spill] sm:$0xff] %v10626_v44  ;;  %13826 = vst [vmem:[#allocation8_spill] sm:$0xff] %v10637_v51 }
   0xb   :  { %10052 = vset.pattern.permute.xlu0 %v13729_v1 }
  0x7d   :  { %v87_v11 = vpop.permute.xlu0 %86 }
  0x7e   :  { %v123_v16 = vmul.f32 %v10547_v12, %v87_v11 }
  0x82   :  { %v132_v15 = vpop.permute.xlu0 %131 }
  0x83   :  { %v162_v17 = vmul.f32 %v10550_v13, %v132_v15  ;;  %v549_v15 = vsub.s32 7, %v10524_v4 }
  0x85   :  { %v169_v19 = vadd.f32 %v162_v17, %v123_v16  ;;  %v10674_v16 = vrot.slane %v10555_v14, %v549_v15 }
  0x87   :  { %v180_v20 = vadd.f32 %v10561_v18, %v169_v19  ;;  %13827 = vst [vmem:[#allocation9_spill] sm:$0xff] %v10674_v16 }
  0x89   :  { %v10564_v21 = vmax.f32 %v180_v20, 0.0 }
  0x8b   :  { %v435_v22 = vsel %vm434_vm0, %v10564_v21, 0.0 }
  0x8c   :  { %436 = vadd.xlane.f32.xlu1 %v435_v22 }
 0x115   :  { %v437_v24 = vpop.xlane.xlu1 %436 }
 0x116   :  { %v439_v25 = vmul.f32 0.03125, %v437_v24 }
 0x118   :  { %v440_v26 = vsub.f32 %v10564_v21, %v439_v25 }
 0x11a   :  { %v441_v27 = vmul.f32 %v440_v26, %v440_v26 }
 0x11c   :  { %v442_v28 = vsel %vm434_vm0, %v441_v27, 0.0 }
 0x11d   :  { %443 = vadd.xlane.f32.xlu1 %v442_v28 }
 0x12e   :  { %298 = vrot.lane.b32.xlu1 %v10575_v29, %s10482_s2  ;;  %v10709_v29 = vld [vmem:[%s13722_s3 + $0x18] sm:$0xff]  ;;  %s10485_s2 = smov 125  }
 0x1a6   :  { %v444_v32 = vpop.xlane.xlu1 %443 }
 0x1a7   :  { %v445_v33 = vmul.f32 0.03125, %v444_v32  ;;  %v10700_v32 = vld [vmem:[%s13722_s3 + $0x20] sm:$0xff] }
 0x1a8   :  { %8801 = vmatpush3.msra.mxu1 %v10700_v32 }
 0x1a9   :  { %v446_v34 = vadd.f32 1e-05, %v445_v33  ;;  %8802 = vmatprep.subr.mxu1 %v13732_v23 }
 0x1aa   :  { %v299_v36 = vpop.permute.xlu1 %298  ;;  %8803 = vmatpush3.msra.mxu1 %v10709_v29 }
 0x1ab   :  { %10081 = vrsqrt.f32 %v446_v34  ;;  %8774 = vmatmul.mubr.msk.f32.vlgmr.msra.gmra.mxu0 %vm303_vm2, %v299_v36  ;;  %v10716_v34 = vld [vmem:[%s13722_s3 + $0x10] sm:$0xff]  ;;  %8804 = vmatprep.subr.mxu1 %v13732_v23  ;;  %v10726_v36 = vld [vmem:[%s13723_s4 + $0x108] sm:$0xff] }
 0x1ac   :  { %8777 = vmatpush3.msra.mxu0 %v10593_v35  ;;  %8784 = vmatprep.mubr.msk.f32.mxu0 %vm10481_vm1, %v13732_v23 }
 0x1ad   :  { %8778 = vmatprep.subr.mxu0 %v13732_v23  ;;  %8805 = vmatpush3.msra.mxu1 %v10716_v34 }
 0x1ae   :  { %8779 = vmatpush3.msra.mxu0 %v10598_v37  ;;  %8844 = vmatprep.subr.mxu1 %v13732_v23 }
 0x1af   :  { %8780 = vmatprep.subr.mxu0 %v13732_v23 }
 0x1b0   :  { %8781 = vmatpush3.msra.mxu0 %v10607_v38 }
 0x1b1   :  { %8782 = vmatprep.subr.mxu0 %v13732_v23 }
 0x1b2   :  { %8783 = vmatpush3.msra.mxu0 %v10614_v39 }
 0x1b3   :  { %8787 = vmatprep.subr.mxu0 %v13732_v23 }
 0x1b8   :  { %v10082_v43 = vpop.eup %10081 }
 0x1b9   :  { %v448_v45 = vmul.f32 %v10082_v43, %v440_v26  ;;  %v10745_v43 = vld [vmem:[%s13723_s4 + $0xf0] sm:$0xff] }
 0x1bb   :  { %v453_v46 = vmul.f32 %v10623_v42, %v448_v45  ;;  %v10752_v45 = vld [vmem:[%s13723_s4 + $0xe8] sm:$0xff] }
 0x1bd   :  { %v458_v47 = vadd.f32 %v10626_v44, %v453_v46  ;;  %v10759_v46 = vld [vmem:[%s13723_s4 + $0xe0] sm:$0xff] }
 0x1bf   :  { %8785 = vmatmul.mubr.msk.f32.vlgmr.msra.gmra.mxu0 %vm434_vm0, %v458_v47  ;;  %v10766_v47 = vld [vmem:[%s13723_s4 + $0xd8] sm:$0xff] }
 0x1c0   :  { %8795 = vmatprep.mubr.msk.f32.mxu0 %vm10481_vm1, %v13732_v23  ;;  %8788 = vmatpush3.msra.mxu0 %v10644_v57 }
 0x1c1   :  { %8789 = vmatprep.subr.mxu0 %v13732_v23 }
 0x1c2   :  { %8790 = vmatpush3.msra.mxu0 %v10649_v58 }
 0x1c3   :  { %8791 = vmatprep.subr.mxu0 %v13732_v23 }
 0x1c4   :  { %8792 = vmatpush3.msra.mxu0 %v10656_v59 }
 0x1c5   :  { %8793 = vmatprep.subr.mxu0 %v13732_v23 }
 0x1c6   :  { %8794 = vmatpush3.msra.mxu0 %v10663_v60 }
 0x1c7   :  { %8809 = vmatprep.subr.mxu0 %v13732_v23 }
 0x26b   :  { %v10633_v48 = vpop.f32.mrf.mxu0 }
 0x26d   :  { %v8775_v49 = vpop.f32.mrf.mxu0 }
 0x26e   :  { %v10773_v49 = vld [vmem:[%s13723_s4 + $0xd0] sm:$0xff] }
 0x27f   :  { %v532_v52 = vpop.f32.mrf.mxu0 }
 0x280   :  { %v533_v53 = vadd.f32 %v532_v52, %v10637_v51  ;;  %v10787_v52 = vld [vmem:[%s13723_s4 + $0xc0] sm:$0xff] }
 0x281   :  { %v8786_v54 = vpop.f32.mrf.mxu0 }
 0x282   :  { %v536_v55 = vmul.f32 %v533_v53, %v533_v53  ;;  %v10801_v54 = vld [vmem:[%s13723_s4 + $0xb0] sm:$0xff] }
 0x284   :  { %v537_v56 = vsel %vm434_vm0, %v536_v55, 0.0  ;;  %v10808_v55 = vld [vmem:[%s13723_s4 + $0xa8] sm:$0xff] }
 0x285   :  { %538 = vadd.xlane.f32.xlu0 %v537_v56 }
 0x30e   :  { %v539_v61 = vpop.xlane.xlu0 %538 }
 0x30f   :  { %v540_v62 = vmul.f32 0.17677669, %v539_v61 }
 0x311   :  { %v541_v63 = vsub.f32 %v540_v62, %v540_v62 }
 0x313   :  { %v542_v0 = vmul.f32 1.442695, %v541_v63 }
 0x315   :  { %10083 = vpow2.f32 %v542_v0  ;;  %v10816_v0 = vrot.slane %v10531_v6, %v10538_v8 }
 0x322   :  { %v10084_v2 = vpop.eup %10083 }
 0x323   :  { %10085 = vrcp.f32 %v10084_v2  ;;  %v545_v5 = vmul.f32 %v10084_v2, %v533_v53  ;;  %v10794_v53 = vld [vmem:[%s13723_s4 + $0xb8] sm:$0xff] }
 0x330   :  { %v10086_v10 = vpop.eup %10085 }
 0x331   :  { %v546_v11 = vmul.f32 %v10086_v10, %v545_v5  ;;  %v10820_v10 = vrot.slane %v10531_v6, %v10541_v9 }
 0x333   :  { %8796 = vmatmul.mubr.msk.f32.vlgmr.msra.gmra.mxu0 %vm434_vm0, %v546_v11 }
 0x334   :  { %8841 = vmatprep.mubr.msk.f32.mxu0 %vm10481_vm1, %v13732_v23  ;;  %8810 = vmatpush3.msra.mxu0 %v10726_v36 }
 0x335   :  { %8811 = vmatprep.subr.mxu0 %v13732_v23 }
 0x336   :  { %8812 = vmatpush3.msra.mxu0 %v10731_v40 }
 0x337   :  { %8813 = vmatprep.subr.mxu0 %v13732_v23 }
 0x338   :  { %8814 = vmatpush3.msra.mxu0 %v10738_v41 }
 0x339   :  { %8815 = vmatprep.subr.mxu0 %v13732_v23 }
 0x33a   :  { %8816 = vmatpush3.msra.mxu0 %v10745_v43 }
 0x33b   :  { %8817 = vmatprep.subr.mxu0 %v13732_v23 }
 0x33c   :  { %8818 = vmatpush3.msra.mxu0 %v10752_v45 }
 0x33d   :  { %8819 = vmatprep.subr.mxu0 %v13732_v23 }
 0x33e   :  { %8820 = vmatpush3.msra.mxu0 %v10759_v46 }
 0x33f   :  { %8821 = vmatprep.subr.mxu0 %v13732_v23 }
 0x340   :  { %8822 = vmatpush3.msra.mxu0 %v10766_v47 }
 0x341   :  { %8823 = vmatprep.subr.mxu0 %v13732_v23 }
 0x342   :  { %8824 = vmatpush3.msra.mxu0 %v10773_v49 }
 0x343   :  { %8825 = vmatprep.subr.mxu0 %v13732_v23 }
 0x344   :  { %8826 = vmatpush3.msra.mxu0 %v10780_v50 }
 0x345   :  { %8827 = vmatprep.subr.mxu0 %v13732_v23 }
 0x346   :  { %8828 = vmatpush3.msra.mxu0 %v10787_v52 }
 0x347   :  { %8829 = vmatprep.subr.mxu0 %v13732_v23 }
 0x348   :  { %8830 = vmatpush3.msra.mxu0 %v10794_v53 }
 0x349   :  { %8831 = vmatprep.subr.mxu0 %v13732_v23 }
 0x34a   :  { %8832 = vmatpush3.msra.mxu0 %v10801_v54 }
 0x34b   :  { %8833 = vmatprep.subr.mxu0 %v13732_v23 }
 0x34c   :  { %8834 = vmatpush3.msra.mxu0 %v10808_v55 }
 0x34d   :  { %8835 = vmatprep.subr.mxu0 %v13732_v23 }
 0x3f3   :  { %v620_v17 = vpop.f32.mrf.mxu0 }
 0x3f4   :  { %v621_v19 = vadd.f32 %v620_v17, %v10674_v16 }
 0x3f5   :  { %v8797_v20 = vpop.f32.mrf.mxu0 }
 0x3f6   :  { %v10678_v22 = vadd.f32 %v621_v19, %v10564_v21  ;;  %v10690_v21 = vsel %vm81_vm3, 1.0, %v13732_v23 }
 0x3f7   :  { %13828 = vst [vmem:[#allocation10_spill] sm:$0xff] %v10690_v21  ;;  %v399_v33 = vsel %vm398_vm4, %v10690_v21, 0.0  ;;  %vm1362_vm6 = vcmp.gt.f32.partialorder %v10690_v21, 0.5 }
 0x3f8   :  { %v625_v24 = vsel %vm434_vm0, %v10678_v22, 0.0 }
 0x3f9   :  { %626 = vadd.xlane.f32.xlu1 %v625_v24 }
 0x482   :  { %v627_v25 = vpop.xlane.xlu1 %626 }
 0x483   :  { %v628_v26 = vmul.f32 0.03125, %v627_v25 }
 0x485   :  { %v10683_v27 = vsub.f32 %v10678_v22, %v628_v26 }
 0x487   :  { %v630_v28 = vmul.f32 %v10683_v27, %v10683_v27 }
 0x489   :  { %v631_v30 = vsel %vm434_vm0, %v630_v28, 0.0  ;;  %v10831_v28 = vld [vmem:[%s13723_s4 + $0xa0] sm:$0xff] }
 0x48a   :  { %632 = vadd.xlane.f32.xlu0 %v631_v30  ;;  %8836 = vmatpush3.msra.mxu0 %v10831_v28  ;;  %v10845_v30 = vld [vmem:[%s13723_s4 + $0x90] sm:$0xff] }
 0x48b   :  { %8837 = vmatprep.subr.mxu0 %v13732_v23 }
 0x48e   :  { %400 = vadd.xlane.f32.xlu0 %v399_v33 }
 0x4a4   :  { %387 = vperm.xlu0 %10052, %v10690_v21  }
 0x513   :  { %v633_v56 = vpop.xlane.xlu0 %632 }
 0x514   :  { %v634_v61 = vmul.f32 0.03125, %v633_v56 }
 0x516   :  { %v635_v62 = vadd.f32 1e-05, %v634_v61 }
 0x517   :  { %v401_v63 = vpop.xlane.xlu0 %400 }
 0x518   :  { %10087 = vrsqrt.f32 %v635_v62  ;;  %v402_v2 = vrot.slane %v401_v63, 4  ;;  %v10851_v62 = vld [vmem:[%s13725_s0] sm:$0xff] }
 0x519   :  { %13829 = vst [vmem:[#allocation11_spill] sm:$0xff] %v10851_v62 }
 0x51a   :  { %v403_v15 = vadd.f32 %v402_v2, %v401_v63 }
 0x51c   :  { %v404_v19 = vrot.slane %v403_v15, 2 }
 0x51e   :  { %v405_v24 = vadd.f32 %v404_v19, %v403_v15 }
 0x51f   :  { %v388_v61 = vpop.permute.xlu0 %387 }
 0x520   :  { %v406_v25 = vrot.slane %v405_v24, 1  ;;  %v390_v63 = vmul.f32 %v388_v61, %v10851_v62  ;;  %v10883_v61 = vld [vmem:[%s13723_s4 + $0x70] sm:$0xff] }
 0x521   :  { %13833 = vst [vmem:[#allocation15_spill] sm:$0xff] %v10883_v61 }
 0x522   :  { %v407_v26 = vadd.f32 %v406_v25, %v405_v24  ;;  %v391_v2 = vsel %vm376_vm5, %v390_v63, 0.0  ;;  %v13731_v63 = vsub.s32 2, %v10524_v4 }
 0x524   :  { %10025 = vpush %v407_v26  ;;  %v10864_v26 = vld [vmem:[%s13723_s4 + $0x88] sm:$0xff] }
 0x525   :  { %v10088_v5 = vpop.eup %10087  ;;  %13830 = vst [vmem:[#allocation12_spill] sm:$0xff] %v10864_v26 }
 0x526   :  { %v637_v11 = vmul.f32 %v10088_v5, %v10683_v27  ;;  %v10838_v27 = vld [vmem:[%s13723_s4 + $0x98] sm:$0xff]  ;;  %v392_v5 = vrot.slane %v391_v2, 4 }
 0x527   :  { %8838 = vmatpush3.msra.mxu0 %v10838_v27 }
 0x528   :  { %v642_v17 = vmul.f32 %v10816_v0, %v637_v11  ;;  %8839 = vmatprep.subr.mxu0 %v13732_v23  ;;  %v393_v11 = vadd.f32 %v392_v5, %v391_v2  ;;  %v10893_v2 = vrot.slane %v10531_v6, %v13731_v63 }
 0x529   :  { %8840 = vmatpush3.msra.mxu0 %v10845_v30 }
 0x52a   :  { %v647_v20 = vadd.f32 %v10820_v10, %v642_v17  ;;  %8888 = vmatprep.subr.mxu0 %v13732_v23  ;;  %v394_v15 = vrot.slane %v393_v11, 2 }
 0x52c   :  { %8807 = vmatmul.mubr.msk.f32.vlgmr.msra.gmra.mxu1 %vm434_vm0, %v647_v20  ;;  %v395_v17 = vadd.f32 %v394_v15, %v393_v11 }
 0x52d   :  { %8852 = vmatprep.mubr.msk.f32.mxu1 %vm10481_vm1, %v13732_v23  ;;  %8845 = vmatpush3.msra.mxu1 %v10864_v26 }
 0x52e   :  { %v396_v19 = vrot.slane %v395_v17, 1  ;;  %8846 = vmatprep.subr.mxu1 %v13732_v23 }
 0x530   :  { %v397_v20 = vadd.f32 %v396_v19, %v395_v17  ;;  %v10909_v19 = vld [vmem:[%s13723_s4 + $0x8] sm:$0xff] }
 0x555   :  { %s10026_s9 = spop %10025 }
 0x556   :  { %v409_v33 = vstv %s10026_s9 }
 0x557   :  { %v410_v56 = vmax.f32 %v409_v33, 1e-06  ;;  %v10869_v33 = vld [vmem:[%s13723_s4 + $0x80] sm:$0xff] }
 0x558   :  { %13831 = vst [vmem:[#allocation13_spill] sm:$0xff] %v10869_v33  ;;  %8847 = vmatpush3.msra.mxu1 %v10869_v33 }
 0x559   :  { %10089 = vrcp.f32 %v410_v56  ;;  %v10876_v56 = vld [vmem:[%s13723_s4 + $0x78] sm:$0xff]  ;;  %8848 = vmatprep.subr.mxu1 %v13732_v23 }
 0x55a   :  { %13832 = vst [vmem:[#allocation14_spill] sm:$0xff] %v10876_v56  ;;  %8849 = vmatpush3.msra.mxu1 %v10876_v56 }
 0x55b   :  { %8850 = vmatprep.subr.mxu1 %v13732_v23 }
 0x55c   :  { %8851 = vmatpush3.msra.mxu1 %v10883_v61 }
 0x55d   :  { %8855 = vmatprep.subr.mxu1 %v13732_v23 }
 0x566   :  { %v10090_v24 = vpop.eup %10089 }
 0x567   :  { %v412_v25 = vmul.f32 %v10090_v24, %v397_v20  ;;  %v10913_v24 = vrot.slane %v10909_v19, %v10538_v8 }
 0x569   :  { %420 = vperm.xlu1 %10053, %v412_v25   ;;  %13834 = vst [vmem:[#allocation16_spill] sm:$0xff] %v10913_v24 }
 0x56d   :  { %10054 = vset.pattern.permute.xlu1 %v13729_v1 }
 0x56e   :  { %196 = vperm.xlu1 %10054, %v10851_v62  }
 0x572   :  { %10055 = vset.pattern.permute.xlu1 %v13727_v3 }
 0x573   :  { %241 = vperm.xlu1 %10055, %v10851_v62  }
 0x577   :  { %10056 = vset.pattern.permute.xlu1 %v13729_v1  ;;  %v10924_v1 = vrot.slane %v10555_v14, %v10541_v9 }
 0x578   :  { %415 = vperm.xlu1 %10056, %v412_v25   ;;  %v10917_v25 = vrot.slane %v10909_v19, %v10541_v9  ;;  %v13838_v9 = vmov 0.0  }
 0x579   :  { %13836 = vst [vmem:[#allocation18_spill] sm:$0xff] %v10924_v1  ;;  %377 = vst.msk [vmem:[%s13726_s5] sm:$0xff] %vm376_vm5, %v13838_v9 }
 0x57a   :  { %13835 = vst [vmem:[#allocation17_spill] sm:$0xff] %v10917_v25  ;;  %384 = vst.msk [vmem:[%s13726_s5 + $0x38] sm:$0xff] %vm376_vm5, %v13838_v9 }
 0x57b   :  { %378 = vst.msk [vmem:[%s13726_s5 + $0x8] sm:$0xff] %vm376_vm5, %v13838_v9  ;;  %379 = vst.msk [vmem:[%s13726_s5 + $0x10] sm:$0xff] %vm376_vm5, %v13838_v9 }
 0x57c   :  { %380 = vst.msk [vmem:[%s13726_s5 + $0x18] sm:$0xff] %vm376_vm5, %v13838_v9  ;;  %381 = vst.msk [vmem:[%s13726_s5 + $0x20] sm:$0xff] %vm376_vm5, %v13838_v9 }
 0x57d   :  { %382 = vst.msk [vmem:[%s13726_s5 + $0x28] sm:$0xff] %vm376_vm5, %v13838_v9  ;;  %383 = vst.msk [vmem:[%s13726_s5 + $0x30] sm:$0xff] %vm376_vm5, %v13838_v9 }
 0x5e4   :  { %v421_v6 = vpop.permute.xlu1 %420 }
 0x5e9   :  { %v197_v20 = vpop.permute.xlu1 %196 }
 0x5ec   :  { %v721_v5 = vpop.f32.mrf.mxu1 }
 0x5ed   :  { %v722_v11 = vadd.f32 %v721_v5, %v10893_v2  ;;  %v423_v5 = vmul.f32 %v421_v6, %v10909_v19 }
 0x5ee   :  { %v8808_v15 = vpop.f32.mrf.mxu1 }
 0x5ef   :  { %v725_v17 = vmax.f32 %v722_v11, 0.0  ;;  %v233_v11 = vmul.f32 %v10913_v24, %v197_v20  ;;  %v242_v15 = vpop.permute.xlu1 %241  ;;  %v425_v3 = vrot.slane %v423_v5, 1  ;;  %v10932_v20 = vld [vmem:[%s13723_s4 + $0x68] sm:$0xff]  ;;  %v13842_v5 = vsub.s32 2, %v10524_v4 }
 0x5f0   :  { %13837 = vst [vmem:[#allocation19_spill] sm:$0xff] %v10932_v20 }
 0x5f1   :  { %8842 = vmatmul.mubr.f32.vlgmr.msra.gmra.mxu0 %v725_v17  ;;  %v272_v17 = vmul.f32 %v10917_v25, %v242_v15 }
 0x5f2   :  { %8889 = vmatpush3.msra.mxu0 %v10695_v31  ;;  %8896 = vmatprep.mubr.msk.f32.mxu0 %vm10481_vm1, %v13732_v23 }
 0x5f3   :  { %8890 = vmatprep.subr.mxu0 %v13732_v23  ;;  %v279_v63 = vadd.f32 %v272_v17, %v233_v11  ;;  %v10976_v11 = vrot.slane %v10555_v14, %v13842_v5 }
 0x5f4   :  { %8891 = vmatpush3.msra.mxu0 %v10700_v32 }
 0x5f5   :  { %8892 = vmatprep.subr.mxu0 %v13732_v23  ;;  %v290_v61 = vadd.f32 %v10924_v1, %v279_v63  ;;  %13843 = vst [vmem:[#allocation23_spill] sm:$0xff] %v10976_v11 }
 0x5f6   :  { %8893 = vmatpush3.msra.mxu0 %v10709_v29 }
 0x5f7   :  { %8894 = vmatprep.subr.mxu0 %v13732_v23 }
 0x5f8   :  { %8895 = vmatpush3.msra.mxu0 %v10716_v34 }
 0x5f9   :  { %8934 = vmatprep.subr.mxu0 %v13732_v23  ;;  %v416_v23 = vpop.permute.xlu1 %415 }
 0x5fa   :  { %v418_v62 = vmul.f32 %v416_v23, %v10909_v19  ;;  %v10949_v23 = vld [vmem:[%s13723_s4 + $0x58] sm:$0xff] }
 0x5fb   :  { %13840 = vst [vmem:[#allocation21_spill] sm:$0xff] %v10949_v23 }
 0x5fc   :  { %v427_v56 = vadd.f32 %v425_v3, %v418_v62  ;;  %v10942_v3 = vld [vmem:[%s13723_s4 + $0x60] sm:$0xff]  ;;  %v10956_v62 = vld [vmem:[%s13723_s4 + $0x50] sm:$0xff] }
 0x5fd   :  { %13839 = vst [vmem:[#allocation20_spill] sm:$0xff] %v10942_v3  ;;  %13841 = vst [vmem:[#allocation22_spill] sm:$0xff] %v10956_v62 }
 0x5fe   :  { %v431_v33 = vrot.slane %v427_v56, %v10538_v8 }
 0x600   :  { %v432_v6 = vsub.f32 %v290_v61, %v431_v33 }
 0x602   :  { %v433_v26 = vmax.f32 %v432_v6, 0.0 }
 0x604   :  { %8853 = vmatmul.mubr.msk.f32.vlgmr.msra.gmra.mxu1 %vm434_vm0, %v433_v26 }
 0x605   :  { %8856 = vmatpush3.msra.mxu1 %v10932_v20  ;;  %8863 = vmatprep.mubr.msk.f32.mxu1 %vm10481_vm1, %v13838_v9 }
 0x606   :  { %8857 = vmatprep.subr.mxu1 %v13838_v9 }
 0x607   :  { %8858 = vmatpush3.msra.mxu1 %v10942_v3 }
 0x608   :  { %8859 = vmatprep.subr.mxu1 %v13838_v9 }
 0x609   :  { %8860 = vmatpush3.msra.mxu1 %v10949_v23 }
 0x60a   :  { %8861 = vmatprep.subr.mxu1 %v13838_v9 }
 0x60b   :  { %8862 = vmatpush3.msra.mxu1 %v10956_v62 }
 0x60c   :  { %8866 = vmatprep.subr.mxu1 %v13838_v9 }
 0x6b1   :  { %v796_v26 = vpop.f32.mrf.mxu0 }
 0x6b2   :  { %v797_v33 = vadd.f32 %v796_v26, %v10534_v7 }
 0x6b3   :  { %v8843_v56 = vpop.f32.mrf.mxu0 }
 0x6b4   :  { %v800_v61 = vadd.f32 %v797_v33, %v10678_v22 }
 0x6b6   :  { %8864 = vmatmul.mubr.msk.f32.vlgmr.msra.gmra.mxu1 %vm434_vm0, %v800_v61 }
 0x6b7   :  { %8867 = vmatpush3.msra.mxu1 %v10593_v35  ;;  %8874 = vmatprep.mubr.msk.f32.mxu1 %vm10481_vm1, %v13838_v9 }
 0x6b8   :  { %8868 = vmatprep.subr.mxu1 %v13838_v9 }
 0x6b9   :  { %8869 = vmatpush3.msra.mxu1 %v10598_v37 }
 0x6ba   :  { %8870 = vmatprep.subr.mxu1 %v13838_v9 }
 0x6bb   :  { %8871 = vmatpush3.msra.mxu1 %v10607_v38 }
 0x6bc   :  { %8872 = vmatprep.subr.mxu1 %v13838_v9 }
 0x6bd   :  { %8873 = vmatpush3.msra.mxu1 %v10614_v39 }
 0x6be   :  { %8877 = vmatprep.subr.mxu1 %v13838_v9 }
 0x6c4   :  { %v870_v22 = vpop.f32.mrf.mxu1 }
 0x6c6   :  { %v8854_v63 = vpop.f32.mrf.mxu1 }
 0x776   :  { %v943_v15 = vpop.f32.mrf.mxu1 }
 0x777   :  { %v944_v17 = vadd.f32 %v943_v15, %v870_v22 }
 0x778   :  { %v8865_v6 = vpop.f32.mrf.mxu1 }
 0x779   :  { %v10979_v26 = vadd.f32 %v10976_v11, %v944_v17 }
 0x77b   :  { %v952_v33 = vsel %vm434_vm0, %v10979_v26, 0.0 }
 0x77c   :  { %953 = vadd.xlane.f32.xlu1 %v952_v33 }
 0x805   :  { %v954_v56 = vpop.xlane.xlu1 %953 }
 0x806   :  { %v955_v61 = vmul.f32 0.03125, %v954_v56 }
 0x808   :  { %v956_v62 = vsub.f32 %v10979_v26, %v955_v61 }
 0x80a   :  { %v957_v63 = vmul.f32 %v956_v62, %v956_v62 }
 0x80c   :  { %v958_v4 = vsel %vm434_vm0, %v957_v63, 0.0 }
 0x80d   :  { %959 = vadd.xlane.f32.xlu0 %v958_v4 }
 0x896   :  { %v960_v5 = vpop.xlane.xlu0 %959 }
 0x897   :  { %v961_v23 = vmul.f32 0.03125, %v960_v5 }
 0x899   :  { %v962_v3 = vadd.f32 1e-05, %v961_v23 }
 0x89b   :  { %10091 = vrsqrt.f32 %v962_v3 }
 0x8a8   :  { %v10092_v22 = vpop.eup %10091 }
 0x8a9   :  { %v964_v15 = vmul.f32 %v10092_v22, %v956_v62 }
 0x8ab   :  { %v965_v17 = vmul.f32 %v964_v15, %v10623_v42 }
 0x8ad   :  { %v966_v6 = vadd.f32 %v965_v17, %v10626_v44 }
 0x8af   :  { %8875 = vmatmul.mubr.msk.f32.vlgmr.msra.gmra.mxu1 %vm434_vm0, %v966_v6 }
 0x8b0   :  { %8878 = vmatpush3.msra.mxu1 %v10644_v57  ;;  %8885 = vmatprep.mubr.msk.f32.mxu1 %vm10481_vm1, %v13838_v9 }
 0x8b1   :  { %8879 = vmatprep.subr.mxu1 %v13838_v9 }
 0x8b2   :  { %8880 = vmatpush3.msra.mxu1 %v10649_v58 }
 0x8b3   :  { %8881 = vmatprep.subr.mxu1 %v13838_v9 }
 0x8b4   :  { %8882 = vmatpush3.msra.mxu1 %v10656_v59 }
 0x8b5   :  { %8883 = vmatprep.subr.mxu1 %v13838_v9 }
 0x8b6   :  { %8884 = vmatpush3.msra.mxu1 %v10663_v60 }
 0x8b7   :  { %8899 = vmatprep.subr.mxu1 %v13838_v9 }
 0x96f   :  { %v1036_v3 = vpop.f32.mrf.mxu1 }
 0x970   :  { %v1037_v23 = vadd.f32 %v1036_v3, %v10637_v51 }
 0x971   :  { %v8876_v62 = vpop.f32.mrf.mxu1 }
 0x972   :  { %v1040_v33 = vmul.f32 %v1037_v23, %v1037_v23 }
 0x974   :  { %v1041_v56 = vsel %vm434_vm0, %v1040_v33, 0.0 }
 0x975   :  { %1042 = vadd.xlane.f32.xlu0 %v1041_v56 }
 0x9fe   :  { %v1043_v61 = vpop.xlane.xlu0 %1042 }
 0x9ff   :  { %v1044_v63 = vmul.f32 0.17677669, %v1043_v61  ;;  %v13844_v61 = vmov 0  }
 0xa01   :  { %v1045_v4 = vsub.f32 %v1044_v63, %v1044_v63  ;;  %v1363_v63 = vsel %vm1362_vm6, 1, %v13844_v61 }
 0xa03   :  { %v1046_v5 = vmul.f32 1.442695, %v1045_v4  ;;  %v74_v4 = vld [vmem:[%s13721_s1 + $0x8] sm:$0xff] }
 0xa05   :  { %10093 = vpow2.f32 %v1046_v5  ;;  %v13845_v5 = vmov 1  }
 0xa12   :  { %v10094_v22 = vpop.eup %10093 }
 0xa13   :  { %10095 = vrcp.f32 %v10094_v22  ;;  %v1049_v15 = vmul.f32 %v10094_v22, %v1037_v23 }
 0xa20   :  { %v10096_v17 = vpop.eup %10095 }
 0xa21   :  { %v1050_v6 = vmul.f32 %v10096_v17, %v1049_v15 }
 0xa23   :  { %8886 = vmatmul.mubr.msk.f32.vlgmr.msra.gmra.mxu1 %vm434_vm0, %v1050_v6 }
 0xa24   :  { %8900 = vmatpush3.msra.mxu1 %v10726_v36  ;;  %8931 = vmatprep.mubr.msk.f32.mxu1 %vm10481_vm1, %v13838_v9 }
 0xa25   :  { %8901 = vmatprep.subr.mxu1 %v13838_v9 }
 0xa26   :  { %8902 = vmatpush3.msra.mxu1 %v10731_v40 }
 0xa27   :  { %8903 = vmatprep.subr.mxu1 %v13838_v9 }
 0xa28   :  { %8904 = vmatpush3.msra.mxu1 %v10738_v41 }
 0xa29   :  { %8905 = vmatprep.subr.mxu1 %v13838_v9 }
 0xa2a   :  { %8906 = vmatpush3.msra.mxu1 %v10745_v43 }
 0xa2b   :  { %8907 = vmatprep.subr.mxu1 %v13838_v9 }
 0xa2c   :  { %8908 = vmatpush3.msra.mxu1 %v10752_v45 }
 0xa2d   :  { %8909 = vmatprep.subr.mxu1 %v13838_v9 }
 0xa2e   :  { %8910 = vmatpush3.msra.mxu1 %v10759_v46 }
 0xa2f   :  { %8911 = vmatprep.subr.mxu1 %v13838_v9 }
 0xa30   :  { %8912 = vmatpush3.msra.mxu1 %v10766_v47 }
 0xa31   :  { %8913 = vmatprep.subr.mxu1 %v13838_v9 }
 0xa32   :  { %8914 = vmatpush3.msra.mxu1 %v10773_v49 }
 0xa33   :  { %8915 = vmatprep.subr.mxu1 %v13838_v9 }
 0xa34   :  { %8916 = vmatpush3.msra.mxu1 %v10780_v50 }
 0xa35   :  { %8917 = vmatprep.subr.mxu1 %v13838_v9 }
 0xa36   :  { %8918 = vmatpush3.msra.mxu1 %v10787_v52 }
 0xa37   :  { %8919 = vmatprep.subr.mxu1 %v13838_v9 }
 0xa38   :  { %8920 = vmatpush3.msra.mxu1 %v10794_v53 }
 0xa39   :  { %8921 = vmatprep.subr.mxu1 %v13838_v9 }
 0xa3a   :  { %8922 = vmatpush3.msra.mxu1 %v10801_v54 }
 0xa3b   :  { %8923 = vmatprep.subr.mxu1 %v13838_v9 }
 0xa3c   :  { %8924 = vmatpush3.msra.mxu1 %v10808_v55 }
 0xa3d   :  { %8925 = vmatprep.subr.mxu1 %v13838_v9 }
 0xa3e   :  { %8926 = vmatpush3.msra.mxu1 %v10831_v28 }
 0xa3f   :  { %8927 = vmatprep.subr.mxu1 %v13838_v9 }
 0xa40   :  { %8928 = vmatpush3.msra.mxu1 %v10838_v27 }
 0xa41   :  { %8929 = vmatprep.subr.mxu1 %v13838_v9 }
 0xa42   :  { %8930 = vmatpush3.msra.mxu1 %v10845_v30 }
 0xa43   :  { %8978 = vmatprep.subr.mxu1 %v13838_v9 }
 0xae3   :  { %v1120_v3 = vpop.f32.mrf.mxu1 }
 0xae4   :  { %v1121_v23 = vadd.f32 %v1120_v3, %v10674_v16 }
 0xae5   :  { %v8887_v62 = vpop.f32.mrf.mxu1 }
 0xae6   :  { %v11037_v33 = vadd.f32 %v1121_v23, %v10979_v26 }
 0xae8   :  { %v1125_v56 = vsel %vm434_vm0, %v11037_v33, 0.0 }
 0xae9   :  { %1126 = vadd.xlane.f32.xlu1 %v1125_v56 }
 0xafa   :  { %1365 = vperm.xlu1 %10056, %v1363_v63  }
 0xafe   :  { %10057 = vset.pattern.permute.xlu1 %v13845_v5 }
 0xaff   :  { %135 = vperm.xlu1 %10057, %v74_v4  }
 0xb03   :  { %10058 = vset.pattern.permute.xlu1 %v13844_v61 }
 0xb72   :  { %v1127_v26 = vpop.xlane.xlu1 %1126 }
 0xb73   :  { %v1128_v22 = vmul.f32 0.03125, %v1127_v26 }
 0xb75   :  { %v1129_v15 = vsub.f32 %v11037_v33, %v1128_v22 }
 0xb76   :  { %v11050_v3 = vpop.permute.xlu1 %1365 }
 0xb77   :  { %v1130_v17 = vmul.f32 %v1129_v15, %v1129_v15  ;;  %vm1367_vm7 = vcmp.eq.s32.totalorder %v11050_v3, 1 }
 0xb79   :  { %v1131_v6 = vsel %vm434_vm0, %v1130_v17, 0.0 }
 0xb7a   :  { %1132 = vadd.xlane.f32.xlu0 %v1131_v6  ;;  %v136_v63 = vpop.permute.xlu1 %135 }
 0xb7b   :  { %v163_v11 = vmul.f32 %v10550_v13, %v136_v63 }
 0xb90   :  { %91 = vperm.xlu0 %10052, %v74_v4  }
 0xc03   :  { %v1133_v23 = vpop.xlane.xlu0 %1132 }
 0xc04   :  { %v1134_v62 = vmul.f32 0.03125, %v1133_v23 }
 0xc06   :  { %v1135_v56 = vadd.f32 1e-05, %v1134_v62 }
 0xc08   :  { %10097 = vrsqrt.f32 %v1135_v56 }
 0xc0b   :  { %v92_v20 = vpop.permute.xlu0 %91 }
 0xc0c   :  { %v124_v1 = vmul.f32 %v10547_v12, %v92_v20 }
 0xc0e   :  { %v170_v26 = vadd.f32 %v163_v11, %v124_v1  ;;  %v11067_v1 = vld [vmem:[%s13723_s4 + $0x128] sm:$0xff] }
 0xc10   :  { %v181_v22 = vadd.f32 %v10561_v18, %v170_v26 }
 0xc12   :  { %v11055_v25 = vmax.f32 %v181_v22, 0.0 }
 0xc14   :  { %v1513_v4 = vsel %vm434_vm0, %v11055_v25, 0.0 }
 0xc15   :  { %v10098_v17 = vpop.eup %10097  ;;  %1514 = vadd.xlane.f32.xlu0 %v1513_v4 }
 0xc16   :  { %v1137_v6 = vmul.f32 %v10098_v17, %v1129_v15 }
 0xc18   :  { %v1138_v23 = vmul.f32 %v1137_v6, %v10816_v0 }
 0xc1a   :  { %v1139_v62 = vadd.f32 %v1138_v23, %v10820_v10 }
 0xc1c   :  { %8897 = vmatmul.mubr.msk.f32.vlgmr.msra.gmra.mxu0 %vm434_vm0, %v1139_v62 }
 0xc1d   :  { %8942 = vmatprep.mubr.msk.f32.mxu0 %vm10481_vm1, %v13838_v9  ;;  %8935 = vmatpush3.msra.mxu0 %v11067_v1 }
 0xc1e   :  { %8936 = vmatprep.subr.mxu0 %v13838_v9 }
 0xcdc   :  { %v1209_v20 = vpop.f32.mrf.mxu0 }
 0xcdd   :  { %v1210_v11 = vadd.f32 %v1209_v20, %v10893_v2 }
 0xcde   :  { %v8898_v15 = vpop.f32.mrf.mxu0 }
 0xcdf   :  { %v1213_v56 = vmax.f32 %v1210_v11, 0.0 }
 0xce1   :  { %8932 = vmatmul.mubr.f32.vlgmr.msra.gmra.mxu1 %v1213_v56 }
 0xce2   :  { %8979 = vmatpush3.msra.mxu1 %v10695_v31  ;;  %8986 = vmatprep.mubr.msk.f32.mxu1 %vm10481_vm1, %v13838_v9  ;;  %v11085_v31 = vld [vmem:[%s13723_s4 + $0x120] sm:$0xff] }
 0xce3   :  { %8980 = vmatprep.subr.mxu1 %v13838_v9  ;;  %8937 = vmatpush3.msra.mxu0 %v11085_v31 }
 0xce4   :  { %8981 = vmatpush3.msra.mxu1 %v10700_v32  ;;  %8938 = vmatprep.subr.mxu0 %v13838_v9  ;;  %v11092_v32 = vld [vmem:[%s13723_s4 + $0x118] sm:$0xff] }
 0xce5   :  { %8982 = vmatprep.subr.mxu1 %v13838_v9  ;;  %8939 = vmatpush3.msra.mxu0 %v11092_v32 }
 0xce6   :  { %8983 = vmatpush3.msra.mxu1 %v10709_v29  ;;  %8940 = vmatprep.subr.mxu0 %v13838_v9  ;;  %v11099_v29 = vld [vmem:[%s13723_s4 + $0x110] sm:$0xff] }
 0xce7   :  { %8984 = vmatprep.subr.mxu1 %v13838_v9  ;;  %8941 = vmatpush3.msra.mxu0 %v11099_v29 }
 0xce8   :  { %8985 = vmatpush3.msra.mxu1 %v10716_v34  ;;  %8945 = vmatprep.subr.mxu0 %v13838_v9  ;;  %v1515_v34 = vpop.xlane.xlu0 %1514 }
 0xce9   :  { %9024 = vmatprep.subr.mxu1 %v13838_v9  ;;  %v1516_v63 = vmul.f32 0.03125, %v1515_v34 }
 0xceb   :  { %v1517_v4 = vsub.f32 %v11055_v25, %v1516_v63 }
 0xced   :  { %v1518_v20 = vmul.f32 %v1517_v4, %v1517_v4 }
 0xda1   :  { %v1280_v26 = vpop.f32.mrf.mxu1 }
 0xda2   :  { %v1281_v22 = vadd.f32 %v1280_v26, %v10534_v7  ;;  %v301_v26 = vrot.slane %v10555_v14, 3 }
 0xda3   :  { %v8933_v17 = vpop.f32.mrf.mxu1 }
 0xda4   :  { %v1284_v6 = vadd.f32 %v1281_v22, %v11037_v33  ;;  %v1519_v33 = vsel %vm434_vm0, %v1518_v20, 0.0  ;;  %v373_v22 = vadd.f32 %v10633_v48, %v301_v26 }
 0xda6   :  { %8943 = vmatmul.mubr.msk.f32.vlgmr.msra.gmra.mxu0 %vm434_vm0, %v1284_v6  ;;  %v1370_v23 = vsel %vm1367_vm7, %v1284_v6, 0.0  ;;  %v11166_v17 = vrot.slane %v373_v22, %v10538_v8 }
 0xda7   :  { %v1371_v62 = vsel %vm434_vm0, %v1370_v23, 0.0  ;;  %8946 = vmatpush3.msra.mxu0 %v10593_v35  ;;  %8953 = vmatprep.mubr.msk.f32.mxu0 %vm10481_vm1, %v13838_v9 }
 0xda8   :  { %1372 = vadd.xlane.f32.xlu1 %v1371_v62  ;;  %8947 = vmatprep.subr.mxu0 %v13838_v9  ;;  %13846 = vst [vmem:[#allocation24_spill] sm:$0xff] %v11166_v17 }
 0xda9   :  { %8948 = vmatpush3.msra.mxu0 %v10598_v37 }
 0xdaa   :  { %8949 = vmatprep.subr.mxu0 %v13838_v9 }
 0xdab   :  { %8950 = vmatpush3.msra.mxu0 %v10607_v38 }
 0xdac   :  { %1520 = vadd.xlane.f32.xlu1 %v1519_v33  ;;  %8951 = vmatprep.subr.mxu0 %v13838_v9 }
 0xdad   :  { %8952 = vmatpush3.msra.mxu0 %v10614_v39 }
 0xdae   :  { %8956 = vmatprep.subr.mxu0 %v13838_v9 }
 0xe31   :  { %v1373_v11 = vpop.xlane.xlu1 %1372 }
 0xe32   :  { %v1374_v15 = vmul.f32 0.03125, %v1373_v11 }
 0xe34   :  { %v1375_v56 = vsub.f32 %v1370_v23, %v1374_v15 }
 0xe35   :  { %v1521_v23 = vpop.xlane.xlu1 %1520 }
 0xe36   :  { %v1376_v34 = vmul.f32 %v1375_v56, %v1375_v56  ;;  %v1522_v11 = vmul.f32 0.03125, %v1521_v23 }
 0xe38   :  { %v1377_v63 = vsel %vm434_vm0, %v1376_v34, 0.0  ;;  %v1523_v48 = vadd.f32 1e-05, %v1522_v11 }
 0xe39   :  { %1378 = vadd.xlane.f32.xlu0 %v1377_v63 }
 0xe66   :  { %v1358_v6 = vpop.f32.mrf.mxu0 }
 0xe67   :  { %v1359_v62 = vadd.f32 %v1358_v6, %v11166_v17 }
 0xe68   :  { %v8944_v20 = vpop.f32.mrf.mxu0 }
 0xe69   :  { %v1368_v33 = vsel %vm1367_vm7, %v1359_v62, 0.0 }
 0xe6a   :  { %1369 = vst.msk [vmem:[%s13726_s5] sm:$0xff] %vm376_vm5, %v1368_v33 }
 0xec2   :  { %v1379_v14 = vpop.xlane.xlu0 %1378 }
 0xec3   :  { %v1380_v15 = vmul.f32 0.03125, %v1379_v14 }
 0xec5   :  { %v1381_v34 = vadd.f32 1e-05, %v1380_v15 }
 0xec7   :  { %10099 = vrsqrt.f32 %v1381_v34 }
 0xec8   :  { %10101 = vrsqrt.f32 %v1523_v48 }
 0xed4   :  { %v10100_v63 = vpop.eup %10099 }
 0xed5   :  { %v1383_v26 = vmul.f32 %v10100_v63, %v1375_v56  ;;  %v10102_v22 = vpop.eup %10101 }
 0xed6   :  { %v1525_v62 = vmul.f32 %v10102_v22, %v1517_v4 }
 0xed7   :  { %v1384_v6 = vmul.f32 %v1383_v26, %v10623_v42 }
 0xed8   :  { %v1526_v20 = vmul.f32 %v1525_v62, %v10623_v42 }
 0xed9   :  { %v1385_v3 = vadd.f32 %v1384_v6, %v10626_v44 }
 0xeda   :  { %v1527_v4 = vadd.f32 %v1526_v20, %v10626_v44 }
 0xedb   :  { %8954 = vmatmul.mubr.msk.f32.vlgmr.msra.gmra.mxu0 %vm434_vm0, %v1385_v3 }
 0xedc   :  { %8957 = vmatpush3.msra.mxu0 %v10593_v35  ;;  %8964 = vmatprep.mubr.msk.f32.mxu0 %vm10481_vm1, %v13838_v9 }
 0xedd   :  { %8958 = vmatprep.subr.mxu0 %v13838_v9 }
 0xede   :  { %8959 = vmatpush3.msra.mxu0 %v10598_v37 }
 0xedf   :  { %8960 = vmatprep.subr.mxu0 %v13838_v9 }
 0xee0   :  { %8961 = vmatpush3.msra.mxu0 %v10607_v38 }
 0xee1   :  { %8962 = vmatprep.subr.mxu0 %v13838_v9 }
 0xee2   :  { %8963 = vmatpush3.msra.mxu0 %v10614_v39 }
 0xee3   :  { %8965 = vmatmul.mubr.msk.f32.vlgmr.msra.gmra.mxu0 %vm434_vm0, %v1527_v4  ;;  %8967 = vmatprep.subr.mxu0 %v13838_v9 }
 0xee4   :  { %8968 = vmatpush3.msra.mxu0 %v10644_v57  ;;  %8975 = vmatprep.mubr.msk.f32.mxu0 %vm10481_vm1, %v13838_v9 }
 0xee5   :  { %8969 = vmatprep.subr.mxu0 %v13838_v9 }
 0xee6   :  { %8970 = vmatpush3.msra.mxu0 %v10649_v58 }
 0xee7   :  { %8971 = vmatprep.subr.mxu0 %v13838_v9 }
 0xee8   :  { %8972 = vmatpush3.msra.mxu0 %v10656_v59 }
 0xee9   :  { %8973 = vmatprep.subr.mxu0 %v13838_v9 }
 0xeea   :  { %8974 = vmatpush3.msra.mxu0 %v10663_v60 }
 0xeeb   :  { %8989 = vmatprep.subr.mxu0 %v13838_v9 }
 0xf9b   :  { %v1455_v35 = vpop.f32.mrf.mxu0 }
 0xf9c   :  { %v11202_v39 = vadd.f32 %v1455_v35, %v10637_v51 }
 0xf9d   :  { %v8955_v37 = vpop.f32.mrf.mxu0 }
 0xfa3   :  { %v1597_v38 = vpop.f32.mrf.mxu0 }
 0xfa4   :  { %v1598_v57 = vadd.f32 %v1597_v38, %v10637_v51 }
 0xfa5   :  { %v8966_v56 = vpop.f32.mrf.mxu0 }
 0xfa6   :  { %v1606_v58 = vmul.f32 %v1598_v57, %v1598_v57  ;;  %v1601_v33 = vmul.f32 %v1598_v57, %v11202_v39 }
 0xfa8   :  { %v1607_v59 = vsel %vm434_vm0, %v1606_v58, 0.0  ;;  %v1602_v23 = vsel %vm434_vm0, %v1601_v33, 0.0 }
 0xfa9   :  { %1608 = vadd.xlane.f32.xlu1 %v1607_v59  ;;  %1603 = vadd.xlane.f32.xlu0 %v1602_v23 }
0x1032   :  { %v1609_v60 = vpop.xlane.xlu1 %1608  ;;  %v1604_v11 = vpop.xlane.xlu0 %1603 }
0x1033   :  { %v1610_v14 = vmul.f32 0.17677669, %v1609_v60  ;;  %v1605_v15 = vmul.f32 0.17677669, %v1604_v11 }
0x1035   :  { %v1611_v48 = vmax.f32 %v1605_v15, %v1610_v14 }
0x1037   :  { %v1612_v34 = vsub.f32 %v1605_v15, %v1611_v48  ;;  %v1615_v63 = vsub.f32 %v1610_v14, %v1611_v48 }
0x1039   :  { %v1613_v26 = vmul.f32 1.442695, %v1612_v34  ;;  %v1616_v22 = vmul.f32 1.442695, %v1615_v63  ;;  %v13847_v34 = vld [vmem:[#allocation12_spill] sm:$0xff]  ;;  %v13848_v63 = vld [vmem:[#allocation13_spill] sm:$0xff] }
0x103b   :  { %10103 = vpow2.f32 %v1613_v26  ;;  %v13849_v26 = vld [vmem:[#allocation14_spill] sm:$0xff] }
0x103c   :  { %10105 = vpow2.f32 %v1616_v22  ;;  %v13850_v22 = vld [vmem:[#allocation15_spill] sm:$0xff] }
0x1048   :  { %v10104_v6 = vpop.eup %10103 }
0x1049   :  { %v10106_v3 = vpop.eup %10105  ;;  %v1620_v20 = vmul.f32 %v10104_v6, %v11202_v39 }
0x104a   :  { %v1618_v62 = vadd.f32 %v10106_v3, %v10104_v6  ;;  %v1621_v4 = vmul.f32 %v10106_v3, %v1598_v57  ;;  %v13851_v6 = vld [vmem:[#allocation11_spill] sm:$0xff] }
0x104c   :  { %10107 = vrcp.f32 %v1618_v62  ;;  %v1622_v35 = vadd.f32 %v1621_v4, %v1620_v20 }
0x1059   :  { %v10108_v37 = vpop.eup %10107 }
0x105a   :  { %v1623_v38 = vmul.f32 %v10108_v37, %v1622_v35 }
0x105c   :  { %8976 = vmatmul.mubr.msk.f32.vlgmr.msra.gmra.mxu0 %vm434_vm0, %v1623_v38 }
0x105d   :  { %8990 = vmatpush3.msra.mxu0 %v10726_v36  ;;  %9021 = vmatprep.mubr.msk.f32.mxu0 %vm10481_vm1, %v13838_v9 }
0x105e   :  { %8991 = vmatprep.subr.mxu0 %v13838_v9 }
0x105f   :  { %8992 = vmatpush3.msra.mxu0 %v10731_v40 }
0x1060   :  { %8993 = vmatprep.subr.mxu0 %v13838_v9 }
0x1061   :  { %8994 = vmatpush3.msra.mxu0 %v10738_v41 }
0x1062   :  { %8995 = vmatprep.subr.mxu0 %v13838_v9 }
0x1063   :  { %8996 = vmatpush3.msra.mxu0 %v10745_v43 }
0x1064   :  { %8997 = vmatprep.subr.mxu0 %v13838_v9 }
0x1065   :  { %8998 = vmatpush3.msra.mxu0 %v10752_v45 }
0x1066   :  { %8999 = vmatprep.subr.mxu0 %v13838_v9 }
0x1067   :  { %9000 = vmatpush3.msra.mxu0 %v10759_v46  ;;  %v67_v46 = vld [vmem:[%s13725_s0 + $0x8] sm:$0xff] }
0x1068   :  { %9001 = vmatprep.subr.mxu0 %v13838_v9  ;;  %v11277_v3 = vadd.f32 %v67_v46, %v13851_v6  ;;  %v13855_v6 = vld [vmem:[#allocation19_spill] sm:$0xff] }
0x1069   :  { %9002 = vmatpush3.msra.mxu0 %v10766_v47 }
0x106a   :  { %9003 = vmatprep.subr.mxu0 %v13838_v9  ;;  %13852 = vst [vmem:[#allocation12_spill] sm:$0xff] %v11277_v3 }
0x106b   :  { %9004 = vmatpush3.msra.mxu0 %v10773_v49 }
0x106c   :  { %9005 = vmatprep.subr.mxu0 %v13838_v9 }
0x106d   :  { %9006 = vmatpush3.msra.mxu0 %v10780_v50 }
0x106e   :  { %9007 = vmatprep.subr.mxu0 %v13838_v9 }
0x106f   :  { %9008 = vmatpush3.msra.mxu0 %v10787_v52 }
0x1070   :  { %9009 = vmatprep.subr.mxu0 %v13838_v9 }
0x1071   :  { %9010 = vmatpush3.msra.mxu0 %v10794_v53 }
0x1072   :  { %9011 = vmatprep.subr.mxu0 %v13838_v9 }
0x1073   :  { %9012 = vmatpush3.msra.mxu0 %v10801_v54 }
0x1074   :  { %9013 = vmatprep.subr.mxu0 %v13838_v9 }
0x1075   :  { %9014 = vmatpush3.msra.mxu0 %v10808_v55 }
0x1076   :  { %9015 = vmatprep.subr.mxu0 %v13838_v9 }
0x1077   :  { %9016 = vmatpush3.msra.mxu0 %v10831_v28 }
0x1078   :  { %9017 = vmatprep.subr.mxu0 %v13838_v9 }
0x1079   :  { %9018 = vmatpush3.msra.mxu0 %v10838_v27 }
0x107a   :  { %9019 = vmatprep.subr.mxu0 %v13838_v9 }
0x107b   :  { %9020 = vmatpush3.msra.mxu0 %v10845_v30 }
0x107c   :  { %9068 = vmatprep.subr.mxu0 %v13838_v9 }
0x111c   :  { %v1693_v36 = vpop.f32.mrf.mxu0 }
0x111d   :  { %v1694_v40 = vadd.f32 %v1693_v36, %v10674_v16 }
0x111e   :  { %v8977_v41 = vpop.f32.mrf.mxu0 }
0x111f   :  { %v11246_v43 = vadd.f32 %v1694_v40, %v11055_v25 }
0x1121   :  { %v1698_v45 = vsel %vm434_vm0, %v11246_v43, 0.0 }
0x1122   :  { %1699 = vadd.xlane.f32.xlu0 %v1698_v45 }
0x1138   :  { %1459 = vrot.lane.b32.xlu0 %v10690_v21, %s10483_s8 }
0x113c   :  { %201 = vperm.xlu0 %10052, %v67_v46  }
0x11ab   :  { %v1700_v47 = vpop.xlane.xlu0 %1699 }
0x11ac   :  { %v1701_v49 = vmul.f32 0.03125, %v1700_v47 }
0x11ae   :  { %v1702_v50 = vsub.f32 %v11246_v43, %v1701_v49 }
0x11af   :  { %v1460_v52 = vpop.permute.xlu0 %1459 }
0x11b0   :  { %v1703_v53 = vmul.f32 %v1702_v50, %v1702_v50  ;;  %v11256_v54 = vmul.f32 %v10690_v21, %v1460_v52 }
0x11b2   :  { %v1704_v55 = vsel %vm434_vm0, %v1703_v53, 0.0  ;;  %v1477_v28 = vsel %vm398_vm4, %v11256_v54, 0.0  ;;  %vm2423_vm8 = vcmp.gt.f32.partialorder %v11256_v54, 0.5 }
0x11b3   :  { %1705 = vadd.xlane.f32.xlu1 %v1704_v55 }
0x11b7   :  { %1478 = vadd.xlane.f32.xlu1 %v1477_v28  ;;  %v202_v53 = vpop.permute.xlu0 %201 }
0x11c8   :  { %1466 = vperm.xlu1 %10058, %v11256_v54  }
0x11cc   :  { %10059 = vset.pattern.permute.xlu1 %v13845_v5 }
0x123c   :  { %v1706_v27 = vpop.xlane.xlu1 %1705 }
0x123d   :  { %v1707_v30 = vmul.f32 0.03125, %v1706_v27 }
0x123f   :  { %v1708_v25 = vadd.f32 1e-05, %v1707_v30 }
0x1240   :  { %v1479_v57 = vpop.xlane.xlu1 %1478 }
0x1241   :  { %10109 = vrsqrt.f32 %v1708_v25  ;;  %v1480_v56 = vrot.slane %v1479_v57, 4 }
0x1243   :  { %v1481_v58 = vadd.f32 %v1480_v56, %v1479_v57  ;;  %v234_v56 = vmul.f32 %v10913_v24, %v202_v53 }
0x1244   :  { %v1467_v62 = vpop.permute.xlu1 %1466 }
0x1245   :  { %v1482_v33 = vrot.slane %v1481_v58, 2  ;;  %v1469_v20 = vmul.f32 %v1467_v62, %v11277_v3  ;;  %v11313_v62 = vld [vmem:[%s13722_s3 + $0x18] sm:$0xff] }
0x1247   :  { %v1483_v59 = vadd.f32 %v1482_v33, %v1481_v58  ;;  %v1470_v4 = vsel %vm376_vm5, %v1469_v20, 0.0  ;;  %v13853_v33 = vld [vmem:[#allocation17_spill] sm:$0xff]  ;;  %v13856_v20 = vld [vmem:[#allocation20_spill] sm:$0xff] }
0x1248   :  { %v1471_v35 = vrot.slane %v1470_v4, 4 }
0x1249   :  { %v1484_v23 = vrot.slane %v1483_v59, 1 }
0x124a   :  { %v1472_v37 = vadd.f32 %v1471_v35, %v1470_v4  ;;  %v11322_v4 = vld [vmem:[%s13722_s3 + $0x10] sm:$0xff]  ;;  %v13857_v35 = vld [vmem:[#allocation21_spill] sm:$0xff] }
0x124b   :  { %v1485_v60 = vadd.f32 %v1484_v23, %v1483_v59 }
0x124c   :  { %v1473_v41 = vrot.slane %v1472_v37, 2 }
0x124d   :  { %10027 = vpush %v1485_v60 }
0x124e   :  { %v10110_v11 = vpop.eup %10109  ;;  %v1474_v45 = vadd.f32 %v1473_v41, %v1472_v37  ;;  %v13858_v37 = vld [vmem:[#allocation22_spill] sm:$0xff] }
0x124f   :  { %v1710_v14 = vmul.f32 %v10110_v11, %v1702_v50 }
0x1250   :  { %v1475_v47 = vrot.slane %v1474_v45, 1 }
0x1251   :  { %v1711_v15 = vmul.f32 %v1710_v14, %v10816_v0 }
0x1252   :  { %v1476_v49 = vadd.f32 %v1475_v47, %v1474_v45 }
0x1253   :  { %v1712_v48 = vadd.f32 %v1711_v15, %v10820_v10  ;;  %v13854_v15 = vld [vmem:[#allocation18_spill] sm:$0xff] }
0x1255   :  { %8987 = vmatmul.mubr.msk.f32.vlgmr.msra.gmra.mxu1 %vm434_vm0, %v1712_v48 }
0x1256   :  { %9025 = vmatpush3.msra.mxu1 %v13847_v34  ;;  %9032 = vmatprep.mubr.msk.f32.mxu1 %vm10481_vm1, %v13838_v9 }
0x1257   :  { %9026 = vmatprep.subr.mxu1 %v13838_v9 }
0x1258   :  { %9027 = vmatpush3.msra.mxu1 %v13848_v63 }
0x1259   :  { %9028 = vmatprep.subr.mxu1 %v13838_v9 }
0x125a   :  { %9029 = vmatpush3.msra.mxu1 %v13849_v26 }
0x125b   :  { %9030 = vmatprep.subr.mxu1 %v13838_v9 }
0x125c   :  { %9031 = vmatpush3.msra.mxu1 %v13850_v22  ;;  %v11301_v22 = vld [vmem:[%s13722_s3 + $0x20] sm:$0xff] }
0x125d   :  { %9035 = vmatprep.subr.mxu1 %v13838_v9 }
0x127e   :  { %s10028_s11 = spop %10027 }
0x127f   :  { %v1487_v38 = vstv %s10028_s11 }
0x1280   :  { %v1488_v36 = vmul.f32 2.0, %v1487_v38 }
0x1282   :  { %v1489_v40 = vmax.f32 %v1488_v36, 1e-06 }
0x1284   :  { %10111 = vrcp.f32 %v1489_v40 }
0x1291   :  { %v10112_v50 = vpop.eup %10111 }
0x1292   :  { %v1491_v52 = vmul.f32 %v10112_v50, %v1476_v49  ;;  %v11336_v49 = vld [vmem:[%s13723_s4 + $0x28] sm:$0xff]  ;;  %v11352_v50 = vld [vmem:[%s13723_s4 + $0x18] sm:$0xff] }
0x1294   :  { %1494 = vperm.xlu0 %10052, %v1491_v52   ;;  %1499 = vperm.xlu1 %10059, %v1491_v52   ;;  %v11359_v52 = vld [vmem:[%s13723_s4 + $0x10] sm:$0xff] }
0x1298   :  { %245 = vperm.xlu1 %10059, %v67_v46  }
0x129c   :  { %10060 = vset.pattern.permute.xlu1 %v13844_v61 }
0x130f   :  { %v1500_v55 = vpop.permute.xlu1 %1499  ;;  %v1495_v28 = vpop.permute.xlu0 %1494 }
0x1310   :  { %v1502_v27 = vmul.f32 %v1500_v55, %v10909_v19  ;;  %v1497_v25 = vmul.f32 %v1495_v28, %v10909_v19  ;;  %v11292_v19 = vld [vmem:[%s13722_s3 + $0x28] sm:$0xff] }
0x1312   :  { %v1504_v30 = vrot.slane %v1502_v27, 1  ;;  %v13859_v27 = vld [vmem:[#allocation23_spill] sm:$0xff] }
0x1313   :  { %v246_v57 = vpop.permute.xlu1 %245 }
0x1314   :  { %v1506_v58 = vadd.f32 %v1504_v30, %v1497_v25  ;;  %v273_v59 = vmul.f32 %v13853_v33, %v246_v57 }
0x1315   :  { %v1782_v23 = vpop.f32.mrf.mxu1 }
0x1316   :  { %v280_v60 = vadd.f32 %v273_v59, %v234_v56  ;;  %v1783_v46 = vadd.f32 %v1782_v23, %v10893_v2  ;;  %v1510_v14 = vrot.slane %v1506_v58, %v10538_v8 }
0x1317   :  { %v8988_v11 = vpop.f32.mrf.mxu1 }
0x1318   :  { %v291_v48 = vadd.f32 %v13854_v15, %v280_v60  ;;  %v1786_v34 = vmax.f32 %v1783_v46, 0.0 }
0x131a   :  { %v1511_v63 = vsub.f32 %v291_v48, %v1510_v14  ;;  %9022 = vmatmul.mubr.f32.vlgmr.msra.gmra.mxu0 %v1786_v34 }
0x131b   :  { %9069 = vmatpush3.msra.mxu0 %v11292_v19  ;;  %9076 = vmatprep.mubr.msk.f32.mxu0 %vm10481_vm1, %v13838_v9 }
0x131c   :  { %v1512_v26 = vmax.f32 %v1511_v63, 0.0  ;;  %9070 = vmatprep.subr.mxu0 %v13838_v9 }
0x131d   :  { %9071 = vmatpush3.msra.mxu0 %v11301_v22 }
0x131e   :  { %9033 = vmatmul.mubr.msk.f32.vlgmr.msra.gmra.mxu1 %vm434_vm0, %v1512_v26  ;;  %9072 = vmatprep.subr.mxu0 %v13838_v9  ;;  %v11376_v26 = vld [vmem:[%s13723_s4 + $0x48] sm:$0xff] }
0x131f   :  { %9036 = vmatpush3.msra.mxu1 %v13855_v6  ;;  %9043 = vmatprep.mubr.msk.f32.mxu1 %vm10481_vm1, %v13838_v9  ;;  %v11385_v6 = vld [vmem:[%s13723_s4 + $0x40] sm:$0xff] }
0x1320   :  { %9037 = vmatprep.subr.mxu1 %v13838_v9  ;;  %9073 = vmatpush3.msra.mxu0 %v11313_v62 }
0x1321   :  { %9038 = vmatpush3.msra.mxu1 %v13856_v20  ;;  %9074 = vmatprep.subr.mxu0 %v13838_v9  ;;  %v11392_v20 = vld [vmem:[%s13723_s4 + $0x38] sm:$0xff] }
0x1322   :  { %9039 = vmatprep.subr.mxu1 %v13838_v9  ;;  %9075 = vmatpush3.msra.mxu0 %v11322_v4 }
0x1323   :  { %9040 = vmatpush3.msra.mxu1 %v13857_v35  ;;  %9114 = vmatprep.subr.mxu0 %v13838_v9  ;;  %v11399_v35 = vld [vmem:[%s13723_s4 + $0x30] sm:$0xff] }
0x1324   :  { %9041 = vmatprep.subr.mxu1 %v13838_v9 }
0x1325   :  { %9042 = vmatpush3.msra.mxu1 %v13858_v37 }
0x1326   :  { %9046 = vmatprep.subr.mxu1 %v13838_v9 }
0x13da   :  { %v1853_v38 = vpop.f32.mrf.mxu0 }
0x13db   :  { %v1854_v36 = vadd.f32 %v1853_v38, %v10534_v7 }
0x13dc   :  { %v9023_v40 = vpop.f32.mrf.mxu0 }
0x13dd   :  { %v1857_v41 = vadd.f32 %v1854_v36, %v11246_v43  ;;  %v11345_v43 = vld [vmem:[%s13723_s4 + $0x20] sm:$0xff] }
0x13de   :  { %v1927_v45 = vpop.f32.mrf.mxu1 }
0x13df   :  { %9044 = vmatmul.mubr.msk.f32.vlgmr.msra.gmra.mxu1 %vm434_vm0, %v1857_v41 }
0x13e0   :  { %v9034_v47 = vpop.f32.mrf.mxu1  ;;  %9047 = vmatpush3.msra.mxu1 %v11336_v49  ;;  %9054 = vmatprep.mubr.msk.f32.mxu1 %vm10481_vm1, %v13838_v9 }
0x13e1   :  { %9048 = vmatprep.subr.mxu1 %v13838_v9 }
0x13e2   :  { %9049 = vmatpush3.msra.mxu1 %v11345_v43 }
0x13e3   :  { %9050 = vmatprep.subr.mxu1 %v13838_v9 }
0x13e4   :  { %9051 = vmatpush3.msra.mxu1 %v11352_v50 }
0x13e5   :  { %9052 = vmatprep.subr.mxu1 %v13838_v9 }
0x13e6   :  { %9053 = vmatpush3.msra.mxu1 %v11359_v52 }
0x13e7   :  { %9057 = vmatprep.subr.mxu1 %v13838_v9 }
0x149f   :  { %v2000_v53 = vpop.f32.mrf.mxu1 }
0x14a0   :  { %v2001_v55 = vadd.f32 %v2000_v53, %v1927_v45 }
0x14a1   :  { %v9045_v28 = vpop.f32.mrf.mxu1 }
0x14a2   :  { %v11364_v30 = vadd.f32 %v2001_v55, %v13859_v27 }
0x14a4   :  { %v2005_v25 = vsel %vm434_vm0, %v11364_v30, 0.0 }
0x14a5   :  { %2006 = vadd.xlane.f32.xlu1 %v2005_v25 }
0x152e   :  { %v2007_v57 = vpop.xlane.xlu1 %2006 }
0x152f   :  { %v2008_v56 = vmul.f32 0.03125, %v2007_v57 }
0x1531   :  { %v2009_v58 = vsub.f32 %v11364_v30, %v2008_v56 }
0x1533   :  { %v2010_v59 = vmul.f32 %v2009_v58, %v2009_v58 }
0x1535   :  { %v2011_v23 = vsel %vm434_vm0, %v2010_v59, 0.0 }
0x1536   :  { %2012 = vadd.xlane.f32.xlu0 %v2011_v23 }
0x15bf   :  { %v2013_v60 = vpop.xlane.xlu0 %2012 }
0x15c0   :  { %v2014_v46 = vmul.f32 0.03125, %v2013_v60 }
0x15c2   :  { %v2015_v11 = vadd.f32 1e-05, %v2014_v46 }
0x15c4   :  { %10113 = vrsqrt.f32 %v2015_v11 }
0x15d1   :  { %v10114_v14 = vpop.eup %10113 }
0x15d2   :  { %v2017_v48 = vmul.f32 %v10114_v14, %v2009_v58 }
0x15d4   :  { %v2018_v34 = vmul.f32 %v2017_v48, %v10623_v42 }
0x15d6   :  { %v2019_v63 = vadd.f32 %v2018_v34, %v10626_v44 }
0x15d8   :  { %9055 = vmatmul.mubr.msk.f32.vlgmr.msra.gmra.mxu1 %vm434_vm0, %v2019_v63 }
0x15d9   :  { %9058 = vmatpush3.msra.mxu1 %v11376_v26  ;;  %9065 = vmatprep.mubr.msk.f32.mxu1 %vm10481_vm1, %v13838_v9 }
0x15da   :  { %9059 = vmatprep.subr.mxu1 %v13838_v9 }
0x15db   :  { %9060 = vmatpush3.msra.mxu1 %v11385_v6 }
0x15dc   :  { %9061 = vmatprep.subr.mxu1 %v13838_v9 }
0x15dd   :  { %9062 = vmatpush3.msra.mxu1 %v11392_v20 }
0x15de   :  { %9063 = vmatprep.subr.mxu1 %v13838_v9 }
0x15df   :  { %9064 = vmatpush3.msra.mxu1 %v11399_v35 }
0x15e0   :  { %9079 = vmatprep.subr.mxu1 %v13838_v9 }
0x1698   :  { %v2089_v37 = vpop.f32.mrf.mxu1 }
0x1699   :  { %v2090_v38 = vadd.f32 %v2089_v37, %v10637_v51 }
0x169a   :  { %v9056_v36 = vpop.f32.mrf.mxu1 }
0x169b   :  { %v2093_v40 = vmul.f32 %v2090_v38, %v11202_v39  ;;  %v2098_v45 = vmul.f32 %v2090_v38, %v2090_v38  ;;  %v11412_v36 = vld [vmem:[%s13723_s4 + $0x108] sm:$0xff] }
0x169d   :  { %v2094_v41 = vsel %vm434_vm0, %v2093_v40, 0.0  ;;  %v2099_v47 = vsel %vm434_vm0, %v2098_v45, 0.0  ;;  %v11428_v40 = vld [vmem:[%s13723_s4 + $0xf8] sm:$0xff]  ;;  %v11442_v45 = vld [vmem:[%s13723_s4 + $0xe8] sm:$0xff] }
0x169e   :  { %2095 = vadd.xlane.f32.xlu0 %v2094_v41  ;;  %v11435_v41 = vld [vmem:[%s13723_s4 + $0xf0] sm:$0xff] }
0x16a2   :  { %2100 = vadd.xlane.f32.xlu0 %v2099_v47  ;;  %v11449_v47 = vld [vmem:[%s13723_s4 + $0xe0] sm:$0xff] }
0x1727   :  { %v2096_v53 = vpop.xlane.xlu0 %2095 }
0x1728   :  { %v2097_v28 = vmul.f32 0.17677669, %v2096_v53  ;;  %v11456_v53 = vld [vmem:[%s13723_s4 + $0xd8] sm:$0xff] }
0x172b   :  { %v2101_v55 = vpop.xlane.xlu0 %2100 }
0x172c   :  { %v2102_v25 = vmul.f32 0.17677669, %v2101_v55  ;;  %v11463_v55 = vld [vmem:[%s13723_s4 + $0xd0] sm:$0xff] }
0x172e   :  { %v2103_v57 = vmax.f32 %v2097_v28, %v2102_v25 }
0x1730   :  { %v2104_v56 = vsub.f32 %v2097_v28, %v2103_v57  ;;  %v2107_v58 = vsub.f32 %v2102_v25, %v2103_v57  ;;  %v11470_v28 = vld [vmem:[%s13723_s4 + $0xc8] sm:$0xff]  ;;  %v11477_v25 = vld [vmem:[%s13723_s4 + $0xc0] sm:$0xff]  ;;  %v11484_v57 = vld [vmem:[%s13723_s4 + $0xb8] sm:$0xff] }
0x1732   :  { %v2105_v59 = vmul.f32 1.442695, %v2104_v56  ;;  %v2108_v23 = vmul.f32 1.442695, %v2107_v58  ;;  %v11491_v56 = vld [vmem:[%s13723_s4 + $0xb0] sm:$0xff]  ;;  %v11498_v58 = vld [vmem:[%s13723_s4 + $0xa8] sm:$0xff] }
0x1734   :  { %10115 = vpow2.f32 %v2105_v59  ;;  %v11505_v59 = vld [vmem:[%s13723_s4 + $0xa0] sm:$0xff] }
0x1735   :  { %10117 = vpow2.f32 %v2108_v23  ;;  %v11512_v23 = vld [vmem:[%s13723_s4 + $0x98] sm:$0xff] }
0x1741   :  { %v10116_v60 = vpop.eup %10115 }
0x1742   :  { %v10118_v46 = vpop.eup %10117  ;;  %v2112_v14 = vmul.f32 %v10116_v60, %v11202_v39 }
0x1743   :  { %v2110_v11 = vadd.f32 %v10118_v46, %v10116_v60  ;;  %v2113_v48 = vmul.f32 %v10118_v46, %v2090_v38  ;;  %v11421_v38 = vld [vmem:[%s13723_s4 + $0x100] sm:$0xff]  ;;  %v11519_v60 = vld [vmem:[%s13723_s4 + $0x90] sm:$0xff] }
0x1745   :  { %10119 = vrcp.f32 %v2110_v11  ;;  %v2114_v34 = vadd.f32 %v2113_v48, %v2112_v14 }
0x1752   :  { %v10120_v63 = vpop.eup %10119 }
0x1753   :  { %v2115_v37 = vmul.f32 %v10120_v63, %v2114_v34  ;;  %v2424_v63 = vsel %vm2423_vm8, 1, %v13844_v61 }
0x1755   :  { %9066 = vmatmul.mubr.msk.f32.vlgmr.msra.gmra.mxu1 %vm434_vm0, %v2115_v37  ;;  %v75_v37 = vld [vmem:[%s13721_s1 + $0x10] sm:$0xff] }
0x1756   :  { %9080 = vmatpush3.msra.mxu1 %v11412_v36  ;;  %9111 = vmatprep.mubr.msk.f32.mxu1 %vm10481_vm1, %v13838_v9 }
0x1757   :  { %9081 = vmatprep.subr.mxu1 %v13838_v9 }
0x1758   :  { %9082 = vmatpush3.msra.mxu1 %v11421_v38 }
0x1759   :  { %9083 = vmatprep.subr.mxu1 %v13838_v9 }
0x175a   :  { %9084 = vmatpush3.msra.mxu1 %v11428_v40 }
0x175b   :  { %9085 = vmatprep.subr.mxu1 %v13838_v9 }
0x175c   :  { %9086 = vmatpush3.msra.mxu1 %v11435_v41 }
0x175d   :  { %9087 = vmatprep.subr.mxu1 %v13838_v9 }
0x175e   :  { %9088 = vmatpush3.msra.mxu1 %v11442_v45 }
0x175f   :  { %9089 = vmatprep.subr.mxu1 %v13838_v9 }
0x1760   :  { %9090 = vmatpush3.msra.mxu1 %v11449_v47 }
0x1761   :  { %9091 = vmatprep.subr.mxu1 %v13838_v9 }
0x1762   :  { %9092 = vmatpush3.msra.mxu1 %v11456_v53 }
0x1763   :  { %9093 = vmatprep.subr.mxu1 %v13838_v9 }
0x1764   :  { %9094 = vmatpush3.msra.mxu1 %v11463_v55 }
0x1765   :  { %9095 = vmatprep.subr.mxu1 %v13838_v9 }
0x1766   :  { %9096 = vmatpush3.msra.mxu1 %v11470_v28 }
0x1767   :  { %9097 = vmatprep.subr.mxu1 %v13838_v9 }
0x1768   :  { %9098 = vmatpush3.msra.mxu1 %v11477_v25 }
0x1769   :  { %9099 = vmatprep.subr.mxu1 %v13838_v9 }
0x176a   :  { %9100 = vmatpush3.msra.mxu1 %v11484_v57 }
0x176b   :  { %9101 = vmatprep.subr.mxu1 %v13838_v9 }
0x176c   :  { %9102 = vmatpush3.msra.mxu1 %v11491_v56 }
0x176d   :  { %9103 = vmatprep.subr.mxu1 %v13838_v9 }
0x176e   :  { %9104 = vmatpush3.msra.mxu1 %v11498_v58 }
0x176f   :  { %9105 = vmatprep.subr.mxu1 %v13838_v9 }
0x1770   :  { %9106 = vmatpush3.msra.mxu1 %v11505_v59 }
0x1771   :  { %9107 = vmatprep.subr.mxu1 %v13838_v9 }
0x1772   :  { %9108 = vmatpush3.msra.mxu1 %v11512_v23 }
0x1773   :  { %9109 = vmatprep.subr.mxu1 %v13838_v9 }
0x1774   :  { %9110 = vmatpush3.msra.mxu1 %v11519_v60 }
0x1775   :  { %9158 = vmatprep.subr.mxu1 %v13838_v9 }
0x1815   :  { %v2185_v46 = vpop.f32.mrf.mxu1 }
0x1816   :  { %v2186_v11 = vadd.f32 %v2185_v46, %v10674_v16 }
0x1817   :  { %v9067_v14 = vpop.f32.mrf.mxu1 }
0x1818   :  { %v11525_v48 = vadd.f32 %v2186_v11, %v11364_v30 }
0x181a   :  { %v2190_v34 = vsel %vm434_vm0, %v11525_v48, 0.0 }
0x181b   :  { %2191 = vadd.xlane.f32.xlu1 %v2190_v34 }
0x182c   :  { %2426 = vperm.xlu1 %10060, %v2424_v63  }
0x1830   :  { %10061 = vset.pattern.permute.xlu1 %v13845_v5 }
0x1831   :  { %139 = vperm.xlu1 %10061, %v75_v37  }
0x18a4   :  { %v2192_v46 = vpop.xlane.xlu1 %2191 }
0x18a5   :  { %v2193_v14 = vmul.f32 0.03125, %v2192_v46 }
0x18a7   :  { %v2194_v30 = vsub.f32 %v11525_v48, %v2193_v14 }
0x18a8   :  { %v11537_v34 = vpop.permute.xlu1 %2426 }
0x18a9   :  { %v2195_v11 = vmul.f32 %v2194_v30, %v2194_v30  ;;  %vm2428_vm9 = vcmp.eq.s32.totalorder %v11537_v34, 1 }
0x18ab   :  { %v2196_v27 = vsel %vm434_vm0, %v2195_v11, 0.0 }
0x18ac   :  { %2197 = vadd.xlane.f32.xlu0 %v2196_v27  ;;  %v140_v33 = vpop.permute.xlu1 %139 }
0x18ad   :  { %v164_v24 = vmul.f32 %v10550_v13, %v140_v33 }
0x18c2   :  { %96 = vperm.xlu0 %10052, %v75_v37  }
0x1935   :  { %v2198_v8 = vpop.xlane.xlu0 %2197 }
0x1936   :  { %v2199_v63 = vmul.f32 0.03125, %v2198_v8 }
0x1938   :  { %v2200_v15 = vadd.f32 1e-05, %v2199_v63 }
0x193a   :  { %10121 = vrsqrt.f32 %v2200_v15 }
0x193d   :  { %v97_v5 = vpop.permute.xlu0 %96 }
0x193e   :  { %v125_v61 = vmul.f32 %v10547_v12, %v97_v5 }
0x1940   :  { %v171_v46 = vadd.f32 %v164_v24, %v125_v61 }
0x1942   :  { %v182_v14 = vadd.f32 %v10561_v18, %v171_v46 }
0x1944   :  { %v11542_v3 = vmax.f32 %v182_v14, 0.0 }
0x1946   :  { %v2575_v27 = vsel %vm434_vm0, %v11542_v3, 0.0 }
0x1947   :  { %v10122_v37 = vpop.eup %10121  ;;  %2576 = vadd.xlane.f32.xlu0 %v2575_v27 }
0x1948   :  { %v2202_v11 = vmul.f32 %v10122_v37, %v2194_v30 }
0x194a   :  { %v2203_v8 = vmul.f32 %v2202_v11, %v10816_v0 }
0x194c   :  { %v2204_v15 = vadd.f32 %v2203_v8, %v10820_v10 }
0x194e   :  { %9077 = vmatmul.mubr.msk.f32.vlgmr.msra.gmra.mxu0 %vm434_vm0, %v2204_v15 }
0x194f   :  { %9115 = vmatpush3.msra.mxu0 %v11067_v1  ;;  %9122 = vmatprep.mubr.msk.f32.mxu0 %vm10481_vm1, %v13838_v9 }
0x1950   :  { %9116 = vmatprep.subr.mxu0 %v13838_v9 }
0x1951   :  { %9117 = vmatpush3.msra.mxu0 %v11085_v31 }
0x1952   :  { %9118 = vmatprep.subr.mxu0 %v13838_v9 }
0x1953   :  { %9119 = vmatpush3.msra.mxu0 %v11092_v32 }
0x1954   :  { %9120 = vmatprep.subr.mxu0 %v13838_v9 }
0x1955   :  { %9121 = vmatpush3.msra.mxu0 %v11099_v29 }
0x1956   :  { %9125 = vmatprep.subr.mxu0 %v13838_v9 }
0x19d0   :  { %v2577_v31 = vpop.xlane.xlu0 %2576 }
0x19d1   :  { %v2578_v32 = vmul.f32 0.03125, %v2577_v31 }
0x19d3   :  { %v2579_v30 = vsub.f32 %v11542_v3, %v2578_v32 }
0x19d5   :  { %v2580_v37 = vmul.f32 %v2579_v30, %v2579_v30 }
0x1a0e   :  { %v2274_v24 = vpop.f32.mrf.mxu0 }
0x1a0f   :  { %v2275_v61 = vadd.f32 %v2274_v24, %v10893_v2 }
0x1a10   :  { %v9078_v5 = vpop.f32.mrf.mxu0 }
0x1a11   :  { %v2278_v1 = vmax.f32 %v2275_v61, 0.0 }
0x1a13   :  { %9112 = vmatmul.mubr.f32.vlgmr.msra.gmra.mxu1 %v2278_v1 }
0x1a14   :  { %9159 = vmatpush3.msra.mxu1 %v11292_v19  ;;  %9166 = vmatprep.mubr.msk.f32.mxu1 %vm10481_vm1, %v13838_v9 }
0x1a15   :  { %9160 = vmatprep.subr.mxu1 %v13838_v9 }
0x1a16   :  { %9161 = vmatpush3.msra.mxu1 %v11301_v22 }
0x1a17   :  { %9162 = vmatprep.subr.mxu1 %v13838_v9 }
0x1a18   :  { %9163 = vmatpush3.msra.mxu1 %v11313_v62 }
0x1a19   :  { %9164 = vmatprep.subr.mxu1 %v13838_v9 }
0x1a1a   :  { %9165 = vmatpush3.msra.mxu1 %v11322_v4 }
0x1a1b   :  { %9204 = vmatprep.subr.mxu1 %v13838_v9 }
0x1ad3   :  { %v2345_v29 = vpop.f32.mrf.mxu1 }
0x1ad4   :  { %v2346_v33 = vadd.f32 %v2345_v29, %v10534_v7 }
0x1ad5   :  { %v9113_v63 = vpop.f32.mrf.mxu1 }
0x1ad6   :  { %v2349_v46 = vadd.f32 %v2346_v33, %v11525_v48  ;;  %v2581_v48 = vsel %vm434_vm0, %v2580_v37, 0.0 }
0x1ad8   :  { %9123 = vmatmul.mubr.msk.f32.vlgmr.msra.gmra.mxu0 %vm434_vm0, %v2349_v46  ;;  %v2432_v14 = vsel %vm2428_vm9, %v2349_v46, 0.0 }
0x1ad9   :  { %v2433_v27 = vsel %vm434_vm0, %v2432_v14, 0.0  ;;  %9126 = vmatpush3.msra.mxu0 %v11336_v49  ;;  %9133 = vmatprep.mubr.msk.f32.mxu0 %vm10481_vm1, %v13838_v9 }
0x1ada   :  { %2434 = vadd.xlane.f32.xlu1 %v2433_v27  ;;  %9127 = vmatprep.subr.mxu0 %v13838_v9 }
0x1adb   :  { %9128 = vmatpush3.msra.mxu0 %v11345_v43 }
0x1adc   :  { %9129 = vmatprep.subr.mxu0 %v13838_v9 }
0x1add   :  { %9130 = vmatpush3.msra.mxu0 %v11352_v50 }
0x1ade   :  { %2582 = vadd.xlane.f32.xlu1 %v2581_v48  ;;  %9131 = vmatprep.subr.mxu0 %v13838_v9 }
0x1adf   :  { %9132 = vmatpush3.msra.mxu0 %v11359_v52 }
0x1ae0   :  { %9136 = vmatprep.subr.mxu0 %v13838_v9 }
0x1b63   :  { %v2435_v11 = vpop.xlane.xlu1 %2434 }
0x1b64   :  { %v2436_v8 = vmul.f32 0.03125, %v2435_v11 }
0x1b66   :  { %v2437_v15 = vsub.f32 %v2432_v14, %v2436_v8 }
0x1b67   :  { %v2583_v29 = vpop.xlane.xlu1 %2582 }
0x1b68   :  { %v2438_v24 = vmul.f32 %v2437_v15, %v2437_v15  ;;  %v2584_v33 = vmul.f32 0.03125, %v2583_v29 }
0x1b6a   :  { %v2439_v61 = vsel %vm434_vm0, %v2438_v24, 0.0  ;;  %v2585_v14 = vadd.f32 1e-05, %v2584_v33 }
0x1b6b   :  { %2440 = vadd.xlane.f32.xlu0 %v2439_v61 }
0x1b98   :  { %v2419_v5 = vpop.f32.mrf.mxu0 }
0x1b99   :  { %v2420_v1 = vadd.f32 %v2419_v5, %v11166_v17 }
0x1b9a   :  { %v9124_v31 = vpop.f32.mrf.mxu0 }
0x1b9b   :  { %v2429_v32 = vsel %vm2428_vm9, %v2420_v1, 0.0 }
0x1b9c   :  { %8127 = vst.msk [vmem:[%s13726_s5 + $0x8] sm:$0xff] %vm376_vm5, %v2429_v32 }
0x1bf4   :  { %v2441_v63 = vpop.xlane.xlu0 %2440 }
0x1bf5   :  { %v2442_v46 = vmul.f32 0.03125, %v2441_v63 }
0x1bf7   :  { %v2443_v27 = vadd.f32 1e-05, %v2442_v46 }
0x1bf9   :  { %10123 = vrsqrt.f32 %v2443_v27 }
0x1bfa   :  { %10125 = vrsqrt.f32 %v2585_v14 }
0x1c06   :  { %v10124_v37 = vpop.eup %10123 }
0x1c07   :  { %v2445_v48 = vmul.f32 %v10124_v37, %v2437_v15  ;;  %v10126_v11 = vpop.eup %10125 }
0x1c08   :  { %v2587_v24 = vmul.f32 %v10126_v11, %v2579_v30 }
0x1c09   :  { %v2446_v8 = vmul.f32 %v2445_v48, %v10623_v42 }
0x1c0a   :  { %v2588_v61 = vmul.f32 %v2587_v24, %v10623_v42 }
0x1c0b   :  { %v2447_v34 = vadd.f32 %v2446_v8, %v10626_v44 }
0x1c0c   :  { %v2589_v30 = vadd.f32 %v2588_v61, %v10626_v44 }
0x1c0d   :  { %9134 = vmatmul.mubr.msk.f32.vlgmr.msra.gmra.mxu0 %vm434_vm0, %v2447_v34 }
0x1c0e   :  { %9137 = vmatpush3.msra.mxu0 %v11336_v49  ;;  %9144 = vmatprep.mubr.msk.f32.mxu0 %vm10481_vm1, %v13838_v9 }
0x1c0f   :  { %9138 = vmatprep.subr.mxu0 %v13838_v9 }
0x1c10   :  { %9139 = vmatpush3.msra.mxu0 %v11345_v43 }
0x1c11   :  { %9140 = vmatprep.subr.mxu0 %v13838_v9 }
0x1c12   :  { %9141 = vmatpush3.msra.mxu0 %v11352_v50 }
0x1c13   :  { %9142 = vmatprep.subr.mxu0 %v13838_v9 }
0x1c14   :  { %9143 = vmatpush3.msra.mxu0 %v11359_v52 }
0x1c15   :  { %9145 = vmatmul.mubr.msk.f32.vlgmr.msra.gmra.mxu0 %vm434_vm0, %v2589_v30  ;;  %9147 = vmatprep.subr.mxu0 %v13838_v9 }
0x1c16   :  { %9148 = vmatpush3.msra.mxu0 %v11376_v26  ;;  %9155 = vmatprep.mubr.msk.f32.mxu0 %vm10481_vm1, %v13838_v9 }
0x1c17   :  { %9149 = vmatprep.subr.mxu0 %v13838_v9 }
0x1c18   :  { %9150 = vmatpush3.msra.mxu0 %v11385_v6 }
0x1c19   :  { %9151 = vmatprep.subr.mxu0 %v13838_v9 }
0x1c1a   :  { %9152 = vmatpush3.msra.mxu0 %v11392_v20 }
0x1c1b   :  { %9153 = vmatprep.subr.mxu0 %v13838_v9 }
0x1c1c   :  { %9154 = vmatpush3.msra.mxu0 %v11399_v35 }
0x1c1d   :  { %9169 = vmatprep.subr.mxu0 %v13838_v9 }
0x1ccd   :  { %v2517_v15 = vpop.f32.mrf.mxu0 }
0x1cce   :  { %v11624_v31 = vadd.f32 %v2517_v15, %v10637_v51 }
0x1ccf   :  { %v9135_v5 = vpop.f32.mrf.mxu0 }
0x1cd5   :  { %v2659_v1 = vpop.f32.mrf.mxu0 }
0x1cd6   :  { %v2660_v32 = vadd.f32 %v2659_v1, %v10637_v51 }
0x1cd7   :  { %v9146_v29 = vpop.f32.mrf.mxu0 }
0x1cd8   :  { %v2668_v33 = vmul.f32 %v2660_v32, %v11624_v31  ;;  %v2663_v63 = vmul.f32 %v2660_v32, %v11202_v39  ;;  %v2673_v27 = vmul.f32 %v2660_v32, %v2660_v32 }
0x1cda   :  { %v2669_v46 = vsel %vm434_vm0, %v2668_v33, 0.0  ;;  %v2664_v14 = vsel %vm434_vm0, %v2663_v63, 0.0  ;;  %v2674_v37 = vsel %vm434_vm0, %v2673_v27, 0.0 }
0x1cdb   :  { %2670 = vadd.xlane.f32.xlu1 %v2669_v46  ;;  %2665 = vadd.xlane.f32.xlu0 %v2664_v14 }
0x1cdf   :  { %2675 = vadd.xlane.f32.xlu0 %v2674_v37 }
0x1d64   :  { %v2671_v48 = vpop.xlane.xlu1 %2670  ;;  %v2666_v11 = vpop.xlane.xlu0 %2665 }
0x1d65   :  { %v2672_v8 = vmul.f32 0.17677669, %v2671_v48  ;;  %v2667_v34 = vmul.f32 0.17677669, %v2666_v11 }
0x1d67   :  { %v2678_v61 = vmax.f32 %v2667_v34, %v2672_v8 }
0x1d68   :  { %v2676_v24 = vpop.xlane.xlu0 %2675 }
0x1d69   :  { %v2677_v30 = vmul.f32 0.17677669, %v2676_v24 }
0x1d6b   :  { %v2679_v15 = vmax.f32 %v2678_v61, %v2677_v30 }
0x1d6d   :  { %v2680_v5 = vsub.f32 %v2667_v34, %v2679_v15  ;;  %v2683_v1 = vsub.f32 %v2672_v8, %v2679_v15  ;;  %v2686_v29 = vsub.f32 %v2677_v30, %v2679_v15 }
0x1d6f   :  { %v2681_v33 = vmul.f32 1.442695, %v2680_v5  ;;  %v2684_v17 = vmul.f32 1.442695, %v2683_v1  ;;  %v2687_v63 = vmul.f32 1.442695, %v2686_v29 }
0x1d71   :  { %10127 = vpow2.f32 %v2681_v33 }
0x1d72   :  { %10129 = vpow2.f32 %v2684_v17 }
0x1d73   :  { %10131 = vpow2.f32 %v2687_v63 }
0x1d7e   :  { %v10128_v46 = vpop.eup %10127 }
0x1d7f   :  { %v10130_v14 = vpop.eup %10129  ;;  %v2692_v48 = vmul.f32 %v10128_v46, %v11202_v39 }
0x1d80   :  { %v2689_v27 = vadd.f32 %v10130_v14, %v10128_v46  ;;  %v10132_v37 = vpop.eup %10131  ;;  %v2693_v11 = vmul.f32 %v10130_v14, %v11624_v31 }
0x1d81   :  { %v2695_v34 = vmul.f32 %v10132_v37, %v2660_v32 }
0x1d82   :  { %v2690_v18 = vadd.f32 %v10132_v37, %v2689_v27  ;;  %v2694_v24 = vadd.f32 %v2693_v11, %v2692_v48 }
0x1d84   :  { %10133 = vrcp.f32 %v2690_v18  ;;  %v2696_v8 = vadd.f32 %v2695_v34, %v2694_v24 }
0x1d91   :  { %v10134_v61 = vpop.eup %10133 }
0x1d92   :  { %v2697_v30 = vmul.f32 %v10134_v61, %v2696_v8 }
0x1d94   :  { %9156 = vmatmul.mubr.msk.f32.vlgmr.msra.gmra.mxu0 %vm434_vm0, %v2697_v30 }
0x1d95   :  { %9170 = vmatpush3.msra.mxu0 %v11412_v36  ;;  %9201 = vmatprep.mubr.msk.f32.mxu0 %vm10481_vm1, %v13838_v9 }
0x1d96   :  { %9171 = vmatprep.subr.mxu0 %v13838_v9 }
0x1d97   :  { %9172 = vmatpush3.msra.mxu0 %v11421_v38 }
0x1d98   :  { %9173 = vmatprep.subr.mxu0 %v13838_v9 }
0x1d99   :  { %9174 = vmatpush3.msra.mxu0 %v11428_v40 }
0x1d9a   :  { %9175 = vmatprep.subr.mxu0 %v13838_v9 }
0x1d9b   :  { %9176 = vmatpush3.msra.mxu0 %v11435_v41 }
0x1d9c   :  { %9177 = vmatprep.subr.mxu0 %v13838_v9 }
0x1d9d   :  { %9178 = vmatpush3.msra.mxu0 %v11442_v45 }
0x1d9e   :  { %9179 = vmatprep.subr.mxu0 %v13838_v9 }
0x1d9f   :  { %9180 = vmatpush3.msra.mxu0 %v11449_v47 }
0x1da0   :  { %9181 = vmatprep.subr.mxu0 %v13838_v9 }
0x1da1   :  { %9182 = vmatpush3.msra.mxu0 %v11456_v53 }
0x1da2   :  { %9183 = vmatprep.subr.mxu0 %v13838_v9 }
0x1da3   :  { %9184 = vmatpush3.msra.mxu0 %v11463_v55 }
0x1da4   :  { %9185 = vmatprep.subr.mxu0 %v13838_v9 }
0x1da5   :  { %9186 = vmatpush3.msra.mxu0 %v11470_v28 }
0x1da6   :  { %9187 = vmatprep.subr.mxu0 %v13838_v9 }
0x1da7   :  { %9188 = vmatpush3.msra.mxu0 %v11477_v25 }
0x1da8   :  { %9189 = vmatprep.subr.mxu0 %v13838_v9 }
0x1da9   :  { %9190 = vmatpush3.msra.mxu0 %v11484_v57 }
0x1daa   :  { %9191 = vmatprep.subr.mxu0 %v13838_v9 }
0x1dab   :  { %9192 = vmatpush3.msra.mxu0 %v11491_v56 }
0x1dac   :  { %9193 = vmatprep.subr.mxu0 %v13838_v9 }
0x1dad   :  { %9194 = vmatpush3.msra.mxu0 %v11498_v58 }
0x1dae   :  { %9195 = vmatprep.subr.mxu0 %v13838_v9 }
0x1daf   :  { %9196 = vmatpush3.msra.mxu0 %v11505_v59 }
0x1db0   :  { %9197 = vmatprep.subr.mxu0 %v13838_v9 }
0x1db1   :  { %9198 = vmatpush3.msra.mxu0 %v11512_v23 }
0x1db2   :  { %9199 = vmatprep.subr.mxu0 %v13838_v9 }
0x1db3   :  { %9200 = vmatpush3.msra.mxu0 %v11519_v60 }
0x1db4   :  { %9248 = vmatprep.subr.mxu0 %v13838_v9 }
0x1e54   :  { %v2767_v18 = vpop.f32.mrf.mxu0 }
0x1e55   :  { %v2768_v17 = vadd.f32 %v2767_v18, %v10674_v16 }
0x1e56   :  { %v9157_v32 = vpop.f32.mrf.mxu0 }
0x1e57   :  { %v11671_v15 = vadd.f32 %v2768_v17, %v11542_v3 }
0x1e59   :  { %v2772_v5 = vsel %vm434_vm0, %v11671_v15, 0.0 }
0x1e5a   :  { %2773 = vadd.xlane.f32.xlu1 %v2772_v5 }
0x1e6b   :  { %2521 = vrot.lane.b32.xlu1 %v10690_v21, %s10484_s20 }
0x1ee3   :  { %v2774_v1 = vpop.xlane.xlu1 %2773 }
0x1ee4   :  { %v2775_v29 = vmul.f32 0.03125, %v2774_v1 }
0x1ee6   :  { %v2776_v33 = vsub.f32 %v11671_v15, %v2775_v29  ;;  %v11690_v29 = vld [vmem:[%s13723_s4 + $0x88] sm:$0xff] }
0x1ee7   :  { %v2522_v63 = vpop.permute.xlu1 %2521 }
0x1ee8   :  { %v2777_v46 = vmul.f32 %v2776_v33, %v2776_v33  ;;  %v11678_v14 = vmul.f32 %v2522_v63, %v11256_v54  ;;  %v11706_v63 = vld [vmem:[%s13723_s4 + $0x78] sm:$0xff] }
0x1eea   :  { %v2778_v27 = vsel %vm434_vm0, %v2777_v46, 0.0  ;;  %v2539_v3 = vsel %vm398_vm4, %v11678_v14, 0.0  ;;  %v11713_v46 = vld [vmem:[%s13723_s4 + $0x70] sm:$0xff]  ;;  %vm3509_vm10 = vcmp.gt.f32.partialorder %v11678_v14, 0.5 }
0x1eeb   :  { %2779 = vadd.xlane.f32.xlu0 %v2778_v27  ;;  %13860 = vst [vmem:[#allocation13_spill] sm:$0xff] %v11713_v46  ;;  %v68_v27 = vld [vmem:[%s13725_s0 + $0x10] sm:$0xff] }
0x1eef   :  { %2540 = vadd.xlane.f32.xlu0 %v2539_v3  ;;  %v13861_v3 = vld [vmem:[#allocation12_spill] sm:$0xff] }
0x1f05   :  { %2528 = vperm.xlu0 %10052, %v11678_v14  }
0x1f74   :  { %v2780_v37 = vpop.xlane.xlu0 %2779 }
0x1f75   :  { %v2781_v48 = vmul.f32 0.03125, %v2780_v37  ;;  %v11721_v37 = vadd.f32 %v13861_v3, %v68_v27  ;;  %v13862_v3 = vmov 0  }
0x1f77   :  { %v2782_v11 = vadd.f32 1e-05, %v2781_v48 }
0x1f78   :  { %v2541_v24 = vpop.xlane.xlu0 %2540 }
0x1f79   :  { %10135 = vrsqrt.f32 %v2782_v11  ;;  %v2542_v34 = vrot.slane %v2541_v24, 4 }
0x1f7b   :  { %v2543_v8 = vadd.f32 %v2542_v34, %v2541_v24 }
0x1f7d   :  { %v2544_v61 = vrot.slane %v2543_v8, 2 }
0x1f7f   :  { %v2545_v30 = vadd.f32 %v2544_v61, %v2543_v8 }
0x1f80   :  { %v2529_v48 = vpop.permute.xlu0 %2528 }
0x1f81   :  { %v2546_v54 = vrot.slane %v2545_v30, 1  ;;  %v2531_v11 = vmul.f32 %v2529_v48, %v11721_v37  ;;  %v13863_v48 = vmov 1  }
0x1f83   :  { %v2547_v18 = vadd.f32 %v2546_v54, %v2545_v30  ;;  %v2532_v24 = vsel %vm376_vm5, %v2531_v11, 0.0 }
0x1f84   :  { %v2533_v34 = vrot.slane %v2532_v24, 4 }
0x1f85   :  { %10029 = vpush %v2547_v18 }
0x1f86   :  { %v10136_v17 = vpop.eup %10135  ;;  %v2534_v61 = vadd.f32 %v2533_v34, %v2532_v24 }
0x1f87   :  { %v2784_v32 = vmul.f32 %v10136_v17, %v2776_v33  ;;  %v11699_v33 = vld [vmem:[%s13723_s4 + $0x80] sm:$0xff] }
0x1f88   :  { %v2535_v18 = vrot.slane %v2534_v61, 2 }
0x1f89   :  { %v2785_v5 = vmul.f32 %v2784_v32, %v10816_v0 }
0x1f8a   :  { %v2536_v17 = vadd.f32 %v2535_v18, %v2534_v61 }
0x1f8b   :  { %v2786_v1 = vadd.f32 %v2785_v5, %v10820_v10 }
0x1f8c   :  { %v2537_v32 = vrot.slane %v2536_v17, 1 }
0x1f8d   :  { %9167 = vmatmul.mubr.msk.f32.vlgmr.msra.gmra.mxu1 %vm434_vm0, %v2786_v1 }
0x1f8e   :  { %9205 = vmatpush3.msra.mxu1 %v11690_v29  ;;  %9212 = vmatprep.mubr.msk.f32.mxu1 %vm10481_vm1, %v13838_v9  ;;  %v2538_v5 = vadd.f32 %v2537_v32, %v2536_v17  ;;  %v13865_v32 = vld [vmem:[#allocation17_spill] sm:$0xff] }
0x1f8f   :  { %9206 = vmatprep.subr.mxu1 %v13838_v9 }
0x1f90   :  { %9207 = vmatpush3.msra.mxu1 %v11699_v33 }
0x1f91   :  { %9208 = vmatprep.subr.mxu1 %v13838_v9 }
0x1f92   :  { %9209 = vmatpush3.msra.mxu1 %v11706_v63 }
0x1f93   :  { %9210 = vmatprep.subr.mxu1 %v13838_v9 }
0x1f94   :  { %9211 = vmatpush3.msra.mxu1 %v11713_v46 }
0x1f95   :  { %9215 = vmatprep.subr.mxu1 %v13838_v9 }
0x1fb6   :  { %s10030_s6 = spop %10029 }
0x1fb7   :  { %v2549_v8 = vstv %s10030_s6 }
0x1fb8   :  { %v2550_v30 = vmul.f32 3.0, %v2549_v8 }
0x1fba   :  { %v2551_v54 = vmax.f32 %v2550_v30, 1e-06 }
0x1fbc   :  { %10137 = vrcp.f32 %v2551_v54  ;;  %v13864_v54 = vld [vmem:[#allocation16_spill] sm:$0xff] }
0x1fc9   :  { %v10138_v1 = vpop.eup %10137 }
0x1fca   :  { %v2553_v46 = vmul.f32 %v10138_v1, %v2538_v5 }
0x1fcc   :  { %2561 = vperm.xlu1 %10061, %v2553_v46  }
0x1fd0   :  { %10062 = vset.pattern.permute.xlu1 %v13862_v3 }
0x1fd1   :  { %206 = vperm.xlu1 %10062, %v68_v27  }
0x1fd5   :  { %10063 = vset.pattern.permute.xlu1 %v13863_v48 }
0x1fd6   :  { %249 = vperm.xlu1 %10063, %v68_v27   ;;  %v11734_v27 = vld [vmem:[%s13723_s4 + $0x8] sm:$0xff] }
0x1fda   :  { %10064 = vset.pattern.permute.xlu1 %v13862_v3 }
0x1fdb   :  { %2556 = vperm.xlu1 %10064, %v2553_v46  }
0x2047   :  { %v2562_v11 = vpop.permute.xlu1 %2561 }
0x2048   :  { %v2564_v46 = vmul.f32 %v11734_v27, %v2562_v11  ;;  %v13866_v11 = vld [vmem:[#allocation18_spill] sm:$0xff] }
0x204c   :  { %v207_v24 = vpop.permute.xlu1 %206 }
0x204d   :  { %v2856_v34 = vpop.f32.mrf.mxu1  ;;  %v235_v18 = vmul.f32 %v13864_v54, %v207_v24 }
0x204e   :  { %v2857_v8 = vadd.f32 %v2856_v34, %v10893_v2  ;;  %v2566_v34 = vrot.slane %v2564_v46, 1  ;;  %v11777_v46 = vld [vmem:[%s13723_s4 + $0x50] sm:$0xff] }
0x204f   :  { %v9168_v61 = vpop.f32.mrf.mxu1  ;;  %13870 = vst [vmem:[#allocation11_spill] sm:$0xff] %v11777_v46 }
0x2050   :  { %v2860_v30 = vmax.f32 %v2857_v8, 0.0 }
0x2051   :  { %v250_v17 = vpop.permute.xlu1 %249 }
0x2052   :  { %v274_v5 = vmul.f32 %v13865_v32, %v250_v17  ;;  %9202 = vmatmul.mubr.f32.vlgmr.msra.gmra.mxu0 %v2860_v30  ;;  %v13867_v30 = vld [vmem:[#allocation2_spill] sm:$0xff] }
0x2053   :  { %9249 = vmatpush3.msra.mxu0 %v11292_v19  ;;  %9256 = vmatprep.mubr.msk.f32.mxu0 %vm10481_vm1, %v13838_v9 }
0x2054   :  { %9250 = vmatprep.subr.mxu0 %v13838_v9  ;;  %v281_v1 = vadd.f32 %v274_v5, %v235_v18  ;;  %v11754_v5 = vld [vmem:[%s13723_s4 + $0x68] sm:$0xff] }
0x2055   :  { %9251 = vmatpush3.msra.mxu0 %v11301_v22 }
0x2056   :  { %v2557_v24 = vpop.permute.xlu1 %2556  ;;  %9252 = vmatprep.subr.mxu0 %v13838_v9  ;;  %v292_v19 = vadd.f32 %v13866_v11, %v281_v1 }
0x2057   :  { %v2559_v8 = vmul.f32 %v11734_v27, %v2557_v24  ;;  %9253 = vmatpush3.msra.mxu0 %v11313_v62  ;;  %v11763_v62 = vld [vmem:[%s13723_s4 + $0x60] sm:$0xff] }
0x2058   :  { %9254 = vmatprep.subr.mxu0 %v13838_v9  ;;  %13868 = vst [vmem:[#allocation14_spill] sm:$0xff] %v11763_v62 }
0x2059   :  { %v2568_v61 = vadd.f32 %v2566_v34, %v2559_v8  ;;  %9255 = vmatpush3.msra.mxu0 %v11322_v4  ;;  %v11770_v4 = vld [vmem:[%s13723_s4 + $0x58] sm:$0xff] }
0x205a   :  { %9294 = vmatprep.subr.mxu0 %v13838_v9  ;;  %13869 = vst [vmem:[#allocation15_spill] sm:$0xff] %v11770_v4 }
0x205b   :  { %v2572_v18 = vrot.slane %v2568_v61, %v13867_v30 }
0x205d   :  { %v2573_v22 = vsub.f32 %v292_v19, %v2572_v18 }
0x205f   :  { %v2574_v17 = vmax.f32 %v2573_v22, 0.0  ;;  %v13871_v22 = vld [vmem:[#allocation23_spill] sm:$0xff] }
0x2061   :  { %9213 = vmatmul.mubr.msk.f32.vlgmr.msra.gmra.mxu1 %vm434_vm0, %v2574_v17 }
0x2062   :  { %9216 = vmatpush3.msra.mxu1 %v11754_v5  ;;  %9223 = vmatprep.mubr.msk.f32.mxu1 %vm10481_vm1, %v13838_v9 }
0x2063   :  { %9217 = vmatprep.subr.mxu1 %v13838_v9 }
0x2064   :  { %9218 = vmatpush3.msra.mxu1 %v11763_v62 }
0x2065   :  { %9219 = vmatprep.subr.mxu1 %v13838_v9 }
0x2066   :  { %9220 = vmatpush3.msra.mxu1 %v11770_v4 }
0x2067   :  { %9221 = vmatprep.subr.mxu1 %v13838_v9 }
0x2068   :  { %9222 = vmatpush3.msra.mxu1 %v11777_v46 }
0x2069   :  { %9226 = vmatprep.subr.mxu1 %v13838_v9 }
0x2112   :  { %v2927_v1 = vpop.f32.mrf.mxu0 }
0x2113   :  { %v2928_v24 = vadd.f32 %v2927_v1, %v10534_v7 }
0x2114   :  { %v9203_v34 = vpop.f32.mrf.mxu0 }
0x2115   :  { %v2931_v8 = vadd.f32 %v2928_v24, %v11671_v15 }
0x2117   :  { %9224 = vmatmul.mubr.msk.f32.vlgmr.msra.gmra.mxu1 %vm434_vm0, %v2931_v8 }
0x2118   :  { %9227 = vmatpush3.msra.mxu1 %v11336_v49  ;;  %9234 = vmatprep.mubr.msk.f32.mxu1 %vm10481_vm1, %v13838_v9 }
0x2119   :  { %9228 = vmatprep.subr.mxu1 %v13838_v9 }
0x211a   :  { %9229 = vmatpush3.msra.mxu1 %v11345_v43 }
0x211b   :  { %9230 = vmatprep.subr.mxu1 %v13838_v9 }
0x211c   :  { %9231 = vmatpush3.msra.mxu1 %v11352_v50 }
0x211d   :  { %9232 = vmatprep.subr.mxu1 %v13838_v9 }
0x211e   :  { %9233 = vmatpush3.msra.mxu1 %v11359_v52 }
0x211f   :  { %9237 = vmatprep.subr.mxu1 %v13838_v9 }
0x2121   :  { %v3001_v15 = vpop.f32.mrf.mxu1 }
0x2123   :  { %v9214_v19 = vpop.f32.mrf.mxu1 }
0x21d7   :  { %v3074_v49 = vpop.f32.mrf.mxu1 }
0x21d8   :  { %v3075_v61 = vadd.f32 %v3074_v49, %v3001_v15 }
0x21d9   :  { %v9225_v18 = vpop.f32.mrf.mxu1 }
0x21da   :  { %v11795_v17 = vadd.f32 %v3075_v61, %v13871_v22 }
0x21dc   :  { %v3079_v43 = vsel %vm434_vm0, %v11795_v17, 0.0 }
0x21dd   :  { %3080 = vadd.xlane.f32.xlu0 %v3079_v43 }
0x2266   :  { %v3081_v1 = vpop.xlane.xlu0 %3080 }
0x2267   :  { %v3082_v50 = vmul.f32 0.03125, %v3081_v1 }
0x2269   :  { %v3083_v24 = vsub.f32 %v11795_v17, %v3082_v50 }
0x226b   :  { %v3084_v34 = vmul.f32 %v3083_v24, %v3083_v24 }
0x226d   :  { %v3085_v52 = vsel %vm434_vm0, %v3084_v34, 0.0 }
0x226e   :  { %3086 = vadd.xlane.f32.xlu1 %v3085_v52 }
0x22f7   :  { %v3087_v8 = vpop.xlane.xlu1 %3086 }
0x22f8   :  { %v3088_v19 = vmul.f32 0.03125, %v3087_v8 }
0x22fa   :  { %v3089_v46 = vadd.f32 1e-05, %v3088_v19 }
0x22fc   :  { %10139 = vrsqrt.f32 %v3089_v46 }
0x2309   :  { %v10140_v15 = vpop.eup %10139 }
0x230a   :  { %v3091_v49 = vmul.f32 %v10140_v15, %v3083_v24 }
0x230c   :  { %v3092_v61 = vmul.f32 %v3091_v49, %v10623_v42 }
0x230e   :  { %v3093_v18 = vadd.f32 %v3092_v61, %v10626_v44 }
0x2310   :  { %9235 = vmatmul.mubr.msk.f32.vlgmr.msra.gmra.mxu1 %vm434_vm0, %v3093_v18 }
0x2311   :  { %9238 = vmatpush3.msra.mxu1 %v11376_v26  ;;  %9245 = vmatprep.mubr.msk.f32.mxu1 %vm10481_vm1, %v13838_v9 }
0x2312   :  { %9239 = vmatprep.subr.mxu1 %v13838_v9 }
0x2313   :  { %9240 = vmatpush3.msra.mxu1 %v11385_v6 }
0x2314   :  { %9241 = vmatprep.subr.mxu1 %v13838_v9 }
0x2315   :  { %9242 = vmatpush3.msra.mxu1 %v11392_v20 }
0x2316   :  { %9243 = vmatprep.subr.mxu1 %v13838_v9 }
0x2317   :  { %9244 = vmatpush3.msra.mxu1 %v11399_v35 }
0x2318   :  { %9259 = vmatprep.subr.mxu1 %v13838_v9 }
0x23d0   :  { %v3163_v46 = vpop.f32.mrf.mxu1 }
0x23d1   :  { %v3164_v26 = vadd.f32 %v3163_v46, %v10637_v51 }
0x23d2   :  { %v9236_v43 = vpop.f32.mrf.mxu1 }
0x23d3   :  { %v3167_v1 = vmul.f32 %v3164_v26, %v11202_v39  ;;  %v3172_v6 = vmul.f32 %v3164_v26, %v11624_v31  ;;  %v3177_v20 = vmul.f32 %v3164_v26, %v3164_v26 }
0x23d5   :  { %v3168_v50 = vsel %vm434_vm0, %v3167_v1, 0.0  ;;  %v3173_v24 = vsel %vm434_vm0, %v3172_v6, 0.0  ;;  %v3178_v34 = vsel %vm434_vm0, %v3177_v20, 0.0 }
0x23d6   :  { %3169 = vadd.xlane.f32.xlu0 %v3168_v50 }
0x23da   :  { %3174 = vadd.xlane.f32.xlu0 %v3173_v24 }
0x23de   :  { %3179 = vadd.xlane.f32.xlu0 %v3178_v34 }
0x245f   :  { %v3170_v35 = vpop.xlane.xlu0 %3169 }
0x2460   :  { %v3171_v19 = vmul.f32 0.17677669, %v3170_v35 }
0x2463   :  { %v3175_v52 = vpop.xlane.xlu0 %3174 }
0x2464   :  { %v3176_v8 = vmul.f32 0.17677669, %v3175_v52 }
0x2466   :  { %v3182_v49 = vmax.f32 %v3171_v19, %v3176_v8 }
0x2467   :  { %v3180_v15 = vpop.xlane.xlu0 %3179 }
0x2468   :  { %v3181_v61 = vmul.f32 0.17677669, %v3180_v15 }
0x246a   :  { %v3183_v18 = vmax.f32 %v3182_v49, %v3181_v61 }
0x246c   :  { %v3184_v46 = vsub.f32 %v3171_v19, %v3183_v18  ;;  %v3187_v43 = vsub.f32 %v3176_v8, %v3183_v18  ;;  %v3190_v1 = vsub.f32 %v3181_v61, %v3183_v18  ;;  %v13872_v18 = vld [vmem:[#allocation5_spill] sm:$0xff] }
0x246e   :  { %v3185_v22 = vmul.f32 1.442695, %v3184_v46  ;;  %v3188_v50 = vmul.f32 1.442695, %v3187_v43  ;;  %v3191_v4 = vmul.f32 1.442695, %v3190_v1 }
0x2470   :  { %10141 = vpow2.f32 %v3185_v22 }
0x2471   :  { %10143 = vpow2.f32 %v3188_v50 }
0x2472   :  { %10145 = vpow2.f32 %v3191_v4 }
0x247d   :  { %v10142_v6 = vpop.eup %10141 }
0x247e   :  { %v10144_v24 = vpop.eup %10143  ;;  %v3196_v35 = vmul.f32 %v10142_v6, %v11202_v39 }
0x247f   :  { %v3193_v20 = vadd.f32 %v10144_v24, %v10142_v6  ;;  %v10146_v34 = vpop.eup %10145  ;;  %v3197_v52 = vmul.f32 %v10144_v24, %v11624_v31 }
0x2480   :  { %v3199_v19 = vmul.f32 %v10146_v34, %v3164_v26 }
0x2481   :  { %v3194_v62 = vadd.f32 %v10146_v34, %v3193_v20  ;;  %v3198_v15 = vadd.f32 %v3197_v52, %v3196_v35  ;;  %v11887_v34 = vld [vmem:[%s13723_s4 + $0x128] sm:$0xff]  ;;  %v11896_v35 = vld [vmem:[%s13723_s4 + $0x120] sm:$0xff]  ;;  %v11903_v52 = vld [vmem:[%s13723_s4 + $0x118] sm:$0xff] }
0x2482   :  { %13873 = vst [vmem:[#allocation19_spill] sm:$0xff] %v11887_v34  ;;  %13874 = vst [vmem:[#allocation20_spill] sm:$0xff] %v11896_v35 }
0x2483   :  { %10147 = vrcp.f32 %v3194_v62  ;;  %v3200_v8 = vadd.f32 %v3199_v19, %v3198_v15  ;;  %13875 = vst [vmem:[#allocation21_spill] sm:$0xff] %v11903_v52  ;;  %v11910_v15 = vld [vmem:[%s13723_s4 + $0x110] sm:$0xff] }
0x2484   :  { %13876 = vst [vmem:[#allocation22_spill] sm:$0xff] %v11910_v15 }
0x2490   :  { %v10148_v49 = vpop.eup %10147 }
0x2491   :  { %v3201_v61 = vmul.f32 %v10148_v49, %v3200_v8 }
0x2493   :  { %9246 = vmatmul.mubr.msk.f32.vlgmr.msra.gmra.mxu1 %vm434_vm0, %v3201_v61 }
0x2494   :  { %9260 = vmatpush3.msra.mxu1 %v11412_v36  ;;  %9291 = vmatprep.mubr.msk.f32.mxu1 %vm10481_vm1, %v13838_v9 }
0x2495   :  { %9261 = vmatprep.subr.mxu1 %v13838_v9 }
0x2496   :  { %9262 = vmatpush3.msra.mxu1 %v11421_v38 }
0x2497   :  { %9263 = vmatprep.subr.mxu1 %v13838_v9 }
0x2498   :  { %9264 = vmatpush3.msra.mxu1 %v11428_v40 }
0x2499   :  { %9265 = vmatprep.subr.mxu1 %v13838_v9 }
0x249a   :  { %9266 = vmatpush3.msra.mxu1 %v11435_v41 }
0x249b   :  { %9267 = vmatprep.subr.mxu1 %v13838_v9 }
0x249c   :  { %9268 = vmatpush3.msra.mxu1 %v11442_v45 }
0x249d   :  { %9269 = vmatprep.subr.mxu1 %v13838_v9 }
0x249e   :  { %9270 = vmatpush3.msra.mxu1 %v11449_v47  ;;  %v3510_v47 = vsel %vm3509_vm10, 1, %v13862_v3 }
0x249f   :  { %9271 = vmatprep.subr.mxu1 %v13838_v9 }
0x24a0   :  { %9272 = vmatpush3.msra.mxu1 %v11456_v53  ;;  %v76_v53 = vld [vmem:[%s13721_s1 + $0x18] sm:$0xff] }
0x24a1   :  { %9273 = vmatprep.subr.mxu1 %v13838_v9 }
0x24a2   :  { %9274 = vmatpush3.msra.mxu1 %v11463_v55 }
0x24a3   :  { %9275 = vmatprep.subr.mxu1 %v13838_v9 }
0x24a4   :  { %9276 = vmatpush3.msra.mxu1 %v11470_v28 }
0x24a5   :  { %9277 = vmatprep.subr.mxu1 %v13838_v9 }
0x24a6   :  { %9278 = vmatpush3.msra.mxu1 %v11477_v25 }
0x24a7   :  { %9279 = vmatprep.subr.mxu1 %v13838_v9 }
0x24a8   :  { %9280 = vmatpush3.msra.mxu1 %v11484_v57 }
0x24a9   :  { %9281 = vmatprep.subr.mxu1 %v13838_v9 }
0x24aa   :  { %9282 = vmatpush3.msra.mxu1 %v11491_v56 }
0x24ab   :  { %9283 = vmatprep.subr.mxu1 %v13838_v9 }
0x24ac   :  { %9284 = vmatpush3.msra.mxu1 %v11498_v58 }
0x24ad   :  { %9285 = vmatprep.subr.mxu1 %v13838_v9 }
0x24ae   :  { %9286 = vmatpush3.msra.mxu1 %v11505_v59 }
0x24af   :  { %9287 = vmatprep.subr.mxu1 %v13838_v9 }
0x24b0   :  { %9288 = vmatpush3.msra.mxu1 %v11512_v23 }
0x24b1   :  { %9289 = vmatprep.subr.mxu1 %v13838_v9 }
0x24b2   :  { %9290 = vmatpush3.msra.mxu1 %v11519_v60 }
0x24b3   :  { %9338 = vmatprep.subr.mxu1 %v13838_v9 }
0x2553   :  { %v3271_v36 = vpop.f32.mrf.mxu1 }
0x2554   :  { %v3272_v38 = vadd.f32 %v3271_v36, %v10674_v16  ;;  %v11918_v36 = vld [vmem:[%s13722_s3 + $0x28] sm:$0xff] }
0x2555   :  { %v9247_v40 = vpop.f32.mrf.mxu1 }
0x2556   :  { %v11859_v41 = vadd.f32 %v3272_v38, %v11795_v17  ;;  %v11927_v38 = vld [vmem:[%s13722_s3 + $0x20] sm:$0xff]  ;;  %v11934_v40 = vld [vmem:[%s13722_s3 + $0x18] sm:$0xff] }
0x2558   :  { %v3276_v45 = vsel %vm434_vm0, %v11859_v41, 0.0 }
0x2559   :  { %3277 = vadd.xlane.f32.xlu1 %v3276_v45  ;;  %v11941_v45 = vld [vmem:[%s13722_s3 + $0x10] sm:$0xff] }
0x256a   :  { %3512 = vperm.xlu1 %10064, %v3510_v47  }
0x256e   :  { %10065 = vset.pattern.permute.xlu1 %v13863_v48 }
0x256f   :  { %143 = vperm.xlu1 %10065, %v76_v53  }
0x2573   :  { %10066 = vset.pattern.permute.xlu1 %v13862_v3 }
0x25e2   :  { %v3278_v55 = vpop.xlane.xlu1 %3277 }
0x25e3   :  { %v3279_v28 = vmul.f32 0.03125, %v3278_v55 }
0x25e5   :  { %v3280_v25 = vsub.f32 %v11859_v41, %v3279_v28 }
0x25e6   :  { %v11872_v58 = vpop.permute.xlu1 %3512 }
0x25e7   :  { %v3281_v57 = vmul.f32 %v3280_v25, %v3280_v25  ;;  %vm3514_vm11 = vcmp.eq.s32.totalorder %v11872_v58, 1 }
0x25e9   :  { %v3282_v56 = vsel %vm434_vm0, %v3281_v57, 0.0 }
0x25ea   :  { %3283 = vadd.xlane.f32.xlu0 %v3282_v56  ;;  %v144_v62 = vpop.permute.xlu1 %143 }
0x25eb   :  { %v165_v4 = vmul.f32 %v10550_v13, %v144_v62  ;;  %v11956_v62 = vld [vmem:[%s13723_s4 + $0x28] sm:$0xff] }
0x2600   :  { %101 = vperm.xlu0 %10052, %v76_v53  }
0x2673   :  { %v3284_v59 = vpop.xlane.xlu0 %3283 }
0x2674   :  { %v3285_v23 = vmul.f32 0.03125, %v3284_v59 }
0x2676   :  { %v3286_v60 = vadd.f32 1e-05, %v3285_v23 }
0x2678   :  { %10149 = vrsqrt.f32 %v3286_v60 }
0x267b   :  { %v102_v22 = vpop.permute.xlu0 %101 }
0x267c   :  { %v126_v17 = vmul.f32 %v10547_v12, %v102_v22  ;;  %v11973_v22 = vld [vmem:[%s13723_s4 + $0x18] sm:$0xff] }
0x267e   :  { %v172_v26 = vadd.f32 %v165_v4, %v126_v17  ;;  %v11980_v17 = vld [vmem:[%s13723_s4 + $0x10] sm:$0xff] }
0x2680   :  { %v183_v46 = vadd.f32 %v13872_v18, %v172_v26 }
0x2682   :  { %v11877_v43 = vmax.f32 %v183_v46, 0.0 }
0x2684   :  { %v3661_v1 = vsel %vm434_vm0, %v11877_v43, 0.0 }
0x2685   :  { %v10150_v50 = vpop.eup %10149  ;;  %3662 = vadd.xlane.f32.xlu0 %v3661_v1 }
0x2686   :  { %v3288_v6 = vmul.f32 %v10150_v50, %v3280_v25 }
0x2688   :  { %v3289_v24 = vmul.f32 %v3288_v6, %v10816_v0 }
0x268a   :  { %v3290_v20 = vadd.f32 %v3289_v24, %v10820_v10 }
0x268c   :  { %9257 = vmatmul.mubr.msk.f32.vlgmr.msra.gmra.mxu0 %vm434_vm0, %v3290_v20  ;;  %v13877_v20 = vld [vmem:[#allocation24_spill] sm:$0xff] }
0x268d   :  { %9295 = vmatpush3.msra.mxu0 %v11887_v34  ;;  %9302 = vmatprep.mubr.msk.f32.mxu0 %vm10481_vm1, %v13838_v9 }
0x268e   :  { %9296 = vmatprep.subr.mxu0 %v13838_v9 }
0x268f   :  { %9297 = vmatpush3.msra.mxu0 %v11896_v35 }
0x2690   :  { %9298 = vmatprep.subr.mxu0 %v13838_v9 }
0x2691   :  { %9299 = vmatpush3.msra.mxu0 %v11903_v52 }
0x2692   :  { %9300 = vmatprep.subr.mxu0 %v13838_v9 }
0x2693   :  { %9301 = vmatpush3.msra.mxu0 %v11910_v15 }
0x2694   :  { %9305 = vmatprep.subr.mxu0 %v13838_v9 }
0x270e   :  { %v3663_v47 = vpop.xlane.xlu0 %3662 }
0x270f   :  { %v3664_v53 = vmul.f32 0.03125, %v3663_v47 }
0x2711   :  { %v3665_v25 = vsub.f32 %v11877_v43, %v3664_v53 }
0x2713   :  { %v3666_v60 = vmul.f32 %v3665_v25, %v3665_v25 }
0x2715   :  { %v3667_v4 = vsel %vm434_vm0, %v3666_v60, 0.0 }
0x274c   :  { %v3360_v19 = vpop.f32.mrf.mxu0 }
0x274d   :  { %v3361_v8 = vadd.f32 %v3360_v19, %v10893_v2 }
0x274e   :  { %v9258_v49 = vpop.f32.mrf.mxu0 }
0x274f   :  { %v3364_v61 = vmax.f32 %v3361_v8, 0.0 }
0x2751   :  { %9292 = vmatmul.mubr.f32.vlgmr.msra.gmra.mxu1 %v3364_v61 }
0x2752   :  { %9339 = vmatpush3.msra.mxu1 %v11918_v36  ;;  %9346 = vmatprep.mubr.msk.f32.mxu1 %vm10481_vm1, %v13838_v9 }
0x2753   :  { %9340 = vmatprep.subr.mxu1 %v13838_v9 }
0x2754   :  { %9341 = vmatpush3.msra.mxu1 %v11927_v38 }
0x2755   :  { %9342 = vmatprep.subr.mxu1 %v13838_v9 }
0x2756   :  { %9343 = vmatpush3.msra.mxu1 %v11934_v40 }
0x2757   :  { %9344 = vmatprep.subr.mxu1 %v13838_v9 }
0x2758   :  { %9345 = vmatpush3.msra.mxu1 %v11941_v45 }
0x2759   :  { %9384 = vmatprep.subr.mxu1 %v13838_v9 }
0x2811   :  { %v3431_v55 = vpop.f32.mrf.mxu1 }
0x2812   :  { %v3432_v28 = vadd.f32 %v3431_v55, %v10534_v7 }
0x2813   :  { %v9293_v57 = vpop.f32.mrf.mxu1 }
0x2814   :  { %v3435_v56 = vadd.f32 %v3432_v28, %v11859_v41  ;;  %v11965_v41 = vld [vmem:[%s13723_s4 + $0x20] sm:$0xff] }
0x2816   :  { %9303 = vmatmul.mubr.msk.f32.vlgmr.msra.gmra.mxu0 %vm434_vm0, %v3435_v56  ;;  %v3518_v59 = vsel %vm3514_vm11, %v3435_v56, 0.0 }
0x2817   :  { %v3519_v23 = vsel %vm434_vm0, %v3518_v59, 0.0  ;;  %9306 = vmatpush3.msra.mxu0 %v11956_v62  ;;  %9313 = vmatprep.mubr.msk.f32.mxu0 %vm10481_vm1, %v13838_v9 }
0x2818   :  { %3520 = vadd.xlane.f32.xlu1 %v3519_v23  ;;  %9307 = vmatprep.subr.mxu0 %v13838_v9 }
0x2819   :  { %9308 = vmatpush3.msra.mxu0 %v11965_v41 }
0x281a   :  { %9309 = vmatprep.subr.mxu0 %v13838_v9 }
0x281b   :  { %9310 = vmatpush3.msra.mxu0 %v11973_v22 }
0x281c   :  { %3668 = vadd.xlane.f32.xlu1 %v3667_v4  ;;  %9311 = vmatprep.subr.mxu0 %v13838_v9 }
0x281d   :  { %9312 = vmatpush3.msra.mxu0 %v11980_v17 }
0x281e   :  { %9316 = vmatprep.subr.mxu0 %v13838_v9 }
0x28a1   :  { %v3521_v26 = vpop.xlane.xlu1 %3520 }
0x28a2   :  { %v3522_v46 = vmul.f32 0.03125, %v3521_v26 }
0x28a4   :  { %v3523_v1 = vsub.f32 %v3518_v59, %v3522_v46  ;;  %v12011_v46 = vld [vmem:[%s13723_s4 + $0x48] sm:$0xff] }
0x28a5   :  { %v3669_v61 = vpop.xlane.xlu1 %3668 }
0x28a6   :  { %v3524_v50 = vmul.f32 %v3523_v1, %v3523_v1  ;;  %v3670_v47 = vmul.f32 0.03125, %v3669_v61 }
0x28a8   :  { %v3525_v6 = vsel %vm434_vm0, %v3524_v50, 0.0  ;;  %v3671_v28 = vadd.f32 1e-05, %v3670_v47  ;;  %v12027_v50 = vld [vmem:[%s13723_s4 + $0x38] sm:$0xff] }
0x28a9   :  { %3526 = vadd.xlane.f32.xlu0 %v3525_v6  ;;  %v12034_v6 = vld [vmem:[%s13723_s4 + $0x30] sm:$0xff] }
0x28d6   :  { %v3505_v24 = vpop.f32.mrf.mxu0 }
0x28d7   :  { %v3506_v19 = vadd.f32 %v3505_v24, %v13877_v20 }
0x28d8   :  { %v9304_v8 = vpop.f32.mrf.mxu0 }
0x28d9   :  { %v3515_v49 = vsel %vm3514_vm11, %v3506_v19, 0.0 }
0x28da   :  { %8138 = vst.msk [vmem:[%s13726_s5 + $0x10] sm:$0xff] %vm376_vm5, %v3515_v49 }
0x2932   :  { %v3527_v53 = vpop.xlane.xlu0 %3526 }
0x2933   :  { %v3528_v55 = vmul.f32 0.03125, %v3527_v53 }
0x2935   :  { %v3529_v57 = vadd.f32 1e-05, %v3528_v55 }
0x2937   :  { %10151 = vrsqrt.f32 %v3529_v57 }
0x2938   :  { %10153 = vrsqrt.f32 %v3671_v28 }
0x2944   :  { %v10152_v56 = vpop.eup %10151 }
0x2945   :  { %v3531_v59 = vmul.f32 %v10152_v56, %v3523_v1  ;;  %v10154_v23 = vpop.eup %10153  ;;  %v12020_v1 = vld [vmem:[%s13723_s4 + $0x40] sm:$0xff] }
0x2946   :  { %v3673_v4 = vmul.f32 %v10154_v23, %v3665_v25 }
0x2947   :  { %v3532_v60 = vmul.f32 %v3531_v59, %v10623_v42 }
0x2948   :  { %v3674_v26 = vmul.f32 %v3673_v4, %v10623_v42 }
0x2949   :  { %v3533_v58 = vadd.f32 %v3532_v60, %v10626_v44 }
0x294a   :  { %v3675_v25 = vadd.f32 %v3674_v26, %v10626_v44 }
0x294b   :  { %9314 = vmatmul.mubr.msk.f32.vlgmr.msra.gmra.mxu0 %vm434_vm0, %v3533_v58 }
0x294c   :  { %9317 = vmatpush3.msra.mxu0 %v11956_v62  ;;  %9324 = vmatprep.mubr.msk.f32.mxu0 %vm10481_vm1, %v13838_v9 }
0x294d   :  { %9318 = vmatprep.subr.mxu0 %v13838_v9 }
0x294e   :  { %9319 = vmatpush3.msra.mxu0 %v11965_v41 }
0x294f   :  { %9320 = vmatprep.subr.mxu0 %v13838_v9 }
0x2950   :  { %9321 = vmatpush3.msra.mxu0 %v11973_v22 }
0x2951   :  { %9322 = vmatprep.subr.mxu0 %v13838_v9 }
0x2952   :  { %9323 = vmatpush3.msra.mxu0 %v11980_v17 }
0x2953   :  { %9325 = vmatmul.mubr.msk.f32.vlgmr.msra.gmra.mxu0 %vm434_vm0, %v3675_v25  ;;  %9327 = vmatprep.subr.mxu0 %v13838_v9 }
0x2954   :  { %9328 = vmatpush3.msra.mxu0 %v12011_v46  ;;  %9335 = vmatprep.mubr.msk.f32.mxu0 %vm10481_vm1, %v13838_v9 }
0x2955   :  { %9329 = vmatprep.subr.mxu0 %v13838_v9 }
0x2956   :  { %9330 = vmatpush3.msra.mxu0 %v12020_v1 }
0x2957   :  { %9331 = vmatprep.subr.mxu0 %v13838_v9 }
0x2958   :  { %9332 = vmatpush3.msra.mxu0 %v12027_v50 }
0x2959   :  { %9333 = vmatprep.subr.mxu0 %v13838_v9 }
0x295a   :  { %9334 = vmatpush3.msra.mxu0 %v12034_v6 }
0x295b   :  { %9349 = vmatprep.subr.mxu0 %v13838_v9 }
0x2a0b   :  { %v3603_v24 = vpop.f32.mrf.mxu0 }
0x2a0c   :  { %v12040_v47 = vadd.f32 %v3603_v24, %v10637_v51 }
0x2a0d   :  { %v9315_v19 = vpop.f32.mrf.mxu0 }
0x2a13   :  { %v3745_v8 = vpop.f32.mrf.mxu0 }
0x2a14   :  { %v3746_v49 = vadd.f32 %v3745_v8, %v10637_v51 }
0x2a15   :  { %v9326_v61 = vpop.f32.mrf.mxu0 }
0x2a16   :  { %v3754_v53 = vmul.f32 %v3746_v49, %v11624_v31  ;;  %v3749_v55 = vmul.f32 %v3746_v49, %v11202_v39  ;;  %v3764_v56 = vmul.f32 %v3746_v49, %v3746_v49  ;;  %v3759_v59 = vmul.f32 %v3746_v49, %v12040_v47 }
0x2a18   :  { %v3755_v28 = vsel %vm434_vm0, %v3754_v53, 0.0  ;;  %v3750_v57 = vsel %vm434_vm0, %v3749_v55, 0.0  ;;  %v3765_v23 = vsel %vm434_vm0, %v3764_v56, 0.0  ;;  %v3760_v60 = vsel %vm434_vm0, %v3759_v59, 0.0 }
0x2a19   :  { %3756 = vadd.xlane.f32.xlu1 %v3755_v28  ;;  %3751 = vadd.xlane.f32.xlu0 %v3750_v57 }
0x2a1d   :  { %3766 = vadd.xlane.f32.xlu1 %v3765_v23  ;;  %3761 = vadd.xlane.f32.xlu0 %v3760_v60 }
0x2aa2   :  { %v3757_v58 = vpop.xlane.xlu1 %3756  ;;  %v3752_v4 = vpop.xlane.xlu0 %3751 }
0x2aa3   :  { %v3758_v26 = vmul.f32 0.17677669, %v3757_v58  ;;  %v3753_v25 = vmul.f32 0.17677669, %v3752_v4 }
0x2aa5   :  { %v3769_v8 = vmax.f32 %v3753_v25, %v3758_v26 }
0x2aa6   :  { %v3767_v24 = vpop.xlane.xlu1 %3766  ;;  %v3762_v19 = vpop.xlane.xlu0 %3761 }
0x2aa7   :  { %v3763_v61 = vmul.f32 0.17677669, %v3762_v19  ;;  %v3768_v53 = vmul.f32 0.17677669, %v3767_v24 }
0x2aa9   :  { %v3770_v55 = vmax.f32 %v3769_v8, %v3763_v61 }
0x2aab   :  { %v3771_v20 = vmax.f32 %v3770_v55, %v3768_v53 }
0x2aad   :  { %v3772_v15 = vsub.f32 %v3753_v25, %v3771_v20  ;;  %v3775_v28 = vsub.f32 %v3758_v26, %v3771_v20  ;;  %v3778_v57 = vsub.f32 %v3763_v61, %v3771_v20  ;;  %v3781_v52 = vsub.f32 %v3768_v53, %v3771_v20 }
0x2aaf   :  { %v3773_v56 = vmul.f32 1.442695, %v3772_v15  ;;  %v3776_v35 = vmul.f32 1.442695, %v3775_v28  ;;  %v3779_v59 = vmul.f32 1.442695, %v3778_v57 }
0x2ab0   :  { %v3782_v23 = vmul.f32 1.442695, %v3781_v52  ;;  %v12056_v28 = vld [vmem:[%s13723_s4 + $0x108] sm:$0xff]  ;;  %v12079_v57 = vld [vmem:[%s13723_s4 + $0xf0] sm:$0xff] }
0x2ab1   :  { %10155 = vpow2.f32 %v3773_v56  ;;  %v12086_v56 = vld [vmem:[%s13723_s4 + $0xe8] sm:$0xff] }
0x2ab2   :  { %10157 = vpow2.f32 %v3776_v35 }
0x2ab3   :  { %10159 = vpow2.f32 %v3779_v59  ;;  %v12093_v59 = vld [vmem:[%s13723_s4 + $0xe0] sm:$0xff] }
0x2ab4   :  { %10161 = vpow2.f32 %v3782_v23  ;;  %v12100_v23 = vld [vmem:[%s13723_s4 + $0xd8] sm:$0xff] }
0x2abe   :  { %v10156_v60 = vpop.eup %10155 }
0x2abf   :  { %v10158_v58 = vpop.eup %10157  ;;  %v3788_v26 = vmul.f32 %v10156_v60, %v11202_v39 }
0x2ac0   :  { %v3784_v4 = vadd.f32 %v10158_v58, %v10156_v60  ;;  %v10160_v34 = vpop.eup %10159  ;;  %v3789_v20 = vmul.f32 %v10158_v58, %v11624_v31  ;;  %v12107_v60 = vld [vmem:[%s13723_s4 + $0xd0] sm:$0xff]  ;;  %v12114_v58 = vld [vmem:[%s13723_s4 + $0xc8] sm:$0xff] }
0x2ac1   :  { %v10162_v24 = vpop.eup %10161  ;;  %v3791_v25 = vmul.f32 %v10160_v34, %v12040_v47 }
0x2ac2   :  { %v3785_v19 = vadd.f32 %v10160_v34, %v3784_v4  ;;  %v3790_v15 = vadd.f32 %v3789_v20, %v3788_v26  ;;  %v3793_v35 = vmul.f32 %v10162_v24, %v3746_v49  ;;  %v12065_v34 = vld [vmem:[%s13723_s4 + $0x100] sm:$0xff]  ;;  %v12072_v49 = vld [vmem:[%s13723_s4 + $0xf8] sm:$0xff] }
0x2ac3   :  { %v12121_v4 = vld [vmem:[%s13723_s4 + $0xc0] sm:$0xff]  ;;  %v12156_v20 = vld [vmem:[%s13723_s4 + $0x98] sm:$0xff] }
0x2ac4   :  { %v3786_v8 = vadd.f32 %v10162_v24, %v3785_v19  ;;  %v3792_v61 = vadd.f32 %v3791_v25, %v3790_v15  ;;  %v12128_v19 = vld [vmem:[%s13723_s4 + $0xb8] sm:$0xff]  ;;  %v12135_v24 = vld [vmem:[%s13723_s4 + $0xb0] sm:$0xff]  ;;  %v12149_v26 = vld [vmem:[%s13723_s4 + $0xa0] sm:$0xff]  ;;  %13880 = vst [vmem:[#allocation26_spill] sm:$0xff] %v12156_v20 }
0x2ac5   :  { %13879 = vst [vmem:[#allocation25_spill] sm:$0xff] %v12149_v26  ;;  %v12163_v15 = vld [vmem:[%s13723_s4 + $0x90] sm:$0xff] }
0x2ac6   :  { %10163 = vrcp.f32 %v3786_v8  ;;  %v3794_v52 = vadd.f32 %v3793_v35, %v3792_v61  ;;  %v12142_v8 = vld [vmem:[%s13723_s4 + $0xa8] sm:$0xff]  ;;  %13881 = vst [vmem:[#allocation27_spill] sm:$0xff] %v12163_v15 }
0x2ac7   :  { %13878 = vst [vmem:[#allocation12_spill] sm:$0xff] %v12142_v8 }
0x2ad3   :  { %v10164_v53 = vpop.eup %10163 }
0x2ad4   :  { %v3795_v55 = vmul.f32 %v10164_v53, %v3794_v52 }
0x2ad6   :  { %9336 = vmatmul.mubr.msk.f32.vlgmr.msra.gmra.mxu0 %vm434_vm0, %v3795_v55  ;;  %v69_v55 = vld [vmem:[%s13725_s0 + $0x18] sm:$0xff] }
0x2ad7   :  { %9350 = vmatpush3.msra.mxu0 %v12056_v28  ;;  %9381 = vmatprep.mubr.msk.f32.mxu0 %vm10481_vm1, %v13838_v9 }
0x2ad8   :  { %9351 = vmatprep.subr.mxu0 %v13838_v9 }
0x2ad9   :  { %9352 = vmatpush3.msra.mxu0 %v12065_v34 }
0x2ada   :  { %9353 = vmatprep.subr.mxu0 %v13838_v9 }
0x2adb   :  { %9354 = vmatpush3.msra.mxu0 %v12072_v49 }
0x2adc   :  { %9355 = vmatprep.subr.mxu0 %v13838_v9 }
0x2add   :  { %9356 = vmatpush3.msra.mxu0 %v12079_v57 }
0x2ade   :  { %9357 = vmatprep.subr.mxu0 %v13838_v9 }
0x2adf   :  { %9358 = vmatpush3.msra.mxu0 %v12086_v56 }
0x2ae0   :  { %9359 = vmatprep.subr.mxu0 %v13838_v9 }
0x2ae1   :  { %9360 = vmatpush3.msra.mxu0 %v12093_v59 }
0x2ae2   :  { %9361 = vmatprep.subr.mxu0 %v13838_v9 }
0x2ae3   :  { %9362 = vmatpush3.msra.mxu0 %v12100_v23 }
0x2ae4   :  { %9363 = vmatprep.subr.mxu0 %v13838_v9 }
0x2ae5   :  { %9364 = vmatpush3.msra.mxu0 %v12107_v60 }
0x2ae6   :  { %9365 = vmatprep.subr.mxu0 %v13838_v9 }
0x2ae7   :  { %9366 = vmatpush3.msra.mxu0 %v12114_v58 }
0x2ae8   :  { %9367 = vmatprep.subr.mxu0 %v13838_v9 }
0x2ae9   :  { %9368 = vmatpush3.msra.mxu0 %v12121_v4 }
0x2aea   :  { %9369 = vmatprep.subr.mxu0 %v13838_v9 }
0x2aeb   :  { %9370 = vmatpush3.msra.mxu0 %v12128_v19 }
0x2aec   :  { %9371 = vmatprep.subr.mxu0 %v13838_v9 }
0x2aed   :  { %9372 = vmatpush3.msra.mxu0 %v12135_v24 }
0x2aee   :  { %9373 = vmatprep.subr.mxu0 %v13838_v9 }
0x2aef   :  { %9374 = vmatpush3.msra.mxu0 %v12142_v8 }
0x2af0   :  { %9375 = vmatprep.subr.mxu0 %v13838_v9 }
0x2af1   :  { %9376 = vmatpush3.msra.mxu0 %v12149_v26 }
0x2af2   :  { %9377 = vmatprep.subr.mxu0 %v13838_v9 }
0x2af3   :  { %9378 = vmatpush3.msra.mxu0 %v12156_v20 }
0x2af4   :  { %9379 = vmatprep.subr.mxu0 %v13838_v9 }
0x2af5   :  { %9380 = vmatpush3.msra.mxu0 %v12163_v15 }
0x2af6   :  { %9428 = vmatprep.subr.mxu0 %v13838_v9 }
0x2b96   :  { %v3865_v25 = vpop.f32.mrf.mxu0 }
0x2b97   :  { %v3866_v61 = vadd.f32 %v3865_v25, %v10674_v16 }
0x2b98   :  { %v9337_v35 = vpop.f32.mrf.mxu0 }
0x2b99   :  { %v12169_v52 = vadd.f32 %v3866_v61, %v11877_v43 }
0x2b9b   :  { %v3870_v53 = vsel %vm434_vm0, %v12169_v52, 0.0 }
0x2b9c   :  { %3871 = vadd.xlane.f32.xlu0 %v3870_v53 }
0x2bb2   :  { %3607 = vrot.lane.b32.xlu0 %v10690_v21, %s10485_s2 }
0x2bb6   :  { %211 = vperm.xlu0 %10052, %v69_v55  }
0x2c25   :  { %v3872_v18 = vpop.xlane.xlu0 %3871 }
0x2c26   :  { %v3873_v12 = vmul.f32 0.03125, %v3872_v18 }
0x2c28   :  { %v3874_v25 = vsub.f32 %v12169_v52, %v3873_v12 }
0x2c29   :  { %v3608_v35 = vpop.permute.xlu0 %3607 }
0x2c2a   :  { %v3875_v13 = vmul.f32 %v3874_v25, %v3874_v25  ;;  %v12179_v43 = vmul.f32 %v3608_v35, %v11678_v14 }
0x2c2c   :  { %13882 = vst [vmem:[#allocation28_spill] sm:$0xff] %v12179_v43  ;;  %v3876_v61 = vsel %vm434_vm0, %v3875_v13, 0.0  ;;  %v3625_v53 = vsel %vm398_vm4, %v12179_v43, 0.0 }
0x2c2d   :  { %3877 = vadd.xlane.f32.xlu1 %v3876_v61 }
0x2c31   :  { %3626 = vadd.xlane.f32.xlu1 %v3625_v53 }
0x2c42   :  { %3614 = vperm.xlu1 %10066, %v12179_v43  }
0x2c46   :  { %10067 = vset.pattern.permute.xlu1 %v13863_v48 }
0x2cb6   :  { %v3878_v21 = vpop.xlane.xlu1 %3877 }
0x2cb7   :  { %v3879_v18 = vmul.f32 0.03125, %v3878_v21  ;;  %v12200_v21 = vadd.f32 %v11721_v37, %v69_v55  ;;  %v212_v37 = vpop.permute.xlu0 %211 }
0x2cb9   :  { %v3880_v16 = vadd.f32 1e-05, %v3879_v18 }
0x2cba   :  { %v3627_v12 = vpop.xlane.xlu1 %3626 }
0x2cbb   :  { %10165 = vrsqrt.f32 %v3880_v16  ;;  %v3628_v15 = vrot.slane %v3627_v12, 4  ;;  %v13883_v16 = vld [vmem:[#allocation13_spill] sm:$0xff] }
0x2cbd   :  { %v3629_v20 = vadd.f32 %v3628_v15, %v3627_v12 }
0x2cbf   :  { %v3630_v14 = vrot.slane %v3629_v20, 2 }
0x2cc1   :  { %v3631_v35 = vadd.f32 %v3630_v14, %v3629_v20 }
0x2cc3   :  { %v3632_v26 = vrot.slane %v3631_v35, 1 }
0x2cc5   :  { %v3633_v13 = vadd.f32 %v3632_v26, %v3631_v35 }
0x2cc7   :  { %10031 = vpush %v3633_v13 }
0x2cc8   :  { %v10166_v61 = vpop.eup %10165 }
0x2cc9   :  { %v3882_v8 = vmul.f32 %v10166_v61, %v3874_v25 }
0x2ccb   :  { %v3883_v53 = vmul.f32 %v3882_v8, %v10816_v0 }
0x2ccd   :  { %v3884_v43 = vadd.f32 %v3883_v53, %v10820_v10 }
0x2ccf   :  { %9347 = vmatmul.mubr.msk.f32.vlgmr.msra.gmra.mxu1 %vm434_vm0, %v3884_v43 }
0x2cd0   :  { %9385 = vmatpush3.msra.mxu1 %v11690_v29  ;;  %9392 = vmatprep.mubr.msk.f32.mxu1 %vm10481_vm1, %v13838_v9  ;;  %v3615_v29 = vpop.permute.xlu1 %3614 }
0x2cd1   :  { %9386 = vmatprep.subr.mxu1 %v13838_v9  ;;  %v3617_v8 = vmul.f32 %v3615_v29, %v12200_v21 }
0x2cd2   :  { %9387 = vmatpush3.msra.mxu1 %v11699_v33 }
0x2cd3   :  { %9388 = vmatprep.subr.mxu1 %v13838_v9  ;;  %v3618_v26 = vsel %vm376_vm5, %v3617_v8, 0.0 }
0x2cd4   :  { %9389 = vmatpush3.msra.mxu1 %v11706_v63  ;;  %v3619_v20 = vrot.slane %v3618_v26, 4 }
0x2cd5   :  { %9390 = vmatprep.subr.mxu1 %v13838_v9 }
0x2cd6   :  { %9391 = vmatpush3.msra.mxu1 %v13883_v16  ;;  %v3620_v15 = vadd.f32 %v3619_v20, %v3618_v26  ;;  %v236_v20 = vmul.f32 %v13864_v54, %v212_v37  ;;  %v13885_v37 = vld [vmem:[#allocation15_spill] sm:$0xff] }
0x2cd7   :  { %9395 = vmatprep.subr.mxu1 %v13838_v9 }
0x2cd8   :  { %v3621_v43 = vrot.slane %v3620_v15, 2 }
0x2cda   :  { %v3622_v18 = vadd.f32 %v3621_v43, %v3620_v15 }
0x2cdc   :  { %v3623_v12 = vrot.slane %v3622_v18, 1 }
0x2cde   :  { %v3624_v14 = vadd.f32 %v3623_v12, %v3622_v18 }
0x2cf8   :  { %s10032_s9 = spop %10031 }
0x2cf9   :  { %v3635_v33 = vstv %s10032_s9 }
0x2cfa   :  { %v3636_v25 = vmul.f32 4.0, %v3635_v33 }
0x2cfc   :  { %v3637_v63 = vmax.f32 %v3636_v25, 1e-06 }
0x2cfe   :  { %10167 = vrcp.f32 %v3637_v63 }
0x2d0b   :  { %v10168_v35 = vpop.eup %10167 }
0x2d0c   :  { %v3639_v13 = vmul.f32 %v10168_v35, %v3624_v14 }
0x2d0e   :  { %3642 = vperm.xlu0 %10052, %v3639_v13   ;;  %3647 = vperm.xlu1 %10067, %v3639_v13   ;;  %v13884_v13 = vld [vmem:[#allocation14_spill] sm:$0xff] }
0x2d12   :  { %253 = vperm.xlu1 %10067, %v69_v55  }
0x2d16   :  { %10068 = vset.pattern.permute.xlu1 %v13862_v3 }
0x2d89   :  { %v3648_v61 = vpop.permute.xlu1 %3647  ;;  %v3643_v53 = vpop.permute.xlu0 %3642 }
0x2d8a   :  { %v3650_v16 = vmul.f32 %v11734_v27, %v3648_v61  ;;  %v3645_v8 = vmul.f32 %v11734_v27, %v3643_v53 }
0x2d8c   :  { %v3652_v29 = vrot.slane %v3650_v16, 1 }
0x2d8d   :  { %v254_v26 = vpop.permute.xlu1 %253 }
0x2d8e   :  { %v3654_v33 = vadd.f32 %v3652_v29, %v3645_v8  ;;  %v275_v15 = vmul.f32 %v13865_v32, %v254_v26 }
0x2d8f   :  { %v3954_v25 = vpop.f32.mrf.mxu1 }
0x2d90   :  { %v282_v63 = vadd.f32 %v275_v15, %v236_v20  ;;  %v3955_v55 = vadd.f32 %v3954_v25, %v10893_v2  ;;  %v3658_v18 = vrot.slane %v3654_v33, %v13867_v30  ;;  %v13887_v15 = vld [vmem:[#allocation23_spill] sm:$0xff] }
0x2d91   :  { %v9348_v43 = vpop.f32.mrf.mxu1 }
0x2d92   :  { %v293_v12 = vadd.f32 %v13866_v11, %v282_v63  ;;  %v3958_v14 = vmax.f32 %v3955_v55, 0.0  ;;  %v13896_v11 = vld [vmem:[#allocation5_spill] sm:$0xff] }
0x2d94   :  { %v3659_v35 = vsub.f32 %v293_v12, %v3658_v18  ;;  %9382 = vmatmul.mubr.f32.vlgmr.msra.gmra.mxu0 %v3958_v14 }
0x2d95   :  { %9429 = vmatpush3.msra.mxu0 %v11918_v36  ;;  %9436 = vmatprep.mubr.msk.f32.mxu0 %vm10481_vm1, %v13838_v9 }
0x2d96   :  { %v3660_v27 = vmax.f32 %v3659_v35, 0.0  ;;  %9430 = vmatprep.subr.mxu0 %v13838_v9 }
0x2d97   :  { %9431 = vmatpush3.msra.mxu0 %v11927_v38 }
0x2d98   :  { %9393 = vmatmul.mubr.msk.f32.vlgmr.msra.gmra.mxu1 %vm434_vm0, %v3660_v27  ;;  %9432 = vmatprep.subr.mxu0 %v13838_v9 }
0x2d99   :  { %9396 = vmatpush3.msra.mxu1 %v11754_v5  ;;  %9403 = vmatprep.mubr.msk.f32.mxu1 %vm10481_vm1, %v13838_v9  ;;  %v13886_v5 = vld [vmem:[#allocation11_spill] sm:$0xff] }
0x2d9a   :  { %9397 = vmatprep.subr.mxu1 %v13838_v9  ;;  %9433 = vmatpush3.msra.mxu0 %v11934_v40 }
0x2d9b   :  { %9398 = vmatpush3.msra.mxu1 %v13884_v13  ;;  %9434 = vmatprep.subr.mxu0 %v13838_v9 }
0x2d9c   :  { %9399 = vmatprep.subr.mxu1 %v13838_v9  ;;  %9435 = vmatpush3.msra.mxu0 %v11941_v45 }
0x2d9d   :  { %9400 = vmatpush3.msra.mxu1 %v13885_v37  ;;  %9474 = vmatprep.subr.mxu0 %v13838_v9 }
0x2d9e   :  { %9401 = vmatprep.subr.mxu1 %v13838_v9 }
0x2d9f   :  { %9402 = vmatpush3.msra.mxu1 %v13886_v5 }
0x2da0   :  { %9406 = vmatprep.subr.mxu1 %v13838_v9 }
0x2e54   :  { %v4025_v61 = vpop.f32.mrf.mxu0 }
0x2e55   :  { %v4026_v53 = vadd.f32 %v4025_v61, %v10534_v7 }
0x2e56   :  { %v9383_v16 = vpop.f32.mrf.mxu0 }
0x2e57   :  { %v4029_v29 = vadd.f32 %v4026_v53, %v12169_v52 }
0x2e58   :  { %v4099_v8 = vpop.f32.mrf.mxu1 }
0x2e59   :  { %9404 = vmatmul.mubr.msk.f32.vlgmr.msra.gmra.mxu1 %vm434_vm0, %v4029_v29 }
0x2e5a   :  { %v9394_v26 = vpop.f32.mrf.mxu1  ;;  %9407 = vmatpush3.msra.mxu1 %v11956_v62  ;;  %9414 = vmatprep.mubr.msk.f32.mxu1 %vm10481_vm1, %v13838_v9 }
0x2e5b   :  { %9408 = vmatprep.subr.mxu1 %v13838_v9 }
0x2e5c   :  { %9409 = vmatpush3.msra.mxu1 %v11965_v41 }
0x2e5d   :  { %9410 = vmatprep.subr.mxu1 %v13838_v9 }
0x2e5e   :  { %9411 = vmatpush3.msra.mxu1 %v11973_v22 }
0x2e5f   :  { %9412 = vmatprep.subr.mxu1 %v13838_v9 }
0x2e60   :  { %9413 = vmatpush3.msra.mxu1 %v11980_v17 }
0x2e61   :  { %9417 = vmatprep.subr.mxu1 %v13838_v9 }
0x2f19   :  { %v4172_v52 = vpop.f32.mrf.mxu1 }
0x2f1a   :  { %v4173_v20 = vadd.f32 %v4172_v52, %v4099_v8 }
0x2f1b   :  { %v9405_v33 = vpop.f32.mrf.mxu1 }
0x2f1c   :  { %v12247_v25 = vadd.f32 %v4173_v20, %v13887_v15 }
0x2f1e   :  { %v4177_v63 = vsel %vm434_vm0, %v12247_v25, 0.0 }
0x2f1f   :  { %4178 = vadd.xlane.f32.xlu1 %v4177_v63 }
0x2fa8   :  { %v4179_v55 = vpop.xlane.xlu1 %4178 }
0x2fa9   :  { %v4180_v43 = vmul.f32 0.03125, %v4179_v55 }
0x2fab   :  { %v4181_v18 = vsub.f32 %v12247_v25, %v4180_v43 }
0x2fad   :  { %v4182_v12 = vmul.f32 %v4181_v18, %v4181_v18 }
0x2faf   :  { %v4183_v14 = vsel %vm434_vm0, %v4182_v12, 0.0 }
0x2fb0   :  { %4184 = vadd.xlane.f32.xlu0 %v4183_v14 }
0x3039   :  { %v4185_v35 = vpop.xlane.xlu0 %4184 }
0x303a   :  { %v4186_v27 = vmul.f32 0.03125, %v4185_v35 }
0x303c   :  { %v4187_v13 = vadd.f32 1e-05, %v4186_v27 }
0x303e   :  { %10169 = vrsqrt.f32 %v4187_v13 }
0x304b   :  { %v10170_v37 = vpop.eup %10169 }
0x304c   :  { %v4189_v5 = vmul.f32 %v10170_v37, %v4181_v18 }
0x304e   :  { %v4190_v61 = vmul.f32 %v4189_v5, %v10623_v42 }
0x3050   :  { %v4191_v53 = vadd.f32 %v4190_v61, %v10626_v44 }
0x3052   :  { %9415 = vmatmul.mubr.msk.f32.vlgmr.msra.gmra.mxu1 %vm434_vm0, %v4191_v53 }
0x3053   :  { %9418 = vmatpush3.msra.mxu1 %v12011_v46  ;;  %9425 = vmatprep.mubr.msk.f32.mxu1 %vm10481_vm1, %v13838_v9 }
0x3054   :  { %9419 = vmatprep.subr.mxu1 %v13838_v9 }
0x3055   :  { %9420 = vmatpush3.msra.mxu1 %v12020_v1 }
0x3056   :  { %9421 = vmatprep.subr.mxu1 %v13838_v9 }
0x3057   :  { %9422 = vmatpush3.msra.mxu1 %v12027_v50 }
0x3058   :  { %9423 = vmatprep.subr.mxu1 %v13838_v9 }
0x3059   :  { %9424 = vmatpush3.msra.mxu1 %v12034_v6 }
0x305a   :  { %9439 = vmatprep.subr.mxu1 %v13838_v9 }
0x3112   :  { %v4261_v16 = vpop.f32.mrf.mxu1 }
0x3113   :  { %v4262_v29 = vadd.f32 %v4261_v16, %v10637_v51 }
0x3114   :  { %v9416_v8 = vpop.f32.mrf.mxu1 }
0x3115   :  { %v4275_v26 = vmul.f32 %v4262_v29, %v12040_v47  ;;  %v4265_v52 = vmul.f32 %v4262_v29, %v11202_v39  ;;  %v4270_v63 = vmul.f32 %v4262_v29, %v11624_v31  ;;  %v4280_v43 = vmul.f32 %v4262_v29, %v4262_v29 }
0x3117   :  { %v4276_v20 = vsel %vm434_vm0, %v4275_v26, 0.0  ;;  %v4266_v33 = vsel %vm434_vm0, %v4265_v52, 0.0  ;;  %v4271_v55 = vsel %vm434_vm0, %v4270_v63, 0.0  ;;  %v4281_v18 = vsel %vm434_vm0, %v4280_v43, 0.0 }
0x3118   :  { %4277 = vadd.xlane.f32.xlu1 %v4276_v20  ;;  %4267 = vadd.xlane.f32.xlu0 %v4266_v33 }
0x311c   :  { %4272 = vadd.xlane.f32.xlu0 %v4271_v55 }
0x3120   :  { %4282 = vadd.xlane.f32.xlu0 %v4281_v18 }
0x31a1   :  { %v4268_v12 = vpop.xlane.xlu0 %4267  ;;  %v4278_v14 = vpop.xlane.xlu1 %4277 }
0x31a2   :  { %v4269_v27 = vmul.f32 0.17677669, %v4268_v12  ;;  %v4279_v37 = vmul.f32 0.17677669, %v4278_v14 }
0x31a5   :  { %v4273_v35 = vpop.xlane.xlu0 %4272 }
0x31a6   :  { %v4274_v13 = vmul.f32 0.17677669, %v4273_v35 }
0x31a8   :  { %v4285_v5 = vmax.f32 %v4269_v27, %v4274_v13 }
0x31a9   :  { %v4283_v61 = vpop.xlane.xlu0 %4282 }
0x31aa   :  { %v4286_v53 = vmax.f32 %v4285_v5, %v4279_v37  ;;  %v4284_v16 = vmul.f32 0.17677669, %v4283_v61 }
0x31ac   :  { %v4287_v8 = vmax.f32 %v4286_v53, %v4284_v16 }
0x31ae   :  { %v4288_v26 = vsub.f32 %v4269_v27, %v4287_v8  ;;  %v4291_v52 = vsub.f32 %v4274_v13, %v4287_v8  ;;  %v4294_v20 = vsub.f32 %v4279_v37, %v4287_v8  ;;  %v4297_v33 = vsub.f32 %v4284_v16, %v4287_v8 }
0x31b0   :  { %v4289_v63 = vmul.f32 1.442695, %v4288_v26  ;;  %v4292_v55 = vmul.f32 1.442695, %v4291_v52  ;;  %v4295_v15 = vmul.f32 1.442695, %v4294_v20 }
0x31b1   :  { %v4298_v43 = vmul.f32 1.442695, %v4297_v33  ;;  %v13890_v20 = vld [vmem:[#allocation26_spill] sm:$0xff]  ;;  %v13891_v33 = vld [vmem:[#allocation27_spill] sm:$0xff] }
0x31b2   :  { %10171 = vpow2.f32 %v4289_v63 }
0x31b3   :  { %10173 = vpow2.f32 %v4292_v55  ;;  %v13892_v55 = vld [vmem:[#allocation9_spill] sm:$0xff] }
0x31b4   :  { %10175 = vpow2.f32 %v4295_v15 }
0x31b5   :  { %10177 = vpow2.f32 %v4298_v43 }
0x31bf   :  { %v10172_v18 = vpop.eup %10171 }
0x31c0   :  { %v10174_v12 = vpop.eup %10173  ;;  %v4304_v27 = vmul.f32 %v10172_v18, %v11202_v39 }
0x31c1   :  { %v4300_v14 = vadd.f32 %v10174_v12, %v10172_v18  ;;  %v10176_v35 = vpop.eup %10175  ;;  %v4305_v13 = vmul.f32 %v10174_v12, %v11624_v31 }
0x31c2   :  { %v10178_v5 = vpop.eup %10177  ;;  %v4307_v53 = vmul.f32 %v10176_v35, %v12040_v47 }
0x31c3   :  { %v4301_v30 = vadd.f32 %v10176_v35, %v4300_v14  ;;  %v4306_v37 = vadd.f32 %v4305_v13, %v4304_v27  ;;  %v4309_v8 = vmul.f32 %v10178_v5, %v4262_v29  ;;  %v13889_v29 = vld [vmem:[#allocation25_spill] sm:$0xff]  ;;  %v13893_v35 = vld [vmem:[#allocation28_spill] sm:$0xff] }
0x31c4   :  { %vm4619_vm12 = vcmp.gt.f32.partialorder %v13893_v35, 0.5 }
0x31c5   :  { %v4302_v61 = vadd.f32 %v10178_v5, %v4301_v30  ;;  %v4308_v16 = vadd.f32 %v4307_v53, %v4306_v37  ;;  %v13888_v30 = vld [vmem:[#allocation12_spill] sm:$0xff]  ;;  %v4620_v5 = vsel %vm4619_vm12, 1, %v13862_v3 }
0x31c7   :  { %10179 = vrcp.f32 %v4302_v61  ;;  %v4310_v26 = vadd.f32 %v4309_v8, %v4308_v16  ;;  %v77_v61 = vld [vmem:[%s13721_s1 + $0x20] sm:$0xff] }
0x31d4   :  { %v10180_v15 = vpop.eup %10179 }
0x31d5   :  { %v4311_v52 = vmul.f32 %v10180_v15, %v4310_v26 }
0x31d7   :  { %9426 = vmatmul.mubr.msk.f32.vlgmr.msra.gmra.mxu1 %vm434_vm0, %v4311_v52 }
0x31d8   :  { %9440 = vmatpush3.msra.mxu1 %v12056_v28  ;;  %9471 = vmatprep.mubr.msk.f32.mxu1 %vm10481_vm1, %v13838_v9 }
0x31d9   :  { %9441 = vmatprep.subr.mxu1 %v13838_v9 }
0x31da   :  { %9442 = vmatpush3.msra.mxu1 %v12065_v34 }
0x31db   :  { %9443 = vmatprep.subr.mxu1 %v13838_v9 }
0x31dc   :  { %9444 = vmatpush3.msra.mxu1 %v12072_v49 }
0x31dd   :  { %9445 = vmatprep.subr.mxu1 %v13838_v9 }
0x31de   :  { %9446 = vmatpush3.msra.mxu1 %v12079_v57 }
0x31df   :  { %9447 = vmatprep.subr.mxu1 %v13838_v9 }
0x31e0   :  { %9448 = vmatpush3.msra.mxu1 %v12086_v56 }
0x31e1   :  { %9449 = vmatprep.subr.mxu1 %v13838_v9 }
0x31e2   :  { %9450 = vmatpush3.msra.mxu1 %v12093_v59 }
0x31e3   :  { %9451 = vmatprep.subr.mxu1 %v13838_v9 }
0x31e4   :  { %9452 = vmatpush3.msra.mxu1 %v12100_v23 }
0x31e5   :  { %9453 = vmatprep.subr.mxu1 %v13838_v9 }
0x31e6   :  { %9454 = vmatpush3.msra.mxu1 %v12107_v60 }
0x31e7   :  { %9455 = vmatprep.subr.mxu1 %v13838_v9 }
0x31e8   :  { %9456 = vmatpush3.msra.mxu1 %v12114_v58 }
0x31e9   :  { %9457 = vmatprep.subr.mxu1 %v13838_v9 }
0x31ea   :  { %9458 = vmatpush3.msra.mxu1 %v12121_v4 }
0x31eb   :  { %9459 = vmatprep.subr.mxu1 %v13838_v9 }
0x31ec   :  { %9460 = vmatpush3.msra.mxu1 %v12128_v19 }
0x31ed   :  { %9461 = vmatprep.subr.mxu1 %v13838_v9 }
0x31ee   :  { %9462 = vmatpush3.msra.mxu1 %v12135_v24 }
0x31ef   :  { %9463 = vmatprep.subr.mxu1 %v13838_v9 }
0x31f0   :  { %9464 = vmatpush3.msra.mxu1 %v13888_v30 }
0x31f1   :  { %9465 = vmatprep.subr.mxu1 %v13838_v9 }
0x31f2   :  { %9466 = vmatpush3.msra.mxu1 %v13889_v29 }
0x31f3   :  { %9467 = vmatprep.subr.mxu1 %v13838_v9 }
0x31f4   :  { %9468 = vmatpush3.msra.mxu1 %v13890_v20 }
0x31f5   :  { %9469 = vmatprep.subr.mxu1 %v13838_v9 }
0x31f6   :  { %9470 = vmatpush3.msra.mxu1 %v13891_v33 }
0x31f7   :  { %9518 = vmatprep.subr.mxu1 %v13838_v9 }
0x3297   :  { %v4381_v63 = vpop.f32.mrf.mxu1 }
0x3298   :  { %v4382_v43 = vadd.f32 %v4381_v63, %v13892_v55  ;;  %v13894_v63 = vld [vmem:[#allocation4_spill] sm:$0xff] }
0x3299   :  { %v9427_v18 = vpop.f32.mrf.mxu1 }
0x329a   :  { %v12314_v12 = vadd.f32 %v4382_v43, %v12247_v25 }
0x329c   :  { %v4386_v14 = vsel %vm434_vm0, %v12314_v12, 0.0 }
0x329d   :  { %4387 = vadd.xlane.f32.xlu1 %v4386_v14  ;;  %v13895_v14 = vld [vmem:[#allocation3_spill] sm:$0xff] }
0x32ae   :  { %4622 = vperm.xlu1 %10068, %v4620_v5  }
0x32b2   :  { %10069 = vset.pattern.permute.xlu1 %v13863_v48 }
0x32b3   :  { %147 = vperm.xlu1 %10069, %v77_v61  }
0x3326   :  { %v4388_v27 = vpop.xlane.xlu1 %4387 }
0x3327   :  { %v4389_v13 = vmul.f32 0.03125, %v4388_v27 }
0x3329   :  { %v4390_v25 = vsub.f32 %v12314_v12, %v4389_v13 }
0x332a   :  { %v12326_v16 = vpop.permute.xlu1 %4622 }
0x332b   :  { %v4391_v37 = vmul.f32 %v4390_v25, %v4390_v25  ;;  %vm4624_vm13 = vcmp.eq.s32.totalorder %v12326_v16, 1 }
0x332d   :  { %v4392_v53 = vsel %vm434_vm0, %v4391_v37, 0.0 }
0x332e   :  { %4393 = vadd.xlane.f32.xlu0 %v4392_v53  ;;  %v148_v52 = vpop.permute.xlu1 %147 }
0x332f   :  { %v166_v43 = vmul.f32 %v13894_v63, %v148_v52  ;;  %v13898_v52 = vld [vmem:[#allocation20_spill] sm:$0xff] }
0x3344   :  { %106 = vperm.xlu0 %10052, %v77_v61  }
0x33b7   :  { %v4394_v8 = vpop.xlane.xlu0 %4393 }
0x33b8   :  { %v4395_v26 = vmul.f32 0.03125, %v4394_v8 }
0x33ba   :  { %v4396_v15 = vadd.f32 1e-05, %v4395_v26 }
0x33bc   :  { %10181 = vrsqrt.f32 %v4396_v15  ;;  %v13897_v15 = vld [vmem:[#allocation19_spill] sm:$0xff] }
0x33bf   :  { %v107_v18 = vpop.permute.xlu0 %106 }
0x33c0   :  { %v127_v5 = vmul.f32 %v13895_v14, %v107_v18 }
0x33c2   :  { %v173_v27 = vadd.f32 %v166_v43, %v127_v5  ;;  %v13899_v43 = vld [vmem:[#allocation21_spill] sm:$0xff] }
0x33c4   :  { %v184_v13 = vadd.f32 %v13896_v11, %v173_v27 }
0x33c6   :  { %v12331_v32 = vmax.f32 %v184_v13, 0.0 }
0x33c8   :  { %v4771_v61 = vsel %vm434_vm0, %v12331_v32, 0.0 }
0x33c9   :  { %v10182_v37 = vpop.eup %10181  ;;  %4772 = vadd.xlane.f32.xlu0 %v4771_v61 }
0x33ca   :  { %v4398_v53 = vmul.f32 %v10182_v37, %v4390_v25  ;;  %v13900_v25 = vld [vmem:[#allocation22_spill] sm:$0xff] }
0x33cc   :  { %v4399_v8 = vmul.f32 %v4398_v53, %v10816_v0 }
0x33ce   :  { %v4400_v26 = vadd.f32 %v4399_v8, %v10820_v10 }
0x33d0   :  { %9437 = vmatmul.mubr.msk.f32.vlgmr.msra.gmra.mxu0 %vm434_vm0, %v4400_v26 }
0x33d1   :  { %9475 = vmatpush3.msra.mxu0 %v13897_v15  ;;  %9482 = vmatprep.mubr.msk.f32.mxu0 %vm10481_vm1, %v13838_v9 }
0x33d2   :  { %9476 = vmatprep.subr.mxu0 %v13838_v9 }
0x33d3   :  { %9477 = vmatpush3.msra.mxu0 %v13898_v52 }
0x33d4   :  { %9478 = vmatprep.subr.mxu0 %v13838_v9 }
0x33d5   :  { %9479 = vmatpush3.msra.mxu0 %v13899_v43 }
0x33d6   :  { %9480 = vmatprep.subr.mxu0 %v13838_v9 }
0x33d7   :  { %9481 = vmatpush3.msra.mxu0 %v13900_v25 }
0x33d8   :  { %9485 = vmatprep.subr.mxu0 %v13838_v9 }
0x3452   :  { %v4773_v61 = vpop.xlane.xlu0 %4772 }
0x3453   :  { %v4774_v37 = vmul.f32 0.03125, %v4773_v61 }
0x3455   :  { %v4775_v8 = vsub.f32 %v12331_v32, %v4774_v37 }
0x3457   :  { %v4776_v15 = vmul.f32 %v4775_v8, %v4775_v8 }
0x3490   :  { %v4470_v18 = vpop.f32.mrf.mxu0 }
0x3491   :  { %v4471_v5 = vadd.f32 %v4470_v18, %v10893_v2 }
0x3492   :  { %v9438_v27 = vpop.f32.mrf.mxu0 }
0x3493   :  { %v4474_v13 = vmax.f32 %v4471_v5, 0.0 }
0x3495   :  { %9472 = vmatmul.mubr.f32.vlgmr.msra.gmra.mxu1 %v4474_v13  ;;  %v13901_v13 = vld [vmem:[#allocation24_spill] sm:$0xff] }
0x3496   :  { %9519 = vmatpush3.msra.mxu1 %v11918_v36  ;;  %9526 = vmatprep.mubr.msk.f32.mxu1 %vm10481_vm1, %v13838_v9 }
0x3497   :  { %9520 = vmatprep.subr.mxu1 %v13838_v9 }
0x3498   :  { %9521 = vmatpush3.msra.mxu1 %v11927_v38 }
0x3499   :  { %9522 = vmatprep.subr.mxu1 %v13838_v9 }
0x349a   :  { %9523 = vmatpush3.msra.mxu1 %v11934_v40 }
0x349b   :  { %9524 = vmatprep.subr.mxu1 %v13838_v9 }
0x349c   :  { %9525 = vmatpush3.msra.mxu1 %v11941_v45 }
0x349d   :  { %9564 = vmatprep.subr.mxu1 %v13838_v9 }
0x3555   :  { %v4541_v36 = vpop.f32.mrf.mxu1 }
0x3556   :  { %v4542_v53 = vadd.f32 %v4541_v36, %v10534_v7 }
0x3557   :  { %v9473_v26 = vpop.f32.mrf.mxu1 }
0x3558   :  { %v4545_v38 = vadd.f32 %v4542_v53, %v12314_v12  ;;  %v4777_v12 = vsel %vm434_vm0, %v4776_v15, 0.0 }
0x355a   :  { %9483 = vmatmul.mubr.msk.f32.vlgmr.msra.gmra.mxu0 %vm434_vm0, %v4545_v38  ;;  %v4628_v40 = vsel %vm4624_vm13, %v4545_v38, 0.0 }
0x355b   :  { %v4629_v45 = vsel %vm434_vm0, %v4628_v40, 0.0  ;;  %9486 = vmatpush3.msra.mxu0 %v11956_v62  ;;  %9493 = vmatprep.mubr.msk.f32.mxu0 %vm10481_vm1, %v13838_v9 }
0x355c   :  { %4630 = vadd.xlane.f32.xlu1 %v4629_v45  ;;  %9487 = vmatprep.subr.mxu0 %v13838_v9 }
0x355d   :  { %9488 = vmatpush3.msra.mxu0 %v11965_v41 }
0x355e   :  { %9489 = vmatprep.subr.mxu0 %v13838_v9 }
0x355f   :  { %9490 = vmatpush3.msra.mxu0 %v11973_v22 }
0x3560   :  { %4778 = vadd.xlane.f32.xlu1 %v4777_v12  ;;  %9491 = vmatprep.subr.mxu0 %v13838_v9 }
0x3561   :  { %9492 = vmatpush3.msra.mxu0 %v11980_v17 }
0x3562   :  { %9496 = vmatprep.subr.mxu0 %v13838_v9 }
0x35e5   :  { %v4631_v52 = vpop.xlane.xlu1 %4630 }
0x35e6   :  { %v4632_v43 = vmul.f32 0.03125, %v4631_v52 }
0x35e8   :  { %v4633_v25 = vsub.f32 %v4628_v40, %v4632_v43 }
0x35e9   :  { %v4779_v53 = vpop.xlane.xlu1 %4778 }
0x35ea   :  { %v4634_v18 = vmul.f32 %v4633_v25, %v4633_v25  ;;  %v4780_v26 = vmul.f32 0.03125, %v4779_v53 }
0x35ec   :  { %v4635_v5 = vsel %vm434_vm0, %v4634_v18, 0.0  ;;  %v4781_v45 = vadd.f32 1e-05, %v4780_v26 }
0x35ed   :  { %4636 = vadd.xlane.f32.xlu0 %v4635_v5 }
0x361a   :  { %v4615_v27 = vpop.f32.mrf.mxu0 }
0x361b   :  { %v4616_v61 = vadd.f32 %v4615_v27, %v13901_v13 }
0x361c   :  { %v9484_v37 = vpop.f32.mrf.mxu0 }
0x361d   :  { %v4625_v36 = vsel %vm4624_vm13, %v4616_v61, 0.0 }
0x361e   :  { %8149 = vst.msk [vmem:[%s13726_s5 + $0x18] sm:$0xff] %vm376_vm5, %v4625_v36 }
0x3676   :  { %v4637_v38 = vpop.xlane.xlu0 %4636 }
0x3677   :  { %v4638_v40 = vmul.f32 0.03125, %v4637_v38 }
0x3679   :  { %v4639_v15 = vadd.f32 1e-05, %v4638_v40 }
0x367b   :  { %10183 = vrsqrt.f32 %v4639_v15 }
0x367c   :  { %10185 = vrsqrt.f32 %v4781_v45 }
0x3688   :  { %v10184_v12 = vpop.eup %10183 }
0x3689   :  { %v4641_v52 = vmul.f32 %v10184_v12, %v4633_v25  ;;  %v10186_v43 = vpop.eup %10185 }
0x368a   :  { %v4783_v16 = vmul.f32 %v10186_v43, %v4775_v8 }
0x368b   :  { %v4642_v18 = vmul.f32 %v4641_v52, %v10623_v42 }
0x368c   :  { %v4784_v27 = vmul.f32 %v4783_v16, %v10623_v42 }
0x368d   :  { %v4643_v5 = vadd.f32 %v4642_v18, %v10626_v44 }
0x368e   :  { %v4785_v8 = vadd.f32 %v4784_v27, %v10626_v44 }
0x368f   :  { %9494 = vmatmul.mubr.msk.f32.vlgmr.msra.gmra.mxu0 %vm434_vm0, %v4643_v5 }
0x3690   :  { %9497 = vmatpush3.msra.mxu0 %v11956_v62  ;;  %9504 = vmatprep.mubr.msk.f32.mxu0 %vm10481_vm1, %v13838_v9 }
0x3691   :  { %9498 = vmatprep.subr.mxu0 %v13838_v9 }
0x3692   :  { %9499 = vmatpush3.msra.mxu0 %v11965_v41 }
0x3693   :  { %9500 = vmatprep.subr.mxu0 %v13838_v9 }
0x3694   :  { %9501 = vmatpush3.msra.mxu0 %v11973_v22 }
0x3695   :  { %9502 = vmatprep.subr.mxu0 %v13838_v9 }
0x3696   :  { %9503 = vmatpush3.msra.mxu0 %v11980_v17 }
0x3697   :  { %9505 = vmatmul.mubr.msk.f32.vlgmr.msra.gmra.mxu0 %vm434_vm0, %v4785_v8  ;;  %9507 = vmatprep.subr.mxu0 %v13838_v9 }
0x3698   :  { %9508 = vmatpush3.msra.mxu0 %v12011_v46  ;;  %9515 = vmatprep.mubr.msk.f32.mxu0 %vm10481_vm1, %v13838_v9 }
0x3699   :  { %9509 = vmatprep.subr.mxu0 %v13838_v9 }
0x369a   :  { %9510 = vmatpush3.msra.mxu0 %v12020_v1 }
0x369b   :  { %9511 = vmatprep.subr.mxu0 %v13838_v9 }
0x369c   :  { %9512 = vmatpush3.msra.mxu0 %v12027_v50 }
0x369d   :  { %9513 = vmatprep.subr.mxu0 %v13838_v9 }
0x369e   :  { %9514 = vmatpush3.msra.mxu0 %v12034_v6 }
0x369f   :  { %9529 = vmatprep.subr.mxu0 %v13838_v9 }
0x374f   :  { %v4713_v62 = vpop.f32.mrf.mxu0 }
0x3750   :  { %v12416_v25 = vadd.f32 %v4713_v62, %v10637_v51 }
0x3751   :  { %v9495_v41 = vpop.f32.mrf.mxu0 }
0x3757   :  { %v4855_v22 = vpop.f32.mrf.mxu0 }
0x3758   :  { %v12413_v17 = vadd.f32 %v4855_v22, %v10637_v51 }
0x3759   :  { %v9506_v46 = vpop.f32.mrf.mxu0 }
0x375a   :  { %v4864_v1 = vmul.f32 %v12413_v17, %v11624_v31  ;;  %v4859_v50 = vmul.f32 %v12413_v17, %v11202_v39  ;;  %v4874_v37 = vmul.f32 %v12413_v17, %v12416_v25  ;;  %v4869_v36 = vmul.f32 %v12413_v17, %v12040_v47 }
0x375b   :  { %v4879_v38 = vmul.f32 %v12413_v17, %v12413_v17 }
0x375c   :  { %v4865_v6 = vsel %vm434_vm0, %v4864_v1, 0.0  ;;  %v4860_v61 = vsel %vm434_vm0, %v4859_v50, 0.0  ;;  %v4875_v53 = vsel %vm434_vm0, %v4874_v37, 0.0  ;;  %v4870_v26 = vsel %vm434_vm0, %v4869_v36, 0.0 }
0x375d   :  { %4866 = vadd.xlane.f32.xlu1 %v4865_v6  ;;  %4861 = vadd.xlane.f32.xlu0 %v4860_v61  ;;  %v4880_v40 = vsel %vm434_vm0, %v4879_v38, 0.0 }
0x3761   :  { %4876 = vadd.xlane.f32.xlu1 %v4875_v53  ;;  %4871 = vadd.xlane.f32.xlu0 %v4870_v26 }
0x3765   :  { %4881 = vadd.xlane.f32.xlu0 %v4880_v40 }
0x37e6   :  { %v4867_v45 = vpop.xlane.xlu1 %4866  ;;  %v4862_v15 = vpop.xlane.xlu0 %4861 }
0x37e7   :  { %v4868_v12 = vmul.f32 0.17677669, %v4867_v45  ;;  %v4863_v52 = vmul.f32 0.17677669, %v4862_v15 }
0x37e9   :  { %v4884_v16 = vmax.f32 %v4863_v52, %v4868_v12 }
0x37ea   :  { %v4877_v43 = vpop.xlane.xlu1 %4876  ;;  %v4872_v18 = vpop.xlane.xlu0 %4871 }
0x37eb   :  { %v4873_v5 = vmul.f32 0.17677669, %v4872_v18  ;;  %v4878_v27 = vmul.f32 0.17677669, %v4877_v43 }
0x37ed   :  { %v4885_v8 = vmax.f32 %v4884_v16, %v4873_v5 }
0x37ee   :  { %v4882_v62 = vpop.xlane.xlu0 %4881 }
0x37ef   :  { %v4886_v41 = vmax.f32 %v4885_v8, %v4878_v27  ;;  %v4883_v22 = vmul.f32 0.17677669, %v4882_v62 }
0x37f1   :  { %v4887_v46 = vmax.f32 %v4886_v41, %v4883_v22 }
0x37f3   :  { %v4888_v1 = vsub.f32 %v4863_v52, %v4887_v46  ;;  %v4891_v50 = vsub.f32 %v4868_v12, %v4887_v46  ;;  %v4894_v6 = vsub.f32 %v4873_v5, %v4887_v46  ;;  %v4897_v61 = vsub.f32 %v4878_v27, %v4887_v46 }
0x37f4   :  { %v4900_v26 = vsub.f32 %v4883_v22, %v4887_v46 }
0x37f5   :  { %v4889_v37 = vmul.f32 1.442695, %v4888_v1  ;;  %v4892_v36 = vmul.f32 1.442695, %v4891_v50  ;;  %v4895_v53 = vmul.f32 1.442695, %v4894_v6 }
0x37f6   :  { %v4898_v38 = vmul.f32 1.442695, %v4897_v61  ;;  %v4901_v40 = vmul.f32 1.442695, %v4900_v26 }
0x37f7   :  { %10187 = vpow2.f32 %v4889_v37 }
0x37f8   :  { %10189 = vpow2.f32 %v4892_v36 }
0x37f9   :  { %10191 = vpow2.f32 %v4895_v53 }
0x37fa   :  { %10193 = vpow2.f32 %v4898_v38 }
0x37fb   :  { %10195 = vpow2.f32 %v4901_v40 }
0x3804   :  { %v10188_v45 = vpop.eup %10187 }
0x3805   :  { %v10190_v15 = vpop.eup %10189  ;;  %v4908_v5 = vmul.f32 %v10188_v45, %v11202_v39 }
0x3806   :  { %v4903_v43 = vadd.f32 %v10190_v15, %v10188_v45  ;;  %v10192_v18 = vpop.eup %10191  ;;  %v4909_v27 = vmul.f32 %v10190_v15, %v11624_v31 }
0x3807   :  { %v10194_v52 = vpop.eup %10193  ;;  %v4911_v22 = vmul.f32 %v10192_v18, %v12040_v47 }
0x3808   :  { %v4904_v16 = vadd.f32 %v10192_v18, %v4903_v43  ;;  %v10196_v8 = vpop.eup %10195  ;;  %v4910_v41 = vadd.f32 %v4909_v27, %v4908_v5  ;;  %v4913_v1 = vmul.f32 %v10194_v52, %v12416_v25  ;;  %v12510_v5 = vld [vmem:[%s13723_s4 + $0x78] sm:$0xff]  ;;  %v12517_v27 = vld [vmem:[%s13723_s4 + $0x70] sm:$0xff] }
0x3809   :  { %v4915_v6 = vmul.f32 %v10196_v8, %v12413_v17  ;;  %13905 = vst [vmem:[#allocation15_spill] sm:$0xff] %v12510_v5  ;;  %13906 = vst [vmem:[#allocation11_spill] sm:$0xff] %v12517_v27 }
0x380a   :  { %v4905_v12 = vadd.f32 %v10194_v52, %v4904_v16  ;;  %v4912_v46 = vadd.f32 %v4911_v22, %v4910_v41  ;;  %v12494_v52 = vld [vmem:[%s13723_s4 + $0x88] sm:$0xff] }
0x380b   :  { %13903 = vst [vmem:[#allocation13_spill] sm:$0xff] %v12494_v52 }
0x380c   :  { %v4906_v62 = vadd.f32 %v10196_v8, %v4905_v12  ;;  %v4914_v50 = vadd.f32 %v4913_v1, %v4912_v46  ;;  %v12503_v12 = vld [vmem:[%s13723_s4 + $0x80] sm:$0xff] }
0x380d   :  { %13904 = vst [vmem:[#allocation14_spill] sm:$0xff] %v12503_v12  ;;  %v70_v8 = vld [vmem:[%s13725_s0 + $0x20] sm:$0xff] }
0x380e   :  { %10197 = vrcp.f32 %v4906_v62  ;;  %v4916_v61 = vadd.f32 %v4915_v6, %v4914_v50  ;;  %v12525_v62 = vadd.f32 %v12200_v21, %v70_v8 }
0x3810   :  { %13907 = vst [vmem:[#allocation12_spill] sm:$0xff] %v12525_v62 }
0x381b   :  { %v10198_v37 = vpop.eup %10197 }
0x381c   :  { %v4917_v36 = vmul.f32 %v10198_v37, %v4916_v61 }
0x381e   :  { %9516 = vmatmul.mubr.msk.f32.vlgmr.msra.gmra.mxu0 %vm434_vm0, %v4917_v36 }
0x381f   :  { %9530 = vmatpush3.msra.mxu0 %v12056_v28  ;;  %9561 = vmatprep.mubr.msk.f32.mxu0 %vm10481_vm1, %v13838_v9 }
0x3820   :  { %9531 = vmatprep.subr.mxu0 %v13838_v9 }
0x3821   :  { %9532 = vmatpush3.msra.mxu0 %v12065_v34 }
0x3822   :  { %9533 = vmatprep.subr.mxu0 %v13838_v9 }
0x3823   :  { %9534 = vmatpush3.msra.mxu0 %v12072_v49 }
0x3824   :  { %9535 = vmatprep.subr.mxu0 %v13838_v9 }
0x3825   :  { %9536 = vmatpush3.msra.mxu0 %v12079_v57 }
0x3826   :  { %9537 = vmatprep.subr.mxu0 %v13838_v9 }
0x3827   :  { %9538 = vmatpush3.msra.mxu0 %v12086_v56 }
0x3828   :  { %9539 = vmatprep.subr.mxu0 %v13838_v9 }
0x3829   :  { %9540 = vmatpush3.msra.mxu0 %v12093_v59  ;;  %v13902_v59 = vld [vmem:[#allocation10_spill] sm:$0xff] }
0x382a   :  { %9541 = vmatprep.subr.mxu0 %v13838_v9 }
0x382b   :  { %9542 = vmatpush3.msra.mxu0 %v12100_v23 }
0x382c   :  { %9543 = vmatprep.subr.mxu0 %v13838_v9 }
0x382d   :  { %9544 = vmatpush3.msra.mxu0 %v12107_v60 }
0x382e   :  { %9545 = vmatprep.subr.mxu0 %v13838_v9 }
0x382f   :  { %9546 = vmatpush3.msra.mxu0 %v12114_v58 }
0x3830   :  { %9547 = vmatprep.subr.mxu0 %v13838_v9 }
0x3831   :  { %9548 = vmatpush3.msra.mxu0 %v12121_v4 }
0x3832   :  { %9549 = vmatprep.subr.mxu0 %v13838_v9 }
0x3833   :  { %9550 = vmatpush3.msra.mxu0 %v12128_v19 }
0x3834   :  { %9551 = vmatprep.subr.mxu0 %v13838_v9 }
0x3835   :  { %9552 = vmatpush3.msra.mxu0 %v12135_v24 }
0x3836   :  { %9553 = vmatprep.subr.mxu0 %v13838_v9 }
0x3837   :  { %9554 = vmatpush3.msra.mxu0 %v13888_v30 }
0x3838   :  { %9555 = vmatprep.subr.mxu0 %v13838_v9 }
0x3839   :  { %9556 = vmatpush3.msra.mxu0 %v13889_v29 }
0x383a   :  { %9557 = vmatprep.subr.mxu0 %v13838_v9 }
0x383b   :  { %9558 = vmatpush3.msra.mxu0 %v13890_v20 }
0x383c   :  { %9559 = vmatprep.subr.mxu0 %v13838_v9 }
0x383d   :  { %9560 = vmatpush3.msra.mxu0 %v13891_v33 }
0x383e   :  { %9608 = vmatprep.subr.mxu0 %v13838_v9 }
0x38de   :  { %v4987_v28 = vpop.f32.mrf.mxu0 }
0x38df   :  { %v4988_v34 = vadd.f32 %v4987_v28, %v13892_v55 }
0x38e0   :  { %v9517_v49 = vpop.f32.mrf.mxu0 }
0x38e1   :  { %v12475_v57 = vadd.f32 %v4988_v34, %v12331_v32 }
0x38e3   :  { %v4992_v56 = vsel %vm434_vm0, %v12475_v57, 0.0 }
0x38e4   :  { %4993 = vadd.xlane.f32.xlu1 %v4992_v56 }
0x38f5   :  { %4717 = vrot.lane.b32.xlu1 %v13902_v59, %s10486_s14 }
0x396d   :  { %v4994_v23 = vpop.xlane.xlu1 %4993 }
0x396e   :  { %v4995_v60 = vmul.f32 0.03125, %v4994_v23 }
0x3970   :  { %v4996_v58 = vsub.f32 %v12475_v57, %v4995_v60 }
0x3971   :  { %v4718_v4 = vpop.permute.xlu1 %4717 }
0x3972   :  { %v4997_v19 = vmul.f32 %v4996_v58, %v4996_v58  ;;  %v12482_v24 = vmul.f32 %v4718_v4, %v13893_v35 }
0x3974   :  { %v4998_v30 = vsel %vm434_vm0, %v4997_v19, 0.0  ;;  %v4735_v32 = vsel %vm398_vm4, %v12482_v24, 0.0  ;;  %vm5753_vm14 = vcmp.gt.f32.partialorder %v12482_v24, 0.5 }
0x3975   :  { %4999 = vadd.xlane.f32.xlu0 %v4998_v30 }
0x3979   :  { %4736 = vadd.xlane.f32.xlu0 %v4735_v32 }
0x398f   :  { %4724 = vperm.xlu0 %10052, %v12482_v24  }
0x39fe   :  { %v5000_v29 = vpop.xlane.xlu0 %4999 }
0x39ff   :  { %v5001_v20 = vmul.f32 0.03125, %v5000_v29 }
0x3a01   :  { %v5002_v33 = vadd.f32 1e-05, %v5001_v20  ;;  %v13908_v20 = vld [vmem:[#allocation17_spill] sm:$0xff] }
0x3a02   :  { %v4737_v17 = vpop.xlane.xlu0 %4736 }
0x3a03   :  { %10199 = vrsqrt.f32 %v5002_v33  ;;  %v4738_v53 = vrot.slane %v4737_v17, 4 }
0x3a05   :  { %v4739_v26 = vadd.f32 %v4738_v53, %v4737_v17  ;;  %v12538_v17 = vld [vmem:[%s13723_s4 + $0x8] sm:$0xff] }
0x3a06   :  { %13909 = vst [vmem:[#allocation25_spill] sm:$0xff] %v12538_v17 }
0x3a07   :  { %v4740_v38 = vrot.slane %v4739_v26, 2 }
0x3a09   :  { %v4741_v40 = vadd.f32 %v4740_v38, %v4739_v26  ;;  %v12544_v26 = vld [vmem:[%s13722_s3 + $0x28] sm:$0xff] }
0x3a0a   :  { %v4725_v41 = vpop.permute.xlu0 %4724 }
0x3a0b   :  { %v4742_v35 = vrot.slane %v4741_v40, 1  ;;  %v4727_v22 = vmul.f32 %v4725_v41, %v12525_v62  ;;  %v12569_v41 = vld [vmem:[%s13722_s3 + $0x10] sm:$0xff] }
0x3a0d   :  { %v4743_v45 = vadd.f32 %v4742_v35, %v4741_v40  ;;  %v4728_v46 = vsel %vm376_vm5, %v4727_v22, 0.0  ;;  %v12553_v40 = vld [vmem:[%s13722_s3 + $0x20] sm:$0xff] }
0x3a0e   :  { %v4729_v1 = vrot.slane %v4728_v46, 4  ;;  %v13911_v22 = vld [vmem:[#allocation2_spill] sm:$0xff] }
0x3a0f   :  { %10033 = vpush %v4743_v45 }
0x3a10   :  { %v10200_v15 = vpop.eup %10199  ;;  %v4730_v6 = vadd.f32 %v4729_v1, %v4728_v46 }
0x3a11   :  { %v5004_v43 = vmul.f32 %v10200_v15, %v4996_v58 }
0x3a12   :  { %v4731_v36 = vrot.slane %v4730_v6, 2 }
0x3a13   :  { %v5005_v18 = vmul.f32 %v5004_v43, %v10816_v0  ;;  %v12561_v43 = vld [vmem:[%s13722_s3 + $0x18] sm:$0xff] }
0x3a14   :  { %v4732_v28 = vadd.f32 %v4731_v36, %v4730_v6  ;;  %v12578_v6 = vld [vmem:[%s13723_s4 + $0x68] sm:$0xff]  ;;  %v12601_v36 = vld [vmem:[%s13723_s4 + $0x50] sm:$0xff] }
0x3a15   :  { %v5006_v16 = vadd.f32 %v5005_v18, %v10820_v10  ;;  %v13910_v18 = vld [vmem:[#allocation18_spill] sm:$0xff]  ;;  %13912 = vst [vmem:[#allocation26_spill] sm:$0xff] %v12578_v6  ;;  %13915 = vst [vmem:[#allocation28_spill] sm:$0xff] %v12601_v36 }
0x3a16   :  { %v4733_v34 = vrot.slane %v4732_v28, 1 }
0x3a17   :  { %9527 = vmatmul.mubr.msk.f32.vlgmr.msra.gmra.mxu1 %vm434_vm0, %v5006_v16 }
0x3a18   :  { %9565 = vmatpush3.msra.mxu1 %v12494_v52  ;;  %9572 = vmatprep.mubr.msk.f32.mxu1 %vm10481_vm1, %v13838_v9  ;;  %v4734_v49 = vadd.f32 %v4733_v34, %v4732_v28 }
0x3a19   :  { %9566 = vmatprep.subr.mxu1 %v13838_v9 }
0x3a1a   :  { %9567 = vmatpush3.msra.mxu1 %v12503_v12 }
0x3a1b   :  { %9568 = vmatprep.subr.mxu1 %v13838_v9 }
0x3a1c   :  { %9569 = vmatpush3.msra.mxu1 %v12510_v5 }
0x3a1d   :  { %9570 = vmatprep.subr.mxu1 %v13838_v9 }
0x3a1e   :  { %9571 = vmatpush3.msra.mxu1 %v12517_v27 }
0x3a1f   :  { %9575 = vmatprep.subr.mxu1 %v13838_v9 }
0x3a40   :  { %s10034_s25 = spop %10033 }
0x3a41   :  { %v4745_v50 = vstv %s10034_s25 }
0x3a42   :  { %v4746_v61 = vmul.f32 5.0, %v4745_v50 }
0x3a44   :  { %v4747_v37 = vmax.f32 %v4746_v61, 1e-06  ;;  %v12587_v61 = vld [vmem:[%s13723_s4 + $0x60] sm:$0xff] }
0x3a45   :  { %13913 = vst [vmem:[#allocation27_spill] sm:$0xff] %v12587_v61 }
0x3a46   :  { %10201 = vrcp.f32 %v4747_v37  ;;  %v12594_v37 = vld [vmem:[%s13723_s4 + $0x58] sm:$0xff] }
0x3a47   :  { %13914 = vst [vmem:[#allocation9_spill] sm:$0xff] %v12594_v37 }
0x3a53   :  { %v10202_v56 = vpop.eup %10201 }
0x3a54   :  { %v4749_v23 = vmul.f32 %v10202_v56, %v4734_v49 }
0x3a56   :  { %4757 = vperm.xlu1 %10069, %v4749_v23  }
0x3a5a   :  { %10070 = vset.pattern.permute.xlu1 %v13862_v3 }
0x3a5b   :  { %216 = vperm.xlu1 %10070, %v70_v8  }
0x3a5f   :  { %10071 = vset.pattern.permute.xlu1 %v13863_v48 }
0x3a60   :  { %257 = vperm.xlu1 %10071, %v70_v8  }
0x3a64   :  { %10072 = vset.pattern.permute.xlu1 %v13862_v3 }
0x3a65   :  { %4752 = vperm.xlu1 %10072, %v4749_v23   ;;  %v12611_v23 = vld [vmem:[%s13723_s4 + $0x28] sm:$0xff] }
0x3ad1   :  { %v4758_v21 = vpop.permute.xlu1 %4757 }
0x3ad2   :  { %v4760_v53 = vmul.f32 %v12538_v17, %v4758_v21  ;;  %v12620_v21 = vld [vmem:[%s13723_s4 + $0x20] sm:$0xff] }
0x3ad4   :  { %v4762_v45 = vrot.slane %v4760_v53, 1 }
0x3ad6   :  { %v217_v60 = vpop.permute.xlu1 %216 }
0x3ad7   :  { %v5076_v58 = vpop.f32.mrf.mxu1  ;;  %v237_v32 = vmul.f32 %v13864_v54, %v217_v60  ;;  %v12634_v60 = vld [vmem:[%s13723_s4 + $0x10] sm:$0xff] }
0x3ad8   :  { %v5077_v4 = vadd.f32 %v5076_v58, %v10893_v2 }
0x3ad9   :  { %v9528_v19 = vpop.f32.mrf.mxu1 }
0x3ada   :  { %v5080_v30 = vmax.f32 %v5077_v4, 0.0 }
0x3adb   :  { %v258_v29 = vpop.permute.xlu1 %257 }
0x3adc   :  { %v276_v33 = vmul.f32 %v13908_v20, %v258_v29  ;;  %9562 = vmatmul.mubr.f32.vlgmr.msra.gmra.mxu0 %v5080_v30  ;;  %v13916_v29 = vld [vmem:[#allocation23_spill] sm:$0xff] }
0x3add   :  { %9609 = vmatpush3.msra.mxu0 %v12544_v26  ;;  %9616 = vmatprep.mubr.msk.f32.mxu0 %vm10481_vm1, %v13838_v9 }
0x3ade   :  { %9610 = vmatprep.subr.mxu0 %v13838_v9  ;;  %v283_v38 = vadd.f32 %v276_v33, %v237_v32 }
0x3adf   :  { %9611 = vmatpush3.msra.mxu0 %v12553_v40 }
0x3ae0   :  { %v4753_v35 = vpop.permute.xlu1 %4752  ;;  %9612 = vmatprep.subr.mxu0 %v13838_v9  ;;  %v294_v16 = vadd.f32 %v13910_v18, %v283_v38 }
0x3ae1   :  { %v4755_v15 = vmul.f32 %v12538_v17, %v4753_v35  ;;  %9613 = vmatpush3.msra.mxu0 %v12561_v43 }
0x3ae2   :  { %9614 = vmatprep.subr.mxu0 %v13838_v9 }
0x3ae3   :  { %v4764_v8 = vadd.f32 %v4762_v45, %v4755_v15  ;;  %9615 = vmatpush3.msra.mxu0 %v12569_v41 }
0x3ae4   :  { %9654 = vmatprep.subr.mxu0 %v13838_v9 }
0x3ae5   :  { %v4768_v46 = vrot.slane %v4764_v8, %v13911_v22 }
0x3ae7   :  { %v4769_v1 = vsub.f32 %v294_v16, %v4768_v46 }
0x3ae9   :  { %v4770_v50 = vmax.f32 %v4769_v1, 0.0 }
0x3aeb   :  { %9573 = vmatmul.mubr.msk.f32.vlgmr.msra.gmra.mxu1 %vm434_vm0, %v4770_v50 }
0x3aec   :  { %9576 = vmatpush3.msra.mxu1 %v12578_v6  ;;  %9583 = vmatprep.mubr.msk.f32.mxu1 %vm10481_vm1, %v13838_v9 }
0x3aed   :  { %9577 = vmatprep.subr.mxu1 %v13838_v9 }
0x3aee   :  { %9578 = vmatpush3.msra.mxu1 %v12587_v61 }
0x3aef   :  { %9579 = vmatprep.subr.mxu1 %v13838_v9 }
0x3af0   :  { %9580 = vmatpush3.msra.mxu1 %v12594_v37 }
0x3af1   :  { %9581 = vmatprep.subr.mxu1 %v13838_v9 }
0x3af2   :  { %9582 = vmatpush3.msra.mxu1 %v12601_v36 }
0x3af3   :  { %9586 = vmatprep.subr.mxu1 %v13838_v9 }
0x3b9c   :  { %v5147_v28 = vpop.f32.mrf.mxu0 }
0x3b9d   :  { %v5148_v34 = vadd.f32 %v5147_v28, %v10534_v7 }
0x3b9e   :  { %v9563_v49 = vpop.f32.mrf.mxu0 }
0x3b9f   :  { %v5151_v56 = vadd.f32 %v5148_v34, %v12475_v57  ;;  %v12627_v57 = vld [vmem:[%s13723_s4 + $0x18] sm:$0xff] }
0x3ba1   :  { %9584 = vmatmul.mubr.msk.f32.vlgmr.msra.gmra.mxu1 %vm434_vm0, %v5151_v56  ;;  %v12651_v56 = vld [vmem:[%s13723_s4 + $0x48] sm:$0xff] }
0x3ba2   :  { %9587 = vmatpush3.msra.mxu1 %v12611_v23  ;;  %9594 = vmatprep.mubr.msk.f32.mxu1 %vm10481_vm1, %v13838_v9 }
0x3ba3   :  { %9588 = vmatprep.subr.mxu1 %v13838_v9 }
0x3ba4   :  { %9589 = vmatpush3.msra.mxu1 %v12620_v21 }
0x3ba5   :  { %9590 = vmatprep.subr.mxu1 %v13838_v9 }
0x3ba6   :  { %9591 = vmatpush3.msra.mxu1 %v12627_v57 }
0x3ba7   :  { %9592 = vmatprep.subr.mxu1 %v13838_v9 }
0x3ba8   :  { %9593 = vmatpush3.msra.mxu1 %v12634_v60 }
0x3ba9   :  { %9597 = vmatprep.subr.mxu1 %v13838_v9 }
0x3bab   :  { %v5221_v58 = vpop.f32.mrf.mxu1 }
0x3bad   :  { %v9574_v4 = vpop.f32.mrf.mxu1 }
0x3bae   :  { %v12667_v4 = vld [vmem:[%s13723_s4 + $0x38] sm:$0xff] }
0x3c61   :  { %v5294_v19 = vpop.f32.mrf.mxu1 }
0x3c62   :  { %v5295_v30 = vadd.f32 %v5294_v19, %v5221_v58  ;;  %v12660_v58 = vld [vmem:[%s13723_s4 + $0x40] sm:$0xff]  ;;  %v12674_v19 = vld [vmem:[%s13723_s4 + $0x30] sm:$0xff] }
0x3c63   :  { %v9585_v32 = vpop.f32.mrf.mxu1  ;;  %13917 = vst [vmem:[#allocation19_spill] sm:$0xff] %v12674_v19 }
0x3c64   :  { %v12639_v33 = vadd.f32 %v5295_v30, %v13916_v29 }
0x3c66   :  { %v5299_v53 = vsel %vm434_vm0, %v12639_v33, 0.0 }
0x3c67   :  { %5300 = vadd.xlane.f32.xlu0 %v5299_v53 }
0x3cf0   :  { %v5301_v38 = vpop.xlane.xlu0 %5300 }
0x3cf1   :  { %v5302_v35 = vmul.f32 0.03125, %v5301_v38 }
0x3cf3   :  { %v5303_v45 = vsub.f32 %v12639_v33, %v5302_v35 }
0x3cf5   :  { %v5304_v15 = vmul.f32 %v5303_v45, %v5303_v45 }
0x3cf7   :  { %v5305_v16 = vsel %vm434_vm0, %v5304_v15, 0.0 }
0x3cf8   :  { %5306 = vadd.xlane.f32.xlu1 %v5305_v16 }
0x3d81   :  { %v5307_v8 = vpop.xlane.xlu1 %5306 }
0x3d82   :  { %v5308_v46 = vmul.f32 0.03125, %v5307_v8 }
0x3d84   :  { %v5309_v1 = vadd.f32 1e-05, %v5308_v46 }
0x3d86   :  { %10203 = vrsqrt.f32 %v5309_v1 }
0x3d93   :  { %v10204_v50 = vpop.eup %10203 }
0x3d94   :  { %v5311_v28 = vmul.f32 %v10204_v50, %v5303_v45 }
0x3d96   :  { %v5312_v34 = vmul.f32 %v5311_v28, %v10623_v42 }
0x3d98   :  { %v5313_v49 = vadd.f32 %v5312_v34, %v10626_v44 }
0x3d9a   :  { %9595 = vmatmul.mubr.msk.f32.vlgmr.msra.gmra.mxu1 %vm434_vm0, %v5313_v49 }
0x3d9b   :  { %9598 = vmatpush3.msra.mxu1 %v12651_v56  ;;  %9605 = vmatprep.mubr.msk.f32.mxu1 %vm10481_vm1, %v13838_v9 }
0x3d9c   :  { %9599 = vmatprep.subr.mxu1 %v13838_v9 }
0x3d9d   :  { %9600 = vmatpush3.msra.mxu1 %v12660_v58 }
0x3d9e   :  { %9601 = vmatprep.subr.mxu1 %v13838_v9 }
0x3d9f   :  { %9602 = vmatpush3.msra.mxu1 %v12667_v4 }
0x3da0   :  { %9603 = vmatprep.subr.mxu1 %v13838_v9 }
0x3da1   :  { %9604 = vmatpush3.msra.mxu1 %v12674_v19 }
0x3da2   :  { %9619 = vmatprep.subr.mxu1 %v13838_v9 }
0x3e5a   :  { %v5383_v30 = vpop.f32.mrf.mxu1 }
0x3e5b   :  { %v12679_v32 = vadd.f32 %v5383_v30, %v10637_v51 }
0x3e5c   :  { %v9596_v53 = vpop.f32.mrf.mxu1 }
0x3e5d   :  { %v5402_v38 = vmul.f32 %v12679_v32, %v12416_v25  ;;  %v5387_v35 = vmul.f32 %v12679_v32, %v11202_v39  ;;  %v5392_v16 = vmul.f32 %v12679_v32, %v11624_v31  ;;  %v5397_v46 = vmul.f32 %v12679_v32, %v12040_v47 }
0x3e5e   :  { %v5407_v50 = vmul.f32 %v12679_v32, %v12679_v32 }
0x3e5f   :  { %v5403_v45 = vsel %vm434_vm0, %v5402_v38, 0.0  ;;  %v5388_v15 = vsel %vm434_vm0, %v5387_v35, 0.0  ;;  %v5393_v8 = vsel %vm434_vm0, %v5392_v16, 0.0  ;;  %v5398_v1 = vsel %vm434_vm0, %v5397_v46, 0.0 }
0x3e60   :  { %5404 = vadd.xlane.f32.xlu1 %v5403_v45  ;;  %5389 = vadd.xlane.f32.xlu0 %v5388_v15  ;;  %v5408_v28 = vsel %vm434_vm0, %v5407_v50, 0.0 }
0x3e64   :  { %5394 = vadd.xlane.f32.xlu0 %v5393_v8 }
0x3e68   :  { %5399 = vadd.xlane.f32.xlu0 %v5398_v1 }
0x3e6c   :  { %5409 = vadd.xlane.f32.xlu0 %v5408_v28 }
0x3ee9   :  { %v5390_v34 = vpop.xlane.xlu0 %5389  ;;  %v5405_v38 = vpop.xlane.xlu1 %5404 }
0x3eea   :  { %v5391_v53 = vmul.f32 0.17677669, %v5390_v34  ;;  %v5406_v16 = vmul.f32 0.17677669, %v5405_v38 }
0x3eed   :  { %v5395_v49 = vpop.xlane.xlu0 %5394 }
0x3eee   :  { %v5396_v30 = vmul.f32 0.17677669, %v5395_v49 }
0x3ef0   :  { %v5412_v45 = vmax.f32 %v5391_v53, %v5396_v30 }
0x3ef1   :  { %v5400_v35 = vpop.xlane.xlu0 %5399 }
0x3ef2   :  { %v5401_v15 = vmul.f32 0.17677669, %v5400_v35 }
0x3ef4   :  { %v5413_v29 = vmax.f32 %v5412_v45, %v5401_v15 }
0x3ef5   :  { %v5410_v8 = vpop.xlane.xlu0 %5409 }
0x3ef6   :  { %v5414_v36 = vmax.f32 %v5413_v29, %v5406_v16  ;;  %v5411_v46 = vmul.f32 0.17677669, %v5410_v8 }
0x3ef8   :  { %v5415_v37 = vmax.f32 %v5414_v36, %v5411_v46 }
0x3efa   :  { %v5416_v61 = vsub.f32 %v5391_v53, %v5415_v37  ;;  %v5419_v6 = vsub.f32 %v5396_v30, %v5415_v37  ;;  %v5422_v1 = vsub.f32 %v5401_v15, %v5415_v37  ;;  %v5425_v18 = vsub.f32 %v5406_v16, %v5415_v37 }
0x3efb   :  { %v5428_v20 = vsub.f32 %v5411_v46, %v5415_v37 }
0x3efc   :  { %v5417_v50 = vmul.f32 1.442695, %v5416_v61  ;;  %v5420_v28 = vmul.f32 1.442695, %v5419_v6  ;;  %v5423_v22 = vmul.f32 1.442695, %v5422_v1 }
0x3efd   :  { %v5426_v34 = vmul.f32 1.442695, %v5425_v18  ;;  %v5429_v49 = vmul.f32 1.442695, %v5428_v20 }
0x3efe   :  { %10205 = vpow2.f32 %v5417_v50 }
0x3eff   :  { %10207 = vpow2.f32 %v5420_v28 }
0x3f00   :  { %10209 = vpow2.f32 %v5423_v22 }
0x3f01   :  { %10211 = vpow2.f32 %v5426_v34  ;;  %v12705_v34 = vld [vmem:[%s13723_s4 + $0x108] sm:$0xff] }
0x3f02   :  { %10213 = vpow2.f32 %v5429_v49  ;;  %v12721_v49 = vld [vmem:[%s13723_s4 + $0xf8] sm:$0xff] }
0x3f0b   :  { %v10206_v38 = vpop.eup %10205 }
0x3f0c   :  { %v10208_v35 = vpop.eup %10207  ;;  %v5436_v15 = vmul.f32 %v10206_v38, %v11202_v39 }
0x3f0d   :  { %v5431_v29 = vadd.f32 %v10208_v35, %v10206_v38  ;;  %v10210_v45 = vpop.eup %10209  ;;  %v5437_v6 = vmul.f32 %v10208_v35, %v11624_v31  ;;  %v12728_v38 = vld [vmem:[%s13723_s4 + $0xf0] sm:$0xff]  ;;  %v12735_v35 = vld [vmem:[%s13723_s4 + $0xe8] sm:$0xff] }
0x3f0e   :  { %v10212_v53 = vpop.eup %10211  ;;  %v5439_v18 = vmul.f32 %v10210_v45, %v12040_v47 }
0x3f0f   :  { %v5432_v36 = vadd.f32 %v10210_v45, %v5431_v29  ;;  %v10214_v61 = vpop.eup %10213  ;;  %v5438_v16 = vadd.f32 %v5437_v6, %v5436_v15  ;;  %v5441_v22 = vmul.f32 %v10212_v53, %v12416_v25  ;;  %v12742_v29 = vld [vmem:[%s13723_s4 + $0xe0] sm:$0xff]  ;;  %v12749_v45 = vld [vmem:[%s13723_s4 + $0xd8] sm:$0xff]  ;;  %v12784_v6 = vld [vmem:[%s13723_s4 + $0xb0] sm:$0xff] }
0x3f10   :  { %v5443_v46 = vmul.f32 %v10214_v61, %v12679_v32  ;;  %v12714_v32 = vld [vmem:[%s13723_s4 + $0x100] sm:$0xff]  ;;  %v12777_v15 = vld [vmem:[%s13723_s4 + $0xb8] sm:$0xff] }
0x3f11   :  { %v5433_v30 = vadd.f32 %v10212_v53, %v5432_v36  ;;  %v5440_v20 = vadd.f32 %v5439_v18, %v5438_v16  ;;  %v12756_v36 = vld [vmem:[%s13723_s4 + $0xd0] sm:$0xff]  ;;  %v12763_v53 = vld [vmem:[%s13723_s4 + $0xc8] sm:$0xff]  ;;  %v12805_v16 = vld [vmem:[%s13723_s4 + $0x98] sm:$0xff] }
0x3f12   :  { %v12812_v18 = vld [vmem:[%s13723_s4 + $0x90] sm:$0xff] }
0x3f13   :  { %v5434_v37 = vadd.f32 %v10214_v61, %v5433_v30  ;;  %v5442_v8 = vadd.f32 %v5441_v22, %v5440_v20  ;;  %v12770_v30 = vld [vmem:[%s13723_s4 + $0xc0] sm:$0xff]  ;;  %v12791_v61 = vld [vmem:[%s13723_s4 + $0xa8] sm:$0xff] }
0x3f15   :  { %10215 = vrcp.f32 %v5434_v37  ;;  %v5444_v1 = vadd.f32 %v5443_v46, %v5442_v8  ;;  %v12798_v37 = vld [vmem:[%s13723_s4 + $0xa0] sm:$0xff] }
0x3f22   :  { %v10216_v50 = vpop.eup %10215 }
0x3f23   :  { %v5445_v28 = vmul.f32 %v10216_v50, %v5444_v1  ;;  %v5754_v50 = vsel %vm5753_vm14, 1, %v13862_v3 }
0x3f25   :  { %9606 = vmatmul.mubr.msk.f32.vlgmr.msra.gmra.mxu1 %vm434_vm0, %v5445_v28  ;;  %v78_v28 = vld [vmem:[%s13721_s1 + $0x28] sm:$0xff] }
0x3f26   :  { %9620 = vmatpush3.msra.mxu1 %v12705_v34  ;;  %9651 = vmatprep.mubr.msk.f32.mxu1 %vm10481_vm1, %v13838_v9 }
0x3f27   :  { %9621 = vmatprep.subr.mxu1 %v13838_v9 }
0x3f28   :  { %9622 = vmatpush3.msra.mxu1 %v12714_v32 }
0x3f29   :  { %9623 = vmatprep.subr.mxu1 %v13838_v9 }
0x3f2a   :  { %9624 = vmatpush3.msra.mxu1 %v12721_v49 }
0x3f2b   :  { %9625 = vmatprep.subr.mxu1 %v13838_v9 }
0x3f2c   :  { %9626 = vmatpush3.msra.mxu1 %v12728_v38 }
0x3f2d   :  { %9627 = vmatprep.subr.mxu1 %v13838_v9 }
0x3f2e   :  { %9628 = vmatpush3.msra.mxu1 %v12735_v35 }
0x3f2f   :  { %9629 = vmatprep.subr.mxu1 %v13838_v9 }
0x3f30   :  { %9630 = vmatpush3.msra.mxu1 %v12742_v29 }
0x3f31   :  { %9631 = vmatprep.subr.mxu1 %v13838_v9 }
0x3f32   :  { %9632 = vmatpush3.msra.mxu1 %v12749_v45 }
0x3f33   :  { %9633 = vmatprep.subr.mxu1 %v13838_v9 }
0x3f34   :  { %9634 = vmatpush3.msra.mxu1 %v12756_v36 }
0x3f35   :  { %9635 = vmatprep.subr.mxu1 %v13838_v9 }
0x3f36   :  { %9636 = vmatpush3.msra.mxu1 %v12763_v53 }
0x3f37   :  { %9637 = vmatprep.subr.mxu1 %v13838_v9 }
0x3f38   :  { %9638 = vmatpush3.msra.mxu1 %v12770_v30 }
0x3f39   :  { %9639 = vmatprep.subr.mxu1 %v13838_v9 }
0x3f3a   :  { %9640 = vmatpush3.msra.mxu1 %v12777_v15 }
0x3f3b   :  { %9641 = vmatprep.subr.mxu1 %v13838_v9 }
0x3f3c   :  { %9642 = vmatpush3.msra.mxu1 %v12784_v6 }
0x3f3d   :  { %9643 = vmatprep.subr.mxu1 %v13838_v9 }
0x3f3e   :  { %9644 = vmatpush3.msra.mxu1 %v12791_v61 }
0x3f3f   :  { %9645 = vmatprep.subr.mxu1 %v13838_v9 }
0x3f40   :  { %9646 = vmatpush3.msra.mxu1 %v12798_v37 }
0x3f41   :  { %9647 = vmatprep.subr.mxu1 %v13838_v9 }
0x3f42   :  { %9648 = vmatpush3.msra.mxu1 %v12805_v16 }
0x3f43   :  { %9649 = vmatprep.subr.mxu1 %v13838_v9 }
0x3f44   :  { %9650 = vmatpush3.msra.mxu1 %v12812_v18 }
0x3f45   :  { %9698 = vmatprep.subr.mxu1 %v13838_v9 }
0x3fe5   :  { %v5515_v20 = vpop.f32.mrf.mxu1 }
0x3fe6   :  { %v5516_v22 = vadd.f32 %v5515_v20, %v13892_v55 }
0x3fe7   :  { %v9607_v8 = vpop.f32.mrf.mxu1 }
0x3fe8   :  { %v12818_v46 = vadd.f32 %v5516_v22, %v12639_v33 }
0x3fea   :  { %v5520_v1 = vsel %vm434_vm0, %v12818_v46, 0.0 }
0x3feb   :  { %5521 = vadd.xlane.f32.xlu1 %v5520_v1 }
0x3ffc   :  { %5756 = vperm.xlu1 %10072, %v5754_v50  }
0x4000   :  { %10073 = vset.pattern.permute.xlu1 %v13863_v48 }
0x4001   :  { %151 = vperm.xlu1 %10073, %v78_v28  }
0x4005   :  { %10074 = vset.pattern.permute.xlu1 %v13862_v3 }
0x4074   :  { %v5522_v33 = vpop.xlane.xlu1 %5521 }
0x4075   :  { %v5523_v20 = vmul.f32 0.03125, %v5522_v33 }
0x4077   :  { %v5524_v22 = vsub.f32 %v12818_v46, %v5523_v20 }
0x4078   :  { %v12831_v54 = vpop.permute.xlu1 %5756 }
0x4079   :  { %v5525_v8 = vmul.f32 %v5524_v22, %v5524_v22  ;;  %vm5758_vm15 = vcmp.eq.s32.totalorder %v12831_v54, 1 }
0x407b   :  { %v5526_v1 = vsel %vm434_vm0, %v5525_v8, 0.0 }
0x407c   :  { %5527 = vadd.xlane.f32.xlu0 %v5526_v1  ;;  %v152_v27 = vpop.permute.xlu1 %151 }
0x407d   :  { %v167_v5 = vmul.f32 %v13894_v63, %v152_v27  ;;  %v10412_v27 = vld [vmem:[%s13723_s4 + $0x110] sm:$0xff] }
0x4092   :  { %111 = vperm.xlu0 %10052, %v78_v28  }
0x4105   :  { %v5528_v50 = vpop.xlane.xlu0 %5527 }
0x4106   :  { %v5529_v17 = vmul.f32 0.03125, %v5528_v50 }
0x4108   :  { %v5530_v62 = vadd.f32 1e-05, %v5529_v17 }
0x410a   :  { %10217 = vrsqrt.f32 %v5530_v62 }
0x410d   :  { %v112_v12 = vpop.permute.xlu0 %111 }
0x410e   :  { %v128_v3 = vmul.f32 %v13895_v14, %v112_v12  ;;  %v10410_v12 = vld [vmem:[%s13723_s4 + $0x120] sm:$0xff] }
0x4110   :  { %v174_v33 = vadd.f32 %v167_v5, %v128_v3  ;;  %v10409_v3 = vld [vmem:[%s13723_s4 + $0x128] sm:$0xff]  ;;  %v10411_v5 = vld [vmem:[%s13723_s4 + $0x118] sm:$0xff] }
0x4112   :  { %v185_v20 = vadd.f32 %v13896_v11, %v174_v33 }
0x4114   :  { %v12836_v52 = vmax.f32 %v185_v20, 0.0 }
0x4116   :  { %v5905_v28 = vsel %vm434_vm0, %v12836_v52, 0.0 }
0x4117   :  { %v10218_v8 = vpop.eup %10217  ;;  %5906 = vadd.xlane.f32.xlu0 %v5905_v28 }
0x4118   :  { %v5532_v1 = vmul.f32 %v10218_v8, %v5524_v22 }
0x411a   :  { %v5533_v17 = vmul.f32 %v5532_v1, %v10816_v0 }
0x411c   :  { %v5534_v62 = vadd.f32 %v5533_v17, %v10820_v10 }
0x411e   :  { %9617 = vmatmul.mubr.msk.f32.vlgmr.msra.gmra.mxu0 %vm434_vm0, %v5534_v62 }
0x411f   :  { %9655 = vmatpush3.msra.mxu0 %v10409_v3  ;;  %9662 = vmatprep.mubr.msk.f32.mxu0 %vm10481_vm1, %v13838_v9 }
0x4120   :  { %9656 = vmatprep.subr.mxu0 %v13838_v9 }
0x4121   :  { %9657 = vmatpush3.msra.mxu0 %v10410_v12 }
0x4122   :  { %9658 = vmatprep.subr.mxu0 %v13838_v9 }
0x4123   :  { %9659 = vmatpush3.msra.mxu0 %v10411_v5 }
0x4124   :  { %9660 = vmatprep.subr.mxu0 %v13838_v9 }
0x4125   :  { %9661 = vmatpush3.msra.mxu0 %v10412_v27 }
0x4126   :  { %9665 = vmatprep.subr.mxu0 %v13838_v9 }
0x41a0   :  { %v5907_v28 = vpop.xlane.xlu0 %5906 }
0x41a1   :  { %v5908_v8 = vmul.f32 0.03125, %v5907_v28 }
0x41a3   :  { %v5909_v17 = vsub.f32 %v12836_v52, %v5908_v8 }
0x41a5   :  { %v5910_v3 = vmul.f32 %v5909_v17, %v5909_v17 }
0x41de   :  { %v5604_v22 = vpop.f32.mrf.mxu0 }
0x41df   :  { %v5605_v50 = vadd.f32 %v5604_v22, %v10893_v2 }
0x41e0   :  { %v9618_v33 = vpop.f32.mrf.mxu0 }
0x41e1   :  { %v5608_v20 = vmax.f32 %v5605_v50, 0.0 }
0x41e3   :  { %9652 = vmatmul.mubr.f32.vlgmr.msra.gmra.mxu1 %v5608_v20 }
0x41e4   :  { %9699 = vmatpush3.msra.mxu1 %v12544_v26  ;;  %9706 = vmatprep.mubr.msk.f32.mxu1 %vm10481_vm1, %v13838_v9 }
0x41e5   :  { %9700 = vmatprep.subr.mxu1 %v13838_v9 }
0x41e6   :  { %9701 = vmatpush3.msra.mxu1 %v12553_v40 }
0x41e7   :  { %9702 = vmatprep.subr.mxu1 %v13838_v9 }
0x41e8   :  { %9703 = vmatpush3.msra.mxu1 %v12561_v43 }
0x41e9   :  { %9704 = vmatprep.subr.mxu1 %v13838_v9 }
0x41ea   :  { %9705 = vmatpush3.msra.mxu1 %v12569_v41 }
0x41eb   :  { %9744 = vmatprep.subr.mxu1 %v13838_v9 }
0x42a3   :  { %v5675_v26 = vpop.f32.mrf.mxu1 }
0x42a4   :  { %v5676_v1 = vadd.f32 %v5675_v26, %v10534_v7 }
0x42a5   :  { %v9653_v62 = vpop.f32.mrf.mxu1 }
0x42a6   :  { %v5679_v40 = vadd.f32 %v5676_v1, %v12818_v46  ;;  %v5911_v46 = vsel %vm434_vm0, %v5910_v3, 0.0 }
0x42a8   :  { %9663 = vmatmul.mubr.msk.f32.vlgmr.msra.gmra.mxu0 %vm434_vm0, %v5679_v40  ;;  %v5762_v43 = vsel %vm5758_vm15, %v5679_v40, 0.0 }
0x42a9   :  { %v5763_v41 = vsel %vm434_vm0, %v5762_v43, 0.0  ;;  %9666 = vmatpush3.msra.mxu0 %v12611_v23  ;;  %9673 = vmatprep.mubr.msk.f32.mxu0 %vm10481_vm1, %v13838_v9 }
0x42aa   :  { %5764 = vadd.xlane.f32.xlu1 %v5763_v41  ;;  %9667 = vmatprep.subr.mxu0 %v13838_v9 }
0x42ab   :  { %9668 = vmatpush3.msra.mxu0 %v12620_v21 }
0x42ac   :  { %9669 = vmatprep.subr.mxu0 %v13838_v9 }
0x42ad   :  { %9670 = vmatpush3.msra.mxu0 %v12627_v57 }
0x42ae   :  { %5912 = vadd.xlane.f32.xlu1 %v5911_v46  ;;  %9671 = vmatprep.subr.mxu0 %v13838_v9 }
0x42af   :  { %9672 = vmatpush3.msra.mxu0 %v12634_v60 }
0x42b0   :  { %9676 = vmatprep.subr.mxu0 %v13838_v9 }
0x4333   :  { %v5765_v12 = vpop.xlane.xlu1 %5764 }
0x4334   :  { %v5766_v5 = vmul.f32 0.03125, %v5765_v12 }
0x4336   :  { %v5767_v27 = vsub.f32 %v5762_v43, %v5766_v5 }
0x4337   :  { %v5913_v26 = vpop.xlane.xlu1 %5912 }
0x4338   :  { %v5768_v22 = vmul.f32 %v5767_v27, %v5767_v27  ;;  %v5914_v1 = vmul.f32 0.03125, %v5913_v26 }
0x433a   :  { %v5769_v50 = vsel %vm434_vm0, %v5768_v22, 0.0  ;;  %v5915_v43 = vadd.f32 1e-05, %v5914_v1 }
0x433b   :  { %5770 = vadd.xlane.f32.xlu0 %v5769_v50 }
0x4368   :  { %v5749_v33 = vpop.f32.mrf.mxu0 }
0x4369   :  { %v5750_v20 = vadd.f32 %v5749_v33, %v13901_v13 }
0x436a   :  { %v9664_v28 = vpop.f32.mrf.mxu0 }
0x436b   :  { %v5759_v8 = vsel %vm5758_vm15, %v5750_v20, 0.0 }
0x436c   :  { %8160 = vst.msk [vmem:[%s13726_s5 + $0x20] sm:$0xff] %vm376_vm5, %v5759_v8 }
0x43c4   :  { %v5771_v62 = vpop.xlane.xlu0 %5770 }
0x43c5   :  { %v5772_v40 = vmul.f32 0.03125, %v5771_v62 }
0x43c7   :  { %v5773_v41 = vadd.f32 1e-05, %v5772_v40 }
0x43c9   :  { %10219 = vrsqrt.f32 %v5773_v41 }
0x43ca   :  { %10221 = vrsqrt.f32 %v5915_v43 }
0x43d6   :  { %v10220_v3 = vpop.eup %10219 }
0x43d7   :  { %v5775_v46 = vmul.f32 %v10220_v3, %v5767_v27  ;;  %v10222_v12 = vpop.eup %10221 }
0x43d8   :  { %v5917_v54 = vmul.f32 %v10222_v12, %v5909_v17 }
0x43d9   :  { %v5776_v5 = vmul.f32 %v5775_v46, %v10623_v42 }
0x43da   :  { %v5918_v50 = vmul.f32 %v5917_v54, %v10623_v42 }
0x43db   :  { %v5777_v22 = vadd.f32 %v5776_v5, %v10626_v44 }
0x43dc   :  { %v5919_v17 = vadd.f32 %v5918_v50, %v10626_v44 }
0x43dd   :  { %9674 = vmatmul.mubr.msk.f32.vlgmr.msra.gmra.mxu0 %vm434_vm0, %v5777_v22 }
0x43de   :  { %9677 = vmatpush3.msra.mxu0 %v12611_v23  ;;  %9684 = vmatprep.mubr.msk.f32.mxu0 %vm10481_vm1, %v13838_v9 }
0x43df   :  { %9678 = vmatprep.subr.mxu0 %v13838_v9 }
0x43e0   :  { %9679 = vmatpush3.msra.mxu0 %v12620_v21 }
0x43e1   :  { %9680 = vmatprep.subr.mxu0 %v13838_v9 }
0x43e2   :  { %9681 = vmatpush3.msra.mxu0 %v12627_v57 }
0x43e3   :  { %9682 = vmatprep.subr.mxu0 %v13838_v9 }
0x43e4   :  { %9683 = vmatpush3.msra.mxu0 %v12634_v60 }
0x43e5   :  { %9685 = vmatmul.mubr.msk.f32.vlgmr.msra.gmra.mxu0 %vm434_vm0, %v5919_v17  ;;  %9687 = vmatprep.subr.mxu0 %v13838_v9 }
0x43e6   :  { %9688 = vmatpush3.msra.mxu0 %v12651_v56  ;;  %9695 = vmatprep.mubr.msk.f32.mxu0 %vm10481_vm1, %v13838_v9 }
0x43e7   :  { %9689 = vmatprep.subr.mxu0 %v13838_v9 }
0x43e8   :  { %9690 = vmatpush3.msra.mxu0 %v12660_v58 }
0x43e9   :  { %9691 = vmatprep.subr.mxu0 %v13838_v9 }
0x43ea   :  { %9692 = vmatpush3.msra.mxu0 %v12667_v4 }
0x43eb   :  { %9693 = vmatprep.subr.mxu0 %v13838_v9 }
0x43ec   :  { %9694 = vmatpush3.msra.mxu0 %v12674_v19 }
0x43ed   :  { %9709 = vmatprep.subr.mxu0 %v13838_v9 }
0x449d   :  { %v5847_v27 = vpop.f32.mrf.mxu0 }
0x449e   :  { %v12939_v3 = vadd.f32 %v5847_v27, %v10637_v51 }
0x449f   :  { %v9675_v33 = vpop.f32.mrf.mxu0 }
0x44a5   :  { %v5989_v20 = vpop.f32.mrf.mxu0 }
0x44a6   :  { %v12926_v28 = vadd.f32 %v5989_v20, %v10637_v51 }
0x44a7   :  { %v9686_v8 = vpop.f32.mrf.mxu0 }
0x44a8   :  { %v5998_v26 = vmul.f32 %v12926_v28, %v11624_v31  ;;  %v5993_v1 = vmul.f32 %v12926_v28, %v11202_v39  ;;  %v6008_v43 = vmul.f32 %v12926_v28, %v12416_v25  ;;  %v6003_v41 = vmul.f32 %v12926_v28, %v12040_v47 }
0x44a9   :  { %v6018_v5 = vmul.f32 %v12926_v28, %v12926_v28  ;;  %v6013_v54 = vmul.f32 %v12926_v28, %v12939_v3 }
0x44aa   :  { %v5999_v62 = vsel %vm434_vm0, %v5998_v26, 0.0  ;;  %v5994_v40 = vsel %vm434_vm0, %v5993_v1, 0.0  ;;  %v6009_v46 = vsel %vm434_vm0, %v6008_v43, 0.0  ;;  %v6004_v12 = vsel %vm434_vm0, %v6003_v41, 0.0 }
0x44ab   :  { %6000 = vadd.xlane.f32.xlu1 %v5999_v62  ;;  %5995 = vadd.xlane.f32.xlu0 %v5994_v40  ;;  %v6019_v22 = vsel %vm434_vm0, %v6018_v5, 0.0  ;;  %v6014_v50 = vsel %vm434_vm0, %v6013_v54, 0.0 }
0x44af   :  { %6010 = vadd.xlane.f32.xlu1 %v6009_v46  ;;  %6005 = vadd.xlane.f32.xlu0 %v6004_v12 }
0x44b3   :  { %6020 = vadd.xlane.f32.xlu1 %v6019_v22  ;;  %6015 = vadd.xlane.f32.xlu0 %v6014_v50 }
0x4534   :  { %v6001_v17 = vpop.xlane.xlu1 %6000  ;;  %v5996_v27 = vpop.xlane.xlu0 %5995 }
0x4535   :  { %v6002_v33 = vmul.f32 0.17677669, %v6001_v17  ;;  %v5997_v20 = vmul.f32 0.17677669, %v5996_v27 }
0x4537   :  { %v6023_v1 = vmax.f32 %v5997_v20, %v6002_v33 }
0x4538   :  { %v6011_v8 = vpop.xlane.xlu1 %6010  ;;  %v6006_v26 = vpop.xlane.xlu0 %6005 }
0x4539   :  { %v6007_v62 = vmul.f32 0.17677669, %v6006_v26  ;;  %v6012_v40 = vmul.f32 0.17677669, %v6011_v8 }
0x453b   :  { %v6024_v43 = vmax.f32 %v6023_v1, %v6007_v62 }
0x453c   :  { %v6021_v41 = vpop.xlane.xlu1 %6020  ;;  %v6016_v13 = vpop.xlane.xlu0 %6015 }
0x453d   :  { %v6025_v46 = vmax.f32 %v6024_v43, %v6012_v40  ;;  %v6017_v12 = vmul.f32 0.17677669, %v6016_v13  ;;  %v6022_v11 = vmul.f32 0.17677669, %v6021_v41 }
0x453f   :  { %v6026_v5 = vmax.f32 %v6025_v46, %v6017_v12 }
0x4541   :  { %v6027_v14 = vmax.f32 %v6026_v5, %v6022_v11 }
0x4543   :  { %v6028_v54 = vsub.f32 %v5997_v20, %v6027_v14  ;;  %v6031_v22 = vsub.f32 %v6002_v33, %v6027_v14  ;;  %v6034_v50 = vsub.f32 %v6007_v62, %v6027_v14  ;;  %v6037_v63 = vsub.f32 %v6012_v40, %v6027_v14 }
0x4544   :  { %v6040_v19 = vsub.f32 %v6017_v12, %v6027_v14  ;;  %v6043_v8 = vsub.f32 %v6022_v11, %v6027_v14 }
0x4545   :  { %v6029_v51 = vmul.f32 1.442695, %v6028_v54  ;;  %v6032_v17 = vmul.f32 1.442695, %v6031_v22  ;;  %v6035_v27 = vmul.f32 1.442695, %v6034_v50 }
0x4546   :  { %v6038_v26 = vmul.f32 1.442695, %v6037_v63  ;;  %v6041_v1 = vmul.f32 1.442695, %v6040_v19  ;;  %v6044_v43 = vmul.f32 1.442695, %v6043_v8 }
0x4547   :  { %10223 = vpow2.f32 %v6029_v51 }
0x4548   :  { %10225 = vpow2.f32 %v6032_v17 }
0x4549   :  { %10227 = vpow2.f32 %v6035_v27 }
0x454a   :  { %10229 = vpow2.f32 %v6038_v26 }
0x454b   :  { %10231 = vpow2.f32 %v6041_v1 }
0x454c   :  { %10233 = vpow2.f32 %v6044_v43 }
0x4554   :  { %v10224_v13 = vpop.eup %10223 }
0x4555   :  { %v10226_v41 = vpop.eup %10225  ;;  %v6052_v40 = vmul.f32 %v10224_v13, %v11202_v39 }
0x4556   :  { %v6046_v20 = vadd.f32 %v10226_v41, %v10224_v13  ;;  %v10228_v33 = vpop.eup %10227  ;;  %v6053_v46 = vmul.f32 %v10226_v41, %v11624_v31 }
0x4557   :  { %v10230_v12 = vpop.eup %10229  ;;  %v6055_v54 = vmul.f32 %v10228_v33, %v12040_v47 }
0x4558   :  { %v6047_v62 = vadd.f32 %v10228_v33, %v6046_v20  ;;  %v10232_v5 = vpop.eup %10231  ;;  %v6054_v11 = vadd.f32 %v6053_v46, %v6052_v40  ;;  %v6057_v50 = vmul.f32 %v10230_v12, %v12416_v25 }
0x4559   :  { %v10234_v14 = vpop.eup %10233  ;;  %v6059_v27 = vmul.f32 %v10232_v5, %v12939_v3 }
0x455a   :  { %v6048_v51 = vadd.f32 %v10230_v12, %v6047_v62  ;;  %v6056_v22 = vadd.f32 %v6055_v54, %v6054_v11  ;;  %v6061_v8 = vmul.f32 %v10234_v14, %v12926_v28  ;;  %v13919_v11 = vld [vmem:[#allocation14_spill] sm:$0xff]  ;;  %v13922_v54 = vld [vmem:[#allocation12_spill] sm:$0xff] }
0x455c   :  { %v6049_v63 = vadd.f32 %v10232_v5, %v6048_v51  ;;  %v6058_v17 = vadd.f32 %v6057_v50, %v6056_v22 }
0x455e   :  { %v6050_v19 = vadd.f32 %v10234_v14, %v6049_v63  ;;  %v6060_v26 = vadd.f32 %v6059_v27, %v6058_v17  ;;  %v13918_v63 = vld [vmem:[#allocation13_spill] sm:$0xff]  ;;  %v13920_v14 = vld [vmem:[#allocation15_spill] sm:$0xff] }
0x4560   :  { %10235 = vrcp.f32 %v6050_v19  ;;  %v6062_v1 = vadd.f32 %v6061_v8, %v6060_v26  ;;  %v13921_v19 = vld [vmem:[#allocation11_spill] sm:$0xff] }
0x456d   :  { %v10236_v43 = vpop.eup %10235 }
0x456e   :  { %v6063_v13 = vmul.f32 %v10236_v43, %v6062_v1 }
0x4570   :  { %9696 = vmatmul.mubr.msk.f32.vlgmr.msra.gmra.mxu0 %vm434_vm0, %v6063_v13 }
0x4571   :  { %9710 = vmatpush3.msra.mxu0 %v12705_v34  ;;  %9741 = vmatprep.mubr.msk.f32.mxu0 %vm10481_vm1, %v13838_v9 }
0x4572   :  { %9711 = vmatprep.subr.mxu0 %v13838_v9 }
0x4573   :  { %9712 = vmatpush3.msra.mxu0 %v12714_v32 }
0x4574   :  { %9713 = vmatprep.subr.mxu0 %v13838_v9 }
0x4575   :  { %9714 = vmatpush3.msra.mxu0 %v12721_v49 }
0x4576   :  { %9715 = vmatprep.subr.mxu0 %v13838_v9 }
0x4577   :  { %9716 = vmatpush3.msra.mxu0 %v12728_v38 }
0x4578   :  { %9717 = vmatprep.subr.mxu0 %v13838_v9 }
0x4579   :  { %9718 = vmatpush3.msra.mxu0 %v12735_v35 }
0x457a   :  { %9719 = vmatprep.subr.mxu0 %v13838_v9 }
0x457b   :  { %9720 = vmatpush3.msra.mxu0 %v12742_v29  ;;  %v71_v29 = vld [vmem:[%s13725_s0 + $0x28] sm:$0xff] }
0x457c   :  { %9721 = vmatprep.subr.mxu0 %v13838_v9  ;;  %v13023_v22 = vadd.f32 %v13922_v54, %v71_v29  ;;  %v13038_v54 = vld [vmem:[%s13722_s3 + $0x28] sm:$0xff] }
0x457d   :  { %9722 = vmatpush3.msra.mxu0 %v12749_v45 }
0x457e   :  { %9723 = vmatprep.subr.mxu0 %v13838_v9 }
0x457f   :  { %9724 = vmatpush3.msra.mxu0 %v12756_v36 }
0x4580   :  { %9725 = vmatprep.subr.mxu0 %v13838_v9 }
0x4581   :  { %9726 = vmatpush3.msra.mxu0 %v12763_v53 }
0x4582   :  { %9727 = vmatprep.subr.mxu0 %v13838_v9 }
0x4583   :  { %9728 = vmatpush3.msra.mxu0 %v12770_v30 }
0x4584   :  { %9729 = vmatprep.subr.mxu0 %v13838_v9 }
0x4585   :  { %9730 = vmatpush3.msra.mxu0 %v12777_v15 }
0x4586   :  { %9731 = vmatprep.subr.mxu0 %v13838_v9 }
0x4587   :  { %9732 = vmatpush3.msra.mxu0 %v12784_v6 }
0x4588   :  { %9733 = vmatprep.subr.mxu0 %v13838_v9 }
0x4589   :  { %9734 = vmatpush3.msra.mxu0 %v12791_v61 }
0x458a   :  { %9735 = vmatprep.subr.mxu0 %v13838_v9 }
0x458b   :  { %9736 = vmatpush3.msra.mxu0 %v12798_v37 }
0x458c   :  { %9737 = vmatprep.subr.mxu0 %v13838_v9 }
0x458d   :  { %9738 = vmatpush3.msra.mxu0 %v12805_v16 }
0x458e   :  { %9739 = vmatprep.subr.mxu0 %v13838_v9 }
0x458f   :  { %9740 = vmatpush3.msra.mxu0 %v12812_v18 }
0x4590   :  { %9788 = vmatprep.subr.mxu0 %v13838_v9 }
0x4630   :  { %v6133_v34 = vpop.f32.mrf.mxu0 }
0x4631   :  { %v6134_v32 = vadd.f32 %v6133_v34, %v13892_v55 }
0x4632   :  { %v9697_v49 = vpop.f32.mrf.mxu0 }
0x4633   :  { %v12992_v38 = vadd.f32 %v6134_v32, %v12836_v52 }
0x4635   :  { %v6138_v35 = vsel %vm434_vm0, %v12992_v38, 0.0 }
0x4636   :  { %6139 = vadd.xlane.f32.xlu0 %v6138_v35 }
0x464c   :  { %5851 = vrot.lane.b32.xlu0 %v13902_v59, %s10487_s26 }
0x4650   :  { %221 = vperm.xlu0 %10052, %v71_v29  }
0x46bf   :  { %v6140_v45 = vpop.xlane.xlu0 %6139 }
0x46c0   :  { %v6141_v36 = vmul.f32 0.03125, %v6140_v45 }
0x46c2   :  { %v6142_v53 = vsub.f32 %v12992_v38, %v6141_v36 }
0x46c3   :  { %v5852_v30 = vpop.permute.xlu0 %5851 }
0x46c4   :  { %v6143_v15 = vmul.f32 %v6142_v53, %v6142_v53  ;;  %v13002_v52 = vmul.f32 %v5852_v30, %v12482_v24 }
0x46c6   :  { %v6144_v6 = vsel %vm434_vm0, %v6143_v15, 0.0  ;;  %v5869_v61 = vsel %vm398_vm4, %v13002_v52, 0.0  ;;  %vm6911_vm2 = vcmp.gt.f32.partialorder %v13002_v52, 0.5 }
0x46c7   :  { %6145 = vadd.xlane.f32.xlu1 %v6144_v6 }
0x46cb   :  { %5870 = vadd.xlane.f32.xlu1 %v5869_v61  ;;  %v222_v30 = vpop.permute.xlu0 %221  ;;  %v13924_v61 = vld [vmem:[#allocation25_spill] sm:$0xff] }
0x46dc   :  { %5858 = vperm.xlu1 %10074, %v13002_v52  }
0x46e0   :  { %10075 = vset.pattern.permute.xlu1 %v13863_v48 }
0x4750   :  { %v6146_v37 = vpop.xlane.xlu1 %6145 }
0x4751   :  { %v6147_v16 = vmul.f32 0.03125, %v6146_v37 }
0x4753   :  { %v6148_v18 = vadd.f32 1e-05, %v6147_v16 }
0x4754   :  { %v5871_v28 = vpop.xlane.xlu1 %5870 }
0x4755   :  { %10237 = vrsqrt.f32 %v6148_v18  ;;  %v5872_v41 = vrot.slane %v5871_v28, 4 }
0x4757   :  { %v5873_v20 = vadd.f32 %v5872_v41, %v5871_v28  ;;  %v13925_v41 = vld [vmem:[#allocation16_spill] sm:$0xff] }
0x4758   :  { %v5859_v50 = vpop.permute.xlu1 %5858 }
0x4759   :  { %v5874_v24 = vrot.slane %v5873_v20, 2  ;;  %v5861_v17 = vmul.f32 %v5859_v50, %v13023_v22 }
0x475b   :  { %v5875_v33 = vadd.f32 %v5874_v24, %v5873_v20  ;;  %v5862_v27 = vsel %vm376_vm5, %v5861_v17, 0.0  ;;  %v238_v20 = vmul.f32 %v13925_v41, %v222_v30  ;;  %v13047_v17 = vld [vmem:[%s13722_s3 + $0x20] sm:$0xff] }
0x475c   :  { %v5863_v26 = vrot.slane %v5862_v27, 4 }
0x475d   :  { %v5876_v62 = vrot.slane %v5875_v33, 1 }
0x475e   :  { %v5864_v1 = vadd.f32 %v5863_v26, %v5862_v27  ;;  %v13929_v27 = vld [vmem:[#allocation26_spill] sm:$0xff]  ;;  %v13059_v26 = vld [vmem:[%s13722_s3 + $0x18] sm:$0xff] }
0x475f   :  { %v5877_v40 = vadd.f32 %v5876_v62, %v5875_v33  ;;  %v13926_v33 = vld [vmem:[#allocation17_spill] sm:$0xff] }
0x4760   :  { %v5865_v34 = vrot.slane %v5864_v1, 2 }
0x4761   :  { %10035 = vpush %v5877_v40 }
0x4762   :  { %v10238_v46 = vpop.eup %10237  ;;  %v5866_v32 = vadd.f32 %v5865_v34, %v5864_v1  ;;  %v13068_v1 = vld [vmem:[%s13722_s3 + $0x10] sm:$0xff] }
0x4763   :  { %v6150_v12 = vmul.f32 %v10238_v46, %v6142_v53  ;;  %v13923_v53 = vmov 0  }
0x4764   :  { %v5867_v49 = vrot.slane %v5866_v32, 1 }
0x4765   :  { %v6151_v51 = vmul.f32 %v6150_v12, %v10816_v0 }
0x4766   :  { %v5868_v35 = vadd.f32 %v5867_v49, %v5866_v32 }
0x4767   :  { %v6152_v5 = vadd.f32 %v6151_v51, %v10820_v10  ;;  %v13927_v51 = vld [vmem:[#allocation2_spill] sm:$0xff] }
0x4769   :  { %9707 = vmatmul.mubr.msk.f32.vlgmr.msra.gmra.mxu1 %vm434_vm0, %v6152_v5 }
0x476a   :  { %9745 = vmatpush3.msra.mxu1 %v13918_v63  ;;  %9752 = vmatprep.mubr.msk.f32.mxu1 %vm10481_vm1, %v13838_v9  ;;  %v13928_v63 = vld [vmem:[#allocation18_spill] sm:$0xff] }
0x476b   :  { %9746 = vmatprep.subr.mxu1 %v13838_v9 }
0x476c   :  { %9747 = vmatpush3.msra.mxu1 %v13919_v11 }
0x476d   :  { %9748 = vmatprep.subr.mxu1 %v13838_v9 }
0x476e   :  { %9749 = vmatpush3.msra.mxu1 %v13920_v14 }
0x476f   :  { %9750 = vmatprep.subr.mxu1 %v13838_v9 }
0x4770   :  { %9751 = vmatpush3.msra.mxu1 %v13921_v19 }
0x4771   :  { %9755 = vmatprep.subr.mxu1 %v13838_v9 }
0x4792   :  { %s10036_s29 = spop %10035 }
0x4793   :  { %v5879_v8 = vstv %s10036_s29 }
0x4794   :  { %v5880_v43 = vmul.f32 6.0, %v5879_v8  ;;  %v13930_v8 = vld [vmem:[#allocation27_spill] sm:$0xff] }
0x4796   :  { %v5881_v13 = vmax.f32 %v5880_v43, 1e-06  ;;  %v13931_v43 = vld [vmem:[#allocation9_spill] sm:$0xff] }
0x4798   :  { %10239 = vrcp.f32 %v5881_v13  ;;  %v13932_v13 = vld [vmem:[#allocation28_spill] sm:$0xff] }
0x47a5   :  { %v10240_v45 = vpop.eup %10239 }
0x47a6   :  { %v5883_v36 = vmul.f32 %v10240_v45, %v5868_v35 }
0x47a8   :  { %5886 = vperm.xlu0 %10052, %v5883_v36   ;;  %5891 = vperm.xlu1 %10075, %v5883_v36  }
0x47ac   :  { %261 = vperm.xlu1 %10075, %v71_v29  }
0x47b0   :  { %10076 = vset.pattern.permute.xlu1 %v13923_v53 }
0x4823   :  { %v5892_v15 = vpop.permute.xlu1 %5891  ;;  %v5887_v6 = vpop.permute.xlu0 %5886 }
0x4824   :  { %v5894_v37 = vmul.f32 %v13924_v61, %v5892_v15  ;;  %v5889_v18 = vmul.f32 %v13924_v61, %v5887_v6  ;;  %v13933_v15 = vld [vmem:[#allocation23_spill] sm:$0xff] }
0x4826   :  { %v5896_v16 = vrot.slane %v5894_v37, 1 }
0x4827   :  { %v262_v28 = vpop.permute.xlu1 %261 }
0x4828   :  { %v5898_v24 = vadd.f32 %v5896_v16, %v5889_v18  ;;  %v277_v62 = vmul.f32 %v13926_v33, %v262_v28 }
0x4829   :  { %v6222_v40 = vpop.f32.mrf.mxu1 }
0x482a   :  { %v284_v46 = vadd.f32 %v277_v62, %v238_v20  ;;  %v6223_v29 = vadd.f32 %v6222_v40, %v10893_v2  ;;  %v5902_v5 = vrot.slane %v5898_v24, %v13927_v51 }
0x482b   :  { %v9708_v12 = vpop.f32.mrf.mxu1 }
0x482c   :  { %v295_v11 = vadd.f32 %v13928_v63, %v284_v46  ;;  %v6226_v14 = vmax.f32 %v6223_v29, 0.0  ;;  %v13934_v29 = vld [vmem:[#allocation19_spill] sm:$0xff] }
0x482e   :  { %v5903_v19 = vsub.f32 %v295_v11, %v5902_v5  ;;  %9742 = vmatmul.mubr.f32.vlgmr.msra.gmra.mxu0 %v6226_v14  ;;  %v13935_v5 = vld [vmem:[#allocation8_spill] sm:$0xff] }
0x482f   :  { %9789 = vmatpush3.msra.mxu0 %v13038_v54  ;;  %9796 = vmatprep.mubr.msk.f32.mxu0 %vm10481_vm1, %v13838_v9 }
0x4830   :  { %v5904_v50 = vmax.f32 %v5903_v19, 0.0  ;;  %9790 = vmatprep.subr.mxu0 %v13838_v9 }
0x4831   :  { %9791 = vmatpush3.msra.mxu0 %v13047_v17 }
0x4832   :  { %9753 = vmatmul.mubr.msk.f32.vlgmr.msra.gmra.mxu1 %vm434_vm0, %v5904_v50  ;;  %9792 = vmatprep.subr.mxu0 %v13838_v9 }
0x4833   :  { %9756 = vmatpush3.msra.mxu1 %v13929_v27  ;;  %9763 = vmatprep.mubr.msk.f32.mxu1 %vm10481_vm1, %v13838_v9 }
0x4834   :  { %9757 = vmatprep.subr.mxu1 %v13838_v9  ;;  %9793 = vmatpush3.msra.mxu0 %v13059_v26 }
0x4835   :  { %9758 = vmatpush3.msra.mxu1 %v13930_v8  ;;  %9794 = vmatprep.subr.mxu0 %v13838_v9 }
0x4836   :  { %9759 = vmatprep.subr.mxu1 %v13838_v9  ;;  %9795 = vmatpush3.msra.mxu0 %v13068_v1 }
0x4837   :  { %9760 = vmatpush3.msra.mxu1 %v13931_v43  ;;  %9834 = vmatprep.subr.mxu0 %v13838_v9 }
0x4838   :  { %9761 = vmatprep.subr.mxu1 %v13838_v9 }
0x4839   :  { %9762 = vmatpush3.msra.mxu1 %v13932_v13 }
0x483a   :  { %9766 = vmatprep.subr.mxu1 %v13838_v9 }
0x48ee   :  { %v6293_v34 = vpop.f32.mrf.mxu0 }
0x48ef   :  { %v6294_v32 = vadd.f32 %v6293_v34, %v10534_v7 }
0x48f0   :  { %v9743_v49 = vpop.f32.mrf.mxu0 }
0x48f1   :  { %v6297_v35 = vadd.f32 %v6294_v32, %v12992_v38 }
0x48f2   :  { %v6367_v45 = vpop.f32.mrf.mxu1 }
0x48f3   :  { %9764 = vmatmul.mubr.msk.f32.vlgmr.msra.gmra.mxu1 %vm434_vm0, %v6297_v35 }
0x48f4   :  { %v9754_v36 = vpop.f32.mrf.mxu1  ;;  %9767 = vmatpush3.msra.mxu1 %v12611_v23  ;;  %9774 = vmatprep.mubr.msk.f32.mxu1 %vm10481_vm1, %v13838_v9 }
0x48f5   :  { %9768 = vmatprep.subr.mxu1 %v13838_v9 }
0x48f6   :  { %9769 = vmatpush3.msra.mxu1 %v12620_v21 }
0x48f7   :  { %9770 = vmatprep.subr.mxu1 %v13838_v9 }
0x48f8   :  { %9771 = vmatpush3.msra.mxu1 %v12627_v57 }
0x48f9   :  { %9772 = vmatprep.subr.mxu1 %v13838_v9 }
0x48fa   :  { %9773 = vmatpush3.msra.mxu1 %v12634_v60 }
0x48fb   :  { %9777 = vmatprep.subr.mxu1 %v13838_v9 }
0x49b3   :  { %v6440_v38 = vpop.f32.mrf.mxu1 }
0x49b4   :  { %v6441_v30 = vadd.f32 %v6440_v38, %v6367_v45 }
0x49b5   :  { %v9765_v23 = vpop.f32.mrf.mxu1 }
0x49b6   :  { %v13090_v6 = vadd.f32 %v6441_v30, %v13933_v15 }
0x49b8   :  { %v6445_v61 = vsel %vm434_vm0, %v13090_v6, 0.0 }
0x49b9   :  { %6446 = vadd.xlane.f32.xlu1 %v6445_v61 }
0x4a42   :  { %v6447_v21 = vpop.xlane.xlu1 %6446 }
0x4a43   :  { %v6448_v37 = vmul.f32 0.03125, %v6447_v21 }
0x4a45   :  { %v6449_v57 = vsub.f32 %v13090_v6, %v6448_v37 }
0x4a47   :  { %v6450_v16 = vmul.f32 %v6449_v57, %v6449_v57 }
0x4a49   :  { %v6451_v18 = vsel %vm434_vm0, %v6450_v16, 0.0 }
0x4a4a   :  { %6452 = vadd.xlane.f32.xlu0 %v6451_v18 }
0x4ad3   :  { %v6453_v60 = vpop.xlane.xlu0 %6452 }
0x4ad4   :  { %v6454_v28 = vmul.f32 0.03125, %v6453_v60 }
0x4ad6   :  { %v6455_v20 = vadd.f32 1e-05, %v6454_v28 }
0x4ad8   :  { %10241 = vrsqrt.f32 %v6455_v20 }
0x4ae5   :  { %v10242_v24 = vpop.eup %10241 }
0x4ae6   :  { %v6457_v62 = vmul.f32 %v10242_v24, %v6449_v57 }
0x4ae8   :  { %v6458_v40 = vmul.f32 %v6457_v62, %v10623_v42 }
0x4aea   :  { %v6459_v46 = vadd.f32 %v6458_v40, %v10626_v44 }
0x4aec   :  { %9775 = vmatmul.mubr.msk.f32.vlgmr.msra.gmra.mxu1 %vm434_vm0, %v6459_v46 }
0x4aed   :  { %9778 = vmatpush3.msra.mxu1 %v12651_v56  ;;  %9785 = vmatprep.mubr.msk.f32.mxu1 %vm10481_vm1, %v13838_v9 }
0x4aee   :  { %9779 = vmatprep.subr.mxu1 %v13838_v9 }
0x4aef   :  { %9780 = vmatpush3.msra.mxu1 %v12660_v58 }
0x4af0   :  { %9781 = vmatprep.subr.mxu1 %v13838_v9 }
0x4af1   :  { %9782 = vmatpush3.msra.mxu1 %v12667_v4 }
0x4af2   :  { %9783 = vmatprep.subr.mxu1 %v13838_v9 }
0x4af3   :  { %9784 = vmatpush3.msra.mxu1 %v13934_v29 }
0x4af4   :  { %9799 = vmatprep.subr.mxu1 %v13838_v9 }
0x4bac   :  { %v6529_v12 = vpop.f32.mrf.mxu1 }
0x4bad   :  { %v13110_v56 = vadd.f32 %v6529_v12, %v13935_v5 }
0x4bae   :  { %v9776_v11 = vpop.f32.mrf.mxu1 }
0x4baf   :  { %v6543_v14 = vmul.f32 %v13110_v56, %v12040_v47  ;;  %v6533_v58 = vmul.f32 %v13110_v56, %v11202_v39  ;;  %v6553_v50 = vmul.f32 %v13110_v56, %v12939_v3  ;;  %v6538_v27 = vmul.f32 %v13110_v56, %v11624_v31 }
0x4bb0   :  { %v6548_v13 = vmul.f32 %v13110_v56, %v12416_v25  ;;  %v6558_v32 = vmul.f32 %v13110_v56, %v13110_v56 }
0x4bb1   :  { %v6544_v19 = vsel %vm434_vm0, %v6543_v14, 0.0  ;;  %v6534_v4 = vsel %vm434_vm0, %v6533_v58, 0.0  ;;  %v6554_v8 = vsel %vm434_vm0, %v6553_v50, 0.0  ;;  %v6539_v43 = vsel %vm434_vm0, %v6538_v27, 0.0 }
0x4bb2   :  { %6545 = vadd.xlane.f32.xlu1 %v6544_v19  ;;  %6535 = vadd.xlane.f32.xlu0 %v6534_v4  ;;  %v6549_v34 = vsel %vm434_vm0, %v6548_v13, 0.0  ;;  %v6559_v49 = vsel %vm434_vm0, %v6558_v32, 0.0 }
0x4bb6   :  { %6555 = vadd.xlane.f32.xlu1 %v6554_v8  ;;  %6540 = vadd.xlane.f32.xlu0 %v6539_v43 }
0x4bba   :  { %6550 = vadd.xlane.f32.xlu0 %v6549_v34 }
0x4bbe   :  { %6560 = vadd.xlane.f32.xlu0 %v6559_v49 }
0x4c3b   :  { %v6536_v35 = vpop.xlane.xlu0 %6535  ;;  %v6546_v45 = vpop.xlane.xlu1 %6545 }
0x4c3c   :  { %v6537_v38 = vmul.f32 0.17677669, %v6536_v35  ;;  %v6547_v23 = vmul.f32 0.17677669, %v6546_v45 }
0x4c3f   :  { %v6541_v36 = vpop.xlane.xlu0 %6540  ;;  %v6556_v21 = vpop.xlane.xlu1 %6555 }
0x4c40   :  { %v6542_v30 = vmul.f32 0.17677669, %v6541_v36  ;;  %v6557_v18 = vmul.f32 0.17677669, %v6556_v21 }
0x4c42   :  { %v6563_v61 = vmax.f32 %v6537_v38, %v6542_v30 }
0x4c43   :  { %v6551_v37 = vpop.xlane.xlu0 %6550 }
0x4c44   :  { %v6564_v57 = vmax.f32 %v6563_v61, %v6547_v23  ;;  %v6552_v16 = vmul.f32 0.17677669, %v6551_v37 }
0x4c46   :  { %v6565_v60 = vmax.f32 %v6564_v57, %v6552_v16 }
0x4c47   :  { %v6561_v28 = vpop.xlane.xlu0 %6560 }
0x4c48   :  { %v6566_v20 = vmax.f32 %v6565_v60, %v6557_v18  ;;  %v6562_v24 = vmul.f32 0.17677669, %v6561_v28 }
0x4c4a   :  { %v6567_v62 = vmax.f32 %v6566_v20, %v6562_v24 }
0x4c4c   :  { %v6568_v40 = vsub.f32 %v6537_v38, %v6567_v62  ;;  %v6571_v46 = vsub.f32 %v6542_v30, %v6567_v62  ;;  %v6574_v29 = vsub.f32 %v6547_v23, %v6567_v62  ;;  %v6577_v12 = vsub.f32 %v6552_v16, %v6567_v62 }
0x4c4d   :  { %v6580_v19 = vsub.f32 %v6557_v18, %v6567_v62  ;;  %v6583_v50 = vsub.f32 %v6562_v24, %v6567_v62 }
0x4c4e   :  { %v6569_v11 = vmul.f32 1.442695, %v6568_v40  ;;  %v6572_v14 = vmul.f32 1.442695, %v6571_v46  ;;  %v6575_v58 = vmul.f32 1.442695, %v6574_v29 }
0x4c4f   :  { %v6578_v4 = vmul.f32 1.442695, %v6577_v12  ;;  %v6581_v27 = vmul.f32 1.442695, %v6580_v19  ;;  %v6584_v8 = vmul.f32 1.442695, %v6583_v50 }
0x4c50   :  { %10243 = vpow2.f32 %v6569_v11  ;;  %v13140_v29 = vld [vmem:[%s13723_s4 + $0x108] sm:$0xff]  ;;  %v13156_v12 = vld [vmem:[%s13723_s4 + $0xf8] sm:$0xff]  ;;  %v13163_v11 = vld [vmem:[%s13723_s4 + $0xf0] sm:$0xff] }
0x4c51   :  { %10245 = vpow2.f32 %v6572_v14  ;;  %v13170_v14 = vld [vmem:[%s13723_s4 + $0xe8] sm:$0xff]  ;;  %v13184_v19 = vld [vmem:[%s13723_s4 + $0xd8] sm:$0xff] }
0x4c52   :  { %10247 = vpow2.f32 %v6575_v58  ;;  %v13177_v58 = vld [vmem:[%s13723_s4 + $0xe0] sm:$0xff]  ;;  %v13198_v50 = vld [vmem:[%s13723_s4 + $0xc8] sm:$0xff] }
0x4c53   :  { %10249 = vpow2.f32 %v6578_v4  ;;  %v13191_v4 = vld [vmem:[%s13723_s4 + $0xd0] sm:$0xff] }
0x4c54   :  { %10251 = vpow2.f32 %v6581_v27  ;;  %v13205_v27 = vld [vmem:[%s13723_s4 + $0xc0] sm:$0xff] }
0x4c55   :  { %10253 = vpow2.f32 %v6584_v8  ;;  %v13212_v8 = vld [vmem:[%s13723_s4 + $0xb8] sm:$0xff] }
0x4c5d   :  { %v10244_v43 = vpop.eup %10243 }
0x4c5e   :  { %v10246_v13 = vpop.eup %10245  ;;  %v6592_v35 = vmul.f32 %v10244_v43, %v11202_v39 }
0x4c5f   :  { %v6586_v34 = vadd.f32 %v10246_v13, %v10244_v43  ;;  %v10248_v32 = vpop.eup %10247  ;;  %v6593_v45 = vmul.f32 %v10246_v13, %v11624_v31  ;;  %v13219_v43 = vld [vmem:[%s13723_s4 + $0xb0] sm:$0xff]  ;;  %v13226_v13 = vld [vmem:[%s13723_s4 + $0xa8] sm:$0xff] }
0x4c60   :  { %v10250_v36 = vpop.eup %10249  ;;  %v6595_v57 = vmul.f32 %v10248_v32, %v12040_v47 }
0x4c61   :  { %v6587_v49 = vadd.f32 %v10248_v32, %v6586_v34  ;;  %v10252_v30 = vpop.eup %10251  ;;  %v6594_v61 = vadd.f32 %v6593_v45, %v6592_v35  ;;  %v6597_v18 = vmul.f32 %v10250_v36, %v12416_v25  ;;  %v13233_v34 = vld [vmem:[%s13723_s4 + $0xa0] sm:$0xff]  ;;  %v13240_v32 = vld [vmem:[%s13723_s4 + $0x98] sm:$0xff] }
0x4c62   :  { %v10254_v21 = vpop.eup %10253  ;;  %v6599_v28 = vmul.f32 %v10252_v30, %v12939_v3 }
0x4c63   :  { %v6588_v38 = vadd.f32 %v10250_v36, %v6587_v49  ;;  %v6596_v16 = vadd.f32 %v6595_v57, %v6594_v61  ;;  %v6601_v24 = vmul.f32 %v10254_v21, %v13110_v56  ;;  %v13149_v56 = vld [vmem:[%s13723_s4 + $0x100] sm:$0xff]  ;;  %v13247_v49 = vld [vmem:[%s13723_s4 + $0x90] sm:$0xff] }
0x4c64   :  { %v79_v61 = vld [vmem:[%s13721_s1 + $0x30] sm:$0xff] }
0x4c65   :  { %v6589_v23 = vadd.f32 %v10252_v30, %v6588_v38  ;;  %v6598_v60 = vadd.f32 %v6597_v18, %v6596_v16 }
0x4c67   :  { %v6590_v37 = vadd.f32 %v10254_v21, %v6589_v23  ;;  %v6600_v20 = vadd.f32 %v6599_v28, %v6598_v60  ;;  %v6912_v23 = vsel %vm6911_vm2, 1, %v13923_v53 }
0x4c69   :  { %10255 = vrcp.f32 %v6590_v37  ;;  %v6602_v62 = vadd.f32 %v6601_v24, %v6600_v20 }
0x4c76   :  { %v10256_v40 = vpop.eup %10255 }
0x4c77   :  { %v6603_v46 = vmul.f32 %v10256_v40, %v6602_v62  ;;  %v13936_v62 = vld [vmem:[#allocation4_spill] sm:$0xff] }
0x4c79   :  { %9786 = vmatmul.mubr.msk.f32.vlgmr.msra.gmra.mxu1 %vm434_vm0, %v6603_v46 }
0x4c7a   :  { %9800 = vmatpush3.msra.mxu1 %v13140_v29  ;;  %9831 = vmatprep.mubr.msk.f32.mxu1 %vm10481_vm1, %v13838_v9 }
0x4c7b   :  { %9801 = vmatprep.subr.mxu1 %v13838_v9 }
0x4c7c   :  { %9802 = vmatpush3.msra.mxu1 %v13149_v56 }
0x4c7d   :  { %9803 = vmatprep.subr.mxu1 %v13838_v9 }
0x4c7e   :  { %9804 = vmatpush3.msra.mxu1 %v13156_v12 }
0x4c7f   :  { %9805 = vmatprep.subr.mxu1 %v13838_v9 }
0x4c80   :  { %9806 = vmatpush3.msra.mxu1 %v13163_v11 }
0x4c81   :  { %9807 = vmatprep.subr.mxu1 %v13838_v9 }
0x4c82   :  { %9808 = vmatpush3.msra.mxu1 %v13170_v14 }
0x4c83   :  { %9809 = vmatprep.subr.mxu1 %v13838_v9 }
0x4c84   :  { %9810 = vmatpush3.msra.mxu1 %v13177_v58 }
0x4c85   :  { %9811 = vmatprep.subr.mxu1 %v13838_v9 }
0x4c86   :  { %9812 = vmatpush3.msra.mxu1 %v13184_v19 }
0x4c87   :  { %9813 = vmatprep.subr.mxu1 %v13838_v9 }
0x4c88   :  { %9814 = vmatpush3.msra.mxu1 %v13191_v4 }
0x4c89   :  { %9815 = vmatprep.subr.mxu1 %v13838_v9 }
0x4c8a   :  { %9816 = vmatpush3.msra.mxu1 %v13198_v50 }
0x4c8b   :  { %9817 = vmatprep.subr.mxu1 %v13838_v9 }
0x4c8c   :  { %9818 = vmatpush3.msra.mxu1 %v13205_v27 }
0x4c8d   :  { %9819 = vmatprep.subr.mxu1 %v13838_v9 }
0x4c8e   :  { %9820 = vmatpush3.msra.mxu1 %v13212_v8 }
0x4c8f   :  { %9821 = vmatprep.subr.mxu1 %v13838_v9 }
0x4c90   :  { %9822 = vmatpush3.msra.mxu1 %v13219_v43 }
0x4c91   :  { %9823 = vmatprep.subr.mxu1 %v13838_v9 }
0x4c92   :  { %9824 = vmatpush3.msra.mxu1 %v13226_v13 }
0x4c93   :  { %9825 = vmatprep.subr.mxu1 %v13838_v9 }
0x4c94   :  { %9826 = vmatpush3.msra.mxu1 %v13233_v34 }
0x4c95   :  { %9827 = vmatprep.subr.mxu1 %v13838_v9 }
0x4c96   :  { %9828 = vmatpush3.msra.mxu1 %v13240_v32 }
0x4c97   :  { %9829 = vmatprep.subr.mxu1 %v13838_v9 }
0x4c98   :  { %9830 = vmatpush3.msra.mxu1 %v13247_v49 }
0x4c99   :  { %9878 = vmatprep.subr.mxu1 %v13838_v9 }
0x4d39   :  { %v6673_v35 = vpop.f32.mrf.mxu1 }
0x4d3a   :  { %v6674_v45 = vadd.f32 %v6673_v35, %v13892_v55  ;;  %v13937_v35 = vld [vmem:[#allocation3_spill] sm:$0xff] }
0x4d3b   :  { %v9787_v36 = vpop.f32.mrf.mxu1 }
0x4d3c   :  { %v13253_v38 = vadd.f32 %v6674_v45, %v13090_v6 }
0x4d3e   :  { %v6678_v30 = vsel %vm434_vm0, %v13253_v38, 0.0 }
0x4d3f   :  { %6679 = vadd.xlane.f32.xlu1 %v6678_v30  ;;  %v13938_v30 = vld [vmem:[#allocation5_spill] sm:$0xff] }
0x4d50   :  { %6914 = vperm.xlu1 %10076, %v6912_v23  }
0x4d54   :  { %10077 = vset.pattern.permute.xlu1 %v13863_v48 }
0x4d55   :  { %155 = vperm.xlu1 %10077, %v79_v61  }
0x4dc8   :  { %v6680_v21 = vpop.xlane.xlu1 %6679 }
0x4dc9   :  { %v6681_v37 = vmul.f32 0.03125, %v6680_v21 }
0x4dcb   :  { %v6682_v6 = vsub.f32 %v13253_v38, %v6681_v37 }
0x4dcc   :  { %v13265_v18 = vpop.permute.xlu1 %6914 }
0x4dcd   :  { %v6683_v57 = vmul.f32 %v6682_v6, %v6682_v6  ;;  %vm6916_vm3 = vcmp.eq.s32.totalorder %v13265_v18, 1 }
0x4dcf   :  { %v6684_v16 = vsel %vm434_vm0, %v6683_v57, 0.0 }
0x4dd0   :  { %6685 = vadd.xlane.f32.xlu0 %v6684_v16  ;;  %v156_v24 = vpop.permute.xlu1 %155 }
0x4dd1   :  { %v168_v40 = vmul.f32 %v13936_v62, %v156_v24  ;;  %v10436_v24 = vld [vmem:[%s13723_s4 + $0x110] sm:$0xff] }
0x4de6   :  { %116 = vperm.xlu0 %10052, %v79_v61  }
0x4e59   :  { %v6686_v60 = vpop.xlane.xlu0 %6685 }
0x4e5a   :  { %v6687_v28 = vmul.f32 0.03125, %v6686_v60 }
0x4e5c   :  { %v6688_v20 = vadd.f32 1e-05, %v6687_v28  ;;  %v10433_v28 = vld [vmem:[%s13723_s4 + $0x128] sm:$0xff] }
0x4e5e   :  { %10257 = vrsqrt.f32 %v6688_v20  ;;  %v10435_v20 = vld [vmem:[%s13723_s4 + $0x118] sm:$0xff] }
0x4e61   :  { %v117_v46 = vpop.permute.xlu0 %116 }
0x4e62   :  { %v129_v45 = vmul.f32 %v13937_v35, %v117_v46 }
0x4e64   :  { %v175_v36 = vadd.f32 %v168_v40, %v129_v45 }
0x4e66   :  { %v186_v23 = vadd.f32 %v13938_v30, %v175_v36 }
0x4e68   :  { %v13270_v21 = vmax.f32 %v186_v23, 0.0 }
0x4e6a   :  { %v7063_v61 = vsel %vm434_vm0, %v13270_v21, 0.0 }
0x4e6b   :  { %v10258_v37 = vpop.eup %10257  ;;  %7064 = vadd.xlane.f32.xlu0 %v7063_v61 }
0x4e6c   :  { %v6690_v57 = vmul.f32 %v10258_v37, %v6682_v6  ;;  %v10434_v6 = vld [vmem:[%s13723_s4 + $0x120] sm:$0xff] }
0x4e6e   :  { %v6691_v16 = vmul.f32 %v6690_v57, %v10816_v0  ;;  %v13317_v57 = vld [vmem:[%s13723_s4 + $0x28] sm:$0xff] }
0x4e6f   :  { %13939 = vst [vmem:[#allocation20_spill] sm:$0xff] %v13317_v57 }
0x4e70   :  { %v6692_v60 = vadd.f32 %v6691_v16, %v10820_v10 }
0x4e72   :  { %9797 = vmatmul.mubr.msk.f32.vlgmr.msra.gmra.mxu0 %vm434_vm0, %v6692_v60  ;;  %v13334_v60 = vld [vmem:[%s13723_s4 + $0x18] sm:$0xff] }
0x4e73   :  { %9835 = vmatpush3.msra.mxu0 %v10433_v28  ;;  %9842 = vmatprep.mubr.msk.f32.mxu0 %vm10481_vm1, %v13838_v9  ;;  %13941 = vst [vmem:[#allocation22_spill] sm:$0xff] %v13334_v60  ;;  %v13341_v28 = vld [vmem:[%s13723_s4 + $0x10] sm:$0xff] }
0x4e74   :  { %9836 = vmatprep.subr.mxu0 %v13838_v9  ;;  %13942 = vst [vmem:[#allocation10_spill] sm:$0xff] %v13341_v28 }
0x4e75   :  { %9837 = vmatpush3.msra.mxu0 %v10434_v6 }
0x4e76   :  { %9838 = vmatprep.subr.mxu0 %v13838_v9 }
0x4e77   :  { %9839 = vmatpush3.msra.mxu0 %v10435_v20 }
0x4e78   :  { %9840 = vmatprep.subr.mxu0 %v13838_v9 }
0x4e79   :  { %9841 = vmatpush3.msra.mxu0 %v10436_v24 }
0x4e7a   :  { %9845 = vmatprep.subr.mxu0 %v13838_v9 }
0x4ef4   :  { %v7065_v45 = vpop.xlane.xlu0 %7064 }
0x4ef5   :  { %v7066_v36 = vmul.f32 0.03125, %v7065_v45 }
0x4ef7   :  { %v7067_v23 = vsub.f32 %v13270_v21, %v7066_v36 }
0x4ef9   :  { %v7068_v37 = vmul.f32 %v7067_v23, %v7067_v23 }
0x4efb   :  { %v7069_v16 = vsel %vm434_vm0, %v7068_v37, 0.0 }
0x4f32   :  { %v6762_v62 = vpop.f32.mrf.mxu0 }
0x4f33   :  { %v6763_v40 = vadd.f32 %v6762_v62, %v10893_v2 }
0x4f34   :  { %v9798_v46 = vpop.f32.mrf.mxu0 }
0x4f35   :  { %v6766_v35 = vmax.f32 %v6763_v40, 0.0 }
0x4f37   :  { %9832 = vmatmul.mubr.f32.vlgmr.msra.gmra.mxu1 %v6766_v35  ;;  %v13943_v35 = vld [vmem:[#allocation24_spill] sm:$0xff] }
0x4f38   :  { %9879 = vmatpush3.msra.mxu1 %v13038_v54  ;;  %9886 = vmatprep.mubr.msk.f32.mxu1 %vm10481_vm1, %v13838_v9 }
0x4f39   :  { %9880 = vmatprep.subr.mxu1 %v13838_v9 }
0x4f3a   :  { %9881 = vmatpush3.msra.mxu1 %v13047_v17 }
0x4f3b   :  { %9882 = vmatprep.subr.mxu1 %v13838_v9 }
0x4f3c   :  { %9883 = vmatpush3.msra.mxu1 %v13059_v26 }
0x4f3d   :  { %9884 = vmatprep.subr.mxu1 %v13838_v9 }
0x4f3e   :  { %9885 = vmatpush3.msra.mxu1 %v13068_v1 }
0x4f3f   :  { %9924 = vmatprep.subr.mxu1 %v13838_v9 }
0x4ff7   :  { %v6833_v54 = vpop.f32.mrf.mxu1 }
0x4ff8   :  { %v6834_v30 = vadd.f32 %v6833_v54, %v10534_v7 }
0x4ff9   :  { %v9833_v61 = vpop.f32.mrf.mxu1 }
0x4ffa   :  { %v6837_v17 = vadd.f32 %v6834_v30, %v13253_v38  ;;  %v13326_v38 = vld [vmem:[%s13723_s4 + $0x20] sm:$0xff] }
0x4ffb   :  { %13940 = vst [vmem:[#allocation21_spill] sm:$0xff] %v13326_v38 }
0x4ffc   :  { %9843 = vmatmul.mubr.msk.f32.vlgmr.msra.gmra.mxu0 %vm434_vm0, %v6837_v17  ;;  %v6920_v26 = vsel %vm6916_vm3, %v6837_v17, 0.0 }
0x4ffd   :  { %v6921_v1 = vsel %vm434_vm0, %v6920_v26, 0.0  ;;  %9846 = vmatpush3.msra.mxu0 %v13317_v57  ;;  %9853 = vmatprep.mubr.msk.f32.mxu0 %vm10481_vm1, %v13838_v9 }
0x4ffe   :  { %6922 = vadd.xlane.f32.xlu1 %v6921_v1  ;;  %9847 = vmatprep.subr.mxu0 %v13838_v9 }
0x4fff   :  { %9848 = vmatpush3.msra.mxu0 %v13326_v38 }
0x5000   :  { %9849 = vmatprep.subr.mxu0 %v13838_v9 }
0x5001   :  { %9850 = vmatpush3.msra.mxu0 %v13334_v60 }
0x5002   :  { %7070 = vadd.xlane.f32.xlu1 %v7069_v16  ;;  %9851 = vmatprep.subr.mxu0 %v13838_v9 }
0x5003   :  { %9852 = vmatpush3.msra.mxu0 %v13341_v28 }
0x5004   :  { %9856 = vmatprep.subr.mxu0 %v13838_v9 }
0x5087   :  { %v6923_v6 = vpop.xlane.xlu1 %6922 }
0x5088   :  { %v6924_v20 = vmul.f32 0.03125, %v6923_v6 }
0x508a   :  { %v6925_v24 = vsub.f32 %v6920_v26, %v6924_v20 }
0x508b   :  { %v7071_v30 = vpop.xlane.xlu1 %7070 }
0x508c   :  { %v6926_v62 = vmul.f32 %v6925_v24, %v6925_v24  ;;  %v7072_v61 = vmul.f32 0.03125, %v7071_v30 }
0x508e   :  { %v6927_v40 = vsel %vm434_vm0, %v6926_v62, 0.0  ;;  %v7073_v1 = vadd.f32 1e-05, %v7072_v61 }
0x508f   :  { %6928 = vadd.xlane.f32.xlu0 %v6927_v40 }
0x50bc   :  { %v6907_v46 = vpop.f32.mrf.mxu0 }
0x50bd   :  { %v6908_v45 = vadd.f32 %v6907_v46, %v13943_v35 }
0x50be   :  { %v9844_v36 = vpop.f32.mrf.mxu0 }
0x50bf   :  { %v6917_v54 = vsel %vm6916_vm3, %v6908_v45, 0.0  ;;  %v13381_v45 = vld [vmem:[%s13723_s4 + $0x40] sm:$0xff]  ;;  %v13388_v36 = vld [vmem:[%s13723_s4 + $0x38] sm:$0xff] }
0x50c0   :  { %8171 = vst.msk [vmem:[%s13726_s5 + $0x28] sm:$0xff] %vm376_vm5, %v6917_v54  ;;  %13945 = vst [vmem:[#allocation14_spill] sm:$0xff] %v13381_v45  ;;  %v13395_v54 = vld [vmem:[%s13723_s4 + $0x30] sm:$0xff] }
0x50c1   :  { %13946 = vst [vmem:[#allocation15_spill] sm:$0xff] %v13388_v36  ;;  %13947 = vst [vmem:[#allocation11_spill] sm:$0xff] %v13395_v54 }
0x5118   :  { %v6929_v17 = vpop.xlane.xlu0 %6928 }
0x5119   :  { %v6930_v26 = vmul.f32 0.03125, %v6929_v17 }
0x511b   :  { %v6931_v37 = vadd.f32 1e-05, %v6930_v26 }
0x511d   :  { %10259 = vrsqrt.f32 %v6931_v37 }
0x511e   :  { %10261 = vrsqrt.f32 %v7073_v1 }
0x512a   :  { %v10260_v16 = vpop.eup %10259 }
0x512b   :  { %v6933_v6 = vmul.f32 %v10260_v16, %v6925_v24  ;;  %v10262_v20 = vpop.eup %10261  ;;  %v13372_v24 = vld [vmem:[%s13723_s4 + $0x48] sm:$0xff] }
0x512c   :  { %v7075_v18 = vmul.f32 %v10262_v20, %v7067_v23  ;;  %13944 = vst [vmem:[#allocation13_spill] sm:$0xff] %v13372_v24 }
0x512d   :  { %v6934_v62 = vmul.f32 %v6933_v6, %v10623_v42 }
0x512e   :  { %v7076_v46 = vmul.f32 %v7075_v18, %v10623_v42 }
0x512f   :  { %v6935_v40 = vadd.f32 %v6934_v62, %v10626_v44 }
0x5130   :  { %v7077_v23 = vadd.f32 %v7076_v46, %v10626_v44 }
0x5131   :  { %9854 = vmatmul.mubr.msk.f32.vlgmr.msra.gmra.mxu0 %vm434_vm0, %v6935_v40 }
0x5132   :  { %9857 = vmatpush3.msra.mxu0 %v13317_v57  ;;  %9864 = vmatprep.mubr.msk.f32.mxu0 %vm10481_vm1, %v13838_v9 }
0x5133   :  { %9858 = vmatprep.subr.mxu0 %v13838_v9 }
0x5134   :  { %9859 = vmatpush3.msra.mxu0 %v13326_v38 }
0x5135   :  { %9860 = vmatprep.subr.mxu0 %v13838_v9 }
0x5136   :  { %9861 = vmatpush3.msra.mxu0 %v13334_v60 }
0x5137   :  { %9862 = vmatprep.subr.mxu0 %v13838_v9 }
0x5138   :  { %9863 = vmatpush3.msra.mxu0 %v13341_v28 }
0x5139   :  { %9865 = vmatmul.mubr.msk.f32.vlgmr.msra.gmra.mxu0 %vm434_vm0, %v7077_v23  ;;  %9867 = vmatprep.subr.mxu0 %v13838_v9 }
0x513a   :  { %9868 = vmatpush3.msra.mxu0 %v13372_v24  ;;  %9875 = vmatprep.mubr.msk.f32.mxu0 %vm10481_vm1, %v13838_v9 }
0x513b   :  { %9869 = vmatprep.subr.mxu0 %v13838_v9 }
0x513c   :  { %9870 = vmatpush3.msra.mxu0 %v13381_v45 }
0x513d   :  { %9871 = vmatprep.subr.mxu0 %v13838_v9 }
0x513e   :  { %9872 = vmatpush3.msra.mxu0 %v13388_v36 }
0x513f   :  { %9873 = vmatprep.subr.mxu0 %v13838_v9 }
0x5140   :  { %9874 = vmatpush3.msra.mxu0 %v13395_v54 }
0x5141   :  { %9889 = vmatprep.subr.mxu0 %v13838_v9 }
0x51f1   :  { %v7005_v30 = vpop.f32.mrf.mxu0 }
0x51f2   :  { %v13413_v40 = vadd.f32 %v7005_v30, %v13935_v5 }
0x51f3   :  { %v9855_v61 = vpop.f32.mrf.mxu0 }
0x51f9   :  { %v7147_v17 = vpop.f32.mrf.mxu0 }
0x51fa   :  { %v13400_v26 = vadd.f32 %v7147_v17, %v13935_v5 }
0x51fb   :  { %v9866_v1 = vpop.f32.mrf.mxu0 }
0x51fc   :  { %v7156_v37 = vmul.f32 %v13400_v26, %v11624_v31  ;;  %v7151_v16 = vmul.f32 %v13400_v26, %v11202_v39  ;;  %v7166_v62 = vmul.f32 %v13400_v26, %v12416_v25  ;;  %v7161_v18 = vmul.f32 %v13400_v26, %v12040_v47 }
0x51fd   :  { %v7176_v61 = vmul.f32 %v13400_v26, %v13413_v40  ;;  %v7171_v17 = vmul.f32 %v13400_v26, %v12939_v3  ;;  %v7181_v30 = vmul.f32 %v13400_v26, %v13400_v26 }
0x51fe   :  { %v7157_v6 = vsel %vm434_vm0, %v7156_v37, 0.0  ;;  %v7152_v20 = vsel %vm434_vm0, %v7151_v16, 0.0  ;;  %v7167_v46 = vsel %vm434_vm0, %v7166_v62, 0.0  ;;  %v7162_v23 = vsel %vm434_vm0, %v7161_v18, 0.0 }
0x51ff   :  { %7158 = vadd.xlane.f32.xlu1 %v7157_v6  ;;  %7153 = vadd.xlane.f32.xlu0 %v7152_v20  ;;  %v7177_v1 = vsel %vm434_vm0, %v7176_v61, 0.0  ;;  %v7172_v37 = vsel %vm434_vm0, %v7171_v17, 0.0  ;;  %v7182_v16 = vsel %vm434_vm0, %v7181_v30, 0.0 }
0x5203   :  { %7168 = vadd.xlane.f32.xlu1 %v7167_v46  ;;  %7163 = vadd.xlane.f32.xlu0 %v7162_v23 }
0x5207   :  { %7178 = vadd.xlane.f32.xlu1 %v7177_v1  ;;  %7173 = vadd.xlane.f32.xlu0 %v7172_v37 }
0x520b   :  { %7183 = vadd.xlane.f32.xlu0 %v7182_v16 }
0x5288   :  { %v7159_v6 = vpop.xlane.xlu1 %7158  ;;  %v7154_v20 = vpop.xlane.xlu0 %7153 }
0x5289   :  { %v7160_v62 = vmul.f32 0.17677669, %v7159_v6  ;;  %v7155_v18 = vmul.f32 0.17677669, %v7154_v20 }
0x528b   :  { %v7186_v46 = vmax.f32 %v7155_v18, %v7160_v62 }
0x528c   :  { %v7169_v35 = vpop.xlane.xlu1 %7168  ;;  %v7164_v5 = vpop.xlane.xlu0 %7163 }
0x528d   :  { %v7165_v23 = vmul.f32 0.17677669, %v7164_v5  ;;  %v7170_v54 = vmul.f32 0.17677669, %v7169_v35 }
0x528f   :  { %v7187_v61 = vmax.f32 %v7186_v46, %v7165_v23 }
0x5290   :  { %v7179_v36 = vpop.xlane.xlu1 %7178  ;;  %v7174_v17 = vpop.xlane.xlu0 %7173 }
0x5291   :  { %v7188_v45 = vmax.f32 %v7187_v61, %v7170_v54  ;;  %v7175_v24 = vmul.f32 0.17677669, %v7174_v17  ;;  %v7180_v44 = vmul.f32 0.17677669, %v7179_v36 }
0x5293   :  { %v7189_v1 = vmax.f32 %v7188_v45, %v7175_v24 }
0x5294   :  { %v7184_v37 = vpop.xlane.xlu0 %7183 }
0x5295   :  { %v7190_v42 = vmax.f32 %v7189_v1, %v7180_v44  ;;  %v7185_v30 = vmul.f32 0.17677669, %v7184_v37 }
0x5297   :  { %v7191_v16 = vmax.f32 %v7190_v42, %v7185_v30 }
0x5299   :  { %v7192_v15 = vsub.f32 %v7155_v18, %v7191_v16  ;;  %v7195_v28 = vsub.f32 %v7160_v62, %v7191_v16  ;;  %v7198_v6 = vsub.f32 %v7165_v23, %v7191_v16  ;;  %v7201_v20 = vsub.f32 %v7170_v54, %v7191_v16 }
0x529a   :  { %v7204_v5 = vsub.f32 %v7175_v24, %v7191_v16  ;;  %v7207_v46 = vsub.f32 %v7180_v44, %v7191_v16  ;;  %v7210_v36 = vsub.f32 %v7185_v30, %v7191_v16 }
0x529b   :  { %v7193_v60 = vmul.f32 1.442695, %v7192_v15  ;;  %v7196_v38 = vmul.f32 1.442695, %v7195_v28  ;;  %v7199_v57 = vmul.f32 1.442695, %v7198_v6 }
0x529c   :  { %v7202_v35 = vmul.f32 1.442695, %v7201_v20  ;;  %v7205_v61 = vmul.f32 1.442695, %v7204_v5  ;;  %v7208_v45 = vmul.f32 1.442695, %v7207_v46 }
0x529d   :  { %10263 = vpow2.f32 %v7193_v60  ;;  %v7211_v17 = vmul.f32 1.442695, %v7210_v36 }
0x529e   :  { %10265 = vpow2.f32 %v7196_v38 }
0x529f   :  { %10267 = vpow2.f32 %v7199_v57 }
0x52a0   :  { %10269 = vpow2.f32 %v7202_v35 }
0x52a1   :  { %10271 = vpow2.f32 %v7205_v61 }
0x52a2   :  { %10273 = vpow2.f32 %v7208_v45 }
0x52a3   :  { %10275 = vpow2.f32 %v7211_v17 }
0x52aa   :  { %v10264_v42 = vpop.eup %10263 }
0x52ab   :  { %v10266_v62 = vpop.eup %10265  ;;  %v7220_v15 = vmul.f32 %v10264_v42, %v11202_v39 }
0x52ac   :  { %v7213_v54 = vadd.f32 %v10266_v62, %v10264_v42  ;;  %v7221_v28 = vmul.f32 %v10266_v62, %v11624_v31  ;;  %v10268_v60 = vpop.eup %10267 }
0x52ad   :  { %v10270_v24 = vpop.eup %10269  ;;  %v7223_v1 = vmul.f32 %v10268_v60, %v12040_v47 }
0x52ae   :  { %v7214_v38 = vadd.f32 %v10268_v60, %v7213_v54  ;;  %v7222_v57 = vadd.f32 %v7221_v28, %v7220_v15  ;;  %v10272_v18 = vpop.eup %10271  ;;  %v7225_v5 = vmul.f32 %v10270_v24, %v12416_v25 }
0x52af   :  { %v10274_v37 = vpop.eup %10273  ;;  %v7227_v46 = vmul.f32 %v10272_v18, %v12939_v3 }
0x52b0   :  { %v7215_v44 = vadd.f32 %v10270_v24, %v7214_v38  ;;  %v7224_v16 = vadd.f32 %v7223_v1, %v7222_v57  ;;  %v10276_v6 = vpop.eup %10275  ;;  %v7229_v36 = vmul.f32 %v10274_v37, %v13413_v40  ;;  %v10447_v1 = vld [vmem:[%s13723_s4 + $0x78] sm:$0xff] }
0x52b1   :  { %v7231_v17 = vmul.f32 %v10276_v6, %v13400_v26 }
0x52b2   :  { %v7216_v23 = vadd.f32 %v10272_v18, %v7215_v44  ;;  %v7226_v35 = vadd.f32 %v7225_v5, %v7224_v16  ;;  %v10445_v18 = vld [vmem:[%s13723_s4 + $0x88] sm:$0xff] }
0x52b4   :  { %v7217_v30 = vadd.f32 %v10274_v37, %v7216_v23  ;;  %v7228_v61 = vadd.f32 %v7227_v46, %v7226_v35  ;;  %v10446_v23 = vld [vmem:[%s13723_s4 + $0x80] sm:$0xff]  ;;  %v10448_v37 = vld [vmem:[%s13723_s4 + $0x70] sm:$0xff] }
0x52b6   :  { %v7218_v20 = vadd.f32 %v10276_v6, %v7217_v30  ;;  %v7230_v45 = vadd.f32 %v7229_v36, %v7228_v61  ;;  %v72_v30 = vld [vmem:[%s13725_s0 + $0x30] sm:$0xff] }
0x52b7   :  { %v7013_v16 = vadd.f32 %v13023_v22, %v72_v30 }
0x52b8   :  { %10277 = vrcp.f32 %v7218_v20  ;;  %v7232_v42 = vadd.f32 %v7231_v17, %v7230_v45 }
0x52c5   :  { %v10278_v62 = vpop.eup %10277 }
0x52c6   :  { %v7233_v54 = vmul.f32 %v10278_v62, %v7232_v42 }
0x52c8   :  { %9876 = vmatmul.mubr.msk.f32.vlgmr.msra.gmra.mxu0 %vm434_vm0, %v7233_v54 }
0x52c9   :  { %9890 = vmatpush3.msra.mxu0 %v13140_v29  ;;  %9921 = vmatprep.mubr.msk.f32.mxu0 %vm10481_vm1, %v13838_v9 }
0x52ca   :  { %9891 = vmatprep.subr.mxu0 %v13838_v9 }
0x52cb   :  { %9892 = vmatpush3.msra.mxu0 %v13149_v56 }
0x52cc   :  { %9893 = vmatprep.subr.mxu0 %v13838_v9 }
0x52cd   :  { %9894 = vmatpush3.msra.mxu0 %v13156_v12 }
0x52ce   :  { %9895 = vmatprep.subr.mxu0 %v13838_v9 }
0x52cf   :  { %9896 = vmatpush3.msra.mxu0 %v13163_v11 }
0x52d0   :  { %9897 = vmatprep.subr.mxu0 %v13838_v9 }
0x52d1   :  { %9898 = vmatpush3.msra.mxu0 %v13170_v14 }
0x52d2   :  { %9899 = vmatprep.subr.mxu0 %v13838_v9 }
0x52d3   :  { %9900 = vmatpush3.msra.mxu0 %v13177_v58 }
0x52d4   :  { %9901 = vmatprep.subr.mxu0 %v13838_v9 }
0x52d5   :  { %9902 = vmatpush3.msra.mxu0 %v13184_v19 }
0x52d6   :  { %9903 = vmatprep.subr.mxu0 %v13838_v9 }
0x52d7   :  { %9904 = vmatpush3.msra.mxu0 %v13191_v4 }
0x52d8   :  { %9905 = vmatprep.subr.mxu0 %v13838_v9 }
0x52d9   :  { %9906 = vmatpush3.msra.mxu0 %v13198_v50 }
0x52da   :  { %9907 = vmatprep.subr.mxu0 %v13838_v9 }
0x52db   :  { %9908 = vmatpush3.msra.mxu0 %v13205_v27 }
0x52dc   :  { %9909 = vmatprep.subr.mxu0 %v13838_v9 }
0x52dd   :  { %9910 = vmatpush3.msra.mxu0 %v13212_v8 }
0x52de   :  { %9911 = vmatprep.subr.mxu0 %v13838_v9 }
0x52df   :  { %9912 = vmatpush3.msra.mxu0 %v13219_v43 }
0x52e0   :  { %9913 = vmatprep.subr.mxu0 %v13838_v9 }
0x52e1   :  { %9914 = vmatpush3.msra.mxu0 %v13226_v13 }
0x52e2   :  { %9915 = vmatprep.subr.mxu0 %v13838_v9 }
0x52e3   :  { %9916 = vmatpush3.msra.mxu0 %v13233_v34 }
0x52e4   :  { %9917 = vmatprep.subr.mxu0 %v13838_v9 }
0x52e5   :  { %9918 = vmatpush3.msra.mxu0 %v13240_v32 }
0x52e6   :  { %9919 = vmatprep.subr.mxu0 %v13838_v9 }
0x52e7   :  { %9920 = vmatpush3.msra.mxu0 %v13247_v49 }
0x52e8   :  { %9968 = vmatprep.subr.mxu0 %v13838_v9 }
0x5388   :  { %v7303_v29 = vpop.f32.mrf.mxu0 }
0x5389   :  { %v7304_v56 = vadd.f32 %v7303_v29, %v13892_v55 }
0x538a   :  { %v9877_v12 = vpop.f32.mrf.mxu0 }
0x538b   :  { %v13470_v11 = vadd.f32 %v7304_v56, %v13270_v21 }
0x538d   :  { %v7308_v14 = vsel %vm434_vm0, %v13470_v11, 0.0 }
0x538e   :  { %7309 = vadd.xlane.f32.xlu1 %v7308_v14 }
0x539f   :  { %7009 = vrot.lane.b32.xlu1 %v13902_v59, %s10488_s19 }
0x5417   :  { %v7310_v58 = vpop.xlane.xlu1 %7309 }
0x5418   :  { %v7311_v19 = vmul.f32 0.03125, %v7310_v58 }
0x541a   :  { %v7312_v4 = vsub.f32 %v13470_v11, %v7311_v19 }
0x541b   :  { %v7010_v50 = vpop.permute.xlu1 %7009 }
0x541c   :  { %v7313_v27 = vmul.f32 %v7312_v4, %v7312_v4  ;;  %v13477_v8 = vmul.f32 %v7010_v50, %v13002_v52 }
0x541e   :  { %v7314_v43 = vsel %vm434_vm0, %v7313_v27, 0.0  ;;  %v7027_v13 = vsel %vm398_vm4, %v13477_v8, 0.0  ;;  %vm8093_vm4 = vcmp.gt.f32.partialorder %v13477_v8, 0.5 }
0x541f   :  { %7315 = vadd.xlane.f32.xlu0 %v7314_v43 }
0x5423   :  { %7028 = vadd.xlane.f32.xlu0 %v7027_v13 }
0x5439   :  { %7016 = vperm.xlu0 %10052, %v13477_v8  }
0x54a8   :  { %v7316_v34 = vpop.xlane.xlu0 %7315 }
0x54a9   :  { %v7317_v59 = vmul.f32 0.03125, %v7316_v34  ;;  %v10450_v34 = vld [vmem:[%s13722_s3 + $0x28] sm:$0xff] }
0x54ab   :  { %v7318_v32 = vadd.f32 1e-05, %v7317_v59 }
0x54ac   :  { %v7029_v49 = vpop.xlane.xlu0 %7028 }
0x54ad   :  { %10279 = vrsqrt.f32 %v7318_v32  ;;  %v7030_v21 = vrot.slane %v7029_v49, 4 }
0x54af   :  { %v7031_v26 = vadd.f32 %v7030_v21, %v7029_v49  ;;  %v10452_v21 = vld [vmem:[%s13722_s3 + $0x18] sm:$0xff] }
0x54b1   :  { %v7032_v15 = vrot.slane %v7031_v26, 2 }
0x54b3   :  { %v7033_v28 = vadd.f32 %v7032_v15, %v7031_v26 }
0x54b4   :  { %v7017_v6 = vpop.permute.xlu0 %7016 }
0x54b5   :  { %v7034_v52 = vrot.slane %v7033_v28, 1  ;;  %v7019_v20 = vmul.f32 %v7017_v6, %v7013_v16  ;;  %v13950_v16 = vld [vmem:[#allocation22_spill] sm:$0xff] }
0x54b6   :  { %v13951_v6 = vld [vmem:[#allocation10_spill] sm:$0xff] }
0x54b7   :  { %v7035_v60 = vadd.f32 %v7034_v52, %v7033_v28  ;;  %v7020_v5 = vsel %vm376_vm5, %v7019_v20, 0.0  ;;  %v10453_v28 = vld [vmem:[%s13722_s3 + $0x10] sm:$0xff] }
0x54b8   :  { %v7021_v35 = vrot.slane %v7020_v5, 4 }
0x54b9   :  { %10037 = vpush %v7035_v60 }
0x54ba   :  { %v10280_v38 = vpop.eup %10279  ;;  %v7022_v61 = vadd.f32 %v7021_v35, %v7020_v5 }
0x54bb   :  { %v7320_v24 = vmul.f32 %v10280_v38, %v7312_v4 }
0x54bc   :  { %v7023_v17 = vrot.slane %v7022_v61, 2 }
0x54bd   :  { %v7321_v44 = vmul.f32 %v7320_v24, %v10816_v0  ;;  %v10454_v24 = vld [vmem:[%s13723_s4 + $0x68] sm:$0xff] }
0x54be   :  { %v7024_v42 = vadd.f32 %v7023_v17, %v7022_v61  ;;  %v13952_v61 = vld [vmem:[#allocation23_spill] sm:$0xff] }
0x54bf   :  { %v7322_v57 = vadd.f32 %v7321_v44, %v10820_v10  ;;  %v10457_v44 = vld [vmem:[%s13723_s4 + $0x50] sm:$0xff] }
0x54c0   :  { %v7025_v62 = vrot.slane %v7024_v42, 1 }
0x54c1   :  { %9887 = vmatmul.mubr.msk.f32.vlgmr.msra.gmra.mxu1 %vm434_vm0, %v7322_v57 }
0x54c2   :  { %9925 = vmatpush3.msra.mxu1 %v10445_v18  ;;  %9932 = vmatprep.mubr.msk.f32.mxu1 %vm10481_vm1, %v13838_v9  ;;  %v7026_v54 = vadd.f32 %v7025_v62, %v7024_v42 }
0x54c3   :  { %9926 = vmatprep.subr.mxu1 %v13838_v9 }
0x54c4   :  { %9927 = vmatpush3.msra.mxu1 %v10446_v23 }
0x54c5   :  { %9928 = vmatprep.subr.mxu1 %v13838_v9 }
0x54c6   :  { %9929 = vmatpush3.msra.mxu1 %v10447_v1 }
0x54c7   :  { %9930 = vmatprep.subr.mxu1 %v13838_v9 }
0x54c8   :  { %9931 = vmatpush3.msra.mxu1 %v10448_v37  ;;  %v13948_v37 = vld [vmem:[#allocation20_spill] sm:$0xff] }
0x54c9   :  { %9935 = vmatprep.subr.mxu1 %v13838_v9 }
0x54ea   :  { %s10038_s29 = spop %10037 }
0x54eb   :  { %v7037_v46 = vstv %s10038_s29 }
0x54ec   :  { %v7038_v36 = vmul.f32 7.0, %v7037_v46 }
0x54ee   :  { %v7039_v45 = vmax.f32 %v7038_v36, 1e-06 }
0x54f0   :  { %10281 = vrcp.f32 %v7039_v45 }
0x54fd   :  { %v10282_v29 = vpop.eup %10281 }
0x54fe   :  { %v7041_v56 = vmul.f32 %v10282_v29, %v7026_v54 }
0x5500   :  { %7049 = vperm.xlu1 %10077, %v7041_v56  }
0x5504   :  { %10078 = vset.pattern.permute.xlu1 %v13923_v53 }
0x5505   :  { %226 = vperm.xlu1 %10078, %v72_v30  }
0x5509   :  { %10079 = vset.pattern.permute.xlu1 %v13863_v48  ;;  %v10449_v48 = vld [vmem:[%s13723_s4 + $0x8] sm:$0xff] }
0x550a   :  { %265 = vperm.xlu1 %10079, %v72_v30   ;;  %v13949_v30 = vld [vmem:[#allocation21_spill] sm:$0xff] }
0x550e   :  { %10080 = vset.pattern.permute.xlu1 %v13923_v53 }
0x550f   :  { %7044 = vperm.xlu1 %10080, %v7041_v56  }
0x557b   :  { %v7050_v22 = vpop.permute.xlu1 %7049 }
0x557c   :  { %v7052_v13 = vmul.f32 %v10449_v48, %v7050_v22 }
0x557e   :  { %v7054_v32 = vrot.slane %v7052_v13, 1  ;;  %v13957_v13 = vld [vmem:[#allocation15_spill] sm:$0xff] }
0x5580   :  { %v227_v12 = vpop.permute.xlu1 %226 }
0x5581   :  { %v7392_v14 = vpop.f32.mrf.mxu1  ;;  %v239_v50 = vmul.f32 %v13925_v41, %v227_v12 }
0x5582   :  { %v7393_v58 = vadd.f32 %v7392_v14, %v10893_v2 }
0x5583   :  { %v9888_v19 = vpop.f32.mrf.mxu1 }
0x5584   :  { %v7396_v4 = vmax.f32 %v7393_v58, 0.0  ;;  %v13953_v19 = vld [vmem:[#allocation6_spill] sm:$0xff] }
0x5585   :  { %v266_v27 = vpop.permute.xlu1 %265 }
0x5586   :  { %v278_v43 = vmul.f32 %v13926_v33, %v266_v27  ;;  %9922 = vmatmul.mubr.f32.vlgmr.msra.gmra.mxu0 %v7396_v4  ;;  %v10451_v33 = vld [vmem:[%s13722_s3 + $0x20] sm:$0xff] }
0x5587   :  { %9969 = vmatpush3.msra.mxu0 %v10450_v34  ;;  %9976 = vmatprep.mubr.msk.f32.mxu0 %vm10481_vm1, %v13838_v9  ;;  %v13958_v34 = vld [vmem:[#allocation11_spill] sm:$0xff] }
0x5588   :  { %9970 = vmatprep.subr.mxu0 %v13838_v9  ;;  %v285_v41 = vadd.f32 %v278_v43, %v239_v50  ;;  %v13954_v50 = vld [vmem:[#allocation7_spill] sm:$0xff]  ;;  %v13955_v43 = vld [vmem:[#allocation13_spill] sm:$0xff] }
0x5589   :  { %9971 = vmatpush3.msra.mxu0 %v10451_v33  ;;  %v13959_v33 = vld [vmem:[#allocation8_spill] sm:$0xff] }
0x558a   :  { %v7045_v59 = vpop.permute.xlu1 %7044  ;;  %9972 = vmatprep.subr.mxu0 %v13838_v9  ;;  %v296_v26 = vadd.f32 %v13928_v63, %v285_v41  ;;  %v10455_v63 = vld [vmem:[%s13723_s4 + $0x60] sm:$0xff] }
0x558b   :  { %v7047_v49 = vmul.f32 %v10449_v48, %v7045_v59  ;;  %9973 = vmatpush3.msra.mxu0 %v10452_v21  ;;  %v13956_v48 = vld [vmem:[#allocation14_spill] sm:$0xff] }
0x558c   :  { %9974 = vmatprep.subr.mxu0 %v13838_v9 }
0x558d   :  { %v7056_v15 = vadd.f32 %v7054_v32, %v7047_v49  ;;  %9975 = vmatpush3.msra.mxu0 %v10453_v28 }
0x558e   :  { %10014 = vmatprep.subr.mxu0 %v13838_v9 }
0x558f   :  { %v7060_v52 = vrot.slane %v7056_v15, %v13927_v51  ;;  %v10456_v51 = vld [vmem:[%s13723_s4 + $0x58] sm:$0xff] }
0x5591   :  { %v7061_v60 = vsub.f32 %v296_v26, %v7060_v52 }
0x5593   :  { %v7062_v38 = vmax.f32 %v7061_v60, 0.0 }
0x5595   :  { %9933 = vmatmul.mubr.msk.f32.vlgmr.msra.gmra.mxu1 %vm434_vm0, %v7062_v38 }
0x5596   :  { %9936 = vmatpush3.msra.mxu1 %v10454_v24  ;;  %9943 = vmatprep.mubr.msk.f32.mxu1 %vm10481_vm1, %v13838_v9 }
0x5597   :  { %9937 = vmatprep.subr.mxu1 %v13838_v9 }
0x5598   :  { %9938 = vmatpush3.msra.mxu1 %v10455_v63 }
0x5599   :  { %9939 = vmatprep.subr.mxu1 %v13838_v9 }
0x559a   :  { %9940 = vmatpush3.msra.mxu1 %v10456_v51 }
0x559b   :  { %9941 = vmatprep.subr.mxu1 %v13838_v9 }
0x559c   :  { %9942 = vmatpush3.msra.mxu1 %v10457_v44 }
0x559d   :  { %9946 = vmatprep.subr.mxu1 %v13838_v9 }
0x5646   :  { %v7463_v57 = vpop.f32.mrf.mxu0 }
0x5647   :  { %v7464_v18 = vadd.f32 %v7463_v57, %v10534_v7 }
0x5648   :  { %v9923_v23 = vpop.f32.mrf.mxu0 }
0x5649   :  { %v7467_v1 = vadd.f32 %v7464_v18, %v13470_v11 }
0x564b   :  { %9944 = vmatmul.mubr.msk.f32.vlgmr.msra.gmra.mxu1 %vm434_vm0, %v7467_v1 }
0x564c   :  { %9947 = vmatpush3.msra.mxu1 %v13948_v37  ;;  %9954 = vmatprep.mubr.msk.f32.mxu1 %vm10481_vm1, %v13838_v9 }
0x564d   :  { %9948 = vmatprep.subr.mxu1 %v13838_v9 }
0x564e   :  { %9949 = vmatpush3.msra.mxu1 %v13949_v30 }
0x564f   :  { %9950 = vmatprep.subr.mxu1 %v13838_v9 }
0x5650   :  { %9951 = vmatpush3.msra.mxu1 %v13950_v16 }
0x5651   :  { %9952 = vmatprep.subr.mxu1 %v13838_v9 }
0x5652   :  { %9953 = vmatpush3.msra.mxu1 %v13951_v6 }
0x5653   :  { %9957 = vmatprep.subr.mxu1 %v13838_v9 }
0x5655   :  { %v7537_v11 = vpop.f32.mrf.mxu1 }
0x5657   :  { %v9934_v20 = vpop.f32.mrf.mxu1 }
0x570b   :  { %v7610_v5 = vpop.f32.mrf.mxu1 }
0x570c   :  { %v7611_v35 = vadd.f32 %v7610_v5, %v7537_v11 }
0x570d   :  { %v9945_v46 = vpop.f32.mrf.mxu1 }
0x570e   :  { %v13571_v36 = vadd.f32 %v7611_v35, %v13952_v61 }
0x5710   :  { %v7615_v45 = vsel %vm434_vm0, %v13571_v36, 0.0 }
0x5711   :  { %7616 = vadd.xlane.f32.xlu0 %v7615_v45 }
0x579a   :  { %v7617_v17 = vpop.xlane.xlu0 %7616 }
0x579b   :  { %v7618_v42 = vmul.f32 0.03125, %v7617_v17 }
0x579d   :  { %v7619_v62 = vsub.f32 %v13571_v36, %v7618_v42 }
0x579f   :  { %v7620_v54 = vmul.f32 %v7619_v62, %v7619_v62 }
0x57a1   :  { %v7621_v29 = vsel %vm434_vm0, %v7620_v54, 0.0 }
0x57a2   :  { %7622 = vadd.xlane.f32.xlu1 %v7621_v29 }
0x582b   :  { %v7623_v56 = vpop.xlane.xlu1 %7622 }
0x582c   :  { %v7624_v22 = vmul.f32 0.03125, %v7623_v56 }
0x582e   :  { %v7625_v12 = vadd.f32 1e-05, %v7624_v22 }
0x5830   :  { %10283 = vrsqrt.f32 %v7625_v12 }
0x583d   :  { %v10284_v14 = vpop.eup %10283 }
0x583e   :  { %v7627_v58 = vmul.f32 %v10284_v14, %v7619_v62 }
0x5840   :  { %v7628_v4 = vmul.f32 %v7627_v58, %v13953_v19 }
0x5842   :  { %v7629_v27 = vadd.f32 %v7628_v4, %v13954_v50 }
0x5844   :  { %9955 = vmatmul.mubr.msk.f32.vlgmr.msra.gmra.mxu1 %vm434_vm0, %v7629_v27 }
0x5845   :  { %9958 = vmatpush3.msra.mxu1 %v13955_v43  ;;  %9965 = vmatprep.mubr.msk.f32.mxu1 %vm10481_vm1, %v13838_v9 }
0x5846   :  { %9959 = vmatprep.subr.mxu1 %v13838_v9 }
0x5847   :  { %9960 = vmatpush3.msra.mxu1 %v13956_v48 }
0x5848   :  { %9961 = vmatprep.subr.mxu1 %v13838_v9 }
0x5849   :  { %9962 = vmatpush3.msra.mxu1 %v13957_v13 }
0x584a   :  { %9963 = vmatprep.subr.mxu1 %v13838_v9 }
0x584b   :  { %9964 = vmatpush3.msra.mxu1 %v13958_v34 }
0x584c   :  { %9979 = vmatprep.subr.mxu1 %v13838_v9 }
0x5904   :  { %v7699_v41 = vpop.f32.mrf.mxu1 }
0x5905   :  { %v13591_v59 = vadd.f32 %v7699_v41, %v13959_v33 }
0x5906   :  { %v9956_v32 = vpop.f32.mrf.mxu1 }
0x5907   :  { %v7718_v49 = vmul.f32 %v13591_v59, %v12416_v25  ;;  %v7703_v21 = vmul.f32 %v13591_v59, %v11202_v39  ;;  %v7728_v28 = vmul.f32 %v13591_v59, %v13413_v40  ;;  %v7708_v52 = vmul.f32 %v13591_v59, %v11624_v31 }
0x5908   :  { %v7713_v24 = vmul.f32 %v13591_v59, %v12040_v47  ;;  %v7723_v51 = vmul.f32 %v13591_v59, %v12939_v3  ;;  %v7733_v57 = vmul.f32 %v13591_v59, %v13591_v59 }
0x5909   :  { %v7719_v26 = vsel %vm434_vm0, %v7718_v49, 0.0  ;;  %v7704_v15 = vsel %vm434_vm0, %v7703_v21, 0.0  ;;  %v7729_v60 = vsel %vm434_vm0, %v7728_v28, 0.0  ;;  %v7709_v38 = vsel %vm434_vm0, %v7708_v52, 0.0 }
0x590a   :  { %7720 = vadd.xlane.f32.xlu1 %v7719_v26  ;;  %7705 = vadd.xlane.f32.xlu0 %v7704_v15  ;;  %v7714_v63 = vsel %vm434_vm0, %v7713_v24, 0.0  ;;  %v7724_v44 = vsel %vm434_vm0, %v7723_v51, 0.0  ;;  %v7734_v18 = vsel %vm434_vm0, %v7733_v57, 0.0 }
0x590e   :  { %7730 = vadd.xlane.f32.xlu1 %v7729_v60  ;;  %7710 = vadd.xlane.f32.xlu0 %v7709_v38 }
0x5912   :  { %7715 = vadd.xlane.f32.xlu0 %v7714_v63 }
0x5916   :  { %7725 = vadd.xlane.f32.xlu0 %v7724_v44 }
0x591a   :  { %7735 = vadd.xlane.f32.xlu0 %v7734_v18 }
0x5993   :  { %v7706_v23 = vpop.xlane.xlu0 %7705  ;;  %v7721_v30 = vpop.xlane.xlu1 %7720 }
0x5994   :  { %v7707_v16 = vmul.f32 0.17677669, %v7706_v23  ;;  %v7722_v5 = vmul.f32 0.17677669, %v7721_v30 }
0x5997   :  { %v7711_v1 = vpop.xlane.xlu0 %7710  ;;  %v7731_v46 = vpop.xlane.xlu1 %7730 }
0x5998   :  { %v7712_v37 = vmul.f32 0.17677669, %v7711_v1  ;;  %v7732_v42 = vmul.f32 0.17677669, %v7731_v46 }
0x599a   :  { %v7738_v11 = vmax.f32 %v7707_v16, %v7712_v37 }
0x599b   :  { %v7716_v6 = vpop.xlane.xlu0 %7715 }
0x599c   :  { %v7717_v20 = vmul.f32 0.17677669, %v7716_v6 }
0x599e   :  { %v7739_v35 = vmax.f32 %v7738_v11, %v7717_v20 }
0x599f   :  { %v7726_v61 = vpop.xlane.xlu0 %7725 }
0x59a0   :  { %v7740_v45 = vmax.f32 %v7739_v35, %v7722_v5  ;;  %v7727_v17 = vmul.f32 0.17677669, %v7726_v61  ;;  %v10458_v61 = vld [vmem:[%s13723_s4 + $0x108] sm:$0xff] }
0x59a2   :  { %v7741_v62 = vmax.f32 %v7740_v45, %v7727_v17  ;;  %v10463_v45 = vld [vmem:[%s13723_s4 + $0xe0] sm:$0xff] }
0x59a3   :  { %v7736_v54 = vpop.xlane.xlu0 %7735 }
0x59a4   :  { %v7742_v29 = vmax.f32 %v7741_v62, %v7732_v42  ;;  %v7737_v56 = vmul.f32 0.17677669, %v7736_v54  ;;  %v10466_v62 = vld [vmem:[%s13723_s4 + $0xc8] sm:$0xff]  ;;  %v10467_v54 = vld [vmem:[%s13723_s4 + $0xc0] sm:$0xff] }
0x59a6   :  { %v7743_v22 = vmax.f32 %v7742_v29, %v7737_v56  ;;  %v10468_v29 = vld [vmem:[%s13723_s4 + $0xb8] sm:$0xff] }
0x59a8   :  { %v7744_v12 = vsub.f32 %v7707_v16, %v7743_v22  ;;  %v7747_v14 = vsub.f32 %v7712_v37, %v7743_v22  ;;  %v7750_v58 = vsub.f32 %v7717_v20, %v7743_v22  ;;  %v7753_v19 = vsub.f32 %v7722_v5, %v7743_v22 }
0x59a9   :  { %v7756_v43 = vsub.f32 %v7727_v17, %v7743_v22  ;;  %v7759_v13 = vsub.f32 %v7732_v42, %v7743_v22  ;;  %v7762_v41 = vsub.f32 %v7737_v56, %v7743_v22  ;;  %v10464_v17 = vld [vmem:[%s13723_s4 + $0xd8] sm:$0xff]  ;;  %v10465_v42 = vld [vmem:[%s13723_s4 + $0xd0] sm:$0xff]  ;;  %v10470_v22 = vld [vmem:[%s13723_s4 + $0xa8] sm:$0xff] }
0x59aa   :  { %v7745_v4 = vmul.f32 1.442695, %v7744_v12  ;;  %v7748_v50 = vmul.f32 1.442695, %v7747_v14  ;;  %v7751_v27 = vmul.f32 1.442695, %v7750_v58 }
0x59ab   :  { %v7754_v48 = vmul.f32 1.442695, %v7753_v19  ;;  %v7757_v34 = vmul.f32 1.442695, %v7756_v43  ;;  %v7760_v33 = vmul.f32 1.442695, %v7759_v13 }
0x59ac   :  { %10285 = vpow2.f32 %v7745_v4  ;;  %v7763_v32 = vmul.f32 1.442695, %v7762_v41  ;;  %v10469_v56 = vld [vmem:[%s13723_s4 + $0xb0] sm:$0xff]  ;;  %v10471_v12 = vld [vmem:[%s13723_s4 + $0xa0] sm:$0xff]  ;;  %v10472_v14 = vld [vmem:[%s13723_s4 + $0x98] sm:$0xff] }
0x59ad   :  { %10287 = vpow2.f32 %v7748_v50  ;;  %v10473_v58 = vld [vmem:[%s13723_s4 + $0x90] sm:$0xff] }
0x59ae   :  { %10289 = vpow2.f32 %v7751_v27 }
0x59af   :  { %10291 = vpow2.f32 %v7754_v48  ;;  %v8094_v48 = vsel %vm8093_vm4, 1, %v13923_v53  ;;  %v10474_v53 = vld [vmem:[%s13723_s4 + $0x128] sm:$0xff] }
0x59b0   :  { %10293 = vpow2.f32 %v7757_v34 }
0x59b1   :  { %10295 = vpow2.f32 %v7760_v33 }
0x59b2   :  { %10297 = vpow2.f32 %v7763_v32 }
0x59b9   :  { %v10286_v49 = vpop.eup %10285 }
0x59ba   :  { %v10288_v21 = vpop.eup %10287  ;;  %v7772_v15 = vmul.f32 %v10286_v49, %v11202_v39 }
0x59bb   :  { %v7765_v26 = vadd.f32 %v10288_v21, %v10286_v49  ;;  %v7773_v28 = vmul.f32 %v10288_v21, %v11624_v31  ;;  %v10290_v52 = vpop.eup %10289 }
0x59bc   :  { %v10292_v38 = vpop.eup %10291  ;;  %v7775_v57 = vmul.f32 %v10290_v52, %v12040_v47 }
0x59bd   :  { %v7766_v60 = vadd.f32 %v10290_v52, %v7765_v26  ;;  %v7774_v63 = vadd.f32 %v7773_v28, %v7772_v15  ;;  %v10294_v51 = vpop.eup %10293  ;;  %v7777_v16 = vmul.f32 %v10292_v38, %v12416_v25  ;;  %v10459_v25 = vld [vmem:[%s13723_s4 + $0x100] sm:$0xff] }
0x59be   :  { %v10296_v18 = vpop.eup %10295  ;;  %v7779_v31 = vmul.f32 %v10294_v51, %v12939_v3  ;;  %v10460_v3 = vld [vmem:[%s13723_s4 + $0xf8] sm:$0xff]  ;;  %v10475_v28 = vld [vmem:[%s13723_s4 + $0x120] sm:$0xff] }
0x59bf   :  { %v7767_v24 = vadd.f32 %v10292_v38, %v7766_v60  ;;  %v7776_v1 = vadd.f32 %v7775_v57, %v7774_v63  ;;  %v10298_v37 = vpop.eup %10297  ;;  %v7781_v11 = vmul.f32 %v10296_v18, %v13413_v40  ;;  %v10461_v40 = vld [vmem:[%s13723_s4 + $0xf0] sm:$0xff] }
0x59c0   :  { %v7783_v5 = vmul.f32 %v10298_v37, %v13591_v59  ;;  %v10462_v59 = vld [vmem:[%s13723_s4 + $0xe8] sm:$0xff] }
0x59c1   :  { %v7768_v44 = vadd.f32 %v10294_v51, %v7767_v24  ;;  %v7778_v39 = vadd.f32 %v7777_v16, %v7776_v1 }
0x59c3   :  { %v7769_v23 = vadd.f32 %v10296_v18, %v7768_v44  ;;  %v7780_v6 = vadd.f32 %v7779_v31, %v7778_v39 }
0x59c5   :  { %v7770_v30 = vadd.f32 %v10298_v37, %v7769_v23  ;;  %v7782_v20 = vadd.f32 %v7781_v11, %v7780_v6  ;;  %v13960_v23 = vld [vmem:[#allocation24_spill] sm:$0xff] }
0x59c7   :  { %10299 = vrcp.f32 %v7770_v30  ;;  %v7784_v35 = vadd.f32 %v7783_v5, %v7782_v20 }
0x59d4   :  { %v10300_v46 = vpop.eup %10299 }
0x59d5   :  { %v7785_v47 = vmul.f32 %v10300_v46, %v7784_v35 }
0x59d7   :  { %9966 = vmatmul.mubr.msk.f32.vlgmr.msra.gmra.mxu1 %vm434_vm0, %v7785_v47 }
0x59d8   :  { %9980 = vmatpush3.msra.mxu1 %v10458_v61  ;;  %10011 = vmatprep.mubr.msk.f32.mxu1 %vm10481_vm1, %v13838_v9 }
0x59d9   :  { %9981 = vmatprep.subr.mxu1 %v13838_v9 }
0x59da   :  { %9982 = vmatpush3.msra.mxu1 %v10459_v25 }
0x59db   :  { %9983 = vmatprep.subr.mxu1 %v13838_v9 }
0x59dc   :  { %9984 = vmatpush3.msra.mxu1 %v10460_v3 }
0x59dd   :  { %9985 = vmatprep.subr.mxu1 %v13838_v9 }
0x59de   :  { %9986 = vmatpush3.msra.mxu1 %v10461_v40 }
0x59df   :  { %9987 = vmatprep.subr.mxu1 %v13838_v9 }
0x59e0   :  { %9988 = vmatpush3.msra.mxu1 %v10462_v59 }
0x59e1   :  { %9989 = vmatprep.subr.mxu1 %v13838_v9 }
0x59e2   :  { %9990 = vmatpush3.msra.mxu1 %v10463_v45 }
0x59e3   :  { %9991 = vmatprep.subr.mxu1 %v13838_v9 }
0x59e4   :  { %9992 = vmatpush3.msra.mxu1 %v10464_v17 }
0x59e5   :  { %9993 = vmatprep.subr.mxu1 %v13838_v9 }
0x59e6   :  { %9994 = vmatpush3.msra.mxu1 %v10465_v42 }
0x59e7   :  { %9995 = vmatprep.subr.mxu1 %v13838_v9 }
0x59e8   :  { %9996 = vmatpush3.msra.mxu1 %v10466_v62 }
0x59e9   :  { %9997 = vmatprep.subr.mxu1 %v13838_v9 }
0x59ea   :  { %9998 = vmatpush3.msra.mxu1 %v10467_v54 }
0x59eb   :  { %9999 = vmatprep.subr.mxu1 %v13838_v9 }
0x59ec   :  { %10000 = vmatpush3.msra.mxu1 %v10468_v29 }
0x59ed   :  { %10001 = vmatprep.subr.mxu1 %v13838_v9 }
0x59ee   :  { %10002 = vmatpush3.msra.mxu1 %v10469_v56 }
0x59ef   :  { %10003 = vmatprep.subr.mxu1 %v13838_v9 }
0x59f0   :  { %10004 = vmatpush3.msra.mxu1 %v10470_v22 }
0x59f1   :  { %10005 = vmatprep.subr.mxu1 %v13838_v9 }
0x59f2   :  { %10006 = vmatpush3.msra.mxu1 %v10471_v12 }
0x59f3   :  { %10007 = vmatprep.subr.mxu1 %v13838_v9 }
0x59f4   :  { %10008 = vmatpush3.msra.mxu1 %v10472_v14 }
0x59f5   :  { %10009 = vmatprep.subr.mxu1 %v13838_v9 }
0x59f6   :  { %10010 = vmatpush3.msra.mxu1 %v10473_v58 }
0x5a97   :  { %v7855_v19 = vpop.f32.mrf.mxu1 }
0x5a98   :  { %v7856_v4 = vadd.f32 %v7855_v19, %v13892_v55 }
0x5a99   :  { %v9967_v50 = vpop.f32.mrf.mxu1 }
0x5a9a   :  { %v7859_v27 = vadd.f32 %v7856_v4, %v13571_v36 }
0x5a9c   :  { %v7860_v43 = vsel %vm434_vm0, %v7859_v27, 0.0 }
0x5a9d   :  { %7861 = vadd.xlane.f32.xlu1 %v7860_v43 }
0x5aae   :  { %8096 = vperm.xlu1 %10080, %v8094_v48  }
0x5b26   :  { %v7862_v13 = vpop.xlane.xlu1 %7861 }
0x5b27   :  { %v7863_v34 = vmul.f32 0.03125, %v7862_v13 }
0x5b29   :  { %v7864_v41 = vsub.f32 %v7859_v27, %v7863_v34 }
0x5b2a   :  { %v8097_v18 = vpop.permute.xlu1 %8096 }
0x5b2b   :  { %v7865_v33 = vmul.f32 %v7864_v41, %v7864_v41 }
0x5b2d   :  { %v7866_v32 = vsel %vm434_vm0, %v7865_v33, 0.0 }
0x5b2e   :  { %7867 = vadd.xlane.f32.xlu0 %v7866_v32 }
0x5bb7   :  { %v7868_v49 = vpop.xlane.xlu0 %7867 }
0x5bb8   :  { %v7869_v55 = vmul.f32 0.03125, %v7868_v49 }
0x5bba   :  { %v7870_v21 = vadd.f32 1e-05, %v7869_v55 }
0x5bbc   :  { %10301 = vrsqrt.f32 %v7870_v21 }
0x5bc9   :  { %v10302_v36 = vpop.eup %10301 }
0x5bca   :  { %v7872_v26 = vmul.f32 %v10302_v36, %v7864_v41 }
0x5bcc   :  { %v7873_v15 = vmul.f32 %v7872_v26, %v10816_v0  ;;  %v10476_v0 = vld [vmem:[%s13723_s4 + $0x118] sm:$0xff] }
0x5bce   :  { %v7874_v8 = vadd.f32 %v7873_v15, %v10820_v10  ;;  %v10477_v10 = vld [vmem:[%s13723_s4 + $0x110] sm:$0xff] }
0x5bd0   :  { %9977 = vmatmul.mubr.msk.f32.vlgmr.msra.gmra.mxu0 %vm434_vm0, %v7874_v8 }
0x5bd1   :  { %10015 = vmatpush3.msra.mxu0 %v10474_v53  ;;  %10022 = vmatprep.mubr.msk.f32.mxu0 %vm10481_vm1, %v13838_v9  ;;  %vm8098_vm1 = vcmp.eq.s32.totalorder %v8097_v18, 1 }
0x5bd2   :  { %10016 = vmatprep.subr.mxu0 %v13838_v9 }
0x5bd3   :  { %10017 = vmatpush3.msra.mxu0 %v10475_v28 }
0x5bd4   :  { %10018 = vmatprep.subr.mxu0 %v13838_v9 }
0x5bd5   :  { %10019 = vmatpush3.msra.mxu0 %v10476_v0 }
0x5bd6   :  { %10020 = vmatprep.subr.mxu0 %v13838_v9 }
0x5bd7   :  { %10021 = vmatpush3.msra.mxu0 %v10477_v10 }
0x5c90   :  { %v7944_v52 = vpop.f32.mrf.mxu0 }
0x5c91   :  { %v7945_v60 = vadd.f32 %v7944_v52, %v10893_v2 }
0x5c92   :  { %v9978_v38 = vpop.f32.mrf.mxu0 }
0x5c93   :  { %v7948_v24 = vmax.f32 %v7945_v60, 0.0 }
0x5c95   :  { %10012 = vmatmul.mubr.f32.vlgmr.msra.gmra.mxu1 %v7948_v24 }
0x5d55   :  { %v8015_v63 = vpop.f32.mrf.mxu1 }
0x5d56   :  { %v8016_v51 = vadd.f32 %v8015_v63, %v10534_v7 }
0x5d57   :  { %v10013_v44 = vpop.f32.mrf.mxu1 }
0x5d58   :  { %v8019_v57 = vadd.f32 %v8016_v51, %v7859_v27 }
0x5d5a   :  { %10023 = vmatmul.mubr.msk.f32.vlgmr.msra.gmra.mxu0 %vm434_vm0, %v8019_v57 }
0x5e1a   :  { %v8089_v9 = vpop.f32.mrf.mxu0 }
0x5e1b   :  { %v8090_v1 = vadd.f32 %v8089_v9, %v13960_v23 }
0x5e1c   :  { %v10024_v37 = vpop.f32.mrf.mxu0 }
0x5e1d   :  { %v8099_v30 = vsel %vm8098_vm1, %v8090_v1, 0.0 }
0x5e1e   :  { %8182 = vst.msk [vmem:[%s13726_s5 + $0x30] sm:$0xff] %vm376_vm5, %v8099_v30 }

</bundles_post_ra>
